<compile_context>
chip_gen: v7x
topology: tpu7x:2x2x1
jax: 0.10.0
libtpu: 0.0.40
codegen_flags: <defaults>
</compile_context>

<pallas_src>
import functools

import jax
import jax.numpy as jnp
from jax.experimental import pallas as pl
from jax.experimental.pallas import tpu as pltpu

_HIGHEST = jax.lax.Precision.HIGHEST
_VMEM_LIMIT = 40 * 1024 * 1024          # <= v7x 64 MiB VMEM; raise freely on v5e/v6e


# ----------------------------- small helpers -------------------------------

def _round_up(x, m):
    return (x + m - 1) // m * m


def _pick_row_tiling(m, cap=512):
    """Rows rounded to a multiple of 8 (<=7 pad rows) and a tile that divides exactly."""
    mp = _round_up(m, 8)
    for t in (512, 256, 128, 64, 32, 16, 8):
        if t <= cap and mp % t == 0:
            return mp, t
    return mp, mp


def _choose_row_tile(n, cap):
    for t in range(min(n, cap), 0, -1):
        if n % t == 0 and (t % 8 == 0 or t == n):
            return t
    return n


def _choose_trh(ho, wo, cap_rows=1024):
    """Rows of the output image per gate-kernel tile."""
    for t in range(ho, 0, -1):
        if ho % t == 0 and t * wo <= cap_rows and (t * wo) % 8 == 0:
            return t
    return ho


def interp_matrix(n_in, n_out):
    """1-D bilinear interpolation matrix, align_corners=True.  out = M @ in."""
    if n_in == 1:
        return jnp.ones((n_out, 1), jnp.float32)
    src = jnp.arange(n_out, dtype=jnp.float32) * (n_in - 1) / (n_out - 1)
    i0 = jnp.clip(jnp.floor(src).astype(jnp.int32), 0, n_in - 2)
    frac = src - i0.astype(jnp.float32)
    m = jnp.zeros((n_out, n_in), jnp.float32)
    rows = jnp.arange(n_out)
    m = m.at[rows, i0].add(1.0 - frac)
    m = m.at[rows, i0 + 1].add(frac)
    return m


# ------------------- deconv sub-pixel GEMM + fused BN stats ------------------

def _deconv_gemm_stats_kernel(a_ref, b_ref, y_ref, stat_ref):
    y = jnp.dot(a_ref[...], b_ref[...], preferred_element_type=jnp.float32)
    y_ref[...] = y
    stat_ref[0] = jnp.concatenate(
        [jnp.sum(y, axis=0, keepdims=True),
         jnp.sum(y * y, axis=0, keepdims=True)], axis=0)


def deconv_gemm_stats(a, b):
    """a (M, K) bf16, b (K, N) bf16 -> y (M, N) f32 and stats (2, N) f32
    (column sums / sums-of-squares over the true M rows; pad rows are zero)."""
    M, K = a.shape
    N = b.shape[1]
    Mp, tm = _pick_row_tiling(M)
    if Mp != M:
        a = jnp.pad(a, ((0, Mp - M), (0, 0)))
    nmt = Mp // tm
    y, stats = pl.pallas_call(
        _deconv_gemm_stats_kernel,
        out_shape=(jax.ShapeDtypeStruct((Mp, N), jnp.float32),
                   jax.ShapeDtypeStruct((nmt, 2, N), jnp.float32)),
        grid=(nmt,),
        in_specs=[pl.BlockSpec((tm, K), lambda i: (i, 0)),
                  pl.BlockSpec((K, N), lambda i: (0, 0))],     # weight VMEM-resident
        out_specs=(pl.BlockSpec((tm, N), lambda i: (i, 0)),
                   pl.BlockSpec((1, 2, N), lambda i: (i, 0, 0))),
        compiler_params=pltpu.CompilerParams(
            dimension_semantics=("parallel",),
            vmem_limit_bytes=_VMEM_LIMIT),
    )(a, b)
    return y[:M], stats.sum(axis=0)


# ---------- fused BatchNorm + ReLU + skip add + (precomputed) up-sample add ----------

def _bn_relu_skip_up_kernel(y_ref, scale_ref, shift_ref, skip_ref, up_ref, o_ref):
    o_ref[0] = (jnp.maximum(y_ref[0] * scale_ref[...] + shift_ref[...], 0.0)
                + skip_ref[0] + up_ref[0])


def bn_relu_skip_up(y, scale, shift, skip, up):
    """y, skip, up: (B, P, C) f32; scale/shift: (1, C) f32 -> (B, P, C) f32."""
    B, P, C = y.shape
    tr = _choose_row_tile(P, 512)
    blk = pl.BlockSpec((1, tr, C), lambda b, r: (b, r, 0))
    vec = pl.BlockSpec((1, C), lambda b, r: (0, 0))
    return pl.pallas_call(
        _bn_relu_skip_up_kernel,
        out_shape=jax.ShapeDtypeStruct((B, P, C), jnp.float32),
        grid=(B, P // tr),
        in_specs=[blk, vec, vec, blk, blk],
        out_specs=blk,
        compiler_params=pltpu.CompilerParams(
            dimension_semantics=("parallel", "parallel"),
            vmem_limit_bytes=_VMEM_LIMIT),
    )(y, scale, shift, skip, up)


# -------------- ConvLSTM gate conv: in-kernel 3x3 patches + fused LSTM --------------

def _gates_lstm_kernel(sp_ref, w_ref, b_ref, pc_ref, h_ref, c_ref, *, trh, Wo, Cp):
    r = pl.program_id(1)
    row0 = r * trh
    Cs = sp_ref.shape[-1]
    acc = jnp.zeros((trh * Wo, 4 * Cp), jnp.float32) + b_ref[...]
    for kh in range(3):
        rows = sp_ref[0, pl.ds(row0 + kh, trh), :, :]          # (trh, Wo+2, Cs) bf16
        for kw in range(3):
            a = rows[:, kw:kw + Wo, :].reshape(trh * Wo, Cs)
            acc = acc + jnp.dot(a, w_ref[kh * 3 + kw],
                                preferred_element_type=jnp.float32)
    in_g = jax.nn.sigmoid(acc[:, 0 * Cp:1 * Cp])
    rem_g = jax.nn.sigmoid(acc[:, 1 * Cp:2 * Cp])
    out_g = jax.nn.sigmoid(acc[:, 2 * Cp:3 * Cp])
    cel_g = jnp.tanh(acc[:, 3 * Cp:4 * Cp])
    cell = rem_g * pc_ref[0] + in_g * cel_g
    c_ref[0] = cell
    h_ref[0] = out_g * jnp.tanh(cell)


def gates_conv_lstm(sp, w_g, bias, prev_c, Ho, Wo, Cp):
    """sp: (B, Ho+2, Wo+2, 2*Cp) bf16 (spatially padded stacked input);
    w_g: (9, 2*Cp, 4*Cp) bf16; bias: (1, 4*Cp) f32; prev_c: (B, Ho*Wo, Cp) f32."""
    B = sp.shape[0]
    Cs = sp.shape[-1]
    P = Ho * Wo
    trh = _choose_trh(Ho, Wo)
    Mt = trh * Wo
    kern = functools.partial(_gates_lstm_kernel, trh=trh, Wo=Wo, Cp=Cp)
    # TODO(synk): for very large images, replace the per-batch resident image block with
    # halo-DMA row tiles (manual make_async_copy) so VMEM does not scale with Ho*Wo.
    h, c = pl.pallas_call(
        kern,
        out_shape=(jax.ShapeDtypeStruct((B, P, Cp), jnp.float32),
                   jax.ShapeDtypeStruct((B, P, Cp), jnp.float32)),
        grid=(B, Ho // trh),
        in_specs=[pl.BlockSpec((1, Ho + 2, Wo + 2, Cs), lambda b, r: (b, 0, 0, 0)),
                  pl.BlockSpec((9, Cs, 4 * Cp), lambda b, r: (0, 0, 0)),   # resident
                  pl.BlockSpec((1, 4 * Cp), lambda b, r: (0, 0)),
                  pl.BlockSpec((1, Mt, Cp), lambda b, r: (b, r, 0))],
        out_specs=(pl.BlockSpec((1, Mt, Cp), lambda b, r: (b, r, 0)),
                   pl.BlockSpec((1, Mt, Cp), lambda b, r: (b, r, 0))),
        compiler_params=pltpu.CompilerParams(
            dimension_semantics=("parallel", "parallel"),
            vmem_limit_bytes=_VMEM_LIMIT),
    )(sp, w_g, bias, prev_c)
    return h, c


# ----------------------------------- forward -----------------------------------

# Sub-pixel decomposition of ConvTranspose2d(k=3, stride=2, padding=1, output_padding=1):
# output (2m+dy, 2n+dx) reads x at taps {(m,n),(m,n+1),(m+1,n),(m+1,n+1)} (tap index
# 0..3) with weight entries W[:, :, kh, kw] listed per phase p = 2*dy + dx.
_PHASE_TAPS = (
    ((0, 1, 1),),                                        # (even, even)
    ((0, 1, 2), (1, 1, 0)),                              # (even, odd)
    ((0, 2, 1), (2, 0, 1)),                              # (odd, even)
    ((0, 2, 2), (1, 2, 0), (2, 0, 2), (3, 0, 0)),        # (odd, odd)
)


def lstm_up_block_forward(params, x, input_skip, hidden_state_temporal=None):
    f32, bf16 = jnp.float32, jnp.bfloat16
    x = x.astype(f32)
    input_skip = input_skip.astype(f32)
    B, Cin, H, W = x.shape
    Cout = params['deconv_w'].shape[1]
    Ho, Wo = input_skip.shape[2], input_skip.shape[3]
    assert (Ho, Wo) == (2 * H, 2 * W)
    assert Cin == 2 * Cout              # required by additive_up_sampling channel sum
    P = Ho * Wo
    M = B * P
    Cp = _round_up(Cout, 128)           # lane-dense internal channel width
    pad_c = Cp - Cout

    # ---- ConvTranspose2d via sub-pixel 4-phase GEMM (+ fused BN batch statistics) ----
    x_nhwc = jnp.transpose(x, (0, 2, 3, 1))                          # (B, H, W, Cin)
    xp = jnp.pad(x_nhwc, ((0, 0), (0, 1), (0, 1), (0, 0)))
    patches = jnp.concatenate(
        [xp[:, :H, :W, :], xp[:, :H, 1:W + 1, :],
         xp[:, 1:H + 1, :W, :], xp[:, 1:H + 1, 1:W + 1, :]], axis=-1)
    patches = patches.reshape(B * H * W, 4 * Cin).astype(bf16)

    w_d = params['deconv_w'].astype(f32)                             # (Cin, Cout, 3, 3)
    wd_mat = jnp.zeros((4 * Cin, 4 * Cp), f32)
    for ph, taps in enumerate(_PHASE_TAPS):
        for (t, kh, kw) in taps:
            wd_mat = wd_mat.at[t * Cin:(t + 1) * Cin,
                               ph * Cp:ph * Cp + Cout].set(w_d[:, :, kh, kw])
    wd_mat = wd_mat.astype(bf16)

    y_phase, stats = deconv_gemm_stats(patches, wd_mat)   # (B*H*W, 4Cp), (2, 4Cp)

    # depth-to-space: (B*H*W, [dy, dx, c]) -> (B, Ho*Wo, Cp), NHWC pixel-major.
    # TODO(synk): fold this permute into the fused BN kernel's input index_map to avoid
    # one f32 HBM round trip of y at large sizes.
    y = y_phase.reshape(B, H, W, 2, 2, Cp)
    y = jnp.transpose(y, (0, 1, 3, 2, 4, 5)).reshape(B, P, Cp)

    # BatchNorm2d(track_running_stats=False): batch statistics (biased variance).
    s = stats[0].reshape(4, Cp).sum(axis=0)
    sq = stats[1].reshape(4, Cp).sum(axis=0)
    mean = s / float(M)
    var = jnp.maximum(sq / float(M) - mean * mean, 0.0)              # clamp >= 0
    gamma = jnp.pad(params['bn_gamma'].astype(f32), (0, pad_c))
    beta = jnp.pad(params['bn_beta'].astype(f32), (0, pad_c))
    sc = gamma * jax.lax.rsqrt(var + 1e-5)
    sh = beta - mean * sc
    scale_v = sc.reshape(1, Cp)
    shift_v = sh.reshape(1, Cp)

    # ---- additive 2x bilinear up-sampling, separable 1-D interps (tiny; linearity
    # folds the channel-half sum into the interp input) ----
    Rm = interp_matrix(H, Ho)                                        # (Ho, H)
    Cm = interp_matrix(W, Wo)                                        # (Wo, W)
    xs_half = x_nhwc[..., :Cout] + x_nhwc[..., Cout:]                # (B, H, W, Cout)
    up = jnp.einsum('oh,bhwc->bowc', Rm, xs_half, precision=_HIGHEST)
    up = jnp.einsum('pw,bowc->bopc', Cm, up, precision=_HIGHEST)     # (B, Ho, Wo, Cout)
    up = jnp.pad(up, ((0, 0), (0, 0), (0, 0), (0, pad_c))).reshape(B, P, Cp)

    skip = jnp.pad(jnp.transpose(input_skip, (0, 2, 3, 1)),
                   ((0, 0), (0, 0), (0, 0), (0, pad_c))).reshape(B, P, Cp)

    # ---- fused BN + ReLU + skip add + up-sample add ----
    add_up = bn_relu_skip_up(y, scale_v, shift_v, skip, up)          # (B, P, Cp)

    # ---- ConvLSTMCell: 3x3 gate conv with in-kernel patches + fused LSTM pointwise ----
    if hidden_state_temporal is None:
        prev_h = jnp.zeros((B, Cout, Ho, Wo), f32)
        prev_c = jnp.zeros((B, Cout, Ho, Wo), f32)
    else:
        prev_h, prev_c = hidden_state_temporal
    prev_h_p = jnp.pad(jnp.transpose(prev_h.astype(f32), (0, 2, 3, 1)),
                       ((0, 0), (0, 0), (0, 0), (0, pad_c)))         # (B, Ho, Wo, Cp)
    prev_c_p = jnp.pad(jnp.transpose(prev_c.astype(f32), (0, 2, 3, 1)),
                       ((0, 0), (0, 0), (0, 0), (0, pad_c))).reshape(B, P, Cp)

    stacked = jnp.concatenate([add_up.reshape(B, Ho, Wo, Cp), prev_h_p], axis=-1)
    sp = jnp.pad(stacked, ((0, 0), (1, 1), (1, 1), (0, 0))).astype(bf16)

    # Gate weights: (kh*3+kw, padded in-channel, padded out-gate-channel), gates fused
    # along N with per-gate blocks of width Cp (128-aligned epilogue slices).
    gw = jnp.transpose(params['gates_w'].astype(f32), (2, 3, 1, 0))  # (3,3,2Cout,4Cout)
    gw = gw.reshape(9, 2 * Cout, 4 * Cout)
    in_idx = jnp.concatenate([jnp.arange(Cout), Cp + jnp.arange(Cout)])
    out_idx = (jnp.arange(4 * Cout) // Cout) * Cp + (jnp.arange(4 * Cout) % Cout)
    w_g = jnp.zeros((9, 2 * Cp, 4 * Cp), f32)
    w_g = w_g.at[:, in_idx[:, None], out_idx[None, :]].set(gw).astype(bf16)
    bias = jnp.zeros((1, 4 * Cp), f32).at[0, out_idx].set(params['gates_b'].astype(f32))

    h_flat, c_flat = gates_conv_lstm(sp, w_g, bias, prev_c_p, Ho, Wo, Cp)

    hidden = jnp.transpose(h_flat.reshape(B, Ho, Wo, Cp)[..., :Cout], (0, 3, 1, 2))
    cell = jnp.transpose(c_flat.reshape(B, Ho, Wo, Cp)[..., :Cout], (0, 3, 1, 2))
    return hidden, cell


# --------------------- pure-JAX reference (correctness check) ---------------------

def reference_forward(params, x, input_skip, state):
    """f32 reference; conv operands are bf16-quantized exactly like the kernels' MXU
    inputs so results match up to f32 accumulation order."""
    f32 = jnp.float32
    q = lambda a: a.astype(jnp.bfloat16).astype(f32)
    B, Cin, H, W = x.shape
    Cout = params['deconv_w'].shape[1]
    Ho, Wo = input_skip.shape[2], input_skip.shape[3]

    w_conv = jnp.flip(jnp.transpose(params['deconv_w'], (1, 0, 2, 3)), axis=(2, 3))
    y = jax.lax.conv_general_dilated(
        q(x), q(w_conv), window_strides=(1, 1), padding=((1, 2), (1, 2)),
        lhs_dilation=(2, 2), dimension_numbers=('NCHW', 'OIHW', 'NCHW'),
        precision=_HIGHEST)
    mean = jnp.mean(y, axis=(0, 2, 3), keepdims=True)
    var = jnp.mean((y - mean) ** 2, axis=(0, 2, 3), keepdims=True)
    yn = (y - mean) / jnp.sqrt(var + 1e-5)
    yn = yn * params['bn_gamma'].reshape(1, -1, 1, 1) + params['bn_beta'].reshape(1, -1, 1, 1)
    add_up = jnp.maximum(yn, 0.0) + input_skip

    Rm = interp_matrix(H, Ho)
    Cm = interp_matrix(W, Wo)
    up = jnp.einsum('oh,bchw->bcow', Rm, x, precision=_HIGHEST)
    up = jnp.einsum('pw,bcow->bcop', Cm, up, precision=_HIGHEST)     # (B, Cin, Ho, Wo)
    add_up = add_up + up[:, :Cout] + up[:, Cout:]

    prev_h, prev_c = state
    stacked = jnp.concatenate([add_up, prev_h], axis=1)
    gates = jax.lax.conv_general_dilated(
        q(stacked), q(params['gates_w']), window_strides=(1, 1), padding=((1, 1), (1, 1)),
        dimension_numbers=('NCHW', 'OIHW', 'NCHW'),
        precision=_HIGHEST) + params['gates_b'].reshape(1, -1, 1, 1)
    ig, rg, og, cg = jnp.split(gates, 4, axis=1)
    cell = jax.nn.sigmoid(rg) * prev_c + jax.nn.sigmoid(ig) * jnp.tanh(cg)
    hidden = jax.nn.sigmoid(og) * jnp.tanh(cell)
    return hidden, cell


# --------------------------------- main -------------------------------------

if __name__ == "__main__":
    key = jax.random.PRNGKey(0)
    B, Cin, H, W = 2, 8, 8, 8
    Cout = Cin // 2                     # additive_up_sampling requires Cin == 2*Cout
    ks = jax.random.split(key, 9)
    params = {
        'deconv_w': 0.2 * jax.random.normal(ks[0], (Cin, Cout, 3, 3), jnp.float32),
        'bn_gamma': 1.0 + 0.1 * jax.random.normal(ks[1], (Cout,), jnp.float32),
        'bn_beta': 0.1 * jax.random.normal(ks[2], (Cout,), jnp.float32),
        'gates_w': 0.15 * jax.random.normal(ks[3], (4 * Cout, 2 * Cout, 3, 3), jnp.float32),
        'gates_b': 0.1 * jax.random.normal(ks[4], (4 * Cout,), jnp.float32),
    }
    x = jax.random.normal(ks[5], (B, Cin, H, W), jnp.float32)
    input_skip = jax.random.normal(ks[6], (B, Cout, 2 * H, 2 * W), jnp.float32)
    hidden_state = (jax.random.normal(ks[7], (B, Cout, 2 * H, 2 * W), jnp.float32),
                    jax.random.normal(ks[8], (B, Cout, 2 * H, 2 * W), jnp.float32))

    fwd = jax.jit(lstm_up_block_forward)
    hidden, cell = jax.block_until_ready(fwd(params, x, input_skip, hidden_state))

    ref_h, ref_c = reference_forward(params, x, input_skip, hidden_state)
    assert hidden.shape == (B, Cout, 2 * H, 2 * W) and cell.shape == (B, Cout, 2 * H, 2 * W)
    assert jnp.allclose(hidden, ref_h, atol=2e-2, rtol=2e-2), \
        float(jnp.max(jnp.abs(hidden - ref_h)))
    assert jnp.allclose(cell, ref_c, atol=2e-2, rtol=2e-2), \
        float(jnp.max(jnp.abs(cell - ref_c)))
    print("KERNEL_OK")
</pallas_src>

<mosaic_0001>
module attributes {stable_mosaic.version = 11 : i64} {
  func.func private @main(%arg0: i32) attributes {dimension_semantics = [#tpu.dimension_semantics<core_parallel>], iteration_bounds = array<i64: 2>, tpu.core_type = #tpu.core_type<sc_scalar_subcore>, window_params = []} {
    return
  }
}

module attributes {stable_mosaic.version = 11 : i64} {
  func.func private @main(%arg0: i32) attributes {dimension_semantics = [#tpu.dimension_semantics<core_parallel>], iteration_bounds = array<i64: 2>, tpu.core_type = #tpu.core_type<sc_scalar_subcore>, window_params = []} {
    return
  }
}

module attributes {stable_mosaic.version = 11 : i64} {
  func.func @_deconv_gemm_stats_kernel(%arg0: i32, %arg1: memref<128x32xbf16, #tpu.memory_space<vmem>>, %arg2: memref<32x512xbf16, #tpu.memory_space<vmem>>, %arg3: memref<128x512xf32, #tpu.memory_space<vmem>>, %arg4: memref<1x2x512xf32, #tpu.memory_space<vmem>>) attributes {dimension_semantics = [#tpu.dimension_semantics<parallel>], iteration_bounds = array<i64: 1>, scalar_prefetch = 0 : i64, scratch_operands = 0 : i64, tpu.core_type = #tpu.core_type<tc>, window_params = [{transform_indices = @transform_0, window_bounds = array<i64: 128, 32>}, {pipeline_mode = #tpu.pipeline_mode<synchronous>, transform_indices = @transform_1, window_bounds = array<i64: 32, 512>}, {transform_indices = @transform_2, window_bounds = array<i64: 128, 512>}, {transform_indices = @transform_3, window_bounds = array<i64: 1, 2, 512>}]} {
    %c0 = arith.constant 0 : index
    %c0_0 = arith.constant 0 : index
    %0 = vector.load %arg1[%c0, %c0_0] : memref<128x32xbf16, #tpu.memory_space<vmem>>, vector<128x32xbf16>
    %c0_1 = arith.constant 0 : index
    %c0_2 = arith.constant 0 : index
    %1 = vector.load %arg2[%c0_1, %c0_2] : memref<32x512xbf16, #tpu.memory_space<vmem>>, vector<32x512xbf16>
    %cst = arith.constant dense<0.000000e+00> : vector<128x512xf32>
    %2 = tpu.matmul %0, %1, %cst {dimension_numbers = #tpu.dot_dimension_numbers<[1], [0], [0], [1], [0, 0, 1, 1], [], []>} : vector<128x32xbf16>, vector<32x512xbf16>, vector<128x512xf32> -> vector<128x512xf32>
    %c0_3 = arith.constant 0 : index
    %c0_4 = arith.constant 0 : index
    %3 = vector.load %arg3[%c0_3, %c0_4] : memref<128x512xf32, #tpu.memory_space<vmem>>, vector<128x512xf32>
    tpu.vector_store %arg3[%c0_3, %c0_4], %2 {strides = array<i32>} : memref<128x512xf32, #tpu.memory_space<vmem>>, vector<128x512xf32>,
    %cst_5 = arith.constant dense<0.000000e+00> : vector<512xf32>
    %4 = vector.multi_reduction <add>, %2, %cst_5 [0] : vector<128x512xf32> to vector<512xf32>
    %5 = vector.shape_cast %4 : vector<512xf32> to vector<1x512xf32>
    %6 = arith.mulf %2, %2 : vector<128x512xf32>
    %cst_6 = arith.constant dense<0.000000e+00> : vector<512xf32>
    %7 = vector.multi_reduction <add>, %6, %cst_6 [0] : vector<128x512xf32> to vector<512xf32>
    %8 = vector.shape_cast %7 : vector<512xf32> to vector<1x512xf32>
    %9 = tpu.concatenate %5, %8 in 0 : vector<1x512xf32>, vector<1x512xf32> -> vector<2x512xf32>
    %c0_7 = arith.constant 0 : index
    %c0_8 = arith.constant 0 : index
    %c0_9 = arith.constant 0 : index
    %10 = vector.load %arg4[%c0_7, %c0_8, %c0_9] : memref<1x2x512xf32, #tpu.memory_space<vmem>>, vector<1x2x512xf32>
    %11 = vector.shape_cast %10 : vector<1x2x512xf32> to vector<2x512xf32>
    %12 = vector.shape_cast %9 : vector<2x512xf32> to vector<1x2x512xf32>
    tpu.vector_store %arg4[%c0_7, %c0_8, %c0_9], %12 {strides = array<i32>} : memref<1x2x512xf32, #tpu.memory_space<vmem>>, vector<1x2x512xf32>,
    return
  }
  func.func @transform_0(%arg0: i32) -> (i32, i32) {
    %c0_i32 = arith.constant 0 : i32
    %c0_i32_0 = arith.constant 0 : i32
    return %arg0, %c0_i32 : i32, i32
  }
  func.func @transform_1(%arg0: i32) -> (i32, i32) {
    %c0_i32 = arith.constant 0 : i32
    %c0_i32_0 = arith.constant 0 : i32
    %c0_i32_1 = arith.constant 0 : i32
    return %c0_i32, %c0_i32_0 : i32, i32
  }
  func.func @transform_2(%arg0: i32) -> (i32, i32) {
    %c0_i32 = arith.constant 0 : i32
    %c0_i32_0 = arith.constant 0 : i32
    return %arg0, %c0_i32 : i32, i32
  }
  func.func @transform_3(%arg0: i32) -> (i32, i32, i32) {
    %c0_i32 = arith.constant 0 : i32
    %c0_i32_0 = arith.constant 0 : i32
    %c0_i32_1 = arith.constant 0 : i32
    return %arg0, %c0_i32, %c0_i32_0 : i32, i32, i32
  }
}

module attributes {stable_mosaic.version = 11 : i64} {
  func.func @_bn_relu_skip_up_kernel(%arg0: i32, %arg1: i32, %arg2: memref<1x256x128xf32, #tpu.memory_space<vmem>>, %arg3: memref<1x128xf32, #tpu.memory_space<vmem>>, %arg4: memref<1x128xf32, #tpu.memory_space<vmem>>, %arg5: memref<1x256x128xf32, #tpu.memory_space<vmem>>, %arg6: memref<1x256x128xf32, #tpu.memory_space<vmem>>, %arg7: memref<1x256x128xf32, #tpu.memory_space<vmem>>) attributes {dimension_semantics = [#tpu.dimension_semantics<parallel>, #tpu.dimension_semantics<parallel>], iteration_bounds = array<i64: 2, 1>, scalar_prefetch = 0 : i64, scratch_operands = 0 : i64, tpu.core_type = #tpu.core_type<tc>, window_params = [{transform_indices = @transform_0, window_bounds = array<i64: 1, 256, 128>}, {pipeline_mode = #tpu.pipeline_mode<synchronous>, transform_indices = @transform_1, window_bounds = array<i64: 1, 128>}, {pipeline_mode = #tpu.pipeline_mode<synchronous>, transform_indices = @transform_2, window_bounds = array<i64: 1, 128>}, {transform_indices = @transform_3, window_bounds = array<i64: 1, 256, 128>}, {transform_indices = @transform_4, window_bounds = array<i64: 1, 256, 128>}, {transform_indices = @transform_5, window_bounds = array<i64: 1, 256, 128>}]} {
    %c0 = arith.constant 0 : index
    %c0_0 = arith.constant 0 : index
    %c0_1 = arith.constant 0 : index
    %0 = vector.load %arg2[%c0, %c0_0, %c0_1] : memref<1x256x128xf32, #tpu.memory_space<vmem>>, vector<1x256x128xf32>
    %1 = vector.shape_cast %0 : vector<1x256x128xf32> to vector<256x128xf32>
    %c0_2 = arith.constant 0 : index
    %c0_3 = arith.constant 0 : index
    %2 = vector.load %arg3[%c0_2, %c0_3] : memref<1x128xf32, #tpu.memory_space<vmem>>, vector<1x128xf32>
    %3 = vector.broadcast %2 : vector<1x128xf32> to vector<256x128xf32>
    %4 = arith.mulf %1, %3 : vector<256x128xf32>
    %c0_4 = arith.constant 0 : index
    %c0_5 = arith.constant 0 : index
    %5 = vector.load %arg4[%c0_4, %c0_5] : memref<1x128xf32, #tpu.memory_space<vmem>>, vector<1x128xf32>
    %6 = vector.broadcast %5 : vector<1x128xf32> to vector<256x128xf32>
    %7 = arith.addf %4, %6 : vector<256x128xf32>
    %cst = arith.constant 0.000000e+00 : f32
    %8 = vector.broadcast %cst : f32 to vector<256x128xf32>
    %9 = arith.maximumf %7, %8 : vector<256x128xf32>
    %c0_6 = arith.constant 0 : index
    %c0_7 = arith.constant 0 : index
    %c0_8 = arith.constant 0 : index
    %10 = vector.load %arg5[%c0_6, %c0_7, %c0_8] : memref<1x256x128xf32, #tpu.memory_space<vmem>>, vector<1x256x128xf32>
    %11 = vector.shape_cast %10 : vector<1x256x128xf32> to vector<256x128xf32>
    %12 = arith.addf %9, %11 : vector<256x128xf32>
    %c0_9 = arith.constant 0 : index
    %c0_10 = arith.constant 0 : index
    %c0_11 = arith.constant 0 : index
    %13 = vector.load %arg6[%c0_9, %c0_10, %c0_11] : memref<1x256x128xf32, #tpu.memory_space<vmem>>, vector<1x256x128xf32>
    %14 = vector.shape_cast %13 : vector<1x256x128xf32> to vector<256x128xf32>
    %15 = arith.addf %12, %14 : vector<256x128xf32>
    %c0_12 = arith.constant 0 : index
    %c0_13 = arith.constant 0 : index
    %c0_14 = arith.constant 0 : index
    %16 = vector.load %arg7[%c0_12, %c0_13, %c0_14] : memref<1x256x128xf32, #tpu.memory_space<vmem>>, vector<1x256x128xf32>
    %17 = vector.shape_cast %16 : vector<1x256x128xf32> to vector<256x128xf32>
    %18 = vector.shape_cast %15 : vector<256x128xf32> to vector<1x256x128xf32>
    tpu.vector_store %arg7[%c0_12, %c0_13, %c0_14], %18 {strides = array<i32>} : memref<1x256x128xf32, #tpu.memory_space<vmem>>, vector<1x256x128xf32>,
    return
  }
  func.func @transform_0(%arg0: i32, %arg1: i32) -> (i32, i32, i32) {
    %c0_i32 = arith.constant 0 : i32
    %c0_i32_0 = arith.constant 0 : i32
    return %arg0, %arg1, %c0_i32 : i32, i32, i32
  }
  func.func @transform_1(%arg0: i32, %arg1: i32) -> (i32, i32) {
    %c0_i32 = arith.constant 0 : i32
    %c0_i32_0 = arith.constant 0 : i32
    %c0_i32_1 = arith.constant 0 : i32
    return %c0_i32, %c0_i32_0 : i32, i32
  }
  func.func @transform_2(%arg0: i32, %arg1: i32) -> (i32, i32) {
    %c0_i32 = arith.constant 0 : i32
    %c0_i32_0 = arith.constant 0 : i32
    %c0_i32_1 = arith.constant 0 : i32
    return %c0_i32, %c0_i32_0 : i32, i32
  }
  func.func @transform_3(%arg0: i32, %arg1: i32) -> (i32, i32, i32) {
    %c0_i32 = arith.constant 0 : i32
    %c0_i32_0 = arith.constant 0 : i32
    return %arg0, %arg1, %c0_i32 : i32, i32, i32
  }
  func.func @transform_4(%arg0: i32, %arg1: i32) -> (i32, i32, i32) {
    %c0_i32 = arith.constant 0 : i32
    %c0_i32_0 = arith.constant 0 : i32
    return %arg0, %arg1, %c0_i32 : i32, i32, i32
  }
  func.func @transform_5(%arg0: i32, %arg1: i32) -> (i32, i32, i32) {
    %c0_i32 = arith.constant 0 : i32
    %c0_i32_0 = arith.constant 0 : i32
    return %arg0, %arg1, %c0_i32 : i32, i32, i32
  }
}

module attributes {stable_mosaic.version = 11 : i64} {
  func.func @_gates_lstm_kernel(%arg0: i32, %arg1: i32, %arg2: memref<1x18x18x256xbf16, #tpu.memory_space<vmem>>, %arg3: memref<9x256x512xbf16, #tpu.memory_space<vmem>>, %arg4: memref<1x512xf32, #tpu.memory_space<vmem>>, %arg5: memref<1x256x128xf32, #tpu.memory_space<vmem>>, %arg6: memref<1x256x128xf32, #tpu.memory_space<vmem>>, %arg7: memref<1x256x128xf32, #tpu.memory_space<vmem>>) attributes {dimension_semantics = [#tpu.dimension_semantics<parallel>, #tpu.dimension_semantics<parallel>], iteration_bounds = array<i64: 2, 1>, scalar_prefetch = 0 : i64, scratch_operands = 0 : i64, tpu.core_type = #tpu.core_type<tc>, window_params = [{transform_indices = @transform_0, window_bounds = array<i64: 1, 18, 18, 256>}, {pipeline_mode = #tpu.pipeline_mode<synchronous>, transform_indices = @transform_1, window_bounds = array<i64: 9, 256, 512>}, {pipeline_mode = #tpu.pipeline_mode<synchronous>, transform_indices = @transform_2, window_bounds = array<i64: 1, 512>}, {transform_indices = @transform_3, window_bounds = array<i64: 1, 256, 128>}, {transform_indices = @transform_4, window_bounds = array<i64: 1, 256, 128>}, {transform_indices = @transform_5, window_bounds = array<i64: 1, 256, 128>}]} {
    %c16_i32 = arith.constant 16 : i32
    %0 = arith.muli %arg1, %c16_i32 : i32
    %cst = arith.constant 0.000000e+00 : f32
    %1 = vector.broadcast %cst : f32 to vector<256x512xf32>
    %c0 = arith.constant 0 : index
    %c0_0 = arith.constant 0 : index
    %2 = vector.load %arg4[%c0, %c0_0] : memref<1x512xf32, #tpu.memory_space<vmem>>, vector<1x512xf32>
    %3 = vector.broadcast %2 : vector<1x512xf32> to vector<256x512xf32>
    %4 = arith.addf %1, %3 : vector<256x512xf32>
    %c0_i32 = arith.constant 0 : i32
    %5 = arith.addi %0, %c0_i32 : i32
    %c0_1 = arith.constant 0 : index
    %6 = arith.index_cast %5 : i32 to index
    %c0_2 = arith.constant 0 : index
    %c0_3 = arith.constant 0 : index
    %7 = vector.load %arg2[%c0_1, %6, %c0_2, %c0_3] : memref<1x18x18x256xbf16, #tpu.memory_space<vmem>>, vector<1x16x18x256xbf16>
    %8 = vector.shape_cast %7 : vector<1x16x18x256xbf16> to vector<16x18x256xbf16>
    %9 = vector.extract_strided_slice %8 {offsets = [0, 0, 0], sizes = [16, 16, 256], strides = [1, 1, 1]} : vector<16x18x256xbf16> to vector<16x16x256xbf16>
    %10 = vector.shape_cast %9 : vector<16x16x256xbf16> to vector<256x256xbf16>
    %c0_4 = arith.constant 0 : index
    %c0_5 = arith.constant 0 : index
    %c0_6 = arith.constant 0 : index
    %11 = vector.load %arg3[%c0_4, %c0_5, %c0_6] : memref<9x256x512xbf16, #tpu.memory_space<vmem>>, vector<1x256x512xbf16>
    %12 = vector.shape_cast %11 : vector<1x256x512xbf16> to vector<256x512xbf16>
    %cst_7 = arith.constant dense<0.000000e+00> : vector<256x512xf32>
    %13 = tpu.matmul %10, %12, %cst_7 {dimension_numbers = #tpu.dot_dimension_numbers<[1], [0], [0], [1], [0, 0, 1, 1], [], []>} : vector<256x256xbf16>, vector<256x512xbf16>, vector<256x512xf32> -> vector<256x512xf32>
    %14 = arith.addf %4, %13 : vector<256x512xf32>
    %15 = vector.extract_strided_slice %8 {offsets = [0, 1, 0], sizes = [16, 16, 256], strides = [1, 1, 1]} : vector<16x18x256xbf16> to vector<16x16x256xbf16>
    %16 = vector.shape_cast %15 : vector<16x16x256xbf16> to vector<256x256xbf16>
    %c1 = arith.constant 1 : index
    %c0_8 = arith.constant 0 : index
    %c0_9 = arith.constant 0 : index
    %17 = vector.load %arg3[%c1, %c0_8, %c0_9] : memref<9x256x512xbf16, #tpu.memory_space<vmem>>, vector<1x256x512xbf16>
    %18 = vector.shape_cast %17 : vector<1x256x512xbf16> to vector<256x512xbf16>
    %cst_10 = arith.constant dense<0.000000e+00> : vector<256x512xf32>
    %19 = tpu.matmul %16, %18, %cst_10 {dimension_numbers = #tpu.dot_dimension_numbers<[1], [0], [0], [1], [0, 0, 1, 1], [], []>} : vector<256x256xbf16>, vector<256x512xbf16>, vector<256x512xf32> -> vector<256x512xf32>
    %20 = arith.addf %14, %19 : vector<256x512xf32>
    %21 = vector.extract_strided_slice %8 {offsets = [0, 2, 0], sizes = [16, 16, 256], strides = [1, 1, 1]} : vector<16x18x256xbf16> to vector<16x16x256xbf16>
    %22 = vector.shape_cast %21 : vector<16x16x256xbf16> to vector<256x256xbf16>
    %c2 = arith.constant 2 : index
    %c0_11 = arith.constant 0 : index
    %c0_12 = arith.constant 0 : index
    %23 = vector.load %arg3[%c2, %c0_11, %c0_12] : memref<9x256x512xbf16, #tpu.memory_space<vmem>>, vector<1x256x512xbf16>
    %24 = vector.shape_cast %23 : vector<1x256x512xbf16> to vector<256x512xbf16>
    %cst_13 = arith.constant dense<0.000000e+00> : vector<256x512xf32>
    %25 = tpu.matmul %22, %24, %cst_13 {dimension_numbers = #tpu.dot_dimension_numbers<[1], [0], [0], [1], [0, 0, 1, 1], [], []>} : vector<256x256xbf16>, vector<256x512xbf16>, vector<256x512xf32> -> vector<256x512xf32>
    %26 = arith.addf %20, %25 : vector<256x512xf32>
    %c1_i32 = arith.constant 1 : i32
    %27 = arith.addi %0, %c1_i32 : i32
    %c0_14 = arith.constant 0 : index
    %28 = arith.index_cast %27 : i32 to index
    %c0_15 = arith.constant 0 : index
    %c0_16 = arith.constant 0 : index
    %29 = vector.load %arg2[%c0_14, %28, %c0_15, %c0_16] : memref<1x18x18x256xbf16, #tpu.memory_space<vmem>>, vector<1x16x18x256xbf16>
    %30 = vector.shape_cast %29 : vector<1x16x18x256xbf16> to vector<16x18x256xbf16>
    %31 = vector.extract_strided_slice %30 {offsets = [0, 0, 0], sizes = [16, 16, 256], strides = [1, 1, 1]} : vector<16x18x256xbf16> to vector<16x16x256xbf16>
    %32 = vector.shape_cast %31 : vector<16x16x256xbf16> to vector<256x256xbf16>
    %c3 = arith.constant 3 : index
    %c0_17 = arith.constant 0 : index
    %c0_18 = arith.constant 0 : index
    %33 = vector.load %arg3[%c3, %c0_17, %c0_18] : memref<9x256x512xbf16, #tpu.memory_space<vmem>>, vector<1x256x512xbf16>
    %34 = vector.shape_cast %33 : vector<1x256x512xbf16> to vector<256x512xbf16>
    %cst_19 = arith.constant dense<0.000000e+00> : vector<256x512xf32>
    %35 = tpu.matmul %32, %34, %cst_19 {dimension_numbers = #tpu.dot_dimension_numbers<[1], [0], [0], [1], [0, 0, 1, 1], [], []>} : vector<256x256xbf16>, vector<256x512xbf16>, vector<256x512xf32> -> vector<256x512xf32>
    %36 = arith.addf %26, %35 : vector<256x512xf32>
    %37 = vector.extract_strided_slice %30 {offsets = [0, 1, 0], sizes = [16, 16, 256], strides = [1, 1, 1]} : vector<16x18x256xbf16> to vector<16x16x256xbf16>
    %38 = vector.shape_cast %37 : vector<16x16x256xbf16> to vector<256x256xbf16>
    %c4 = arith.constant 4 : index
    %c0_20 = arith.constant 0 : index
    %c0_21 = arith.constant 0 : index
    %39 = vector.load %arg3[%c4, %c0_20, %c0_21] : memref<9x256x512xbf16, #tpu.memory_space<vmem>>, vector<1x256x512xbf16>
    %40 = vector.shape_cast %39 : vector<1x256x512xbf16> to vector<256x512xbf16>
    %cst_22 = arith.constant dense<0.000000e+00> : vector<256x512xf32>
    %41 = tpu.matmul %38, %40, %cst_22 {dimension_numbers = #tpu.dot_dimension_numbers<[1], [0], [0], [1], [0, 0, 1, 1], [], []>} : vector<256x256xbf16>, vector<256x512xbf16>, vector<256x512xf32> -> vector<256x512xf32>
    %42 = arith.addf %36, %41 : vector<256x512xf32>
    %43 = vector.extract_strided_slice %30 {offsets = [0, 2, 0], sizes = [16, 16, 256], strides = [1, 1, 1]} : vector<16x18x256xbf16> to vector<16x16x256xbf16>
    %44 = vector.shape_cast %43 : vector<16x16x256xbf16> to vector<256x256xbf16>
    %c5 = arith.constant 5 : index
    %c0_23 = arith.constant 0 : index
    %c0_24 = arith.constant 0 : index
    %45 = vector.load %arg3[%c5, %c0_23, %c0_24] : memref<9x256x512xbf16, #tpu.memory_space<vmem>>, vector<1x256x512xbf16>
    %46 = vector.shape_cast %45 : vector<1x256x512xbf16> to vector<256x512xbf16>
    %cst_25 = arith.constant dense<0.000000e+00> : vector<256x512xf32>
    %47 = tpu.matmul %44, %46, %cst_25 {dimension_numbers = #tpu.dot_dimension_numbers<[1], [0], [0], [1], [0, 0, 1, 1], [], []>} : vector<256x256xbf16>, vector<256x512xbf16>, vector<256x512xf32> -> vector<256x512xf32>
    %48 = arith.addf %42, %47 : vector<256x512xf32>
    %c2_i32 = arith.constant 2 : i32
    %49 = arith.addi %0, %c2_i32 : i32
    %c0_26 = arith.constant 0 : index
    %50 = arith.index_cast %49 : i32 to index
    %c0_27 = arith.constant 0 : index
    %c0_28 = arith.constant 0 : index
    %51 = vector.load %arg2[%c0_26, %50, %c0_27, %c0_28] : memref<1x18x18x256xbf16, #tpu.memory_space<vmem>>, vector<1x16x18x256xbf16>
    %52 = vector.shape_cast %51 : vector<1x16x18x256xbf16> to vector<16x18x256xbf16>
    %53 = vector.extract_strided_slice %52 {offsets = [0, 0, 0], sizes = [16, 16, 256], strides = [1, 1, 1]} : vector<16x18x256xbf16> to vector<16x16x256xbf16>
    %54 = vector.shape_cast %53 : vector<16x16x256xbf16> to vector<256x256xbf16>
    %c6 = arith.constant 6 : index
    %c0_29 = arith.constant 0 : index
    %c0_30 = arith.constant 0 : index
    %55 = vector.load %arg3[%c6, %c0_29, %c0_30] : memref<9x256x512xbf16, #tpu.memory_space<vmem>>, vector<1x256x512xbf16>
    %56 = vector.shape_cast %55 : vector<1x256x512xbf16> to vector<256x512xbf16>
    %cst_31 = arith.constant dense<0.000000e+00> : vector<256x512xf32>
    %57 = tpu.matmul %54, %56, %cst_31 {dimension_numbers = #tpu.dot_dimension_numbers<[1], [0], [0], [1], [0, 0, 1, 1], [], []>} : vector<256x256xbf16>, vector<256x512xbf16>, vector<256x512xf32> -> vector<256x512xf32>
    %58 = arith.addf %48, %57 : vector<256x512xf32>
    %59 = vector.extract_strided_slice %52 {offsets = [0, 1, 0], sizes = [16, 16, 256], strides = [1, 1, 1]} : vector<16x18x256xbf16> to vector<16x16x256xbf16>
    %60 = vector.shape_cast %59 : vector<16x16x256xbf16> to vector<256x256xbf16>
    %c7 = arith.constant 7 : index
    %c0_32 = arith.constant 0 : index
    %c0_33 = arith.constant 0 : index
    %61 = vector.load %arg3[%c7, %c0_32, %c0_33] : memref<9x256x512xbf16, #tpu.memory_space<vmem>>, vector<1x256x512xbf16>
    %62 = vector.shape_cast %61 : vector<1x256x512xbf16> to vector<256x512xbf16>
    %cst_34 = arith.constant dense<0.000000e+00> : vector<256x512xf32>
    %63 = tpu.matmul %60, %62, %cst_34 {dimension_numbers = #tpu.dot_dimension_numbers<[1], [0], [0], [1], [0, 0, 1, 1], [], []>} : vector<256x256xbf16>, vector<256x512xbf16>, vector<256x512xf32> -> vector<256x512xf32>
    %64 = arith.addf %58, %63 : vector<256x512xf32>
    %65 = vector.extract_strided_slice %52 {offsets = [0, 2, 0], sizes = [16, 16, 256], strides = [1, 1, 1]} : vector<16x18x256xbf16> to vector<16x16x256xbf16>
    %66 = vector.shape_cast %65 : vector<16x16x256xbf16> to vector<256x256xbf16>
    %c8 = arith.constant 8 : index
    %c0_35 = arith.constant 0 : index
    %c0_36 = arith.constant 0 : index
    %67 = vector.load %arg3[%c8, %c0_35, %c0_36] : memref<9x256x512xbf16, #tpu.memory_space<vmem>>, vector<1x256x512xbf16>
    %68 = vector.shape_cast %67 : vector<1x256x512xbf16> to vector<256x512xbf16>
    %cst_37 = arith.constant dense<0.000000e+00> : vector<256x512xf32>
    %69 = tpu.matmul %66, %68, %cst_37 {dimension_numbers = #tpu.dot_dimension_numbers<[1], [0], [0], [1], [0, 0, 1, 1], [], []>} : vector<256x256xbf16>, vector<256x512xbf16>, vector<256x512xf32> -> vector<256x512xf32>
    %70 = arith.addf %64, %69 : vector<256x512xf32>
    %71 = vector.extract_strided_slice %70 {offsets = [0, 0], sizes = [256, 128], strides = [1, 1]} : vector<256x512xf32> to vector<256x128xf32>
    %72 = arith.negf %71 : vector<256x128xf32>
    %73 = math.exp %72 : vector<256x128xf32>
    %cst_38 = arith.constant 1.000000e+00 : f32
    %74 = vector.broadcast %cst_38 : f32 to vector<256x128xf32>
    %75 = arith.addf %74, %73 : vector<256x128xf32>
    %76 = arith.divf %74, %75 : vector<256x128xf32>
    %77 = vector.extract_strided_slice %70 {offsets = [0, 128], sizes = [256, 128], strides = [1, 1]} : vector<256x512xf32> to vector<256x128xf32>
    %78 = arith.negf %77 : vector<256x128xf32>
    %79 = math.exp %78 : vector<256x128xf32>
    %cst_39 = arith.constant 1.000000e+00 : f32
    %80 = vector.broadcast %cst_39 : f32 to vector<256x128xf32>
    %81 = arith.addf %80, %79 : vector<256x128xf32>
    %82 = arith.divf %80, %81 : vector<256x128xf32>
    %83 = vector.extract_strided_slice %70 {offsets = [0, 256], sizes = [256, 128], strides = [1, 1]} : vector<256x512xf32> to vector<256x128xf32>
    %84 = arith.negf %83 : vector<256x128xf32>
    %85 = math.exp %84 : vector<256x128xf32>
    %cst_40 = arith.constant 1.000000e+00 : f32
    %86 = vector.broadcast %cst_40 : f32 to vector<256x128xf32>
    %87 = arith.addf %86, %85 : vector<256x128xf32>
    %88 = arith.divf %86, %87 : vector<256x128xf32>
    %89 = vector.extract_strided_slice %70 {offsets = [0, 384], sizes = [256, 128], strides = [1, 1]} : vector<256x512xf32> to vector<256x128xf32>
    %90 = math.tanh %89 : vector<256x128xf32>
    %c0_41 = arith.constant 0 : index
    %c0_42 = arith.constant 0 : index
    %c0_43 = arith.constant 0 : index
    %91 = vector.load %arg5[%c0_41, %c0_42, %c0_43] : memref<1x256x128xf32, #tpu.memory_space<vmem>>, vector<1x256x128xf32>
    %92 = vector.shape_cast %91 : vector<1x256x128xf32> to vector<256x128xf32>
    %93 = arith.mulf %82, %92 : vector<256x128xf32>
    %94 = arith.mulf %76, %90 : vector<256x128xf32>
    %95 = arith.addf %93, %94 : vector<256x128xf32>
    %c0_44 = arith.constant 0 : index
    %c0_45 = arith.constant 0 : index
    %c0_46 = arith.constant 0 : index
    %96 = vector.load %arg7[%c0_44, %c0_45, %c0_46] : memref<1x256x128xf32, #tpu.memory_space<vmem>>, vector<1x256x128xf32>
    %97 = vector.shape_cast %96 : vector<1x256x128xf32> to vector<256x128xf32>
    %98 = vector.shape_cast %95 : vector<256x128xf32> to vector<1x256x128xf32>
    tpu.vector_store %arg7[%c0_44, %c0_45, %c0_46], %98 {strides = array<i32>} : memref<1x256x128xf32, #tpu.memory_space<vmem>>, vector<1x256x128xf32>,
    %99 = math.tanh %95 : vector<256x128xf32>
    %100 = arith.mulf %88, %99 : vector<256x128xf32>
    %c0_47 = arith.constant 0 : index
    %c0_48 = arith.constant 0 : index
    %c0_49 = arith.constant 0 : index
    %101 = vector.load %arg6[%c0_47, %c0_48, %c0_49] : memref<1x256x128xf32, #tpu.memory_space<vmem>>, vector<1x256x128xf32>
    %102 = vector.shape_cast %101 : vector<1x256x128xf32> to vector<256x128xf32>
    %103 = vector.shape_cast %100 : vector<256x128xf32> to vector<1x256x128xf32>
    tpu.vector_store %arg6[%c0_47, %c0_48, %c0_49], %103 {strides = array<i32>} : memref<1x256x128xf32, #tpu.memory_space<vmem>>, vector<1x256x128xf32>,
    return
  }
  func.func @transform_0(%arg0: i32, %arg1: i32) -> (i32, i32, i32, i32) {
    %c0_i32 = arith.constant 0 : i32
    %c0_i32_0 = arith.constant 0 : i32
    %c0_i32_1 = arith.constant 0 : i32
    %c0_i32_2 = arith.constant 0 : i32
    return %arg0, %c0_i32, %c0_i32_0, %c0_i32_1 : i32, i32, i32, i32
  }
  func.func @transform_1(%arg0: i32, %arg1: i32) -> (i32, i32, i32) {
    %c0_i32 = arith.constant 0 : i32
    %c0_i32_0 = arith.constant 0 : i32
    %c0_i32_1 = arith.constant 0 : i32
    %c0_i32_2 = arith.constant 0 : i32
    return %c0_i32, %c0_i32_0, %c0_i32_1 : i32, i32, i32
  }
  func.func @transform_2(%arg0: i32, %arg1: i32) -> (i32, i32) {
    %c0_i32 = arith.constant 0 : i32
    %c0_i32_0 = arith.constant 0 : i32
    %c0_i32_1 = arith.constant 0 : i32
    return %c0_i32, %c0_i32_0 : i32, i32
  }
  func.func @transform_3(%arg0: i32, %arg1: i32) -> (i32, i32, i32) {
    %c0_i32 = arith.constant 0 : i32
    %c0_i32_0 = arith.constant 0 : i32
    return %arg0, %arg1, %c0_i32 : i32, i32, i32
  }
  func.func @transform_4(%arg0: i32, %arg1: i32) -> (i32, i32, i32) {
    %c0_i32 = arith.constant 0 : i32
    %c0_i32_0 = arith.constant 0 : i32
    return %arg0, %arg1, %c0_i32 : i32, i32, i32
  }
  func.func @transform_5(%arg0: i32, %arg1: i32) -> (i32, i32, i32) {
    %c0_i32 = arith.constant 0 : i32
    %c0_i32_0 = arith.constant 0 : i32
    return %arg0, %arg1, %c0_i32 : i32, i32, i32
  }
}

</mosaic_0001>

<bundles_post_ra>
// kernel: lstm_up_block_forward.3
= control target key start
LH: loop header
LB: loop body
LE: loop exit
PB: predicated region body
PF: predicated region fallthrough
CT: control target
= control target key end

     0   :  { %v755_v1 = vmov 0   ;;  %vm118_vm0 = vcmask 261120   ;;  %vm665_vm1 = vcmask 1040384   ;;  %s1044_s1 = inlined_call_operand.vmem [shape: bf16[32,512], index: 1, kind: input, shape index: {}]   ;;  %s1045_s0 = inlined_call_operand.vmem [shape: bf16[128,32], index: 0, kind: input, shape index: {}]   ;;  %s1046_s2 = inlined_call_operand.vmem [shape: f32[128,512], index: 2, kind: output, shape index: {0}]   ;;  %s1047_s3 = inlined_call_operand.vmem [shape: f32[1,2,512], index: 3, kind: output, shape index: {1}]  }
   0x1   :  { %v735_v0 = vld [vmem:[%s1044_s1 + $0x4] ss:$16 sps:$4 sm:$0xff]   ;;  %175 = vmatprep.mubr.bf16.mxu0 %v755_v1  ;;  %288 = vmatprep.mubr.bf16.mxu1 %v755_v1  ;;  %v737_v2 = vld [vmem:[%s1044_s1 + $0xc] ss:$16 sps:$4 sm:$0xff]   ;;  %v739_v3 = vld [vmem:[%s1044_s1] ss:$16 sps:$4 sm:$0xff]  }
   0x2   :  { %143 = vmatprep.subr.bf16.mxu0 %v735_v0  ;;  %v740_v4 = vld [vmem:[%s1044_s1 + $0x8] ss:$16 sps:$4 sm:$0xff]   ;;  %256 = vmatprep.subr.bf16.mxu1 %v737_v2  ;;  %v741_v5 = vld [vmem:[%s1044_s1 + $0x24] ss:$16 sps:$4 sm:$0xff]   ;;  %v743_v6 = vld [vmem:[%s1044_s1 + $0x2c] ss:$16 sps:$4 sm:$0xff]  }
   0x3   :  { %144 = vmatpush1.bf16.msra.mxu0 %v739_v3  ;;  %257 = vmatpush1.bf16.msra.mxu1 %v740_v4  ;;  %v745_v7 = vld [vmem:[%s1044_s1 + $0x20] ss:$16 sps:$4 sm:$0xff]   ;;  %v746_v8 = vld [vmem:[%s1044_s1 + $0x28] ss:$16 sps:$4 sm:$0xff]  }
   0x4   :  { %145 = vmatprep.subr.bf16.mxu0 %v741_v5  ;;  %258 = vmatprep.subr.bf16.mxu1 %v743_v6  ;;  %v747_v9 = vld [vmem:[%s1045_s0] sm:$0xff]   ;;  %v748_v10 = vld [vmem:[%s1045_s0 + $0x8] sm:$0xff]   ;;  %v749_v11 = vld [vmem:[%s1045_s0 + $0x10] sm:$0xff]  }
   0x5   :  { %v750_v12 = vld [vmem:[%s1045_s0 + $0x18] sm:$0xff]   ;;  %v751_v13 = vld [vmem:[%s1045_s0 + $0x20] sm:$0xff]   ;;  %v752_v14 = vld [vmem:[%s1045_s0 + $0x28] sm:$0xff]  }
   0x6   :  { %v753_v15 = vld [vmem:[%s1045_s0 + $0x30] sm:$0xff]   ;;  %v754_v16 = vld [vmem:[%s1045_s0 + $0x38] sm:$0xff]  }
   0x7   :  { %146 = vmatpush1.bf16.msra.mxu0 %v745_v7  ;;  %259 = vmatpush1.bf16.msra.mxu1 %v746_v8 }
   0xa   :  { %717 = vmatmul.mubr.msk.bf16.vlgmr.msra.gmra.mrb[0].mxu0 %vm118_vm0, %v747_v9  ;;  %725 = vmatmul.mubr.msk.bf16.vlgmr.msra.gmra.mrb[0].mxu1 %vm118_vm0, %v747_v9 }
   0xb   :  { %185 = vmatprep.mubr.bf16.mxu0 %v755_v1  ;;  %298 = vmatprep.mubr.bf16.mxu1 %v755_v1 }
  0x12   :  { %718 = vmatmul.mubr.msk.bf16.gmra.mrb[4].mxu0 %vm118_vm0, %v748_v10  ;;  %726 = vmatmul.mubr.msk.bf16.gmra.mrb[4].mxu1 %vm118_vm0, %v748_v10 }
  0x13   :  { %195 = vmatprep.mubr.bf16.mxu0 %v755_v1  ;;  %308 = vmatprep.mubr.bf16.mxu1 %v755_v1 }
  0x1a   :  { %719 = vmatmul.mubr.msk.bf16.gmra.mrb[8].mxu0 %vm118_vm0, %v749_v11  ;;  %727 = vmatmul.mubr.msk.bf16.gmra.mrb[8].mxu1 %vm118_vm0, %v749_v11 }
  0x1b   :  { %205 = vmatprep.mubr.bf16.mxu0 %v755_v1  ;;  %318 = vmatprep.mubr.bf16.mxu1 %v755_v1 }
  0x22   :  { %720 = vmatmul.mubr.msk.bf16.gmra.mrb[12].mxu0 %vm118_vm0, %v750_v12  ;;  %728 = vmatmul.mubr.msk.bf16.gmra.mrb[12].mxu1 %vm118_vm0, %v750_v12 }
  0x23   :  { %215 = vmatprep.mubr.bf16.mxu0 %v755_v1  ;;  %328 = vmatprep.mubr.bf16.mxu1 %v755_v1 }
  0x2a   :  { %721 = vmatmul.mubr.msk.bf16.gmra.mrb[16].mxu0 %vm118_vm0, %v751_v13  ;;  %729 = vmatmul.mubr.msk.bf16.gmra.mrb[16].mxu1 %vm118_vm0, %v751_v13 }
  0x2b   :  { %225 = vmatprep.mubr.bf16.mxu0 %v755_v1  ;;  %338 = vmatprep.mubr.bf16.mxu1 %v755_v1 }
  0x32   :  { %722 = vmatmul.mubr.msk.bf16.gmra.mrb[20].mxu0 %vm118_vm0, %v752_v14  ;;  %730 = vmatmul.mubr.msk.bf16.gmra.mrb[20].mxu1 %vm118_vm0, %v752_v14 }
  0x33   :  { %235 = vmatprep.mubr.bf16.mxu0 %v755_v1  ;;  %348 = vmatprep.mubr.bf16.mxu1 %v755_v1 }
  0x3a   :  { %723 = vmatmul.mubr.msk.bf16.gmra.mrb[24].mxu0 %vm118_vm0, %v753_v15  ;;  %731 = vmatmul.mubr.msk.bf16.gmra.mrb[24].mxu1 %vm118_vm0, %v753_v15 }
  0x3b   :  { %245 = vmatprep.mubr.bf16.mxu0 %v755_v1  ;;  %358 = vmatprep.mubr.bf16.mxu1 %v755_v1 }
  0x42   :  { %724 = vmatmul.mubr.msk.bf16.gmra.mrb[28].mxu0 %vm118_vm0, %v754_v16  ;;  %732 = vmatmul.mubr.msk.bf16.gmra.mrb[28].mxu1 %vm118_vm0, %v754_v16 }
  0xdd   :  { %v177_v17 = vpop.f32.mrb[0].mxu0  ;;  %v290_v18 = vpop.f32.mrb[0].mxu1 }
  0xde   :  { %369 = vst [vmem:[%s1046_s2] sm:$0xff] %v177_v17  ;;  %371 = vst [vmem:[%s1046_s2 + $0x10] sm:$0xff] %v290_v18  ;;  %v179_v19 = vpop.f32.mrb[1].mxu0  ;;  %v292_v20 = vpop.f32.mrb[1].mxu1  ;;  %v517_v21 = vmul.f32 %v177_v17, %v177_v17  ;;  %v519_v22 = vmul.f32 %v290_v18, %v290_v18 }
  0xdf   :  { %370 = vst [vmem:[%s1046_s2 + $0x8] sm:$0xff] %v179_v19  ;;  %v518_v23 = vmul.f32 %v179_v19, %v179_v19  ;;  %372 = vst [vmem:[%s1046_s2 + $0x18] sm:$0xff] %v292_v20  ;;  %v520_v24 = vmul.f32 %v292_v20, %v292_v20  ;;  %v181_v25 = vpop.f32.mrb[2].mxu0  ;;  %v294_v26 = vpop.f32.mrb[2].mxu1 }
  0xe0   :  { %373 = vst [vmem:[%s1046_s2 + $0x20] sm:$0xff] %v181_v25  ;;  %v433_v27 = vadd.f32 %v181_v25, %v177_v17  ;;  %v521_v28 = vmul.f32 %v181_v25, %v181_v25  ;;  %375 = vst [vmem:[%s1046_s2 + $0x30] sm:$0xff] %v294_v26  ;;  %v475_v29 = vadd.f32 %v294_v26, %v290_v18  ;;  %v183_v31 = vpop.f32.mrb[3].mxu0  ;;  %v296_v32 = vpop.f32.mrb[3].mxu1 }
  0xe1   :  { %v523_v30 = vmul.f32 %v294_v26, %v294_v26  ;;  %374 = vst [vmem:[%s1046_s2 + $0x28] sm:$0xff] %v183_v31  ;;  %v454_v33 = vadd.f32 %v183_v31, %v179_v19  ;;  %v522_v34 = vmul.f32 %v183_v31, %v183_v31  ;;  %376 = vst [vmem:[%s1046_s2 + $0x38] sm:$0xff] %v296_v32 }
  0xe2   :  { %v496_v35 = vadd.f32 %v296_v32, %v292_v20  ;;  %v524_v36 = vmul.f32 %v296_v32, %v296_v32  ;;  %v581_v37 = vadd.f32 %v521_v28, %v517_v21 }
  0xe3   :  { %v623_v38 = vadd.f32 %v523_v30, %v519_v22  ;;  %v602_v39 = vadd.f32 %v522_v34, %v518_v23 }
  0xe4   :  { %v644_v40 = vadd.f32 %v524_v36, %v520_v24 }
  0xe5   :  { %v187_v41 = vpop.f32.mrb[4].mxu0  ;;  %v300_v42 = vpop.f32.mrb[4].mxu1 }
  0xe6   :  { %377 = vst [vmem:[%s1046_s2 + $0x40] sm:$0xff] %v187_v41  ;;  %v434_v43 = vadd.f32 %v433_v27, %v187_v41  ;;  %v525_v44 = vmul.f32 %v187_v41, %v187_v41  ;;  %379 = vst [vmem:[%s1046_s2 + $0x50] sm:$0xff] %v300_v42  ;;  %v476_v45 = vadd.f32 %v475_v29, %v300_v42  ;;  %v189_v47 = vpop.f32.mrb[5].mxu0  ;;  %v302_v48 = vpop.f32.mrb[5].mxu1 }
  0xe7   :  { %v527_v46 = vmul.f32 %v300_v42, %v300_v42  ;;  %378 = vst [vmem:[%s1046_s2 + $0x48] sm:$0xff] %v189_v47  ;;  %v455_v49 = vadd.f32 %v454_v33, %v189_v47  ;;  %v526_v50 = vmul.f32 %v189_v47, %v189_v47  ;;  %380 = vst [vmem:[%s1046_s2 + $0x58] sm:$0xff] %v302_v48  ;;  %v191_v53 = vpop.f32.mrb[6].mxu0  ;;  %v304_v54 = vpop.f32.mrb[6].mxu1 }
  0xe8   :  { %v497_v51 = vadd.f32 %v496_v35, %v302_v48  ;;  %v528_v52 = vmul.f32 %v302_v48, %v302_v48  ;;  %v582_v55 = vadd.f32 %v581_v37, %v525_v44  ;;  %381 = vst [vmem:[%s1046_s2 + $0x60] sm:$0xff] %v191_v53  ;;  %v435_v57 = vadd.f32 %v434_v43, %v191_v53  ;;  %v193_v59 = vpop.f32.mrb[7].mxu0  ;;  %v306_v60 = vpop.f32.mrb[7].mxu1 }
  0xe9   :  { %v624_v56 = vadd.f32 %v623_v38, %v527_v46  ;;  %v529_v58 = vmul.f32 %v191_v53, %v191_v53  ;;  %383 = vst [vmem:[%s1046_s2 + $0x70] sm:$0xff] %v304_v54  ;;  %v603_v61 = vadd.f32 %v602_v39, %v526_v50  ;;  %v477_v63 = vadd.f32 %v476_v45, %v304_v54 }
  0xea   :  { %v645_v62 = vadd.f32 %v644_v40, %v528_v52  ;;  %v531_v0 = vmul.f32 %v304_v54, %v304_v54  ;;  %382 = vst [vmem:[%s1046_s2 + $0x68] sm:$0xff] %v193_v59  ;;  %384 = vst [vmem:[%s1046_s2 + $0x78] sm:$0xff] %v306_v60  ;;  %v456_v2 = vadd.f32 %v455_v49, %v193_v59 }
  0xeb   :  { %v583_v1 = vadd.f32 %v582_v55, %v529_v58  ;;  %v530_v3 = vmul.f32 %v193_v59, %v193_v59  ;;  %v498_v4 = vadd.f32 %v497_v51, %v306_v60  ;;  %v532_v6 = vmul.f32 %v306_v60, %v306_v60 }
  0xec   :  { %v625_v5 = vadd.f32 %v624_v56, %v531_v0 }
  0xed   :  { %v604_v7 = vadd.f32 %v603_v61, %v530_v3  ;;  %v646_v8 = vadd.f32 %v645_v62, %v532_v6  ;;  %v197_v9 = vpop.f32.mrb[8].mxu0  ;;  %v310_v10 = vpop.f32.mrb[8].mxu1 }
  0xee   :  { %385 = vst [vmem:[%s1046_s2 + $0x80] sm:$0xff] %v197_v9  ;;  %v436_v11 = vadd.f32 %v435_v57, %v197_v9  ;;  %v533_v12 = vmul.f32 %v197_v9, %v197_v9  ;;  %387 = vst [vmem:[%s1046_s2 + $0x90] sm:$0xff] %v310_v10  ;;  %v478_v13 = vadd.f32 %v477_v63, %v310_v10  ;;  %v199_v15 = vpop.f32.mrb[9].mxu0  ;;  %v312_v16 = vpop.f32.mrb[9].mxu1 }
  0xef   :  { %v535_v14 = vmul.f32 %v310_v10, %v310_v10  ;;  %386 = vst [vmem:[%s1046_s2 + $0x88] sm:$0xff] %v199_v15  ;;  %v457_v17 = vadd.f32 %v456_v2, %v199_v15  ;;  %v534_v18 = vmul.f32 %v199_v15, %v199_v15  ;;  %388 = vst [vmem:[%s1046_s2 + $0x98] sm:$0xff] %v312_v16  ;;  %v201_v21 = vpop.f32.mrb[10].mxu0  ;;  %v314_v22 = vpop.f32.mrb[10].mxu1 }
  0xf0   :  { %v499_v19 = vadd.f32 %v498_v4, %v312_v16  ;;  %v536_v20 = vmul.f32 %v312_v16, %v312_v16  ;;  %v584_v23 = vadd.f32 %v583_v1, %v533_v12  ;;  %389 = vst [vmem:[%s1046_s2 + $0xa0] sm:$0xff] %v201_v21  ;;  %v437_v25 = vadd.f32 %v436_v11, %v201_v21  ;;  %v203_v27 = vpop.f32.mrb[11].mxu0  ;;  %v316_v28 = vpop.f32.mrb[11].mxu1 }
  0xf1   :  { %v626_v24 = vadd.f32 %v625_v5, %v535_v14  ;;  %v537_v26 = vmul.f32 %v201_v21, %v201_v21  ;;  %391 = vst [vmem:[%s1046_s2 + $0xb0] sm:$0xff] %v314_v22  ;;  %v605_v29 = vadd.f32 %v604_v7, %v534_v18  ;;  %v479_v31 = vadd.f32 %v478_v13, %v314_v22 }
  0xf2   :  { %v647_v30 = vadd.f32 %v646_v8, %v536_v20  ;;  %v539_v32 = vmul.f32 %v314_v22, %v314_v22  ;;  %390 = vst [vmem:[%s1046_s2 + $0xa8] sm:$0xff] %v203_v27  ;;  %392 = vst [vmem:[%s1046_s2 + $0xb8] sm:$0xff] %v316_v28  ;;  %v458_v34 = vadd.f32 %v457_v17, %v203_v27 }
  0xf3   :  { %v585_v33 = vadd.f32 %v584_v23, %v537_v26  ;;  %v538_v35 = vmul.f32 %v203_v27, %v203_v27  ;;  %v500_v36 = vadd.f32 %v499_v19, %v316_v28  ;;  %v540_v38 = vmul.f32 %v316_v28, %v316_v28 }
  0xf4   :  { %v627_v37 = vadd.f32 %v626_v24, %v539_v32 }
  0xf5   :  { %v606_v39 = vadd.f32 %v605_v29, %v538_v35  ;;  %v648_v40 = vadd.f32 %v647_v30, %v540_v38  ;;  %v207_v41 = vpop.f32.mrb[12].mxu0  ;;  %v320_v42 = vpop.f32.mrb[12].mxu1 }
  0xf6   :  { %393 = vst [vmem:[%s1046_s2 + $0xc0] sm:$0xff] %v207_v41  ;;  %v438_v43 = vadd.f32 %v437_v25, %v207_v41  ;;  %v541_v44 = vmul.f32 %v207_v41, %v207_v41  ;;  %395 = vst [vmem:[%s1046_s2 + $0xd0] sm:$0xff] %v320_v42  ;;  %v480_v45 = vadd.f32 %v479_v31, %v320_v42  ;;  %v209_v47 = vpop.f32.mrb[13].mxu0  ;;  %v322_v48 = vpop.f32.mrb[13].mxu1 }
  0xf7   :  { %v543_v46 = vmul.f32 %v320_v42, %v320_v42  ;;  %394 = vst [vmem:[%s1046_s2 + $0xc8] sm:$0xff] %v209_v47  ;;  %v459_v49 = vadd.f32 %v458_v34, %v209_v47  ;;  %v542_v50 = vmul.f32 %v209_v47, %v209_v47  ;;  %396 = vst [vmem:[%s1046_s2 + $0xd8] sm:$0xff] %v322_v48  ;;  %v211_v53 = vpop.f32.mrb[14].mxu0  ;;  %v324_v54 = vpop.f32.mrb[14].mxu1 }
  0xf8   :  { %v501_v51 = vadd.f32 %v500_v36, %v322_v48  ;;  %v544_v52 = vmul.f32 %v322_v48, %v322_v48  ;;  %v586_v55 = vadd.f32 %v585_v33, %v541_v44  ;;  %397 = vst [vmem:[%s1046_s2 + $0xe0] sm:$0xff] %v211_v53  ;;  %v439_v57 = vadd.f32 %v438_v43, %v211_v53  ;;  %v213_v59 = vpop.f32.mrb[15].mxu0  ;;  %v326_v60 = vpop.f32.mrb[15].mxu1 }
  0xf9   :  { %v628_v56 = vadd.f32 %v627_v37, %v543_v46  ;;  %v545_v58 = vmul.f32 %v211_v53, %v211_v53  ;;  %399 = vst [vmem:[%s1046_s2 + $0xf0] sm:$0xff] %v324_v54  ;;  %v607_v61 = vadd.f32 %v606_v39, %v542_v50  ;;  %v481_v63 = vadd.f32 %v480_v45, %v324_v54 }
  0xfa   :  { %v649_v62 = vadd.f32 %v648_v40, %v544_v52  ;;  %v547_v0 = vmul.f32 %v324_v54, %v324_v54  ;;  %398 = vst [vmem:[%s1046_s2 + $0xe8] sm:$0xff] %v213_v59  ;;  %400 = vst [vmem:[%s1046_s2 + $0xf8] sm:$0xff] %v326_v60  ;;  %v460_v2 = vadd.f32 %v459_v49, %v213_v59 }
  0xfb   :  { %v587_v1 = vadd.f32 %v586_v55, %v545_v58  ;;  %v546_v3 = vmul.f32 %v213_v59, %v213_v59  ;;  %v502_v4 = vadd.f32 %v501_v51, %v326_v60  ;;  %v548_v6 = vmul.f32 %v326_v60, %v326_v60 }
  0xfc   :  { %v629_v5 = vadd.f32 %v628_v56, %v547_v0 }
  0xfd   :  { %v608_v7 = vadd.f32 %v607_v61, %v546_v3  ;;  %v650_v8 = vadd.f32 %v649_v62, %v548_v6  ;;  %v217_v9 = vpop.f32.mrb[16].mxu0  ;;  %v330_v10 = vpop.f32.mrb[16].mxu1 }
  0xfe   :  { %401 = vst [vmem:[%s1046_s2 + $0x100] sm:$0xff] %v217_v9  ;;  %v440_v11 = vadd.f32 %v439_v57, %v217_v9  ;;  %v549_v12 = vmul.f32 %v217_v9, %v217_v9  ;;  %403 = vst [vmem:[%s1046_s2 + $0x110] sm:$0xff] %v330_v10  ;;  %v482_v13 = vadd.f32 %v481_v63, %v330_v10  ;;  %v219_v15 = vpop.f32.mrb[17].mxu0  ;;  %v332_v16 = vpop.f32.mrb[17].mxu1 }
  0xff   :  { %v551_v14 = vmul.f32 %v330_v10, %v330_v10  ;;  %402 = vst [vmem:[%s1046_s2 + $0x108] sm:$0xff] %v219_v15  ;;  %v461_v17 = vadd.f32 %v460_v2, %v219_v15  ;;  %v550_v18 = vmul.f32 %v219_v15, %v219_v15  ;;  %404 = vst [vmem:[%s1046_s2 + $0x118] sm:$0xff] %v332_v16  ;;  %v221_v21 = vpop.f32.mrb[18].mxu0  ;;  %v334_v22 = vpop.f32.mrb[18].mxu1 }
 0x100   :  { %v503_v19 = vadd.f32 %v502_v4, %v332_v16  ;;  %v552_v20 = vmul.f32 %v332_v16, %v332_v16  ;;  %v588_v23 = vadd.f32 %v587_v1, %v549_v12  ;;  %405 = vst [vmem:[%s1046_s2 + $0x120] sm:$0xff] %v221_v21  ;;  %v441_v25 = vadd.f32 %v440_v11, %v221_v21  ;;  %v223_v27 = vpop.f32.mrb[19].mxu0  ;;  %v336_v28 = vpop.f32.mrb[19].mxu1 }
 0x101   :  { %v630_v24 = vadd.f32 %v629_v5, %v551_v14  ;;  %v553_v26 = vmul.f32 %v221_v21, %v221_v21  ;;  %407 = vst [vmem:[%s1046_s2 + $0x130] sm:$0xff] %v334_v22  ;;  %v609_v29 = vadd.f32 %v608_v7, %v550_v18  ;;  %v483_v31 = vadd.f32 %v482_v13, %v334_v22 }
 0x102   :  { %v651_v30 = vadd.f32 %v650_v8, %v552_v20  ;;  %v555_v32 = vmul.f32 %v334_v22, %v334_v22  ;;  %406 = vst [vmem:[%s1046_s2 + $0x128] sm:$0xff] %v223_v27  ;;  %408 = vst [vmem:[%s1046_s2 + $0x138] sm:$0xff] %v336_v28  ;;  %v462_v34 = vadd.f32 %v461_v17, %v223_v27 }
 0x103   :  { %v589_v33 = vadd.f32 %v588_v23, %v553_v26  ;;  %v554_v35 = vmul.f32 %v223_v27, %v223_v27  ;;  %v504_v36 = vadd.f32 %v503_v19, %v336_v28  ;;  %v556_v38 = vmul.f32 %v336_v28, %v336_v28 }
 0x104   :  { %v631_v37 = vadd.f32 %v630_v24, %v555_v32 }
 0x105   :  { %v610_v39 = vadd.f32 %v609_v29, %v554_v35  ;;  %v652_v40 = vadd.f32 %v651_v30, %v556_v38  ;;  %v227_v41 = vpop.f32.mrb[20].mxu0  ;;  %v340_v42 = vpop.f32.mrb[20].mxu1 }
 0x106   :  { %409 = vst [vmem:[%s1046_s2 + $0x140] sm:$0xff] %v227_v41  ;;  %v442_v43 = vadd.f32 %v441_v25, %v227_v41  ;;  %v557_v44 = vmul.f32 %v227_v41, %v227_v41  ;;  %411 = vst [vmem:[%s1046_s2 + $0x150] sm:$0xff] %v340_v42  ;;  %v484_v45 = vadd.f32 %v483_v31, %v340_v42  ;;  %v229_v47 = vpop.f32.mrb[21].mxu0  ;;  %v342_v48 = vpop.f32.mrb[21].mxu1 }
 0x107   :  { %v559_v46 = vmul.f32 %v340_v42, %v340_v42  ;;  %410 = vst [vmem:[%s1046_s2 + $0x148] sm:$0xff] %v229_v47  ;;  %v463_v49 = vadd.f32 %v462_v34, %v229_v47  ;;  %v558_v50 = vmul.f32 %v229_v47, %v229_v47  ;;  %412 = vst [vmem:[%s1046_s2 + $0x158] sm:$0xff] %v342_v48  ;;  %v231_v53 = vpop.f32.mrb[22].mxu0  ;;  %v344_v54 = vpop.f32.mrb[22].mxu1 }
 0x108   :  { %v505_v51 = vadd.f32 %v504_v36, %v342_v48  ;;  %v560_v52 = vmul.f32 %v342_v48, %v342_v48  ;;  %v590_v55 = vadd.f32 %v589_v33, %v557_v44  ;;  %413 = vst [vmem:[%s1046_s2 + $0x160] sm:$0xff] %v231_v53  ;;  %v443_v57 = vadd.f32 %v442_v43, %v231_v53  ;;  %v233_v59 = vpop.f32.mrb[23].mxu0  ;;  %v346_v60 = vpop.f32.mrb[23].mxu1 }
 0x109   :  { %v632_v56 = vadd.f32 %v631_v37, %v559_v46  ;;  %v561_v58 = vmul.f32 %v231_v53, %v231_v53  ;;  %415 = vst [vmem:[%s1046_s2 + $0x170] sm:$0xff] %v344_v54  ;;  %v611_v61 = vadd.f32 %v610_v39, %v558_v50  ;;  %v485_v63 = vadd.f32 %v484_v45, %v344_v54 }
 0x10a   :  { %v653_v62 = vadd.f32 %v652_v40, %v560_v52  ;;  %v563_v0 = vmul.f32 %v344_v54, %v344_v54  ;;  %414 = vst [vmem:[%s1046_s2 + $0x168] sm:$0xff] %v233_v59  ;;  %416 = vst [vmem:[%s1046_s2 + $0x178] sm:$0xff] %v346_v60  ;;  %v464_v2 = vadd.f32 %v463_v49, %v233_v59  ;;  %v756_v43 = vmov 1983009808  }
 0x10b   :  { %v591_v1 = vadd.f32 %v590_v55, %v561_v58  ;;  %v562_v3 = vmul.f32 %v233_v59, %v233_v59  ;;  %v506_v4 = vadd.f32 %v505_v51, %v346_v60  ;;  %v564_v6 = vmul.f32 %v346_v60, %v346_v60 }
 0x10c   :  { %v633_v5 = vadd.f32 %v632_v56, %v563_v0  ;;  %v1009_v44 = vunpack.c.l.s4 %v756_v43  ;;  %v679_v45 = vlaneseq }
 0x10d   :  { %v612_v7 = vadd.f32 %v611_v61, %v562_v3  ;;  %v654_v8 = vadd.f32 %v653_v62, %v564_v6  ;;  %v237_v9 = vpop.f32.mrb[24].mxu0  ;;  %v350_v10 = vpop.f32.mrb[24].mxu1 }
 0x10e   :  { %417 = vst [vmem:[%s1046_s2 + $0x180] sm:$0xff] %v237_v9  ;;  %v444_v11 = vadd.f32 %v443_v57, %v237_v9  ;;  %v565_v12 = vmul.f32 %v237_v9, %v237_v9  ;;  %419 = vst [vmem:[%s1046_s2 + $0x190] sm:$0xff] %v350_v10  ;;  %v486_v13 = vadd.f32 %v485_v63, %v350_v10  ;;  %v239_v15 = vpop.f32.mrb[25].mxu0  ;;  %v352_v16 = vpop.f32.mrb[25].mxu1 }
 0x10f   :  { %v567_v14 = vmul.f32 %v350_v10, %v350_v10  ;;  %418 = vst [vmem:[%s1046_s2 + $0x188] sm:$0xff] %v239_v15  ;;  %v465_v17 = vadd.f32 %v464_v2, %v239_v15  ;;  %v566_v18 = vmul.f32 %v239_v15, %v239_v15  ;;  %420 = vst [vmem:[%s1046_s2 + $0x198] sm:$0xff] %v352_v16  ;;  %v241_v21 = vpop.f32.mrb[26].mxu0  ;;  %v354_v22 = vpop.f32.mrb[26].mxu1 }
 0x110   :  { %v507_v19 = vadd.f32 %v506_v4, %v352_v16  ;;  %v568_v20 = vmul.f32 %v352_v16, %v352_v16  ;;  %v592_v23 = vadd.f32 %v591_v1, %v565_v12  ;;  %421 = vst [vmem:[%s1046_s2 + $0x1a0] sm:$0xff] %v241_v21  ;;  %v445_v25 = vadd.f32 %v444_v11, %v241_v21  ;;  %v243_v27 = vpop.f32.mrb[27].mxu0  ;;  %v356_v28 = vpop.f32.mrb[27].mxu1 }
 0x111   :  { %v634_v24 = vadd.f32 %v633_v5, %v567_v14  ;;  %v569_v26 = vmul.f32 %v241_v21, %v241_v21  ;;  %423 = vst [vmem:[%s1046_s2 + $0x1b0] sm:$0xff] %v354_v22  ;;  %v613_v29 = vadd.f32 %v612_v7, %v566_v18  ;;  %v487_v31 = vadd.f32 %v486_v13, %v354_v22 }
 0x112   :  { %v655_v30 = vadd.f32 %v654_v8, %v568_v20  ;;  %v571_v32 = vmul.f32 %v354_v22, %v354_v22  ;;  %422 = vst [vmem:[%s1046_s2 + $0x1a8] sm:$0xff] %v243_v27  ;;  %424 = vst [vmem:[%s1046_s2 + $0x1b8] sm:$0xff] %v356_v28  ;;  %v466_v34 = vadd.f32 %v465_v17, %v243_v27 }
 0x113   :  { %v593_v33 = vadd.f32 %v592_v23, %v569_v26  ;;  %v570_v35 = vmul.f32 %v243_v27, %v243_v27  ;;  %v508_v36 = vadd.f32 %v507_v19, %v356_v28  ;;  %v572_v38 = vmul.f32 %v356_v28, %v356_v28 }
 0x114   :  { %v635_v37 = vadd.f32 %v634_v24, %v571_v32 }
 0x115   :  { %v614_v39 = vadd.f32 %v613_v29, %v570_v35  ;;  %v656_v40 = vadd.f32 %v655_v30, %v572_v38  ;;  %v247_v41 = vpop.f32.mrb[28].mxu0  ;;  %v360_v42 = vpop.f32.mrb[28].mxu1 }
 0x116   :  { %425 = vst [vmem:[%s1046_s2 + $0x1c0] sm:$0xff] %v247_v41  ;;  %v446_v46 = vadd.f32 %v445_v25, %v247_v41  ;;  %v573_v47 = vmul.f32 %v247_v41, %v247_v41  ;;  %427 = vst [vmem:[%s1046_s2 + $0x1d0] sm:$0xff] %v360_v42  ;;  %v488_v48 = vadd.f32 %v487_v31, %v360_v42  ;;  %v249_v50 = vpop.f32.mrb[29].mxu0  ;;  %v362_v51 = vpop.f32.mrb[29].mxu1 }
 0x117   :  { %v575_v49 = vmul.f32 %v360_v42, %v360_v42  ;;  %426 = vst [vmem:[%s1046_s2 + $0x1c8] sm:$0xff] %v249_v50  ;;  %v467_v52 = vadd.f32 %v466_v34, %v249_v50  ;;  %v574_v53 = vmul.f32 %v249_v50, %v249_v50  ;;  %428 = vst [vmem:[%s1046_s2 + $0x1d8] sm:$0xff] %v362_v51  ;;  %v251_v56 = vpop.f32.mrb[30].mxu0  ;;  %v364_v57 = vpop.f32.mrb[30].mxu1 }
 0x118   :  { %v509_v54 = vadd.f32 %v508_v36, %v362_v51  ;;  %v576_v55 = vmul.f32 %v362_v51, %v362_v51  ;;  %v594_v58 = vadd.f32 %v593_v33, %v573_v47  ;;  %429 = vst [vmem:[%s1046_s2 + $0x1e0] sm:$0xff] %v251_v56  ;;  %v447_v60 = vadd.f32 %v446_v46, %v251_v56  ;;  %v253_v62 = vpop.f32.mrb[31].mxu0  ;;  %v366_v63 = vpop.f32.mrb[31].mxu1 }
 0x119   :  { %v636_v59 = vadd.f32 %v635_v37, %v575_v49  ;;  %v577_v61 = vmul.f32 %v251_v56, %v251_v56  ;;  %431 = vst [vmem:[%s1046_s2 + $0x1f0] sm:$0xff] %v364_v57  ;;  %v615_v0 = vadd.f32 %v614_v39, %v574_v53  ;;  %v489_v2 = vadd.f32 %v488_v48, %v364_v57 }
 0x11a   :  { %v657_v1 = vadd.f32 %v656_v40, %v576_v55  ;;  %v579_v3 = vmul.f32 %v364_v57, %v364_v57  ;;  %430 = vst [vmem:[%s1046_s2 + $0x1e8] sm:$0xff] %v253_v62  ;;  %432 = vst [vmem:[%s1046_s2 + $0x1f8] sm:$0xff] %v366_v63  ;;  %v448_v4 = vrot.slane %v447_v60, 4  ;;  %v468_v6 = vadd.f32 %v467_v52, %v253_v62 }
 0x11b   :  { %v595_v5 = vadd.f32 %v594_v58, %v577_v61  ;;  %v578_v7 = vmul.f32 %v253_v62, %v253_v62  ;;  %v490_v8 = vrot.slane %v489_v2, 4  ;;  %v510_v10 = vadd.f32 %v509_v54, %v366_v63 }
 0x11c   :  { %v637_v9 = vadd.f32 %v636_v59, %v579_v3  ;;  %v580_v11 = vmul.f32 %v366_v63, %v366_v63  ;;  %v449_v12 = vadd.f32 %v448_v4, %v447_v60  ;;  %v469_v14 = vrot.slane %v468_v6, 4 }
 0x11d   :  { %v596_v13 = vrot.slane %v595_v5, 4  ;;  %v616_v15 = vadd.f32 %v615_v0, %v578_v7  ;;  %v491_v16 = vadd.f32 %v490_v8, %v489_v2  ;;  %v511_v18 = vrot.slane %v510_v10, 4 }
 0x11e   :  { %v638_v17 = vrot.slane %v637_v9, 4  ;;  %v658_v19 = vadd.f32 %v657_v1, %v580_v11  ;;  %v450_v20 = vrot.slane %v449_v12, 2  ;;  %v470_v22 = vadd.f32 %v469_v14, %v468_v6 }
 0x11f   :  { %v597_v21 = vadd.f32 %v596_v13, %v595_v5  ;;  %v617_v23 = vrot.slane %v616_v15, 4  ;;  %v492_v24 = vrot.slane %v491_v16, 2  ;;  %v512_v26 = vadd.f32 %v511_v18, %v510_v10 }
 0x120   :  { %v639_v25 = vadd.f32 %v638_v17, %v637_v9  ;;  %v659_v27 = vrot.slane %v658_v19, 4  ;;  %v451_v28 = vadd.f32 %v450_v20, %v449_v12  ;;  %v471_v30 = vrot.slane %v470_v22, 2 }
 0x121   :  { %v598_v29 = vrot.slane %v597_v21, 2  ;;  %v618_v31 = vadd.f32 %v617_v23, %v616_v15  ;;  %v493_v32 = vadd.f32 %v492_v24, %v491_v16  ;;  %v513_v34 = vrot.slane %v512_v26, 2 }
 0x122   :  { %v640_v33 = vrot.slane %v639_v25, 2  ;;  %v660_v35 = vadd.f32 %v659_v27, %v658_v19  ;;  %v452_v36 = vrot.slane %v451_v28, 1  ;;  %v472_v38 = vadd.f32 %v471_v30, %v470_v22 }
 0x123   :  { %v599_v37 = vadd.f32 %v598_v29, %v597_v21  ;;  %v619_v39 = vrot.slane %v618_v31, 2  ;;  %v494_v40 = vrot.slane %v493_v32, 1  ;;  %v514_v42 = vadd.f32 %v513_v34, %v512_v26 }
 0x124   :  { %v641_v41 = vadd.f32 %v640_v33, %v639_v25  ;;  %v661_v43 = vrot.slane %v660_v35, 2  ;;  %v473_v47 = vrot.slane %v472_v38, 1  ;;  %v678_v49 = vunpack.c.0.s8 %v1009_v44 }
 0x125   :  { %v600_v46 = vrot.slane %v599_v37, 1  ;;  %v620_v48 = vadd.f32 %v619_v39, %v618_v31  ;;  %v680_v51 = vshrl.u32 %v679_v45, 7  ;;  %v515_v52 = vrot.slane %v514_v42, 1 }
 0x126   :  { %v642_v50 = vrot.slane %v641_v41, 1  ;;  %v662_v53 = vadd.f32 %v661_v43, %v660_v35  ;;  %v453_v54 = vadd.f32 %v452_v36, %v451_v28  ;;  %v495_v57 = vadd.f32 %v494_v40, %v493_v32 }
 0x127   :  { %v601_v55 = vadd.f32 %v600_v46, %v599_v37  ;;  %v621_v56 = vrot.slane %v620_v48, 1  ;;  %v474_v61 = vadd.f32 %v473_v47, %v472_v38  ;;  %v681_v0 = vsub.s32 %v678_v49, %v680_v51 }
 0x128   :  { %v643_v58 = vadd.f32 %v642_v50, %v641_v41  ;;  %v663_v59 = vrot.slane %v662_v53, 1  ;;  %v516_v1 = vadd.f32 %v515_v52, %v514_v42 }
 0x129   :  { %v666_v60 = vsel %vm665_vm1, %v453_v54, %v601_v55  ;;  %v622_v62 = vadd.f32 %v621_v56, %v620_v48 }
 0x12a   :  { %v668_v63 = vsel %vm665_vm1, %v495_v57, %v643_v58  ;;  %v664_v44 = vadd.f32 %v663_v59, %v662_v53 }
 0x12b   :  { %v667_v2 = vsel %vm665_vm1, %v474_v61, %v622_v62 }
 0x12c   :  { %v674_v45 = vcombine.low %v666_v60, %v667_v2  ;;  %v669_v3 = vsel %vm665_vm1, %v516_v1, %v664_v44 }
 0x12d   :  { %v675_v4 = vcombine.low %v668_v63, %v669_v3 }
 0x12e   :  { %v682_v5 = vrot.slane %v674_v45, %v681_v0 }
 0x12f   :  { %v689_v6 = vrot.slane %v675_v4, %v681_v0 }
 0x131   :  { %v690_v7 = vcombine.low %v682_v5, %v689_v6 }
 0x133   :  { %692 = vst [vmem:[%s1047_s3] sm:$0xff] %v690_v7 }

// kernel: lstm_up_block_forward.4
= control target key start
LH: loop header
LB: loop body
LE: loop exit
PB: predicated region body
PF: predicated region fallthrough
CT: control target
= control target key end

     0   :  { %s860_s18 = smov 0   ;;  %s862_s19 = smov 0   ;;  %s1115_s0 = inlined_call_operand.vmem [shape: f32[2,256,128], index: 0, kind: input, shape index: {}]   ;;  %s1116_s1 = inlined_call_operand.vmem [shape: f32[1,128], index: 1, kind: input, shape index: {}]   ;;  %s1117_s2 = inlined_call_operand.vmem [shape: f32[1,128], index: 2, kind: input, shape index: {}]   ;;  %s1118_s3 = inlined_call_operand.vmem [shape: f32[2,256,128], index: 3, kind: input, shape index: {}]   ;;  %s1119_s4 = inlined_call_operand.vmem [shape: f32[2,256,128], index: 4, kind: input, shape index: {}]   ;;  %s1120_s5 = inlined_call_operand.vmem [shape: f32[2,256,128], index: 5, kind: output, shape index: {}]  }
   0x1   :  { %s864_s20 = smov 0  }
   0x2 LB: > { %s27_s21 = sadd.s32 1, %s824_s19  ;;  %p765_p0 = scmp.ge.s32.totalorder %s828_s20, 1  ;;  %s828_s20 = sphi %s864_s20, %s15_s20   ;;  %s824_s19 = sphi %s862_s19, %s1122_s19   ;;  %s820_s18 = sphi %s860_s18, %s1121_s18  }
   0x3   : > { %p29_p1 = scmp.ge.s32.totalorder %s27_s21, 2  ;;  %p242_p2 = scmp.lt.s32.totalorder %s828_s20, 3 }
   0x5   : > { %s1124_s21 = smov (%p29_p1, %s27_s21), 0  ;;  %p243_p3 = pnand %p765_p0, %p242_p2 }
   0x6   : > { %p297_p4 = scmp.lt.s32.totalorder (!%p243_p3), %s820_s18, 1  ;;  %v883_v0 = vld [vmem:[%s1116_s1] ss:$0 sm:$0xff] (!%p243_p3) }
   0x7   : > { %246 = sbr.rel (%p243_p3) target bundleno = 65 (0x41), region = 40  ;;  %v895_v2 = vld [vmem:[%s1117_s2] ss:$0 sm:$0xff] (!%p243_p3) }
   0xe   : > { %s1126_s18 = smov (!%p297_p4, %s820_s18), 1 }
   0xf   : > { %s878_s22 = sshll.u32 %s1126_s18, 8 }
  0x10   : > { %s889_s27 = scalar_lea.vmem %s1115_s0, %s878_s22  ;;  %s902_s7 = scalar_lea.vmem %s1118_s3, %s878_s22 }
  0x11   : > { %v336_v1 = vld [vmem:[%s889_s27] sm:$0xff]  ;;  %v337_v3 = vld [vmem:[%s889_s27 + $0x8] sm:$0xff]  ;;  %s910_s10 = scalar_lea.vmem %s1119_s4, %s878_s22  ;;  %v338_v6 = vld [vmem:[%s889_s27 + $0x10] sm:$0xff]  ;;  %s937_s13 = scalar_lea.vmem %s1120_s5, %s878_s22 }
  0x12   : > { %v375_v4 = vmul.f32 %v883_v0, %v336_v1  ;;  %v376_v5 = vmul.f32 %v883_v0, %v337_v3  ;;  %v377_v9 = vmul.f32 %v883_v0, %v338_v6  ;;  %v339_v10 = vld [vmem:[%s889_s27 + $0x18] sm:$0xff]  ;;  %v478_v11 = vld [vmem:[%s902_s7] sm:$0xff]  ;;  %v479_v12 = vld [vmem:[%s902_s7 + $0x8] sm:$0xff] }
  0x13   : > { %v378_v13 = vmul.f32 %v883_v0, %v339_v10  ;;  %v340_v14 = vld [vmem:[%s889_s27 + $0x20] sm:$0xff]  ;;  %v341_v20 = vld [vmem:[%s889_s27 + $0x28] sm:$0xff]  ;;  %v480_v22 = vld [vmem:[%s902_s7 + $0x10] sm:$0xff] }
  0x14   : > { %v414_v7 = vadd.f32 %v895_v2, %v375_v4  ;;  %v415_v8 = vadd.f32 %v895_v2, %v376_v5  ;;  %v542_v16 = vld [vmem:[%s910_s10] sm:$0xff]  ;;  %v416_v18 = vadd.f32 %v895_v2, %v377_v9  ;;  %v379_v19 = vmul.f32 %v883_v0, %v340_v14  ;;  %v543_v21 = vld [vmem:[%s910_s10 + $0x8] sm:$0xff]  ;;  %v342_v25 = vld [vmem:[%s889_s27 + $0x30] sm:$0xff] }
  0x15   : > { %v417_v23 = vadd.f32 %v895_v2, %v378_v13  ;;  %v380_v24 = vmul.f32 %v883_v0, %v341_v20  ;;  %v481_v29 = vld [vmem:[%s902_s7 + $0x18] sm:$0xff]  ;;  %v544_v32 = vld [vmem:[%s910_s10 + $0x10] sm:$0xff]  ;;  %v482_v34 = vld [vmem:[%s902_s7 + $0x20] sm:$0xff]  ;;  %v381_v36 = vmul.f32 %v883_v0, %v342_v25 }
  0x16   : > { %v446_v15 = vmax.f32 %v414_v7, 0.0  ;;  %v447_v17 = vmax.f32 %v415_v8, 0.0  ;;  %v448_v28 = vmax.f32 %v416_v18, 0.0  ;;  %v418_v30 = vadd.f32 %v895_v2, %v379_v19  ;;  %v343_v31 = vld [vmem:[%s889_s27 + $0x38] sm:$0xff]  ;;  %v344_v38 = vld [vmem:[%s889_s27 + $0x40] sm:$0xff]  ;;  %v483_v44 = vld [vmem:[%s902_s7 + $0x28] sm:$0xff] }
  0x17   : > { %v449_v33 = vmax.f32 %v417_v23, 0.0  ;;  %v419_v35 = vadd.f32 %v895_v2, %v380_v24  ;;  %v382_v37 = vmul.f32 %v883_v0, %v343_v31  ;;  %v545_v42 = vld [vmem:[%s910_s10 + $0x18] sm:$0xff]  ;;  %v345_v45 = vld [vmem:[%s889_s27 + $0x48] sm:$0xff]  ;;  %v546_v47 = vld [vmem:[%s910_s10 + $0x20] sm:$0xff]  ;;  %v420_v50 = vadd.f32 %v895_v2, %v381_v36 }
  0x18   : > { %v510_v26 = vadd.f32 %v478_v11, %v446_v15  ;;  %v511_v27 = vadd.f32 %v479_v12, %v447_v17  ;;  %v512_v41 = vadd.f32 %v480_v22, %v448_v28  ;;  %v450_v43 = vmax.f32 %v418_v30, 0.0  ;;  %v547_v49 = vld [vmem:[%s910_s10 + $0x28] sm:$0xff]  ;;  %v346_v52 = vld [vmem:[%s889_s27 + $0x50] sm:$0xff]  ;;  %v485_v56 = vld [vmem:[%s902_s7 + $0x38] sm:$0xff] }
  0x19   : > { %v513_v46 = vadd.f32 %v481_v29, %v449_v33  ;;  %v451_v48 = vmax.f32 %v419_v35, 0.0  ;;  %v421_v51 = vadd.f32 %v895_v2, %v382_v37  ;;  %v484_v55 = vld [vmem:[%s902_s7 + $0x30] sm:$0xff]  ;;  %v383_v57 = vmul.f32 %v883_v0, %v344_v38  ;;  %v347_v59 = vld [vmem:[%s889_s27 + $0x58] sm:$0xff]  ;;  %v348_v1 = vld [vmem:[%s889_s27 + $0x60] sm:$0xff] }
  0x1a   : > { %v574_v39 = vadd.f32 %v542_v16, %v510_v26  ;;  %v575_v40 = vadd.f32 %v543_v21, %v511_v27  ;;  %v576_v53 = vadd.f32 %v544_v32, %v512_v41  ;;  %v514_v54 = vadd.f32 %v482_v34, %v450_v43  ;;  %v548_v4 = vld [vmem:[%s910_s10 + $0x30] sm:$0xff]  ;;  %v549_v5 = vld [vmem:[%s910_s10 + $0x38] sm:$0xff]  ;;  %v349_v9 = vld [vmem:[%s889_s27 + $0x68] sm:$0xff] }
  0x1b   : > { %v384_v58 = vmul.f32 %v883_v0, %v345_v45  ;;  %v577_v60 = vadd.f32 %v545_v42, %v513_v46  ;;  %v515_v61 = vadd.f32 %v483_v44, %v451_v48  ;;  %v452_v62 = vmax.f32 %v420_v50, 0.0  ;;  %v486_v13 = vld [vmem:[%s902_s7 + $0x40] sm:$0xff]  ;;  %v487_v14 = vld [vmem:[%s902_s7 + $0x48] sm:$0xff]  ;;  %v350_v20 = vld [vmem:[%s889_s27 + $0x70] sm:$0xff] }
  0x1c   : > { %606 = vst [vmem:[%s937_s13] sm:$0xff] %v574_v39  ;;  %607 = vst [vmem:[%s937_s13 + $0x8] sm:$0xff] %v575_v40  ;;  %v453_v63 = vmax.f32 %v421_v51, 0.0  ;;  %v578_v3 = vadd.f32 %v546_v47, %v514_v54  ;;  %v422_v6 = vadd.f32 %v895_v2, %v383_v57  ;;  %v385_v8 = vmul.f32 %v883_v0, %v346_v52  ;;  %v351_v21 = vld [vmem:[%s889_s27 + $0x78] sm:$0xff]  ;;  %v550_v24 = vld [vmem:[%s910_s10 + $0x40] sm:$0xff] }
  0x1d   : > { %608 = vst [vmem:[%s937_s13 + $0x10] sm:$0xff] %v576_v53  ;;  %v423_v7 = vadd.f32 %v895_v2, %v384_v58  ;;  %609 = vst [vmem:[%s937_s13 + $0x18] sm:$0xff] %v577_v60  ;;  %v579_v10 = vadd.f32 %v547_v49, %v515_v61  ;;  %v516_v11 = vadd.f32 %v484_v55, %v452_v62  ;;  %v551_v25 = vld [vmem:[%s910_s10 + $0x48] sm:$0xff]  ;;  %v488_v26 = vld [vmem:[%s902_s7 + $0x50] sm:$0xff] }
  0x1e   : > { %v517_v12 = vadd.f32 %v485_v56, %v453_v63  ;;  %v386_v15 = vmul.f32 %v883_v0, %v347_v59  ;;  %610 = vst [vmem:[%s937_s13 + $0x20] sm:$0xff] %v578_v3  ;;  %v454_v16 = vmax.f32 %v422_v6, 0.0  ;;  %v424_v18 = vadd.f32 %v895_v2, %v385_v8  ;;  %v552_v32 = vld [vmem:[%s910_s10 + $0x50] sm:$0xff]  ;;  %v489_v33 = vld [vmem:[%s902_s7 + $0x58] sm:$0xff]  ;;  %v490_v36 = vld [vmem:[%s902_s7 + $0x60] sm:$0xff] }
  0x1f   : > { %v455_v17 = vmax.f32 %v423_v7, 0.0  ;;  %v387_v19 = vmul.f32 %v883_v0, %v348_v1  ;;  %611 = vst [vmem:[%s937_s13 + $0x28] sm:$0xff] %v579_v10  ;;  %v580_v22 = vadd.f32 %v548_v4, %v516_v11  ;;  %v388_v28 = vmul.f32 %v883_v0, %v349_v9  ;;  %v352_v40 = vld [vmem:[%s889_s27 + $0x80] sm:$0xff]  ;;  %v353_v41 = vld [vmem:[%s889_s27 + $0x88] sm:$0xff]  ;;  %v553_v45 = vld [vmem:[%s910_s10 + $0x58] sm:$0xff] }
  0x20   : > { %v581_v23 = vadd.f32 %v549_v5, %v517_v12  ;;  %v425_v27 = vadd.f32 %v895_v2, %v386_v15  ;;  %v518_v29 = vadd.f32 %v486_v13, %v454_v16  ;;  %v456_v31 = vmax.f32 %v424_v18, 0.0  ;;  %v491_v47 = vld [vmem:[%s902_s7 + $0x68] sm:$0xff]  ;;  %v554_v49 = vld [vmem:[%s910_s10 + $0x60] sm:$0xff]  ;;  %v354_v54 = vld [vmem:[%s889_s27 + $0x90] sm:$0xff] }
  0x21   : > { %v519_v30 = vadd.f32 %v487_v14, %v455_v17  ;;  %v426_v34 = vadd.f32 %v895_v2, %v387_v19  ;;  %612 = vst [vmem:[%s937_s13 + $0x30] sm:$0xff] %v580_v22  ;;  %v427_v37 = vadd.f32 %v895_v2, %v388_v28  ;;  %v389_v38 = vmul.f32 %v883_v0, %v350_v20  ;;  %v555_v51 = vld [vmem:[%s910_s10 + $0x68] sm:$0xff]  ;;  %v492_v57 = vld [vmem:[%s902_s7 + $0x70] sm:$0xff]  ;;  %v493_v58 = vld [vmem:[%s902_s7 + $0x78] sm:$0xff] }
  0x22   : > { %613 = vst [vmem:[%s937_s13 + $0x38] sm:$0xff] %v581_v23  ;;  %v457_v35 = vmax.f32 %v425_v27, 0.0  ;;  %v390_v39 = vmul.f32 %v883_v0, %v351_v21  ;;  %v582_v42 = vadd.f32 %v550_v24, %v518_v29  ;;  %v520_v44 = vadd.f32 %v488_v26, %v456_v31  ;;  %v355_v61 = vld [vmem:[%s889_s27 + $0x98] sm:$0xff]  ;;  %v356_v4 = vld [vmem:[%s889_s27 + $0xa0] sm:$0xff]  ;;  %v556_v6 = vld [vmem:[%s910_s10 + $0x70] sm:$0xff] }
  0x23   : > { %v583_v43 = vadd.f32 %v551_v25, %v519_v30  ;;  %v458_v46 = vmax.f32 %v426_v34, 0.0  ;;  %v459_v50 = vmax.f32 %v427_v37, 0.0  ;;  %v428_v52 = vadd.f32 %v895_v2, %v389_v38  ;;  %v557_v7 = vld [vmem:[%s910_s10 + $0x78] sm:$0xff]  ;;  %v357_v11 = vld [vmem:[%s889_s27 + $0xa8] sm:$0xff]  ;;  %v494_v15 = vld [vmem:[%s902_s7 + $0x80] sm:$0xff] }
  0x24   : > { %v521_v48 = vadd.f32 %v489_v33, %v457_v35  ;;  %v429_v53 = vadd.f32 %v895_v2, %v390_v39  ;;  %614 = vst [vmem:[%s937_s13 + $0x40] sm:$0xff] %v582_v42  ;;  %v584_v55 = vadd.f32 %v552_v32, %v520_v44  ;;  %v391_v59 = vmul.f32 %v883_v0, %v352_v40  ;;  %v495_v16 = vld [vmem:[%s902_s7 + $0x88] sm:$0xff]  ;;  %v358_v22 = vld [vmem:[%s889_s27 + $0xb0] sm:$0xff]  ;;  %v359_v23 = vld [vmem:[%s889_s27 + $0xb8] sm:$0xff] }
  0x25   : > { %615 = vst [vmem:[%s937_s13 + $0x48] sm:$0xff] %v583_v43  ;;  %v522_v56 = vadd.f32 %v490_v36, %v458_v46  ;;  %v392_v60 = vmul.f32 %v883_v0, %v353_v41  ;;  %v523_v63 = vadd.f32 %v491_v47, %v459_v50  ;;  %v460_v1 = vmax.f32 %v428_v52, 0.0  ;;  %v558_v26 = vld [vmem:[%s910_s10 + $0x80] sm:$0xff]  ;;  %v559_v27 = vld [vmem:[%s910_s10 + $0x88] sm:$0xff]  ;;  %v496_v28 = vld [vmem:[%s902_s7 + $0x90] sm:$0xff] }
  0x26   : > { %v585_v62 = vadd.f32 %v553_v45, %v521_v48  ;;  %v461_v3 = vmax.f32 %v429_v53, 0.0  ;;  %616 = vst [vmem:[%s937_s13 + $0x50] sm:$0xff] %v584_v55  ;;  %v430_v8 = vadd.f32 %v895_v2, %v391_v59  ;;  %v393_v10 = vmul.f32 %v883_v0, %v354_v54  ;;  %v560_v34 = vld [vmem:[%s910_s10 + $0x90] sm:$0xff]  ;;  %v497_v35 = vld [vmem:[%s902_s7 + $0x98] sm:$0xff]  ;;  %v498_v38 = vld [vmem:[%s902_s7 + $0xa0] sm:$0xff] }
  0x27   : > { %v586_v5 = vadd.f32 %v554_v49, %v522_v56  ;;  %v431_v9 = vadd.f32 %v895_v2, %v392_v60  ;;  %v587_v12 = vadd.f32 %v555_v51, %v523_v63  ;;  %v524_v13 = vadd.f32 %v492_v57, %v460_v1  ;;  %v360_v42 = vld [vmem:[%s889_s27 + $0xc0] sm:$0xff]  ;;  %v361_v43 = vld [vmem:[%s889_s27 + $0xc8] sm:$0xff]  ;;  %v561_v47 = vld [vmem:[%s910_s10 + $0x98] sm:$0xff] }
  0x28   : > { %617 = vst [vmem:[%s937_s13 + $0x58] sm:$0xff] %v585_v62  ;;  %v525_v14 = vadd.f32 %v493_v58, %v461_v3  ;;  %v394_v17 = vmul.f32 %v883_v0, %v355_v61  ;;  %v462_v18 = vmax.f32 %v430_v8, 0.0  ;;  %v432_v20 = vadd.f32 %v895_v2, %v393_v10  ;;  %v499_v49 = vld [vmem:[%s902_s7 + $0xa8] sm:$0xff]  ;;  %v562_v51 = vld [vmem:[%s910_s10 + $0xa0] sm:$0xff]  ;;  %v362_v56 = vld [vmem:[%s889_s27 + $0xd0] sm:$0xff] }
  0x29   : > { %618 = vst [vmem:[%s937_s13 + $0x60] sm:$0xff] %v586_v5  ;;  %v463_v19 = vmax.f32 %v431_v9, 0.0  ;;  %v395_v21 = vmul.f32 %v883_v0, %v356_v4  ;;  %619 = vst [vmem:[%s937_s13 + $0x68] sm:$0xff] %v587_v12  ;;  %v588_v24 = vadd.f32 %v556_v6, %v524_v13  ;;  %v396_v30 = vmul.f32 %v883_v0, %v357_v11  ;;  %v563_v53 = vld [vmem:[%s910_s10 + $0xa8] sm:$0xff]  ;;  %v500_v59 = vld [vmem:[%s902_s7 + $0xb0] sm:$0xff] }
  0x2a   : > { %v589_v25 = vadd.f32 %v557_v7, %v525_v14  ;;  %v433_v29 = vadd.f32 %v895_v2, %v394_v17  ;;  %v526_v31 = vadd.f32 %v494_v15, %v462_v18  ;;  %v464_v33 = vmax.f32 %v432_v20, 0.0  ;;  %v501_v60 = vld [vmem:[%s902_s7 + $0xb8] sm:$0xff]  ;;  %v364_v6 = vld [vmem:[%s889_s27 + $0xe0] sm:$0xff]  ;;  %v564_v8 = vld [vmem:[%s910_s10 + $0xb0] sm:$0xff] }
  0x2b   : > { %v527_v32 = vadd.f32 %v495_v16, %v463_v19  ;;  %v434_v36 = vadd.f32 %v895_v2, %v395_v21  ;;  %620 = vst [vmem:[%s937_s13 + $0x70] sm:$0xff] %v588_v24  ;;  %v435_v39 = vadd.f32 %v895_v2, %v396_v30  ;;  %v397_v40 = vmul.f32 %v883_v0, %v358_v22  ;;  %v363_v63 = vld [vmem:[%s889_s27 + $0xd8] sm:$0xff]  ;;  %v365_v13 = vld [vmem:[%s889_s27 + $0xe8] sm:$0xff]  ;;  %v502_v17 = vld [vmem:[%s902_s7 + $0xc0] sm:$0xff] }
  0x2c   : > { %621 = vst [vmem:[%s937_s13 + $0x78] sm:$0xff] %v589_v25  ;;  %v465_v37 = vmax.f32 %v433_v29, 0.0  ;;  %v398_v41 = vmul.f32 %v883_v0, %v359_v23  ;;  %v590_v44 = vadd.f32 %v558_v26, %v526_v31  ;;  %v528_v46 = vadd.f32 %v496_v28, %v464_v33  ;;  %v565_v9 = vld [vmem:[%s910_s10 + $0xb8] sm:$0xff]  ;;  %v503_v18 = vld [vmem:[%s902_s7 + $0xc8] sm:$0xff]  ;;  %v366_v24 = vld [vmem:[%s889_s27 + $0xf0] sm:$0xff] }
  0x2d   : > { %v591_v45 = vadd.f32 %v559_v27, %v527_v32  ;;  %v466_v48 = vmax.f32 %v434_v36, 0.0  ;;  %v467_v52 = vmax.f32 %v435_v39, 0.0  ;;  %v436_v54 = vadd.f32 %v895_v2, %v397_v40  ;;  %v367_v25 = vld [vmem:[%s889_s27 + $0xf8] sm:$0xff]  ;;  %v566_v28 = vld [vmem:[%s910_s10 + $0xc0] sm:$0xff]  ;;  %v567_v29 = vld [vmem:[%s910_s10 + $0xc8] sm:$0xff] }
  0x2e   : > { %v529_v50 = vadd.f32 %v497_v35, %v465_v37  ;;  %v437_v55 = vadd.f32 %v895_v2, %v398_v41  ;;  %622 = vst [vmem:[%s937_s13 + $0x80] sm:$0xff] %v590_v44  ;;  %v592_v57 = vadd.f32 %v560_v34, %v528_v46  ;;  %v399_v61 = vmul.f32 %v883_v0, %v360_v42  ;;  %v504_v30 = vld [vmem:[%s902_s7 + $0xd0] sm:$0xff]  ;;  %v505_v36 = vld [vmem:[%s902_s7 + $0xd8] sm:$0xff]  ;;  %v506_v40 = vld [vmem:[%s902_s7 + $0xe0] sm:$0xff] }
  0x2f   : > { %623 = vst [vmem:[%s937_s13 + $0x88] sm:$0xff] %v591_v45  ;;  %v530_v58 = vadd.f32 %v498_v38, %v466_v48  ;;  %v400_v62 = vmul.f32 %v883_v0, %v361_v43  ;;  %v531_v3 = vadd.f32 %v499_v49, %v467_v52  ;;  %v468_v4 = vmax.f32 %v436_v54, 0.0  ;;  %v568_v38 = vld [vmem:[%s910_s10 + $0xd0] sm:$0xff]  ;;  %v507_v49 = vld [vmem:[%s902_s7 + $0xe8] sm:$0xff] }
  0x30   : > { %v593_v1 = vadd.f32 %v561_v47, %v529_v50  ;;  %v469_v5 = vmax.f32 %v437_v55, 0.0  ;;  %624 = vst [vmem:[%s937_s13 + $0x90] sm:$0xff] %v592_v57  ;;  %v438_v10 = vadd.f32 %v895_v2, %v399_v61  ;;  %v401_v12 = vmul.f32 %v883_v0, %v362_v56  ;;  %v569_v47 = vld [vmem:[%s910_s10 + $0xd8] sm:$0xff]  ;;  %v571_v56 = vld [vmem:[%s910_s10 + $0xe8] sm:$0xff]  ;;  %v508_v57 = vld [vmem:[%s902_s7 + $0xf0] sm:$0xff] }
  0x31   : > { %v594_v7 = vadd.f32 %v562_v51, %v530_v58  ;;  %v439_v11 = vadd.f32 %v895_v2, %v400_v62  ;;  %v595_v14 = vadd.f32 %v563_v53, %v531_v3  ;;  %v532_v15 = vadd.f32 %v500_v59, %v468_v4  ;;  %v570_v51 = vld [vmem:[%s910_s10 + $0xe0] sm:$0xff]  ;;  %v509_v58 = vld [vmem:[%s902_s7 + $0xf8] sm:$0xff] }
  0x32   : > { %625 = vst [vmem:[%s937_s13 + $0x98] sm:$0xff] %v593_v1  ;;  %v533_v16 = vadd.f32 %v501_v60, %v469_v5  ;;  %v402_v19 = vmul.f32 %v883_v0, %v363_v63  ;;  %v470_v20 = vmax.f32 %v438_v10, 0.0  ;;  %v440_v22 = vadd.f32 %v895_v2, %v401_v12  ;;  %v572_v1 = vld [vmem:[%s910_s10 + $0xf0] sm:$0xff] }
  0x33   : > { %626 = vst [vmem:[%s937_s13 + $0xa0] sm:$0xff] %v594_v7  ;;  %v471_v21 = vmax.f32 %v439_v11, 0.0  ;;  %v403_v23 = vmul.f32 %v883_v0, %v364_v6  ;;  %627 = vst [vmem:[%s937_s13 + $0xa8] sm:$0xff] %v595_v14  ;;  %v596_v26 = vadd.f32 %v564_v8, %v532_v15  ;;  %v404_v32 = vmul.f32 %v883_v0, %v365_v13 }
  0x34   : > { %v597_v27 = vadd.f32 %v565_v9, %v533_v16  ;;  %v441_v31 = vadd.f32 %v895_v2, %v402_v19  ;;  %v534_v33 = vadd.f32 %v502_v17, %v470_v20  ;;  %v472_v35 = vmax.f32 %v440_v22, 0.0 }
  0x35   : > { %v535_v34 = vadd.f32 %v503_v18, %v471_v21  ;;  %v442_v37 = vadd.f32 %v895_v2, %v403_v23  ;;  %628 = vst [vmem:[%s937_s13 + $0xb0] sm:$0xff] %v596_v26  ;;  %v443_v41 = vadd.f32 %v895_v2, %v404_v32  ;;  %v405_v42 = vmul.f32 %v883_v0, %v366_v24 }
  0x36   : > { %629 = vst [vmem:[%s937_s13 + $0xb8] sm:$0xff] %v597_v27  ;;  %v473_v39 = vmax.f32 %v441_v31, 0.0  ;;  %v406_v43 = vmul.f32 %v883_v0, %v367_v25  ;;  %v598_v44 = vadd.f32 %v566_v28, %v534_v33  ;;  %v536_v46 = vadd.f32 %v504_v30, %v472_v35 }
  0x37   : > { %v599_v45 = vadd.f32 %v567_v29, %v535_v34  ;;  %v474_v48 = vmax.f32 %v442_v37, 0.0  ;;  %v475_v52 = vmax.f32 %v443_v41, 0.0  ;;  %v444_v53 = vadd.f32 %v895_v2, %v405_v42 }
  0x38   : > { %v537_v50 = vadd.f32 %v505_v36, %v473_v39  ;;  %v445_v54 = vadd.f32 %v895_v2, %v406_v43  ;;  %630 = vst [vmem:[%s937_s13 + $0xc0] sm:$0xff] %v598_v44  ;;  %v600_v0 = vadd.f32 %v568_v38, %v536_v46  ;;  %v573_v2 = vld [vmem:[%s910_s10 + $0xf8] sm:$0xff] }
  0x39   : > { %631 = vst [vmem:[%s937_s13 + $0xc8] sm:$0xff] %v599_v45  ;;  %v538_v55 = vadd.f32 %v506_v40, %v474_v48  ;;  %v539_v60 = vadd.f32 %v507_v49, %v475_v52  ;;  %v476_v61 = vmax.f32 %v444_v53, 0.0 }
  0x3a   : > { %v601_v59 = vadd.f32 %v569_v47, %v537_v50  ;;  %v477_v62 = vmax.f32 %v445_v54, 0.0  ;;  %632 = vst [vmem:[%s937_s13 + $0xd0] sm:$0xff] %v600_v0 }
  0x3b   : > { %v602_v63 = vadd.f32 %v570_v51, %v538_v55  ;;  %v603_v3 = vadd.f32 %v571_v56, %v539_v60  ;;  %v540_v4 = vadd.f32 %v508_v57, %v476_v61 }
  0x3c   : > { %633 = vst [vmem:[%s937_s13 + $0xd8] sm:$0xff] %v601_v59  ;;  %v541_v5 = vadd.f32 %v509_v58, %v477_v62 }
  0x3d   : > { %634 = vst [vmem:[%s937_s13 + $0xe0] sm:$0xff] %v602_v63  ;;  %635 = vst [vmem:[%s937_s13 + $0xe8] sm:$0xff] %v603_v3  ;;  %v604_v6 = vadd.f32 %v572_v1, %v540_v4 }
  0x3e   : > { %v605_v7 = vadd.f32 %v573_v2, %v541_v5 }
  0x3f   : > { %636 = vst [vmem:[%s937_s13 + $0xf0] sm:$0xff] %v604_v6 }
  0x40   : > { %637 = vst [vmem:[%s937_s13 + $0xf8] sm:$0xff] %v605_v7 }
  0x41 PF: > { %s15_s20 = sadd.s32 1, %s828_s20   ;;  %s1121_s18 = smov %s824_s19 }
  0x42   : > { %p12_p5 = scmp.ge.s32.totalorder %s15_s20, 4   ;;  %s1122_s19 = smov %s1124_s21 }
  0x44   :  { %14 = sbr.rel (!%p12_p5) target bundleno = 2 (0x2), region = 76 }

// kernel: lstm_up_block_forward.5
= control target key start
LH: loop header
LB: loop body
LE: loop exit
PB: predicated region body
PF: predicated region fallthrough
CT: control target
= control target key end

     0   :  { %s16848_s18 = smov 0   ;;  %s16850_s19 = smov 0   ;;  %s20514_s0 = inlined_call_operand.vmem [shape: bf16[2,18,18,256], index: 0, kind: input, shape index: {}]   ;;  %s20515_s1 = inlined_call_operand.vmem [shape: bf16[9,256,512], index: 1, kind: input, shape index: {}]   ;;  %s20516_s2 = inlined_call_operand.vmem [shape: f32[1,512], index: 2, kind: input, shape index: {}]   ;;  %s20517_s3 = inlined_call_operand.vmem [shape: f32[2,256,128], index: 3, kind: input, shape index: {}]   ;;  %s20518_s4 = inlined_call_operand.vmem [shape: f32[2,256,128], index: 4, kind: output, shape index: {0}]   ;;  %s20519_s5 = inlined_call_operand.vmem [shape: f32[2,256,128], index: 5, kind: output, shape index: {1}]  }
   0x1   :  { %s16852_s20 = smov 0  }
   0x2 LB: > { %s28_s21 = sadd.s32 1, %s16812_s19  ;;  %p12397_p0 = scmp.ge.s32.totalorder %s16816_s20, 1  ;;  %s16816_s20 = sphi %s16852_s20, %s16_s20   ;;  %s16812_s19 = sphi %s16850_s19, %s20571_s19   ;;  %s16808_s18 = sphi %s16848_s18, %s20570_s18  }
   0x3   : > { %p30_p1 = scmp.ge.s32.totalorder %s28_s21, 2  ;;  %p223_p2 = scmp.lt.s32.totalorder %s16816_s20, 3 }
   0x5   : > { %s20573_s21 = smov (%p30_p1, %s28_s21), 0  ;;  %p224_p3 = pnand %p12397_p0, %p223_p2 }
   0x7   : > { %227 = sbr.rel (%p224_p3) target bundleno = 1608 (0x648), region = 36 }
   0xe   : > { %v15203_v0 = vld [vmem:[%s20515_s1 + $0x4] ss:$16 sps:$4 sm:$0xff]   ;;  %v15205_v1 = vld [vmem:[%s20515_s1 + $0xc] ss:$16 sps:$4 sm:$0xff]   ;;  %v15207_v2 = vld [vmem:[%s20515_s1] ss:$16 sps:$4 sm:$0xff]  }
   0xf   : > { %930 = vmatprep.subr.bf16.mxu0 %v15203_v0  ;;  %v15208_v3 = vld [vmem:[%s20515_s1 + $0x8] ss:$16 sps:$4 sm:$0xff]   ;;  %1123 = vmatprep.subr.bf16.mxu1 %v15205_v1  ;;  %v15209_v4 = vld [vmem:[%s20515_s1 + $0x24] ss:$16 sps:$4 sm:$0xff]   ;;  %v15211_v5 = vld [vmem:[%s20515_s1 + $0x2c] ss:$16 sps:$4 sm:$0xff]  }
  0x10   : > { %931 = vmatpush1.bf16.msra.mxu0 %v15207_v2  ;;  %1124 = vmatpush1.bf16.msra.mxu1 %v15208_v3  ;;  %v15213_v6 = vld [vmem:[%s20515_s1 + $0x20] ss:$16 sps:$4 sm:$0xff]   ;;  %v15214_v7 = vld [vmem:[%s20515_s1 + $0x28] ss:$16 sps:$4 sm:$0xff]   ;;  %v15215_v8 = vld [vmem:[%s20515_s1 + $0x44] ss:$16 sps:$4 sm:$0xff]  }
  0x11   : > { %932 = vmatprep.subr.bf16.mxu0 %v15209_v4  ;;  %1125 = vmatprep.subr.bf16.mxu1 %v15211_v5  ;;  %v15217_v9 = vld [vmem:[%s20515_s1 + $0x4c] ss:$16 sps:$4 sm:$0xff]   ;;  %v15219_v10 = vld [vmem:[%s20515_s1 + $0x40] ss:$16 sps:$4 sm:$0xff]   ;;  %v15220_v11 = vld [vmem:[%s20515_s1 + $0x48] ss:$16 sps:$4 sm:$0xff]  }
  0x12   : > { %v15221_v12 = vld [vmem:[%s20515_s1 + $0x64] ss:$16 sps:$4 sm:$0xff]   ;;  %v15223_v13 = vld [vmem:[%s20515_s1 + $0x6c] ss:$16 sps:$4 sm:$0xff]   ;;  %v15225_v14 = vld [vmem:[%s20515_s1 + $0x60] ss:$16 sps:$4 sm:$0xff]  }
  0x13   : > { %v15226_v15 = vld [vmem:[%s20515_s1 + $0x68] ss:$16 sps:$4 sm:$0xff]   ;;  %v15227_v16 = vld [vmem:[%s20515_s1 + $0x84] ss:$16 sps:$4 sm:$0xff]   ;;  %v15229_v17 = vld [vmem:[%s20515_s1 + $0x8c] ss:$16 sps:$4 sm:$0xff]  }
  0x14   : > { %933 = vmatpush1.bf16.msra.mxu0 %v15213_v6  ;;  %1126 = vmatpush1.bf16.msra.mxu1 %v15214_v7  ;;  %v15231_v18 = vld [vmem:[%s20515_s1 + $0x80] ss:$16 sps:$4 sm:$0xff]   ;;  %v15232_v19 = vld [vmem:[%s20515_s1 + $0x88] ss:$16 sps:$4 sm:$0xff]   ;;  %v15233_v20 = vld [vmem:[%s20515_s1 + $0xa4] ss:$16 sps:$4 sm:$0xff]  }
  0x15   : > { %934 = vmatprep.subr.bf16.mxu0 %v15215_v8  ;;  %1127 = vmatprep.subr.bf16.mxu1 %v15217_v9  ;;  %v15235_v21 = vld [vmem:[%s20515_s1 + $0xac] ss:$16 sps:$4 sm:$0xff]   ;;  %v15237_v22 = vld [vmem:[%s20515_s1 + $0xa0] ss:$16 sps:$4 sm:$0xff]   ;;  %v15238_v23 = vld [vmem:[%s20515_s1 + $0xa8] ss:$16 sps:$4 sm:$0xff]  }
  0x16   : > { %v15239_v24 = vld [vmem:[%s20515_s1 + $0xc4] ss:$16 sps:$4 sm:$0xff]   ;;  %v15241_v25 = vld [vmem:[%s20515_s1 + $0xcc] ss:$16 sps:$4 sm:$0xff]   ;;  %v15243_v26 = vld [vmem:[%s20515_s1 + $0xc0] ss:$16 sps:$4 sm:$0xff]  }
  0x17   : > { %v15244_v27 = vld [vmem:[%s20515_s1 + $0xc8] ss:$16 sps:$4 sm:$0xff]   ;;  %v15245_v28 = vld [vmem:[%s20515_s1 + $0xe4] ss:$16 sps:$4 sm:$0xff]   ;;  %v15247_v29 = vld [vmem:[%s20515_s1 + $0xec] ss:$16 sps:$4 sm:$0xff]  }
  0x18   : > { %935 = vmatpush1.bf16.msra.mxu0 %v15219_v10  ;;  %1128 = vmatpush1.bf16.msra.mxu1 %v15220_v11  ;;  %v15249_v30 = vld [vmem:[%s20515_s1 + $0xe0] ss:$16 sps:$4 sm:$0xff]   ;;  %p273_p4 = scmp.lt.s32.totalorder %s16808_s18, 1  ;;  %v15250_v31 = vld [vmem:[%s20515_s1 + $0xe8] ss:$16 sps:$4 sm:$0xff]   ;;  %vm2874_vm3 = vcmask 1042432  }
  0x19   : > { %936 = vmatprep.subr.bf16.mxu0 %v15221_v12  ;;  %1129 = vmatprep.subr.bf16.mxu1 %v15223_v13  ;;  %v15251_v32 = vld [vmem:[%s20515_s1 + $0x104] ss:$16 sps:$4 sm:$0xff]   ;;  %v15253_v33 = vld [vmem:[%s20515_s1 + $0x10c] ss:$16 sps:$4 sm:$0xff]   ;;  %v15255_v34 = vld [vmem:[%s20515_s1 + $0x100] ss:$16 sps:$4 sm:$0xff]  }
  0x1a   : > { %v15256_v35 = vld [vmem:[%s20515_s1 + $0x108] ss:$16 sps:$4 sm:$0xff]   ;;  %s20575_s18 = smov (!%p273_p4, %s16808_s18), 1  ;;  %v15257_v36 = vld [vmem:[%s20515_s1 + $0x124] ss:$16 sps:$4 sm:$0xff]   ;;  %vm2875_vm4 = vcmask 1046532  }
  0x1b   : > { %v15259_v37 = vld [vmem:[%s20515_s1 + $0x12c] ss:$16 sps:$4 sm:$0xff]   ;;  %v15261_v38 = vld [vmem:[%s20515_s1 + $0x120] ss:$16 sps:$4 sm:$0xff]   ;;  %s15178_s12 = smul.u32 432, %s20575_s18  ;;  %vm17722_vm5 = vmor %vm2874_vm3, %vm2875_vm4  ;;  %s19958_s10 = sshll.u32 %s20575_s18, 8 }
  0x1c   : > { %937 = vmatpush1.bf16.msra.mxu0 %v15225_v14  ;;  %1130 = vmatpush1.bf16.msra.mxu1 %v15226_v15  ;;  %v15262_v39 = vld [vmem:[%s20515_s1 + $0x128] ss:$16 sps:$4 sm:$0xff]   ;;  %v15263_v40 = vld [vmem:[%s20515_s1 + $0x144] ss:$16 sps:$4 sm:$0xff]   ;;  %v15265_v41 = vld [vmem:[%s20515_s1 + $0x14c] ss:$16 sps:$4 sm:$0xff]   ;;  %s19968_s18 = scalar_lea.vmem %s20517_s3, %s19958_s10  ;;  %s19993_s15 = scalar_lea.vmem %s20519_s5, %s19958_s10 }
  0x1d   : > { %938 = vmatprep.subr.bf16.mxu0 %v15227_v16  ;;  %1131 = vmatprep.subr.bf16.mxu1 %v15229_v17  ;;  %v15267_v42 = vld [vmem:[%s20515_s1 + $0x140] ss:$16 sps:$4 sm:$0xff]   ;;  %v15268_v43 = vld [vmem:[%s20515_s1 + $0x148] ss:$16 sps:$4 sm:$0xff]   ;;  %s17008_s29 = scalar_lea.vmem %s20514_s0, %s15178_s12  ;;  %v15269_v44 = vld [vmem:[%s20515_s1 + $0x164] ss:$16 sps:$4 sm:$0xff]   ;;  %s20051_s22 = scalar_lea.vmem %s20518_s4, %s19958_s10 }
  0x1e   : > { %v15271_v45 = vld [vmem:[%s20515_s1 + $0x16c] ss:$16 sps:$4 sm:$0xff]   ;;  %v17017_v46 = vld [vmem:[%s17008_s29] sm:$0xff]  ;;  %v15274_v49 = vld [vmem:[%s20515_s1 + $0x168] ss:$16 sps:$4 sm:$0xff]  }
  0x1f   : > { %v17020_v47 = vld [vmem:[%s17008_s29 + $0x8] sm:$0xff]  ;;  %v15273_v48 = vld [vmem:[%s20515_s1 + $0x160] ss:$16 sps:$4 sm:$0xff]   ;;  %v15275_v50 = vld [vmem:[%s20515_s1 + $0x184] ss:$16 sps:$4 sm:$0xff]  }
  0x20   : > { %939 = vmatpush1.bf16.msra.mxu0 %v15231_v18  ;;  %1132 = vmatpush1.bf16.msra.mxu1 %v15232_v19  ;;  %v12406_v51 = vcombine.high %v17017_v46, %v17020_v47  ;;  %v15277_v52 = vld [vmem:[%s20515_s1 + $0x18c] ss:$16 sps:$4 sm:$0xff]   ;;  %v15279_v53 = vld [vmem:[%s20515_s1 + $0x180] ss:$16 sps:$4 sm:$0xff]   ;;  %v15280_v54 = vld [vmem:[%s20515_s1 + $0x188] ss:$16 sps:$4 sm:$0xff]   ;;  %v12405_v7 = vcombine.low %v17017_v46, %v17020_v47 }
  0x21   : > { %940 = vmatprep.subr.bf16.mxu0 %v15233_v20  ;;  %1133 = vmatprep.subr.bf16.mxu1 %v15235_v21  ;;  %v15281_v55 = vld [vmem:[%s20515_s1 + $0x1a4] ss:$16 sps:$4 sm:$0xff]   ;;  %v15283_v56 = vld [vmem:[%s20515_s1 + $0x1ac] ss:$16 sps:$4 sm:$0xff]   ;;  %v15285_v57 = vld [vmem:[%s20515_s1 + $0x1a0] ss:$16 sps:$4 sm:$0xff]  }
  0x22   : > { %962 = vmatprep.mubr.bf16.mxu0 %v12406_v51  ;;  %1155 = vmatprep.mubr.bf16.mxu1 %v12406_v51  ;;  %v15286_v58 = vld [vmem:[%s20515_s1 + $0x1a8] ss:$16 sps:$4 sm:$0xff]   ;;  %v15287_v59 = vld [vmem:[%s20515_s1 + $0x1c4] ss:$16 sps:$4 sm:$0xff]   ;;  %v15289_v60 = vld [vmem:[%s20515_s1 + $0x1cc] ss:$16 sps:$4 sm:$0xff]  }
  0x23   : > { %v15291_v61 = vld [vmem:[%s20515_s1 + $0x1c0] ss:$16 sps:$4 sm:$0xff]   ;;  %v15292_v62 = vld [vmem:[%s20515_s1 + $0x1c8] ss:$16 sps:$4 sm:$0xff]   ;;  %v15293_v63 = vld [vmem:[%s20515_s1 + $0x1e4] ss:$16 sps:$4 sm:$0xff]  }
  0x24   : > { %941 = vmatpush1.bf16.msra.mxu0 %v15237_v22  ;;  %1134 = vmatpush1.bf16.msra.mxu1 %v15238_v23  ;;  %v15295_v0 = vld [vmem:[%s20515_s1 + $0x1ec] ss:$16 sps:$4 sm:$0xff]   ;;  %v15297_v1 = vld [vmem:[%s20515_s1 + $0x1e0] ss:$16 sps:$4 sm:$0xff]   ;;  %v15298_v2 = vld [vmem:[%s20515_s1 + $0x1e8] ss:$16 sps:$4 sm:$0xff]  }
  0x25   : > { %942 = vmatprep.subr.bf16.mxu0 %v15239_v24  ;;  %1135 = vmatprep.subr.bf16.mxu1 %v15241_v25  ;;  %v15303_v3 = vld [vmem:[%s20515_s1 + $0x204] ss:$16 sps:$4 sm:$0xff]   ;;  %v17082_v4 = vld [vmem:[%s17008_s29 + $0x18] sm:$0xff]  ;;  %v15301_v8 = vld [vmem:[%s20515_s1 + $0x200] ss:$16 sps:$4 sm:$0xff]  }
  0x26   : > { %v17085_v5 = vld [vmem:[%s17008_s29 + $0x20] sm:$0xff]  ;;  %v15312_v6 = vld [vmem:[%s20515_s1 + $0x20c] ss:$16 sps:$4 sm:$0xff]   ;;  %v15310_v11 = vld [vmem:[%s20515_s1 + $0x208] ss:$16 sps:$4 sm:$0xff]  }
  0x27   : > { %v12408_v9 = vcombine.high %v17082_v4, %v17085_v5  ;;  %v15308_v10 = vld [vmem:[%s20515_s1 + $0x224] ss:$16 sps:$4 sm:$0xff]   ;;  %v15320_v12 = vld [vmem:[%s20515_s1 + $0x22c] ss:$16 sps:$4 sm:$0xff]   ;;  %v15306_v13 = vld [vmem:[%s20515_s1 + $0x220] ss:$16 sps:$4 sm:$0xff]   ;;  %v12407_v18 = vcombine.low %v17082_v4, %v17085_v5 }
  0x28   : > { %943 = vmatpush1.bf16.msra.mxu0 %v15243_v26  ;;  %1136 = vmatpush1.bf16.msra.mxu1 %v15244_v27  ;;  %v17110_v14 = vld [vmem:[%s17008_s29 + $0x30] sm:$0xff]  ;;  %v17113_v15 = vld [vmem:[%s17008_s29 + $0x38] sm:$0xff]  ;;  %v17141_v25 = vld [vmem:[%s17008_s29 + $0x48] sm:$0xff]  ;;  %vm1444_vm0 = vsmask.f32 3328 }
  0x29   : > { %944 = vmatprep.subr.bf16.mxu0 %v15245_v28  ;;  %1137 = vmatprep.subr.bf16.mxu1 %v15247_v29  ;;  %v15316_v16 = vld [vmem:[%s20515_s1 + $0x244] ss:$16 sps:$4 sm:$0xff]   ;;  %v15318_v17 = vld [vmem:[%s20515_s1 + $0x228] ss:$16 sps:$4 sm:$0xff]   ;;  %v12410_v19 = vcombine.high %v17110_v14, %v17113_v15  ;;  %v15314_v20 = vld [vmem:[%s20515_s1 + $0x240] ss:$16 sps:$4 sm:$0xff]  }
  0x2a   : > { %v15324_v21 = vld [vmem:[%s20515_s1 + $0x264] ss:$16 sps:$4 sm:$0xff]   ;;  %v15328_v22 = vld [vmem:[%s20515_s1 + $0x24c] ss:$16 sps:$4 sm:$0xff]   ;;  %v15326_v23 = vld [vmem:[%s20515_s1 + $0x248] ss:$16 sps:$4 sm:$0xff]  }
  0x2b   : > { %v15336_v24 = vld [vmem:[%s20515_s1 + $0x26c] ss:$16 sps:$4 sm:$0xff]   ;;  %v17144_v26 = vld [vmem:[%s17008_s29 + $0x50] sm:$0xff]  ;;  %v15334_v29 = vld [vmem:[%s20515_s1 + $0x268] ss:$16 sps:$4 sm:$0xff]  }
  0x2c   : > { %945 = vmatpush1.bf16.msra.mxu0 %v15249_v30  ;;  %1138 = vmatpush1.bf16.msra.mxu1 %v15250_v31  ;;  %v15322_v27 = vld [vmem:[%s20515_s1 + $0x260] ss:$16 sps:$4 sm:$0xff]   ;;  %v15332_v28 = vld [vmem:[%s20515_s1 + $0x284] ss:$16 sps:$4 sm:$0xff]   ;;  %v12409_v30 = vcombine.low %v17110_v14, %v17113_v15  ;;  %v12412_v31 = vcombine.high %v17141_v25, %v17144_v26  ;;  %v15368_v51 = vld [vmem:[%s20515_s1 + $0x2ec] ss:$16 sps:$4 sm:$0xff]  }
  0x2d   : > { %946 = vmatprep.subr.bf16.mxu0 %v15251_v32  ;;  %1139 = vmatprep.subr.bf16.mxu1 %v15253_v33  ;;  %v15330_v32 = vld [vmem:[%s20515_s1 + $0x280] ss:$16 sps:$4 sm:$0xff]   ;;  %v15340_v33 = vld [vmem:[%s20515_s1 + $0x2a4] ss:$16 sps:$4 sm:$0xff]   ;;  %vm1445_vm1 = vsmask.f32 7440 }
  0x2e   : > { %vm17355_vm2 = vmor %vm1444_vm0, %vm1445_vm1 }
  0x30   : > { %947 = vmatpush1.bf16.msra.mxu0 %v15255_v34  ;;  %1140 = vmatpush1.bf16.msra.mxu1 %v15256_v35  ;;  %v15344_v34 = vld [vmem:[%s20515_s1 + $0x28c] ss:$16 sps:$4 sm:$0xff]   ;;  %v15342_v35 = vld [vmem:[%s20515_s1 + $0x288] ss:$16 sps:$4 sm:$0xff]  }
  0x31   : > { %948 = vmatprep.subr.bf16.mxu0 %v15257_v36  ;;  %1141 = vmatprep.subr.bf16.mxu1 %v15259_v37  ;;  %v17172_v36 = vld [vmem:[%s17008_s29 + $0x60] sm:$0xff]  ;;  %v15352_v37 = vld [vmem:[%s20515_s1 + $0x2ac] ss:$16 sps:$4 sm:$0xff]  }
  0x34   : > { %949 = vmatpush1.bf16.msra.mxu0 %v15261_v38  ;;  %1142 = vmatpush1.bf16.msra.mxu1 %v15262_v39  ;;  %v17178_v38 = vld [vmem:[%s17008_s29 + $0x68] sm:$0xff]  ;;  %v15338_v39 = vld [vmem:[%s20515_s1 + $0x2a0] ss:$16 sps:$4 sm:$0xff]  }
  0x35   : > { %950 = vmatprep.subr.bf16.mxu0 %v15263_v40  ;;  %1143 = vmatprep.subr.bf16.mxu1 %v15265_v41  ;;  %v15348_v40 = vld [vmem:[%s20515_s1 + $0x2c4] ss:$16 sps:$4 sm:$0xff]   ;;  %v15350_v41 = vld [vmem:[%s20515_s1 + $0x2a8] ss:$16 sps:$4 sm:$0xff]  }
  0x38   : > { %951 = vmatpush1.bf16.msra.mxu0 %v15267_v42  ;;  %1144 = vmatpush1.bf16.msra.mxu1 %v15268_v43  ;;  %v12411_v42 = vcombine.low %v17141_v25, %v17144_v26  ;;  %v12414_v43 = vcombine.high %v17172_v36, %v17178_v38 }
  0x39   : > { %952 = vmatprep.subr.bf16.mxu0 %v15269_v44  ;;  %1145 = vmatprep.subr.bf16.mxu1 %v15271_v45  ;;  %v15346_v44 = vld [vmem:[%s20515_s1 + $0x2c0] ss:$16 sps:$4 sm:$0xff]   ;;  %v15356_v45 = vld [vmem:[%s20515_s1 + $0x2e4] ss:$16 sps:$4 sm:$0xff]  }
  0x3c   : > { %953 = vmatpush1.bf16.msra.mxu0 %v15273_v48  ;;  %1146 = vmatpush1.bf16.msra.mxu1 %v15274_v49  ;;  %v15360_v48 = vld [vmem:[%s20515_s1 + $0x2cc] ss:$16 sps:$4 sm:$0xff]   ;;  %v15358_v49 = vld [vmem:[%s20515_s1 + $0x2c8] ss:$16 sps:$4 sm:$0xff]  }
  0x3d   : > { %954 = vmatprep.subr.bf16.mxu0 %v15275_v50  ;;  %1147 = vmatprep.subr.bf16.mxu1 %v15277_v52  ;;  %v17206_v50 = vld [vmem:[%s17008_s29 + $0x78] sm:$0xff]  ;;  %v17212_v52 = vld [vmem:[%s17008_s29 + $0x80] sm:$0xff] }
  0x40   : > { %955 = vmatpush1.bf16.msra.mxu0 %v15279_v53  ;;  %1148 = vmatpush1.bf16.msra.mxu1 %v15280_v54  ;;  %v15354_v53 = vld [vmem:[%s20515_s1 + $0x2e0] ss:$16 sps:$4 sm:$0xff]   ;;  %v15364_v54 = vld [vmem:[%s20515_s1 + $0x304] ss:$16 sps:$4 sm:$0xff]  }
  0x41   : > { %956 = vmatprep.subr.bf16.mxu0 %v15281_v55  ;;  %1149 = vmatprep.subr.bf16.mxu1 %v15283_v56  ;;  %v15366_v55 = vld [vmem:[%s20515_s1 + $0x2e8] ss:$16 sps:$4 sm:$0xff]   ;;  %v12413_v56 = vcombine.low %v17172_v36, %v17178_v38 }
  0x44   : > { %957 = vmatpush1.bf16.msra.mxu0 %v15285_v57  ;;  %1150 = vmatpush1.bf16.msra.mxu1 %v15286_v58  ;;  %v12416_v57 = vcombine.high %v17206_v50, %v17212_v52  ;;  %v15362_v58 = vld [vmem:[%s20515_s1 + $0x300] ss:$16 sps:$4 sm:$0xff]  }
  0x45   : > { %958 = vmatprep.subr.bf16.mxu0 %v15287_v59  ;;  %1151 = vmatprep.subr.bf16.mxu1 %v15289_v60  ;;  %v15372_v59 = vld [vmem:[%s20515_s1 + $0x324] ss:$16 sps:$4 sm:$0xff]   ;;  %v15376_v60 = vld [vmem:[%s20515_s1 + $0x30c] ss:$16 sps:$4 sm:$0xff]  }
  0x48   : > { %959 = vmatpush1.bf16.msra.mxu0 %v15291_v61  ;;  %1152 = vmatpush1.bf16.msra.mxu1 %v15292_v62  ;;  %v15374_v61 = vld [vmem:[%s20515_s1 + $0x308] ss:$16 sps:$4 sm:$0xff]   ;;  %v15384_v62 = vld [vmem:[%s20515_s1 + $0x32c] ss:$16 sps:$4 sm:$0xff]  }
  0x49   : > { %960 = vmatprep.subr.bf16.mxu0 %v15293_v63  ;;  %1153 = vmatprep.subr.bf16.mxu1 %v15295_v0  ;;  %v356_v63 = vld [vmem:[%s17008_s29 + $0x90] sm:$0xff]  ;;  %v357_v0 = vld [vmem:[%s17008_s29 + $0x98] sm:$0xff] }
  0x4c   : > { %961 = vmatpush1.bf16.msra.mxu0 %v15297_v1  ;;  %1154 = vmatpush1.bf16.msra.mxu1 %v15298_v2  ;;  %v15370_v1 = vld [vmem:[%s20515_s1 + $0x320] ss:$16 sps:$4 sm:$0xff]   ;;  %v15380_v2 = vld [vmem:[%s20515_s1 + $0x344] ss:$16 sps:$4 sm:$0xff]  }
  0x4d   : > { %2344 = vmatprep.subr.bf16.mxu0 %v15303_v3  ;;  %2537 = vmatprep.subr.bf16.mxu1 %v15312_v6  ;;  %v15382_v3 = vld [vmem:[%s20515_s1 + $0x328] ss:$16 sps:$4 sm:$0xff]   ;;  %v12415_v6 = vcombine.low %v17206_v50, %v17212_v52 }
  0x4f   : > { %963 = vmatmul.mubr.bf16.vlgmr.msra.gmra.mrb[0].mxu0 %v12405_v7  ;;  %1156 = vmatmul.mubr.bf16.vlgmr.msra.gmra.mrb[0].mxu1 %v12405_v7  ;;  %v12418_v7 = vcombine.high %v356_v63, %v357_v0 }
  0x50   : > { %2345 = vmatpush1.bf16.msra.mxu0 %v15301_v8  ;;  %972 = vmatprep.mubr.bf16.mxu0 %v12408_v9  ;;  %v15378_v8 = vld [vmem:[%s20515_s1 + $0x340] ss:$16 sps:$4 sm:$0xff]  }
  0x51   : > { %1165 = vmatprep.mubr.bf16.mxu1 %v12408_v9  ;;  %2346 = vmatprep.subr.bf16.mxu0 %v15308_v10  ;;  %v15392_v9 = vld [vmem:[%s20515_s1 + $0x34c] ss:$16 sps:$4 sm:$0xff]   ;;  %v15388_v10 = vld [vmem:[%s20515_s1 + $0x364] ss:$16 sps:$4 sm:$0xff]  }
  0x52   : > { %2538 = vmatpush1.bf16.msra.mxu1 %v15310_v11  ;;  %v15390_v11 = vld [vmem:[%s20515_s1 + $0x348] ss:$16 sps:$4 sm:$0xff]  }
  0x53   : > { %2539 = vmatprep.subr.bf16.mxu1 %v15320_v12  ;;  %v15400_v12 = vld [vmem:[%s20515_s1 + $0x36c] ss:$16 sps:$4 sm:$0xff]  }
  0x54   : > { %2347 = vmatpush1.bf16.msra.mxu0 %v15306_v13  ;;  %v359_v13 = vld [vmem:[%s17008_s29 + $0xa8] sm:$0xff] }
  0x55   : > { %2348 = vmatprep.subr.bf16.mxu0 %v15316_v16  ;;  %v360_v16 = vld [vmem:[%s17008_s29 + $0xb0] sm:$0xff] }
  0x56   : > { %2540 = vmatpush1.bf16.msra.mxu1 %v15318_v17  ;;  %v15386_v17 = vld [vmem:[%s20515_s1 + $0x360] ss:$16 sps:$4 sm:$0xff]  }
  0x57   : > { %973 = vmatmul.mubr.bf16.gmra.mrb[4].mxu0 %v12407_v18  ;;  %1166 = vmatmul.mubr.bf16.gmra.mrb[4].mxu1 %v12407_v18  ;;  %v15396_v18 = vld [vmem:[%s20515_s1 + $0x384] ss:$16 sps:$4 sm:$0xff]  }
  0x58   : > { %982 = vmatprep.mubr.bf16.mxu0 %v12410_v19  ;;  %1175 = vmatprep.mubr.bf16.mxu1 %v12410_v19  ;;  %v15398_v19 = vld [vmem:[%s20515_s1 + $0x368] ss:$16 sps:$4 sm:$0xff]  }
  0x59   : > { %2349 = vmatpush1.bf16.msra.mxu0 %v15314_v20  ;;  %2541 = vmatprep.subr.bf16.mxu1 %v15328_v22  ;;  %v12417_v20 = vcombine.low %v356_v63, %v357_v0  ;;  %v15394_v22 = vld [vmem:[%s20515_s1 + $0x380] ss:$16 sps:$4 sm:$0xff]   ;;  %v375_v0 = vld [vmem:[%s17008_s29 + $0x128] sm:$0xff] }
  0x5a   : > { %2350 = vmatprep.subr.bf16.mxu0 %v15324_v21  ;;  %2542 = vmatpush1.bf16.msra.mxu1 %v15326_v23  ;;  %v12420_v21 = vcombine.high %v359_v13, %v360_v16  ;;  %v15408_v23 = vld [vmem:[%s20515_s1 + $0x38c] ss:$16 sps:$4 sm:$0xff]   ;;  %v374_v63 = vld [vmem:[%s17008_s29 + $0x120] sm:$0xff] }
  0x5b   : > { %2543 = vmatprep.subr.bf16.mxu1 %v15336_v24  ;;  %v15404_v24 = vld [vmem:[%s20515_s1 + $0x3a4] ss:$16 sps:$4 sm:$0xff]  }
  0x5d   : > { %2351 = vmatpush1.bf16.msra.mxu0 %v15322_v27  ;;  %v15406_v27 = vld [vmem:[%s20515_s1 + $0x388] ss:$16 sps:$4 sm:$0xff]  }
  0x5e   : > { %2352 = vmatprep.subr.bf16.mxu0 %v15332_v28  ;;  %2544 = vmatpush1.bf16.msra.mxu1 %v15334_v29  ;;  %v15415_v28 = vld [vmem:[%s20515_s1 + $0x3ac] ss:$16 sps:$4 sm:$0xff]   ;;  %v362_v29 = vld [vmem:[%s17008_s29 + $0xc0] sm:$0xff] }
  0x5f   : > { %983 = vmatmul.mubr.bf16.gmra.mrb[8].mxu0 %v12409_v30  ;;  %1176 = vmatmul.mubr.bf16.gmra.mrb[8].mxu1 %v12409_v30  ;;  %v363_v30 = vld [vmem:[%s17008_s29 + $0xc8] sm:$0xff] }
  0x60   : > { %992 = vmatprep.mubr.bf16.mxu0 %v12412_v31  ;;  %1185 = vmatprep.mubr.bf16.mxu1 %v12412_v31  ;;  %v15402_v31 = vld [vmem:[%s20515_s1 + $0x3a0] ss:$16 sps:$4 sm:$0xff]  }
  0x61   : > { %2353 = vmatpush1.bf16.msra.mxu0 %v15330_v32  ;;  %2545 = vmatprep.subr.bf16.mxu1 %v15344_v34  ;;  %v15412_v32 = vld [vmem:[%s20515_s1 + $0x3c4] ss:$16 sps:$4 sm:$0xff]   ;;  %v12419_v34 = vcombine.low %v359_v13, %v360_v16  ;;  %v1457_v13 = vshll.u32 %v17020_v47, 16  ;;  %v1461_v16 = vshrl.u32 %v17020_v47, 16 }
  0x62   : > { %2354 = vmatprep.subr.bf16.mxu0 %v15340_v33  ;;  %2546 = vmatpush1.bf16.msra.mxu1 %v15342_v35  ;;  %v15413_v33 = vld [vmem:[%s20515_s1 + $0x3a8] ss:$16 sps:$4 sm:$0xff]   ;;  %v15410_v35 = vld [vmem:[%s20515_s1 + $0x3c0] ss:$16 sps:$4 sm:$0xff]  }
  0x63   : > { %2547 = vmatprep.subr.bf16.mxu1 %v15352_v37  ;;  %v15423_v37 = vld [vmem:[%s20515_s1 + $0x3cc] ss:$16 sps:$4 sm:$0xff]   ;;  %v384_v47 = vld [vmem:[%s17008_s29 + $0x170] sm:$0xff] }
  0x65   : > { %2355 = vmatpush1.bf16.msra.mxu0 %v15338_v39  ;;  %v12422_v39 = vcombine.high %v362_v29, %v363_v30 }
  0x66   : > { %2356 = vmatprep.subr.bf16.mxu0 %v15348_v40  ;;  %2548 = vmatpush1.bf16.msra.mxu1 %v15350_v41  ;;  %v15420_v40 = vld [vmem:[%s20515_s1 + $0x3e4] ss:$16 sps:$4 sm:$0xff]   ;;  %v15421_v41 = vld [vmem:[%s20515_s1 + $0x3c8] ss:$16 sps:$4 sm:$0xff]  }
  0x67   : > { %993 = vmatmul.mubr.bf16.gmra.mrb[12].mxu0 %v12411_v42  ;;  %1186 = vmatmul.mubr.bf16.gmra.mrb[12].mxu1 %v12411_v42  ;;  %v365_v42 = vld [vmem:[%s17008_s29 + $0xd8] sm:$0xff] }
  0x68   : > { %1002 = vmatprep.mubr.bf16.mxu0 %v12414_v43  ;;  %1195 = vmatprep.mubr.bf16.mxu1 %v12414_v43  ;;  %v366_v43 = vld [vmem:[%s17008_s29 + $0xe0] sm:$0xff] }
  0x69   : > { %2357 = vmatpush1.bf16.msra.mxu0 %v15346_v44  ;;  %2549 = vmatprep.subr.bf16.mxu1 %v15360_v48  ;;  %v15418_v44 = vld [vmem:[%s20515_s1 + $0x3e0] ss:$16 sps:$4 sm:$0xff]   ;;  %v15424_v48 = vld [vmem:[%s20515_s1 + $0x3e8] ss:$16 sps:$4 sm:$0xff]  }
  0x6a   : > { %2358 = vmatprep.subr.bf16.mxu0 %v15356_v45  ;;  %2550 = vmatpush1.bf16.msra.mxu1 %v15358_v49  ;;  %v15426_v45 = vld [vmem:[%s20515_s1 + $0x3ec] ss:$16 sps:$4 sm:$0xff]   ;;  %v15429_v49 = vld [vmem:[%s20515_s1 + $0x404] ss:$16 sps:$4 sm:$0xff]  }
  0x6b   : > { %2551 = vmatprep.subr.bf16.mxu1 %v15368_v51  ;;  %v12421_v51 = vcombine.low %v362_v29, %v363_v30  ;;  %v1481_v29 = vshll.u32 %v17085_v5, 16  ;;  %v1485_v30 = vshrl.u32 %v17085_v5, 16  ;;  %v1496_v5 = vshrl.u32 %v17110_v14, 16 }
  0x6d   : > { %2359 = vmatpush1.bf16.msra.mxu0 %v15354_v53  ;;  %v12424_v53 = vcombine.high %v365_v42, %v366_v43 }
  0x6e   : > { %2360 = vmatprep.subr.bf16.mxu0 %v15364_v54  ;;  %2552 = vmatpush1.bf16.msra.mxu1 %v15366_v55  ;;  %v15435_v54 = vld [vmem:[%s20515_s1 + $0x40c] ss:$16 sps:$4 sm:$0xff]   ;;  %v368_v55 = vld [vmem:[%s17008_s29 + $0xf0] sm:$0xff] }
  0x6f   : > { %1003 = vmatmul.mubr.bf16.gmra.mrb[16].mxu0 %v12413_v56  ;;  %1196 = vmatmul.mubr.bf16.gmra.mrb[16].mxu1 %v12413_v56  ;;  %v369_v56 = vld [vmem:[%s17008_s29 + $0xf8] sm:$0xff] }
  0x70   : > { %1012 = vmatprep.mubr.bf16.mxu0 %v12416_v57  ;;  %1205 = vmatprep.mubr.bf16.mxu1 %v12416_v57  ;;  %v12423_v57 = vcombine.low %v365_v42, %v366_v43 }
  0x71   : > { %2361 = vmatpush1.bf16.msra.mxu0 %v15362_v58  ;;  %2553 = vmatprep.subr.bf16.mxu1 %v15376_v60  ;;  %v12426_v58 = vcombine.high %v368_v55, %v369_v56  ;;  %v372_v60 = vld [vmem:[%s17008_s29 + $0x110] sm:$0xff] }
  0x72   : > { %2362 = vmatprep.subr.bf16.mxu0 %v15372_v59  ;;  %2554 = vmatpush1.bf16.msra.mxu1 %v15374_v61  ;;  %v371_v59 = vld [vmem:[%s17008_s29 + $0x108] sm:$0xff]  ;;  %v12425_v61 = vcombine.low %v368_v55, %v369_v56  ;;  %v1509_v56 = vshrl.u32 %v17113_v15, 16 }
  0x73   : > { %2555 = vmatprep.subr.bf16.mxu1 %v15384_v62  ;;  %v12428_v62 = vcombine.high %v371_v59, %v372_v60 }
  0x75   : > { %2363 = vmatpush1.bf16.msra.mxu0 %v15370_v1  ;;  %v12427_v1 = vcombine.low %v371_v59, %v372_v60  ;;  %v1498_v60 = vrot.slane %v1496_v5, 4 }
  0x76   : > { %2364 = vmatprep.subr.bf16.mxu0 %v15380_v2  ;;  %2556 = vmatpush1.bf16.msra.mxu1 %v15382_v3  ;;  %v12430_v2 = vcombine.high %v374_v63, %v375_v0  ;;  %v377_v3 = vld [vmem:[%s17008_s29 + $0x138] sm:$0xff] }
  0x77   : > { %1013 = vmatmul.mubr.bf16.gmra.mrb[20].mxu0 %v12415_v6  ;;  %1206 = vmatmul.mubr.bf16.gmra.mrb[20].mxu1 %v12415_v6  ;;  %v378_v6 = vld [vmem:[%s17008_s29 + $0x140] sm:$0xff] }
  0x78   : > { %1022 = vmatprep.mubr.bf16.mxu0 %v12418_v7  ;;  %1215 = vmatprep.mubr.bf16.mxu1 %v12418_v7  ;;  %v12429_v7 = vcombine.low %v374_v63, %v375_v0 }
  0x79   : > { %2365 = vmatpush1.bf16.msra.mxu0 %v15378_v8  ;;  %2557 = vmatprep.subr.bf16.mxu1 %v15392_v9  ;;  %v12432_v8 = vcombine.high %v377_v3, %v378_v6  ;;  %v1448_v9 = vshrl.u32 %v17017_v46, 16 }
  0x7a   : > { %2366 = vmatprep.subr.bf16.mxu0 %v15388_v10  ;;  %2558 = vmatpush1.bf16.msra.mxu1 %v15390_v11  ;;  %v1451_v10 = vshll.u32 %v17017_v46, 16  ;;  %v380_v11 = vld [vmem:[%s17008_s29 + $0x150] sm:$0xff]  ;;  %v383_v46 = vld [vmem:[%s17008_s29 + $0x168] sm:$0xff] }
  0x7b   : > { %2559 = vmatprep.subr.bf16.mxu1 %v15400_v12  ;;  %v381_v12 = vld [vmem:[%s17008_s29 + $0x158] sm:$0xff] }
  0x7d   : > { %2367 = vmatpush1.bf16.msra.mxu0 %v15386_v17  ;;  %v12431_v17 = vcombine.low %v377_v3, %v378_v6  ;;  %v1523_v3 = vshll.u32 %v17141_v25, 16  ;;  %v1529_v6 = vshll.u32 %v17144_v26, 16 }
  0x7e   : > { %2368 = vmatprep.subr.bf16.mxu0 %v15396_v18  ;;  %2560 = vmatpush1.bf16.msra.mxu1 %v15398_v19  ;;  %v1450_v18 = vrot.slane %v1448_v9, 4  ;;  %v1453_v19 = vrot.slane %v1451_v10, 5 }
  0x7f   : > { %1023 = vmatmul.mubr.bf16.gmra.mrb[24].mxu0 %v12417_v20  ;;  %1216 = vmatmul.mubr.bf16.gmra.mrb[24].mxu1 %v12417_v20  ;;  %v12434_v20 = vcombine.high %v380_v11, %v381_v12 }
  0x80   : > { %1032 = vmatprep.mubr.bf16.mxu0 %v12420_v21  ;;  %1225 = vmatprep.mubr.bf16.mxu1 %v12420_v21  ;;  %v1459_v21 = vrot.slane %v1457_v13, 5  ;;  %v15432_v13 = vld [vmem:[%s20515_s1 + $0x424] ss:$16 sps:$4 sm:$0xff]  }
  0x81   : > { %2369 = vmatpush1.bf16.msra.mxu0 %v15394_v22  ;;  %2561 = vmatprep.subr.bf16.mxu1 %v15408_v23  ;;  %v1463_v22 = vrot.slane %v1461_v16, 4  ;;  %v340_v23 = vld [vmem:[%s17008_s29 + $0x10] sm:$0x11] }
  0x82   : > { %2370 = vmatprep.subr.bf16.mxu0 %v15404_v24  ;;  %2562 = vmatpush1.bf16.msra.mxu1 %v15406_v27  ;;  %v1472_v24 = vshrl.u32 %v17082_v4, 16  ;;  %v1475_v27 = vshll.u32 %v17082_v4, 16  ;;  %v1483_v4 = vrot.slane %v1481_v29, 5  ;;  %v15441_v29 = vld [vmem:[%s20515_s1 + $0x42c] ss:$16 sps:$4 sm:$0xff]  }
  0x83   : > { %2563 = vmatprep.subr.bf16.mxu1 %v15415_v28 }
  0x85   : > { %2371 = vmatpush1.bf16.msra.mxu0 %v15402_v31  ;;  %v1454_v31 = vor.u32 %v1453_v19, %v1450_v18  ;;  %v15433_v18 = vld [vmem:[%s20515_s1 + $0x408] ss:$16 sps:$4 sm:$0xff]  }
  0x86   : > { %2372 = vmatprep.subr.bf16.mxu0 %v15412_v32  ;;  %2564 = vmatpush1.bf16.msra.mxu1 %v15413_v33  ;;  %v1464_v32 = vor.u32 %v1463_v22, %v1459_v21  ;;  %v1467_v33 = vshll.u32 %v340_v23, 16  ;;  %v349_v19 = vld [vmem:[%s17008_s29 + $0x58] sm:$0x11] }
  0x87   : > { %1033 = vmatmul.mubr.bf16.gmra.mrb[28].mxu0 %v12419_v34  ;;  %1226 = vmatmul.mubr.bf16.gmra.mrb[28].mxu1 %v12419_v34  ;;  %v12433_v34 = vcombine.low %v380_v11, %v381_v12 }
  0x88   : > { %1042 = vmatprep.mubr.bf16.mxu0 %v12422_v39  ;;  %1235 = vmatprep.mubr.bf16.mxu1 %v12422_v39  ;;  %v12436_v39 = vcombine.high %v383_v46, %v384_v47  ;;  %v1465_v42 = vrot.slane %v1464_v32, 4  ;;  %v1469_v43 = vrot.slane %v1467_v33, 5  ;;  %v1544_v32 = vshrl.u32 %v17172_v36, 16 }
  0x89   : > { %2373 = vmatpush1.bf16.msra.mxu0 %v15410_v35  ;;  %2565 = vmatprep.subr.bf16.mxu1 %v15423_v37  ;;  %v1474_v35 = vrot.slane %v1472_v24, 4  ;;  %v1477_v37 = vrot.slane %v1475_v27, 5  ;;  %v15430_v24 = vld [vmem:[%s20515_s1 + $0x420] ss:$16 sps:$4 sm:$0xff]   ;;  %v15438_v27 = vld [vmem:[%s20515_s1 + $0x444] ss:$16 sps:$4 sm:$0xff]  }
  0x8a   : > { %2374 = vmatprep.subr.bf16.mxu0 %v15420_v40  ;;  %2566 = vmatpush1.bf16.msra.mxu1 %v15421_v41  ;;  %v1487_v40 = vrot.slane %v1485_v30, 4  ;;  %v1455_v41 = vrot.slane %v1454_v31, 4  ;;  %v15439_v31 = vld [vmem:[%s20515_s1 + $0x428] ss:$16 sps:$4 sm:$0xff]   ;;  %v1547_v33 = vshll.u32 %v17172_v36, 16 }
  0x8b   : > { %2567 = vmatprep.subr.bf16.mxu1 %v15426_v45  ;;  %v1478_v45 = vor.u32 %v1477_v37, %v1474_v35  ;;  %v15436_v36 = vld [vmem:[%s20515_s1 + $0x440] ss:$16 sps:$4 sm:$0xff]  }
  0x8c   : > { %v1549_v5 = vrot.slane %v1547_v33, 5  ;;  %v358_v33 = vld [vmem:[%s17008_s29 + $0xa0] sm:$0x11] }
  0x8d   : > { %2375 = vmatpush1.bf16.msra.mxu0 %v15418_v44  ;;  %v343_v44 = vld [vmem:[%s17008_s29 + $0x28] sm:$0x11]  ;;  %v1479_v59 = vrot.slane %v1478_v45, 4  ;;  %v15444_v45 = vld [vmem:[%s20515_s1 + $0x464] ss:$16 sps:$4 sm:$0xff]  }
  0x8e   : > { %2568 = vmatpush1.bf16.msra.mxu1 %v15424_v48  ;;  %3502 = vmatprep.subr.bf16.mxu0 %v15429_v49  ;;  %v1488_v48 = vor.u32 %v1487_v40, %v1483_v4  ;;  %v1499_v49 = vshll.u32 %v17110_v14, 16  ;;  %v1491_v55 = vshll.u32 %v343_v44, 16  ;;  %v1511_v14 = vrot.slane %v1509_v56, 4  ;;  %v15442_v56 = vld [vmem:[%s20515_s1 + $0x460] ss:$16 sps:$4 sm:$0xff]  }
  0x8f   : > { %1043 = vmatmul.mubr.bf16.gmra.mrb[32].mxu0 %v12421_v51  ;;  %1236 = vmatmul.mubr.bf16.gmra.mrb[32].mxu1 %v12421_v51  ;;  %v1505_v51 = vshll.u32 %v17113_v15, 16 }
  0x90   : > { %1052 = vmatprep.mubr.bf16.mxu0 %v12424_v53  ;;  %1245 = vmatprep.mubr.bf16.mxu1 %v12424_v53  ;;  %v1460_v53 = vsel %vm17355_vm2, %v1455_v41, %v1459_v21  ;;  %v1493_v63 = vrot.slane %v1491_v55, 5  ;;  %v1568_v55 = vshrl.u32 %v17206_v50, 16 }
  0x91   : > { %3695 = vmatprep.subr.bf16.mxu1 %v15435_v54  ;;  %v1470_v54 = vsel %vm17355_vm2, %v1465_v42, %v1469_v43  ;;  %v1507_v0 = vrot.slane %v1505_v51, 5  ;;  %v15447_v42 = vld [vmem:[%s20515_s1 + $0x44c] ss:$16 sps:$4 sm:$0xff]  }
  0x92   : > { %v12565_v12 = vcombine.low %v1460_v53, %v1470_v54 }
  0x93   : > { %v1512_v10 = vor.u32 %v1511_v14, %v1507_v0 }
  0x95   : > { %v1513_v23 = vrot.slane %v1512_v10, 4  ;;  %v355_v10 = vld [vmem:[%s17008_s29 + $0x88] sm:$0x11] }
  0x97   : > { %1053 = vmatmul.mubr.bf16.gmra.mrb[36].mxu0 %v12423_v57  ;;  %1246 = vmatmul.mubr.bf16.gmra.mrb[36].mxu1 %v12423_v57  ;;  %v12435_v57 = vcombine.low %v383_v46, %v384_v47 }
  0x98   : > { %1062 = vmatprep.mubr.bf16.mxu0 %v12426_v58  ;;  %1255 = vmatprep.mubr.bf16.mxu1 %v12426_v58  ;;  %v12566_v58 = vcombine.high %v1460_v53, %v1470_v54 }
  0x9f   : > { %1063 = vmatmul.mubr.bf16.gmra.mrb[40].mxu0 %v12425_v61  ;;  %1256 = vmatmul.mubr.bf16.gmra.mrb[40].mxu1 %v12425_v61  ;;  %v1501_v61 = vrot.slane %v1499_v49, 5  ;;  %v15445_v49 = vld [vmem:[%s20515_s1 + $0x448] ss:$16 sps:$4 sm:$0xff]  }
  0xa0   : > { %1072 = vmatprep.mubr.bf16.mxu0 %v12428_v62  ;;  %1265 = vmatprep.mubr.bf16.mxu1 %v12428_v62  ;;  %v1489_v62 = vrot.slane %v1488_v48, 4  ;;  %v1546_v48 = vrot.slane %v1544_v32, 4 }
  0xa1   : > { %v1502_v15 = vor.u32 %v1501_v61, %v1498_v60  ;;  %v15450_v61 = vld [vmem:[%s20515_s1 + $0x484] ss:$16 sps:$4 sm:$0xff]  }
  0xa2   : > { %v1494_v9 = vsel %vm17355_vm2, %v1489_v62, %v1493_v63  ;;  %v1550_v60 = vor.u32 %v1549_v5, %v1546_v48  ;;  %v16675_v62 = vld [vmem:[%s17008_s29 + $0x80] sm:$0xff]  ;;  %v1611_v48 = vshll.u32 %v358_v33, 16  ;;  %v16678_v5 = vld [vmem:[%s17008_s29 + $0xa8] sm:$0xff] }
  0xa3   : > { %v1503_v22 = vrot.slane %v1502_v15, 4  ;;  %v1581_v63 = vshrl.u32 %v16675_v62, 16  ;;  %v1570_v15 = vrot.slane %v1568_v55, 4 }
  0xa5   : > { %v1508_v35 = vsel %vm17355_vm2, %v1503_v22, %v1507_v0  ;;  %v15451_v0 = vld [vmem:[%s20515_s1 + $0x468] ss:$16 sps:$4 sm:$0xff]  }
  0xa7   : > { %1073 = vmatmul.mubr.bf16.gmra.mrb[44].mxu0 %v12427_v1  ;;  %1266 = vmatmul.mubr.bf16.gmra.mrb[44].mxu1 %v12427_v1  ;;  %v346_v1 = vld [vmem:[%s17008_s29 + $0x40] sm:$0x11] }
  0xa8   : > { %1082 = vmatprep.mubr.bf16.mxu0 %v12430_v2  ;;  %1275 = vmatprep.mubr.bf16.mxu1 %v12430_v2  ;;  %v1520_v2 = vshrl.u32 %v17141_v25, 16  ;;  %v1515_v11 = vshll.u32 %v346_v1, 16  ;;  %v15427_v25 = vld [vmem:[%s20515_s1 + $0x400] ss:$16 sps:$4 sm:$0xff]  }
  0xaa   : > { %v1522_v16 = vrot.slane %v1520_v2, 4  ;;  %v1517_v46 = vrot.slane %v1515_v11, 5 }
  0xac   : > { %v1518_v37 = vsel %vm17355_vm2, %v1513_v23, %v1517_v46 }
  0xad   : > { %v12570_v43 = vcombine.high %v1508_v35, %v1518_v37  ;;  %v12569_v2 = vcombine.low %v1508_v35, %v1518_v37  ;;  %v15460_v37 = vld [vmem:[%s20515_s1 + $0x4c0] ss:$16 sps:$4 sm:$0xff]  }
  0xaf   : > { %1083 = vmatmul.mubr.bf16.gmra.mrb[48].mxu0 %v12429_v7  ;;  %1276 = vmatmul.mubr.bf16.gmra.mrb[48].mxu1 %v12429_v7  ;;  %v1533_v7 = vshrl.u32 %v17144_v26, 16 }
  0xb0   : > { %1092 = vmatprep.mubr.bf16.mxu0 %v12432_v8  ;;  %1285 = vmatprep.mubr.bf16.mxu1 %v12432_v8  ;;  %v1484_v8 = vsel %vm17355_vm2, %v1479_v59, %v1483_v4  ;;  %v1557_v4 = vshrl.u32 %v17178_v38, 16  ;;  %v15453_v59 = vld [vmem:[%s20515_s1 + $0x46c] ss:$16 sps:$4 sm:$0xff]  }
  0xb1   : > { %v12568_v26 = vcombine.high %v1484_v8, %v1494_v9  ;;  %v1535_v21 = vrot.slane %v1533_v7, 4  ;;  %v12567_v40 = vcombine.low %v1484_v8, %v1494_v9  ;;  %v15459_v7 = vld [vmem:[%s20515_s1 + $0x48c] ss:$16 sps:$4 sm:$0xff]   ;;  %v1551_v9 = vrot.slane %v1550_v60, 4 }
  0xb2   : > { %v1559_v54 = vrot.slane %v1557_v4, 4 }
  0xb7   : > { %1093 = vmatmul.mubr.bf16.gmra.mrb[52].mxu0 %v12431_v17  ;;  %1286 = vmatmul.mubr.bf16.gmra.mrb[52].mxu1 %v12431_v17  ;;  %v1525_v17 = vrot.slane %v1523_v3, 5  ;;  %v15448_v3 = vld [vmem:[%s20515_s1 + $0x480] ss:$16 sps:$4 sm:$0xff]  }
  0xb8   : > { %1102 = vmatprep.mubr.bf16.mxu0 %v12434_v20  ;;  %1295 = vmatprep.mubr.bf16.mxu1 %v12434_v20  ;;  %v1531_v20 = vrot.slane %v1529_v6, 5 }
  0xb9   : > { %v1526_v47 = vor.u32 %v1525_v17, %v1522_v16 }
  0xba   : > { %v1536_v30 = vor.u32 %v1535_v21, %v1531_v20  ;;  %v15465_v21 = vld [vmem:[%s20515_s1 + $0x4ac] ss:$16 sps:$4 sm:$0xff]  }
  0xbb   : > { %v1527_v41 = vrot.slane %v1526_v47, 4 }
  0xbc   : > { %v1537_v44 = vrot.slane %v1536_v30, 4  ;;  %v16677_v30 = vld [vmem:[%s17008_s29 + $0x98] sm:$0xff] }
  0xbd   : > { %v1605_v32 = vshrl.u32 %v16677_v30, 16 }
  0xbf   : > { %1103 = vmatmul.mubr.bf16.gmra.mrb[56].mxu0 %v12433_v34  ;;  %1296 = vmatmul.mubr.bf16.gmra.mrb[56].mxu1 %v12433_v34  ;;  %v1553_v34 = vshll.u32 %v17178_v38, 16  ;;  %v352_v38 = vld [vmem:[%s17008_s29 + $0x70] sm:$0x11] }
  0xc0   : > { %1112 = vmatprep.mubr.bf16.mxu0 %v12436_v39  ;;  %1305 = vmatprep.mubr.bf16.mxu1 %v12436_v39  ;;  %v1539_v39 = vshll.u32 %v349_v19, 16  ;;  %v1563_v1 = vshll.u32 %v352_v38, 16  ;;  %v16676_v19 = vld [vmem:[%s17008_s29 + $0x90] sm:$0xff]  ;;  %v1607_v38 = vrot.slane %v1605_v32, 4  ;;  %v15495_v32 = vld [vmem:[%s20515_s1 + $0x54c] ss:$16 sps:$4 sm:$0xff]  }
  0xc1   : > { %v1555_v53 = vrot.slane %v1553_v34, 5  ;;  %v1595_v46 = vshll.u32 %v16676_v19, 16 }
  0xc2   : > { %v1541_v51 = vrot.slane %v1539_v39, 5  ;;  %v1565_v17 = vrot.slane %v1563_v1, 5  ;;  %v15471_v39 = vld [vmem:[%s20515_s1 + $0x4cc] ss:$16 sps:$4 sm:$0xff]  }
  0xc3   : > { %v1560_v14 = vor.u32 %v1559_v54, %v1555_v53  ;;  %v1556_v22 = vsel %vm17355_vm2, %v1551_v9, %v1555_v53  ;;  %v15477_v53 = vld [vmem:[%s20515_s1 + $0x4ec] ss:$16 sps:$4 sm:$0xff]  }
  0xc4   : > { %v15483_v1 = vld [vmem:[%s20515_s1 + $0x50c] ss:$16 sps:$4 sm:$0xff]  }
  0xc5   : > { %v1561_v16 = vrot.slane %v1560_v14, 4  ;;  %v15472_v14 = vld [vmem:[%s20515_s1 + $0x500] ss:$16 sps:$4 sm:$0xff]  }
  0xc7   : > { %1113 = vmatmul.mubr.bf16.gmra.mrb[60].mxu0 %v12435_v57  ;;  %1306 = vmatmul.mubr.bf16.gmra.mrb[60].mxu1 %v12435_v57  ;;  %v1571_v57 = vshll.u32 %v17206_v50, 16  ;;  %v1532_v50 = vsel %vm17355_vm2, %v1527_v41, %v1531_v20  ;;  %v1592_v20 = vshrl.u32 %v16676_v19, 16  ;;  %v1566_v47 = vsel %vm17355_vm2, %v1561_v16, %v1565_v17  ;;  %v15478_v16 = vld [vmem:[%s20515_s1 + $0x520] ss:$16 sps:$4 sm:$0xff]   ;;  %v15489_v17 = vld [vmem:[%s20515_s1 + $0x52c] ss:$16 sps:$4 sm:$0xff]  }
  0xc8   : > { %2376 = vmatprep.mubr.bf16.mxu0 %v12566_v58  ;;  %2569 = vmatprep.mubr.bf16.mxu1 %v12566_v58  ;;  %v1577_v58 = vshll.u32 %v17212_v52, 16  ;;  %v1542_v52 = vsel %vm17355_vm2, %v1537_v44, %v1541_v51  ;;  %v12574_v4 = vcombine.high %v1556_v22, %v1566_v47  ;;  %v1597_v41 = vrot.slane %v1595_v46, 5  ;;  %v15466_v51 = vld [vmem:[%s20515_s1 + $0x4e0] ss:$16 sps:$4 sm:$0xff]   ;;  %v16681_v46 = vld [vmem:[%s17008_s29 + $0xc8] sm:$0xff] }
  0xc9   : > { %v1573_v6 = vrot.slane %v1571_v57, 5  ;;  %v12572_v8 = vcombine.high %v1532_v50, %v1542_v52  ;;  %v12571_v34 = vcombine.low %v1532_v50, %v1542_v52  ;;  %v15474_v57 = vld [vmem:[%s20515_s1 + $0x504] ss:$16 sps:$4 sm:$0xff]   ;;  %v12573_v50 = vcombine.low %v1556_v22, %v1566_v47 }
  0xca   : > { %v1579_v11 = vrot.slane %v1577_v58, 5  ;;  %v15475_v58 = vld [vmem:[%s20515_s1 + $0x4e8] ss:$16 sps:$4 sm:$0xff]   ;;  %v1613_v52 = vrot.slane %v1611_v48, 5  ;;  %v364_v47 = vld [vmem:[%s17008_s29 + $0xd0] sm:$0x11] }
  0xcf   : > { %2377 = vmatmul.mubr.bf16.vlgmr.msra.gmra.mrb[0].mxu0 %v12565_v12  ;;  %2570 = vmatmul.mubr.bf16.vlgmr.msra.gmra.mrb[0].mxu1 %v12565_v12  ;;  %v15456_v12 = vld [vmem:[%s20515_s1 + $0x4a4] ss:$16 sps:$4 sm:$0xff]  }
  0xd0   : > { %3503 = vmatpush1.bf16.msra.mxu0 %v15427_v25  ;;  %2386 = vmatprep.mubr.bf16.mxu0 %v12568_v26  ;;  %v1583_v25 = vrot.slane %v1581_v63, 4 }
  0xd1   : > { %2579 = vmatprep.mubr.bf16.mxu1 %v12568_v26  ;;  %3504 = vmatprep.subr.bf16.mxu0 %v15432_v13  ;;  %v15457_v13 = vld [vmem:[%s20515_s1 + $0x488] ss:$16 sps:$4 sm:$0xff]   ;;  %v1574_v26 = vor.u32 %v1573_v6, %v1570_v15 }
  0xd2   : > { %3696 = vmatpush1.bf16.msra.mxu1 %v15433_v18  ;;  %v15454_v18 = vld [vmem:[%s20515_s1 + $0x4a0] ss:$16 sps:$4 sm:$0xff]   ;;  %v1584_v23 = vor.u32 %v1583_v25, %v1579_v11 }
  0xd3   : > { %3697 = vmatprep.subr.bf16.mxu1 %v15441_v29  ;;  %v1587_v29 = vshll.u32 %v355_v10, 16  ;;  %v1575_v35 = vrot.slane %v1574_v26, 4 }
  0xd4   : > { %3505 = vmatpush1.bf16.msra.mxu0 %v15430_v24  ;;  %v15462_v24 = vld [vmem:[%s20515_s1 + $0x4c4] ss:$16 sps:$4 sm:$0xff]  }
  0xd5   : > { %3506 = vmatprep.subr.bf16.mxu0 %v15438_v27  ;;  %v15463_v27 = vld [vmem:[%s20515_s1 + $0x4a8] ss:$16 sps:$4 sm:$0xff]   ;;  %v1589_v44 = vrot.slane %v1587_v29, 5  ;;  %v1580_v54 = vsel %vm17355_vm2, %v1575_v35, %v1579_v11 }
  0xd6   : > { %3698 = vmatpush1.bf16.msra.mxu1 %v15439_v31  ;;  %v1601_v31 = vshll.u32 %v16677_v30, 16 }
  0xd7   : > { %2387 = vmatmul.mubr.bf16.gmra.mrb[4].mxu0 %v12567_v40  ;;  %2580 = vmatmul.mubr.bf16.gmra.mrb[4].mxu1 %v12567_v40  ;;  %v1585_v40 = vrot.slane %v1584_v23, 4 }
  0xd8   : > { %2396 = vmatprep.mubr.bf16.mxu0 %v12570_v43  ;;  %2589 = vmatprep.mubr.bf16.mxu1 %v12570_v43  ;;  %v15469_v43 = vld [vmem:[%s20515_s1 + $0x4c8] ss:$16 sps:$4 sm:$0xff]  }
  0xd9   : > { %3507 = vmatpush1.bf16.msra.mxu0 %v15436_v36  ;;  %3699 = vmatprep.subr.bf16.mxu1 %v15447_v42  ;;  %v1594_v36 = vrot.slane %v1592_v20, 4  ;;  %v15468_v42 = vld [vmem:[%s20515_s1 + $0x4e4] ss:$16 sps:$4 sm:$0xff]  }
  0xda   : > { %3508 = vmatprep.subr.bf16.mxu0 %v15444_v45  ;;  %3700 = vmatpush1.bf16.msra.mxu1 %v15445_v49  ;;  %v1603_v45 = vrot.slane %v1601_v31, 5  ;;  %v1616_v49 = vshrl.u32 %v16678_v5, 16  ;;  %v15486_v20 = vld [vmem:[%s20515_s1 + $0x544] ss:$16 sps:$4 sm:$0xff]   ;;  %v15484_v31 = vld [vmem:[%s20515_s1 + $0x540] ss:$16 sps:$4 sm:$0xff]  }
  0xdb   : > { %3701 = vmatprep.subr.bf16.mxu1 %v15453_v59  ;;  %v1598_v55 = vor.u32 %v1597_v41, %v1594_v36  ;;  %v1590_v59 = vsel %vm17355_vm2, %v1585_v40, %v1589_v44 }
  0xdc   : > { %v1608_v60 = vor.u32 %v1607_v38, %v1603_v45  ;;  %v1618_v15 = vrot.slane %v1616_v49, 4  ;;  %v12575_v29 = vcombine.low %v1580_v54, %v1590_v59  ;;  %v15501_v38 = vld [vmem:[%s20515_s1 + $0x56c] ss:$16 sps:$4 sm:$0xff]  }
  0xdd   : > { %3509 = vmatpush1.bf16.msra.mxu0 %v15442_v56  ;;  %v1619_v56 = vshll.u32 %v16678_v5, 16 }
  0xde   : > { %3510 = vmatprep.subr.bf16.mxu0 %v15450_v61  ;;  %3702 = vmatpush1.bf16.msra.mxu1 %v15451_v0  ;;  %v16679_v61 = vld [vmem:[%s17008_s29 + $0xb0] sm:$0xff]  ;;  %v361_v0 = vld [vmem:[%s17008_s29 + $0xb8] sm:$0x11]  ;;  %v1609_v9 = vrot.slane %v1608_v60, 4 }
  0xdf   : > { %2397 = vmatmul.mubr.bf16.gmra.mrb[8].mxu0 %v12569_v2  ;;  %2590 = vmatmul.mubr.bf16.gmra.mrb[8].mxu1 %v12569_v2  ;;  %v1625_v62 = vshll.u32 %v16679_v61, 16  ;;  %v1629_v63 = vshrl.u32 %v16679_v61, 16  ;;  %v12576_v2 = vcombine.high %v1580_v54, %v1590_v59  ;;  %v1621_v6 = vrot.slane %v1619_v56, 5  ;;  %v16683_v56 = vld [vmem:[%s17008_s29 + $0xe0] sm:$0xff]  ;;  %v367_v61 = vld [vmem:[%s17008_s29 + $0xe8] sm:$0x11] }
  0xe0   : > { %2406 = vmatprep.mubr.bf16.mxu0 %v12572_v8  ;;  %2599 = vmatprep.mubr.bf16.mxu1 %v12572_v8  ;;  %v15481_v8 = vld [vmem:[%s20515_s1 + $0x508] ss:$16 sps:$4 sm:$0xff]   ;;  %v1635_v25 = vshll.u32 %v361_v0, 16  ;;  %v1614_v22 = vsel %vm17355_vm2, %v1609_v9, %v1613_v52 }
  0xe1   : > { %3511 = vmatpush1.bf16.msra.mxu0 %v15448_v3  ;;  %3703 = vmatprep.subr.bf16.mxu1 %v15459_v7  ;;  %v1599_v3 = vrot.slane %v1598_v55, 4  ;;  %v15480_v7 = vld [vmem:[%s20515_s1 + $0x524] ss:$16 sps:$4 sm:$0xff]   ;;  %v1627_v10 = vrot.slane %v1625_v62, 5  ;;  %v1631_v11 = vrot.slane %v1629_v63, 4 }
  0xe2   : > { %3512 = vmatprep.subr.bf16.mxu0 %v15456_v12  ;;  %3704 = vmatpush1.bf16.msra.mxu1 %v15457_v13  ;;  %v16680_v12 = vld [vmem:[%s17008_s29 + $0xc0] sm:$0xff]  ;;  %v1637_v30 = vrot.slane %v1635_v25, 5  ;;  %v15507_v63 = vld [vmem:[%s20515_s1 + $0x58c] ss:$16 sps:$4 sm:$0xff]  }
  0xe3   : > { %3705 = vmatprep.subr.bf16.mxu1 %v15465_v21  ;;  %v1640_v13 = vshrl.u32 %v16680_v12, 16  ;;  %v1604_v26 = vsel %vm17355_vm2, %v1599_v3, %v1603_v45  ;;  %v1643_v19 = vshll.u32 %v16680_v12, 16  ;;  %v15487_v21 = vld [vmem:[%s20515_s1 + $0x528] ss:$16 sps:$4 sm:$0xff]   ;;  %v1632_v23 = vor.u32 %v1631_v11, %v1627_v10  ;;  %v15490_v45 = vld [vmem:[%s20515_s1 + $0x560] ss:$16 sps:$4 sm:$0xff]  }
  0xe4   : > { %v12578_v33 = vcombine.high %v1604_v26, %v1614_v22  ;;  %v12577_v59 = vcombine.low %v1604_v26, %v1614_v22  ;;  %v15496_v62 = vld [vmem:[%s20515_s1 + $0x580] ss:$16 sps:$4 sm:$0xff]   ;;  %v15513_v11 = vld [vmem:[%s20515_s1 + $0x5ac] ss:$16 sps:$4 sm:$0xff]  }
  0xe5   : > { %3513 = vmatpush1.bf16.msra.mxu0 %v15454_v18  ;;  %v1622_v18 = vor.u32 %v1621_v6, %v1618_v15  ;;  %v1642_v35 = vrot.slane %v1640_v13, 4  ;;  %v1633_v40 = vrot.slane %v1632_v23, 4  ;;  %v1683_v13 = vshll.u32 %v367_v61, 16  ;;  %v370_v22 = vld [vmem:[%s17008_s29 + $0x100] sm:$0x11] }
  0xe6   : > { %3514 = vmatprep.subr.bf16.mxu0 %v15462_v24  ;;  %3706 = vmatpush1.bf16.msra.mxu1 %v15463_v27  ;;  %v1649_v24 = vshll.u32 %v16681_v46, 16  ;;  %v1653_v27 = vshrl.u32 %v16681_v46, 16 }
  0xe7   : > { %2407 = vmatmul.mubr.bf16.gmra.mrb[12].mxu0 %v12571_v34  ;;  %2600 = vmatmul.mubr.bf16.gmra.mrb[12].mxu1 %v12571_v34  ;;  %v1623_v34 = vrot.slane %v1622_v18, 4  ;;  %v1638_v54 = vsel %vm17355_vm2, %v1633_v40, %v1637_v30  ;;  %v16686_v40 = vld [vmem:[%s17008_s29 + $0x108] sm:$0xff] }
  0xe8   : > { %2416 = vmatprep.mubr.bf16.mxu0 %v12574_v4  ;;  %2609 = vmatprep.mubr.bf16.mxu1 %v12574_v4  ;;  %v15493_v4 = vld [vmem:[%s20515_s1 + $0x548] ss:$16 sps:$4 sm:$0xff]   ;;  %v1651_v36 = vrot.slane %v1649_v24, 5  ;;  %v1655_v41 = vrot.slane %v1653_v27, 4  ;;  %v15508_v27 = vld [vmem:[%s20515_s1 + $0x5c0] ss:$16 sps:$4 sm:$0xff]  }
  0xe9   : > { %3515 = vmatpush1.bf16.msra.mxu0 %v15460_v37  ;;  %3707 = vmatprep.subr.bf16.mxu1 %v15471_v39  ;;  %v1645_v37 = vrot.slane %v1643_v19, 5  ;;  %v15492_v39 = vld [vmem:[%s20515_s1 + $0x564] ss:$16 sps:$4 sm:$0xff]   ;;  %v1628_v48 = vsel %vm17355_vm2, %v1623_v34, %v1627_v10  ;;  %v15502_v10 = vld [vmem:[%s20515_s1 + $0x5a0] ss:$16 sps:$4 sm:$0xff]   ;;  %v16685_v19 = vld [vmem:[%s17008_s29 + $0xf8] sm:$0xff] }
  0xea   : > { %3516 = vmatprep.subr.bf16.mxu0 %v15468_v42  ;;  %3708 = vmatpush1.bf16.msra.mxu1 %v15469_v43  ;;  %v1659_v42 = vshll.u32 %v364_v47, 16  ;;  %v16682_v43 = vld [vmem:[%s17008_s29 + $0xd8] sm:$0xff]  ;;  %v1656_v55 = vor.u32 %v1655_v41, %v1651_v36  ;;  %v12580_v0 = vcombine.high %v1628_v48, %v1638_v54  ;;  %v12579_v23 = vcombine.low %v1628_v48, %v1638_v54  ;;  %v15514_v41 = vld [vmem:[%s20515_s1 + $0x5e0] ss:$16 sps:$4 sm:$0xff]  }
  0xeb   : > { %3709 = vmatprep.subr.bf16.mxu1 %v15477_v53  ;;  %v1664_v44 = vshrl.u32 %v16682_v43, 16  ;;  %v1646_v5 = vor.u32 %v1645_v37, %v1642_v35  ;;  %v1667_v49 = vshll.u32 %v16682_v43, 16  ;;  %v15499_v53 = vld [vmem:[%s20515_s1 + $0x568] ss:$16 sps:$4 sm:$0xff]   ;;  %v15519_v47 = vld [vmem:[%s20515_s1 + $0x5cc] ss:$16 sps:$4 sm:$0xff]  }
  0xec   : > { %v1661_v60 = vrot.slane %v1659_v42, 5  ;;  %v1657_v3 = vrot.slane %v1656_v55, 4  ;;  %v15522_v42 = vld [vmem:[%s20515_s1 + $0x5ec] ss:$16 sps:$4 sm:$0xff]  }
  0xed   : > { %3517 = vmatpush1.bf16.msra.mxu0 %v15466_v51  ;;  %v15498_v51 = vld [vmem:[%s20515_s1 + $0x584] ss:$16 sps:$4 sm:$0xff]   ;;  %v1666_v52 = vrot.slane %v1664_v44, 4  ;;  %v1715_v44 = vshll.u32 %v16686_v40, 16 }
  0xee   : > { %3518 = vmatprep.subr.bf16.mxu0 %v15474_v57  ;;  %3710 = vmatpush1.bf16.msra.mxu1 %v15475_v58  ;;  %v1673_v57 = vshll.u32 %v16683_v56, 16  ;;  %v1677_v58 = vshrl.u32 %v16683_v56, 16  ;;  %v1662_v26 = vsel %vm17355_vm2, %v1657_v3, %v1661_v60  ;;  %v17633_v56 = vld [vmem:[%s17008_s29 + $0x118] sm:$0x11] }
  0xef   : > { %2417 = vmatmul.mubr.bf16.gmra.mrb[16].mxu0 %v12573_v50  ;;  %2610 = vmatmul.mubr.bf16.gmra.mrb[16].mxu1 %v12573_v50  ;;  %v1647_v50 = vrot.slane %v1646_v5, 4  ;;  %v1717_v61 = vrot.slane %v1715_v44, 5  ;;  %v1731_v3 = vshll.u32 %v17633_v56, 16 }
  0xf0   : > { %2426 = vmatprep.mubr.bf16.mxu0 %v12576_v2  ;;  %2619 = vmatprep.mubr.bf16.mxu1 %v12576_v2  ;;  %v15505_v2 = vld [vmem:[%s20515_s1 + $0x588] ss:$16 sps:$4 sm:$0xff]   ;;  %v1675_v15 = vrot.slane %v1673_v57, 5  ;;  %v1679_v6 = vrot.slane %v1677_v58, 4  ;;  %v15531_v57 = vld [vmem:[%s20515_s1 + $0x60c] ss:$16 sps:$4 sm:$0xff]  }
  0xf1   : > { %3519 = vmatpush1.bf16.msra.mxu0 %v15472_v14  ;;  %3711 = vmatprep.subr.bf16.mxu1 %v15483_v1  ;;  %v1669_v14 = vrot.slane %v1667_v49, 5  ;;  %v15504_v1 = vld [vmem:[%s20515_s1 + $0x5a4] ss:$16 sps:$4 sm:$0xff]   ;;  %v1652_v25 = vsel %vm17355_vm2, %v1647_v50, %v1651_v36  ;;  %v1712_v36 = vshrl.u32 %v16686_v40, 16 }
  0xf2   : > { %3520 = vmatprep.subr.bf16.mxu0 %v15480_v7  ;;  %3712 = vmatpush1.bf16.msra.mxu1 %v15481_v8  ;;  %v16684_v7 = vld [vmem:[%s17008_s29 + $0xf0] sm:$0xff]  ;;  %v1680_v18 = vor.u32 %v1679_v6, %v1675_v15  ;;  %v12581_v54 = vcombine.low %v1652_v25, %v1662_v26  ;;  %v17639_v50 = vld [vmem:[%s17008_s29 + $0x120] sm:$0xff] }
  0xf3   : > { %3713 = vmatprep.subr.bf16.mxu1 %v15489_v17  ;;  %v1688_v8 = vshrl.u32 %v16684_v7, 16  ;;  %v1691_v9 = vshll.u32 %v16684_v7, 16  ;;  %v1670_v12 = vor.u32 %v1669_v14, %v1666_v52  ;;  %v15511_v17 = vld [vmem:[%s20515_s1 + $0x5a8] ss:$16 sps:$4 sm:$0xff]   ;;  %v17628_v49 = vld [vmem:[%s17008_s29 + $0x110] sm:$0xff]  ;;  %v1714_v60 = vrot.slane %v1712_v36, 4 }
  0xf4   : > { %v1681_v34 = vrot.slane %v1680_v18, 4  ;;  %v1736_v52 = vshrl.u32 %v17639_v50, 16  ;;  %v1739_v14 = vshll.u32 %v17639_v50, 16  ;;  %v17649_v7 = vld [vmem:[%s17008_s29 + $0x128] sm:$0xff] }
  0xf5   : > { %3521 = vmatpush1.bf16.msra.mxu0 %v15478_v16  ;;  %v15510_v16 = vld [vmem:[%s20515_s1 + $0x5c4] ss:$16 sps:$4 sm:$0xff]   ;;  %v1690_v46 = vrot.slane %v1688_v8, 4  ;;  %v1693_v24 = vrot.slane %v1691_v9, 5  ;;  %v1671_v30 = vrot.slane %v1670_v12, 4  ;;  %v1745_v8 = vshll.u32 %v17649_v7, 16 }
  0xf6   : > { %3522 = vmatprep.subr.bf16.mxu0 %v15486_v20  ;;  %3714 = vmatpush1.bf16.msra.mxu1 %v15487_v21  ;;  %v1697_v20 = vshll.u32 %v16685_v19, 16  ;;  %v1701_v21 = vshrl.u32 %v16685_v19, 16  ;;  %v1749_v9 = vshrl.u32 %v17649_v7, 16  ;;  %v1741_v12 = vrot.slane %v1739_v14, 5 }
  0xf7   : > { %2427 = vmatmul.mubr.bf16.gmra.mrb[20].mxu0 %v12575_v29  ;;  %2620 = vmatmul.mubr.bf16.gmra.mrb[20].mxu1 %v12575_v29  ;;  %v12582_v29 = vcombine.high %v1652_v25, %v1662_v26  ;;  %v1676_v43 = vsel %vm17355_vm2, %v1671_v30, %v1675_v15  ;;  %v1738_v25 = vrot.slane %v1736_v52, 4  ;;  %v1747_v18 = vrot.slane %v1745_v8, 5 }
  0xf8   : > { %2436 = vmatprep.mubr.bf16.mxu0 %v12578_v33  ;;  %2629 = vmatprep.mubr.bf16.mxu1 %v12578_v33  ;;  %v15517_v33 = vld [vmem:[%s20515_s1 + $0x5c8] ss:$16 sps:$4 sm:$0xff]   ;;  %v1699_v35 = vrot.slane %v1697_v20, 5  ;;  %v1703_v37 = vrot.slane %v1701_v21, 4  ;;  %v1751_v19 = vrot.slane %v1749_v9, 4 }
  0xf9   : > { %3523 = vmatpush1.bf16.msra.mxu0 %v15484_v31  ;;  %3715 = vmatprep.subr.bf16.mxu1 %v15495_v32  ;;  %v1685_v31 = vrot.slane %v1683_v13, 5  ;;  %v15516_v32 = vld [vmem:[%s20515_s1 + $0x5e4] ss:$16 sps:$4 sm:$0xff]   ;;  %v1742_v20 = vor.u32 %v1741_v12, %v1738_v25 }
  0xfa   : > { %3524 = vmatprep.subr.bf16.mxu0 %v15492_v39  ;;  %3716 = vmatpush1.bf16.msra.mxu1 %v15493_v4  ;;  %v1694_v39 = vor.u32 %v1693_v24, %v1690_v46  ;;  %v1707_v4 = vshll.u32 %v370_v22, 16  ;;  %v1704_v5 = vor.u32 %v1703_v37, %v1699_v35  ;;  %v17672_v37 = vld [vmem:[%s17008_s29 + $0x148] sm:$0x11]  ;;  %v17703_v25 = vld [vmem:[%s17008_s29 + $0x170] sm:$0xff] }
  0xfb   : > { %3717 = vmatprep.subr.bf16.mxu1 %v15501_v38  ;;  %v15525_v38 = vld [vmem:[%s20515_s1 + $0x604] ss:$16 sps:$4 sm:$0xff]   ;;  %v1686_v48 = vsel %vm17355_vm2, %v1681_v34, %v1685_v31  ;;  %v1817_v12 = vshll.u32 %v17703_v25, 16 }
  0xfc   : > { %v1695_v55 = vrot.slane %v1694_v39, 4  ;;  %v12584_v58 = vcombine.high %v1676_v43, %v1686_v48 }
  0xfd   : > { %3525 = vmatpush1.bf16.msra.mxu0 %v15490_v45  ;;  %v15520_v45 = vld [vmem:[%s20515_s1 + $0x5e8] ss:$16 sps:$4 sm:$0xff]  }
  0xfe   : > { %3526 = vmatprep.subr.bf16.mxu0 %v15498_v51  ;;  %3718 = vmatpush1.bf16.msra.mxu1 %v15499_v53  ;;  %v1721_v51 = vshll.u32 %v17628_v49, 16  ;;  %v1725_v53 = vshrl.u32 %v17628_v49, 16 }
  0xff   : > { %2437 = vmatmul.mubr.bf16.gmra.mrb[24].mxu0 %v12577_v59  ;;  %2630 = vmatmul.mubr.bf16.gmra.mrb[24].mxu1 %v12577_v59  ;;  %v1709_v59 = vrot.slane %v1707_v4, 5 }
 0x100   : > { %2446 = vmatprep.mubr.bf16.mxu0 %v12580_v0  ;;  %2639 = vmatprep.mubr.bf16.mxu1 %v12580_v0  ;;  %v1727_v0 = vrot.slane %v1725_v53, 4 }
 0x101   : > { %3527 = vmatpush1.bf16.msra.mxu0 %v15496_v62  ;;  %3719 = vmatprep.subr.bf16.mxu1 %v15507_v63  ;;  %v1705_v62 = vrot.slane %v1704_v5, 4  ;;  %v1723_v63 = vrot.slane %v1721_v51, 5 }
 0x102   : > { %3528 = vmatprep.subr.bf16.mxu0 %v15504_v1  ;;  %3720 = vmatpush1.bf16.msra.mxu1 %v15505_v2  ;;  %v1700_v1 = vsel %vm17355_vm2, %v1695_v55, %v1699_v35  ;;  %v1718_v2 = vor.u32 %v1717_v61, %v1714_v60  ;;  %v1779_v55 = vshll.u32 %v17672_v37, 16 }
 0x103   : > { %3721 = vmatprep.subr.bf16.mxu1 %v15513_v11  ;;  %v1710_v15 = vsel %vm17355_vm2, %v1705_v62, %v1709_v59  ;;  %v1728_v6 = vor.u32 %v1727_v0, %v1723_v63  ;;  %v17654_v11 = vld [vmem:[%s17008_s29 + $0x130] sm:$0x11] }
 0x104   : > { %v12586_v13 = vcombine.high %v1700_v1, %v1710_v15  ;;  %v1755_v22 = vshll.u32 %v17654_v11, 16  ;;  %v1781_v14 = vrot.slane %v1779_v55, 5 }
 0x105   : > { %3529 = vmatpush1.bf16.msra.mxu0 %v15502_v10  ;;  %v12583_v10 = vcombine.low %v1676_v43, %v1686_v48  ;;  %v1729_v26 = vrot.slane %v1728_v6, 4  ;;  %v17696_v6 = vld [vmem:[%s17008_s29 + $0x168] sm:$0xff] }
 0x106   : > { %3530 = vmatprep.subr.bf16.mxu0 %v15510_v16  ;;  %3722 = vmatpush1.bf16.msra.mxu1 %v15511_v17  ;;  %v1719_v16 = vrot.slane %v1718_v2, 4  ;;  %v1733_v17 = vrot.slane %v1731_v3, 5  ;;  %v1757_v35 = vrot.slane %v1755_v22, 5  ;;  %v1808_v8 = vshrl.u32 %v17696_v6, 16 }
 0x107   : > { %2447 = vmatmul.mubr.bf16.gmra.mrb[28].mxu0 %v12579_v23  ;;  %2640 = vmatmul.mubr.bf16.gmra.mrb[28].mxu1 %v12579_v23  ;;  %v17660_v23 = vld [vmem:[%s17008_s29 + $0x138] sm:$0xff] }
 0x108   : > { %2456 = vmatprep.mubr.bf16.mxu0 %v12582_v29  ;;  %2649 = vmatprep.mubr.bf16.mxu1 %v12582_v29  ;;  %v1724_v21 = vsel %vm17355_vm2, %v1719_v16, %v1723_v63  ;;  %v1760_v46 = vshrl.u32 %v17660_v23, 16  ;;  %v1763_v24 = vshll.u32 %v17660_v23, 16  ;;  %v17667_v29 = vld [vmem:[%s17008_s29 + $0x140] sm:$0xff] }
 0x109   : > { %3531 = vmatpush1.bf16.msra.mxu0 %v15508_v27  ;;  %3723 = vmatprep.subr.bf16.mxu1 %v15519_v47  ;;  %v1734_v27 = vsel %vm17355_vm2, %v1729_v26, %v1733_v17  ;;  %v1752_v47 = vor.u32 %v1751_v19, %v1747_v18  ;;  %v1769_v30 = vshll.u32 %v17667_v29, 16  ;;  %v1773_v31 = vshrl.u32 %v17667_v29, 16 }
 0x10a   : > { %3532 = vmatprep.subr.bf16.mxu0 %v15516_v32  ;;  %3724 = vmatpush1.bf16.msra.mxu1 %v15517_v33  ;;  %v12585_v32 = vcombine.low %v1700_v1, %v1710_v15  ;;  %v1743_v33 = vrot.slane %v1742_v20, 4  ;;  %v12588_v34 = vcombine.high %v1724_v21, %v1734_v27  ;;  %v1762_v39 = vrot.slane %v1760_v46, 4  ;;  %v17708_v20 = vld [vmem:[%s17008_s29 + $0x178] sm:$0x11] }
 0x10b   : > { %3725 = vmatprep.subr.bf16.mxu1 %v15522_v42  ;;  %v1765_v4 = vrot.slane %v1763_v24, 5  ;;  %v1753_v40 = vrot.slane %v1752_v47, 4  ;;  %v1771_v36 = vrot.slane %v1769_v30, 5  ;;  %v17675_v42 = vld [vmem:[%s17008_s29 + $0x150] sm:$0xff]  ;;  %v1819_v46 = vrot.slane %v1817_v12, 5 }
 0x10c   : > { %v1784_v43 = vshrl.u32 %v17675_v42, 16  ;;  %v1787_v44 = vshll.u32 %v17675_v42, 16  ;;  %v1748_v51 = vsel %vm17355_vm2, %v1743_v33, %v1747_v18  ;;  %v15523_v12 = vld [vmem:[%s20515_s1 + $0x600] ss:$16 sps:$4 sm:$0xff]  }
 0x10d   : > { %3533 = vmatpush1.bf16.msra.mxu0 %v15514_v41  ;;  %v1775_v41 = vrot.slane %v1773_v31, 4  ;;  %v1758_v53 = vsel %vm17355_vm2, %v1753_v40, %v1757_v35 }
 0x10e   : > { %3726 = vmatpush1.bf16.msra.mxu1 %v15520_v45  ;;  %4613 = vmatprep.subr.bf16.mxu0 %v15525_v38  ;;  %v1766_v45 = vor.u32 %v1765_v4, %v1762_v39  ;;  %v17680_v38 = vld [vmem:[%s17008_s29 + $0x158] sm:$0xff]  ;;  %v1786_v59 = vrot.slane %v1784_v43, 4  ;;  %v1789_v60 = vrot.slane %v1787_v44, 5  ;;  %v12590_v61 = vcombine.high %v1748_v51, %v1758_v53 }
 0x10f   : > { %2457 = vmatmul.mubr.bf16.gmra.mrb[32].mxu0 %v12581_v54  ;;  %2650 = vmatmul.mubr.bf16.gmra.mrb[32].mxu1 %v12581_v54  ;;  %v1793_v48 = vshll.u32 %v17680_v38, 16  ;;  %v1797_v5 = vshrl.u32 %v17680_v38, 16  ;;  %v1776_v54 = vor.u32 %v1775_v41, %v1771_v36  ;;  %v12589_v16 = vcombine.low %v1748_v51, %v1758_v53  ;;  %v16696_v41 = vld [vmem:[%s17008_s29 + $0x8] sm:$0xff]  ;;  %v16698_v53 = vld [vmem:[%s17008_s29 + $0x10] sm:$0x11] }
 0x110   : > { %2466 = vmatprep.mubr.bf16.mxu0 %v12584_v58  ;;  %2659 = vmatprep.mubr.bf16.mxu1 %v12584_v58  ;;  %v17690_v58 = vld [vmem:[%s17008_s29 + $0x160] sm:$0x11]  ;;  %v1767_v62 = vrot.slane %v1766_v45, 4  ;;  %v1790_v1 = vor.u32 %v1789_v60, %v1786_v59  ;;  %v2879_v43 = vrot.slane %v16696_v41, 5  ;;  %v16707_v41 = vld [vmem:[%s17008_s29 + $0x58] sm:$0x11] }
 0x111   : > { %4806 = vmatprep.subr.bf16.mxu1 %v15531_v57  ;;  %v12587_v57 = vcombine.low %v1724_v21, %v1734_v27  ;;  %v1795_v63 = vrot.slane %v1793_v48, 5  ;;  %v1799_v0 = vrot.slane %v1797_v5, 4  ;;  %v1777_v52 = vrot.slane %v1776_v54, 4  ;;  %v16697_v48 = vld [vmem:[%s17008_s29] sm:$0xff] }
 0x112   : > { %v1772_v2 = vsel %vm17355_vm2, %v1767_v62, %v1771_v36  ;;  %v1803_v15 = vshll.u32 %v17690_v58, 16  ;;  %v1791_v17 = vrot.slane %v1790_v1, 4  ;;  %v1810_v21 = vrot.slane %v1808_v8, 4  ;;  %v16699_v60 = vld [vmem:[%s17008_s29 + $0x20] sm:$0xff]  ;;  %v16701_v1 = vld [vmem:[%s17008_s29 + $0x28] sm:$0x11] }
 0x113   : > { %v1800_v3 = vor.u32 %v1799_v0, %v1795_v63  ;;  %v1782_v9 = vsel %vm17355_vm2, %v1777_v52, %v1781_v14  ;;  %v12661_v5 = vrot.slane %v16697_v48, 9  ;;  %v2881_v51 = vrot.slane %v2879_v43, 4  ;;  %v16700_v0 = vld [vmem:[%s17008_s29 + $0x18] sm:$0xff] }
 0x114   : > { %v12592_v26 = vcombine.high %v1772_v2, %v1782_v9  ;;  %v1805_v19 = vrot.slane %v1803_v15, 5  ;;  %v1796_v27 = vsel %vm17355_vm2, %v1791_v17, %v1795_v63  ;;  %v12591_v33 = vcombine.low %v1772_v2, %v1782_v9  ;;  %v16702_v8 = vld [vmem:[%s17008_s29 + $0x38] sm:$0xff]  ;;  %v16703_v17 = vld [vmem:[%s17008_s29 + $0x30] sm:$0xff] }
 0x115   : > { %v1801_v18 = vrot.slane %v1800_v3, 4  ;;  %v2882_v54 = vrot.slane %v16698_v53, 5  ;;  %v12662_v52 = vrot.slane %v16700_v0, 9  ;;  %v2889_v2 = vrot.slane %v16701_v1, 5  ;;  %v15541_v48 = vld [vmem:[%s20515_s1 + $0x648] ss:$16 sps:$4 sm:$0xff]  }
 0x116   : > { %v2893_v9 = vrot.slane %v16702_v8, 5  ;;  %v16709_v0 = vld [vmem:[%s17008_s29 + $0x60] sm:$0xff]  ;;  %v16710_v1 = vld [vmem:[%s17008_s29 + $0x70] sm:$0x11] }
 0x117   : > { %2467 = vmatmul.mubr.bf16.gmra.mrb[36].mxu0 %v12583_v10  ;;  %2660 = vmatmul.mubr.bf16.gmra.mrb[36].mxu1 %v12583_v10  ;;  %v1811_v10 = vshll.u32 %v17696_v6, 16  ;;  %v1806_v47 = vsel %vm17355_vm2, %v1801_v18, %v1805_v19  ;;  %v2883_v59 = vsel %vm17722_vm5, %v2881_v51, %v2882_v54  ;;  %v16704_v19 = vld [vmem:[%s17008_s29 + $0x40] sm:$0x11] }
 0x118   : > { %2476 = vmatprep.mubr.bf16.mxu0 %v12586_v13  ;;  %2669 = vmatprep.mubr.bf16.mxu1 %v12586_v13  ;;  %v1821_v13 = vshrl.u32 %v17703_v25, 16  ;;  %v12593_v44 = vcombine.low %v1796_v27, %v1806_v47  ;;  %v2895_v18 = vrot.slane %v2893_v9, 4  ;;  %v15538_v54 = vld [vmem:[%s20515_s1 + $0x660] ss:$16 sps:$4 sm:$0xff]   ;;  %v15552_v8 = vld [vmem:[%s20515_s1 + $0x6a4] ss:$16 sps:$4 sm:$0xff]  }
 0x119   : > { %v1813_v22 = vrot.slane %v1811_v10, 5 }
 0x11a   : > { %v1823_v24 = vrot.slane %v1821_v13, 4 }
 0x11b   : > { %v1814_v30 = vor.u32 %v1813_v22, %v1810_v21  ;;  %v2896_v21 = vrot.slane %v16704_v19, 5  ;;  %v15529_v22 = vld [vmem:[%s20515_s1 + $0x608] ss:$16 sps:$4 sm:$0xff]  }
 0x11c   : > { %v1824_v31 = vor.u32 %v1823_v24, %v1819_v46  ;;  %v15526_v24 = vld [vmem:[%s20515_s1 + $0x620] ss:$16 sps:$4 sm:$0xff]   ;;  %v15559_v19 = vld [vmem:[%s20515_s1 + $0x6a8] ss:$16 sps:$4 sm:$0xff]  }
 0x11d   : > { %v1815_v35 = vrot.slane %v1814_v30, 4  ;;  %v15534_v30 = vld [vmem:[%s20515_s1 + $0x644] ss:$16 sps:$4 sm:$0xff]  }
 0x11e   : > { %v1825_v39 = vrot.slane %v1824_v31, 4  ;;  %v16705_v31 = vld [vmem:[%s17008_s29 + $0x50] sm:$0xff] }
 0x11f   : > { %2477 = vmatmul.mubr.bf16.gmra.mrb[40].mxu0 %v12585_v32  ;;  %2670 = vmatmul.mubr.bf16.gmra.mrb[40].mxu1 %v12585_v32  ;;  %v1827_v32 = vshll.u32 %v17708_v20, 16  ;;  %v1820_v40 = vsel %vm17355_vm2, %v1815_v35, %v1819_v46  ;;  %v15537_v46 = vld [vmem:[%s20515_s1 + $0x62c] ss:$16 sps:$4 sm:$0xff]  }
 0x120   : > { %2486 = vmatprep.mubr.bf16.mxu0 %v12588_v34  ;;  %2679 = vmatprep.mubr.bf16.mxu1 %v12588_v34  ;;  %v12594_v34 = vcombine.high %v1796_v27, %v1806_v47  ;;  %v2897_v47 = vsel %vm17722_vm5, %v2895_v18, %v2896_v21  ;;  %v15558_v18 = vld [vmem:[%s20515_s1 + $0x6c4] ss:$16 sps:$4 sm:$0xff]  }
 0x121   : > { %v1829_v4 = vrot.slane %v1827_v32, 5  ;;  %v2900_v32 = vrot.slane %v16705_v31, 5  ;;  %v15556_v31 = vld [vmem:[%s20515_s1 + $0x6c0] ss:$16 sps:$4 sm:$0xff]  }
 0x123   : > { %v1830_v36 = vsel %vm17355_vm2, %v1825_v39, %v1829_v4  ;;  %v15532_v39 = vld [vmem:[%s20515_s1 + $0x640] ss:$16 sps:$4 sm:$0xff]   ;;  %v16706_v4 = vld [vmem:[%s17008_s29 + $0x48] sm:$0xff] }
 0x124   : > { %v12596_v45 = vcombine.high %v1820_v40, %v1830_v36  ;;  %v12595_v62 = vcombine.low %v1820_v40, %v1830_v36  ;;  %v12664_v40 = vrot.slane %v16706_v4, 9  ;;  %v2902_v36 = vrot.slane %v2900_v32, 4 }
 0x126   : > { %v2901_v51 = vsel %vm17722_vm5, %v12664_v40, %v2900_v32  ;;  %v15567_v32 = vld [vmem:[%s20515_s1 + $0x6cc] ss:$16 sps:$4 sm:$0xff]  }
 0x127   : > { %2487 = vmatmul.mubr.bf16.gmra.mrb[44].mxu0 %v12587_v57  ;;  %2680 = vmatmul.mubr.bf16.gmra.mrb[44].mxu1 %v12587_v57  ;;  %v2880_v57 = vsel %vm17722_vm5, %v12661_v5, %v2879_v43  ;;  %v2903_v43 = vrot.slane %v16707_v41, 5  ;;  %v15549_v5 = vld [vmem:[%s20515_s1 + $0x66c] ss:$16 sps:$4 sm:$0xff]   ;;  %v15562_v41 = vld [vmem:[%s20515_s1 + $0x6e0] ss:$16 sps:$4 sm:$0xff]  }
 0x128   : > { %2496 = vmatprep.mubr.bf16.mxu0 %v12590_v61  ;;  %2689 = vmatprep.mubr.bf16.mxu1 %v12590_v61  ;;  %v2886_v61 = vrot.slane %v16699_v60, 5  ;;  %v12742_v63 = vcombine.high %v2880_v57, %v2883_v59  ;;  %v12741_v10 = vcombine.low %v2880_v57, %v2883_v59  ;;  %v16708_v57 = vld [vmem:[%s17008_s29 + $0x68] sm:$0xff]  ;;  %v15546_v60 = vld [vmem:[%s20515_s1 + $0x684] ss:$16 sps:$4 sm:$0xff]   ;;  %v16714_v40 = vld [vmem:[%s17008_s29 + $0x98] sm:$0xff] }
 0x129   : > { %v2904_v53 = vsel %vm17722_vm5, %v2902_v36, %v2903_v43  ;;  %v2907_v59 = vrot.slane %v16708_v57, 5  ;;  %v2921_v36 = vrot.slane %v16714_v40, 5  ;;  %v15570_v43 = vld [vmem:[%s20515_s1 + $0x704] ss:$16 sps:$4 sm:$0xff]  }
 0x12a   : > { %v2888_v14 = vrot.slane %v2886_v61, 4  ;;  %v2887_v3 = vsel %vm17722_vm5, %v12662_v52, %v2886_v61  ;;  %v15547_v61 = vld [vmem:[%s20515_s1 + $0x668] ss:$16 sps:$4 sm:$0xff]   ;;  %v12665_v52 = vrot.slane %v16709_v0, 9  ;;  %v12747_v21 = vcombine.low %v2901_v51, %v2904_v53  ;;  %v16722_v40 = vld [vmem:[%s17008_s29 + $0xd0] sm:$0x11] }
 0x12c   : > { %v2890_v15 = vsel %vm17722_vm5, %v2888_v14, %v2889_v2  ;;  %v2909_v14 = vrot.slane %v2907_v59, 4  ;;  %v2910_v2 = vrot.slane %v16710_v1, 5 }
 0x12d   : > { %v12744_v13 = vcombine.high %v2887_v3, %v2890_v15 }
 0x12f   : > { %2497 = vmatmul.mubr.bf16.gmra.mrb[48].mxu0 %v12589_v16  ;;  %2690 = vmatmul.mubr.bf16.gmra.mrb[48].mxu1 %v12589_v16  ;;  %v15528_v16 = vld [vmem:[%s20515_s1 + $0x624] ss:$16 sps:$4 sm:$0xff]  }
 0x130   : > { %2506 = vmatprep.mubr.bf16.mxu0 %v12592_v26  ;;  %2699 = vmatprep.mubr.bf16.mxu1 %v12592_v26  ;;  %v12663_v26 = vrot.slane %v16703_v17, 9 }
 0x132   : > { %v2894_v27 = vsel %vm17722_vm5, %v12663_v26, %v2893_v9  ;;  %v15553_v9 = vld [vmem:[%s20515_s1 + $0x688] ss:$16 sps:$4 sm:$0xff]   ;;  %v15550_v26 = vld [vmem:[%s20515_s1 + $0x6a0] ss:$16 sps:$4 sm:$0xff]  }
 0x133   : > { %v12746_v35 = vcombine.high %v2894_v27, %v2897_v47 }
 0x137   : > { %2507 = vmatmul.mubr.bf16.gmra.mrb[52].mxu0 %v12591_v33  ;;  %2700 = vmatmul.mubr.bf16.gmra.mrb[52].mxu1 %v12591_v33  ;;  %v15535_v33 = vld [vmem:[%s20515_s1 + $0x628] ss:$16 sps:$4 sm:$0xff]  }
 0x138   : > { %2516 = vmatprep.mubr.bf16.mxu0 %v12594_v34  ;;  %2709 = vmatprep.mubr.bf16.mxu1 %v12594_v34  ;;  %v12743_v34 = vcombine.low %v2887_v3, %v2890_v15  ;;  %v15544_v3 = vld [vmem:[%s20515_s1 + $0x680] ss:$16 sps:$4 sm:$0xff]   ;;  %v15555_v15 = vld [vmem:[%s20515_s1 + $0x68c] ss:$16 sps:$4 sm:$0xff]  }
 0x13f   : > { %2517 = vmatmul.mubr.bf16.gmra.mrb[56].mxu0 %v12593_v44  ;;  %2710 = vmatmul.mubr.bf16.gmra.mrb[56].mxu1 %v12593_v44  ;;  %v15543_v44 = vld [vmem:[%s20515_s1 + $0x64c] ss:$16 sps:$4 sm:$0xff]  }
 0x140   : > { %2526 = vmatprep.mubr.bf16.mxu0 %v12596_v45  ;;  %2719 = vmatprep.mubr.bf16.mxu1 %v12596_v45  ;;  %v15540_v45 = vld [vmem:[%s20515_s1 + $0x664] ss:$16 sps:$4 sm:$0xff]  }
 0x147   : > { %2527 = vmatmul.mubr.bf16.gmra.mrb[60].mxu0 %v12595_v62  ;;  %2720 = vmatmul.mubr.bf16.gmra.mrb[60].mxu1 %v12595_v62  ;;  %v12745_v62 = vcombine.low %v2894_v27, %v2897_v47  ;;  %v16713_v47 = vld [vmem:[%s17008_s29 + $0x88] sm:$0x11] }
 0x148   : > { %3534 = vmatprep.mubr.bf16.mxu0 %v12742_v63  ;;  %3727 = vmatprep.mubr.bf16.mxu1 %v12742_v63  ;;  %v12748_v63 = vcombine.high %v2901_v51, %v2904_v53  ;;  %v2923_v53 = vrot.slane %v2921_v36, 4 }
 0x14f   : > { %3535 = vmatmul.mubr.bf16.vlgmr.msra.gmra.mrb[0].mxu0 %v12741_v10  ;;  %3728 = vmatmul.mubr.bf16.vlgmr.msra.gmra.mrb[0].mxu1 %v12741_v10  ;;  %v15561_v10 = vld [vmem:[%s20515_s1 + $0x6ac] ss:$16 sps:$4 sm:$0xff]  }
 0x150   : > { %4614 = vmatpush1.bf16.msra.mxu0 %v15523_v12  ;;  %3544 = vmatprep.mubr.bf16.mxu0 %v12744_v13  ;;  %v2908_v12 = vsel %vm17722_vm5, %v12665_v52, %v2907_v59  ;;  %v15568_v59 = vld [vmem:[%s20515_s1 + $0x700] ss:$16 sps:$4 sm:$0xff]  }
 0x151   : > { %3737 = vmatprep.mubr.bf16.mxu1 %v12744_v13  ;;  %4615 = vmatprep.subr.bf16.mxu0 %v15528_v16  ;;  %v2911_v13 = vsel %vm17722_vm5, %v2909_v14, %v2910_v2  ;;  %v16711_v16 = vld [vmem:[%s17008_s29 + $0x80] sm:$0xff]  ;;  %v16717_v14 = vld [vmem:[%s17008_s29 + $0xb0] sm:$0xff] }
 0x152   : > { %4807 = vmatpush1.bf16.msra.mxu1 %v15529_v22  ;;  %v2914_v17 = vrot.slane %v16711_v16, 5  ;;  %v12750_v22 = vcombine.high %v2908_v12, %v2911_v13  ;;  %v2928_v1 = vrot.slane %v16717_v14, 5  ;;  %v15574_v2 = vld [vmem:[%s20515_s1 + $0x720] ss:$16 sps:$4 sm:$0xff]   ;;  %v16719_v16 = vld [vmem:[%s17008_s29 + $0xb8] sm:$0x11] }
 0x153   : > { %4808 = vmatprep.subr.bf16.mxu1 %v15537_v46  ;;  %v16712_v46 = vld [vmem:[%s17008_s29 + $0x78] sm:$0xff]  ;;  %v16725_v14 = vld [vmem:[%s17008_s29 + $0xe8] sm:$0x11] }
 0x154   : > { %4616 = vmatpush1.bf16.msra.mxu0 %v15526_v24  ;;  %v12666_v24 = vrot.slane %v16712_v46, 9  ;;  %v2916_v27 = vrot.slane %v2914_v17, 4 }
 0x155   : > { %4617 = vmatprep.subr.bf16.mxu0 %v15534_v30  ;;  %v2917_v30 = vrot.slane %v16713_v47, 5 }
 0x156   : > { %4809 = vmatpush1.bf16.msra.mxu1 %v15535_v33  ;;  %v15564_v33 = vld [vmem:[%s20515_s1 + $0x6e4] ss:$16 sps:$4 sm:$0xff]  }
 0x157   : > { %3545 = vmatmul.mubr.bf16.gmra.mrb[4].mxu0 %v12743_v34  ;;  %3738 = vmatmul.mubr.bf16.gmra.mrb[4].mxu1 %v12743_v34  ;;  %v15565_v34 = vld [vmem:[%s20515_s1 + $0x6c8] ss:$16 sps:$4 sm:$0xff]   ;;  %v2918_v4 = vsel %vm17722_vm5, %v2916_v27, %v2917_v30  ;;  %v15586_v30 = vld [vmem:[%s20515_s1 + $0x760] ss:$16 sps:$4 sm:$0xff]  }
 0x158   : > { %3554 = vmatprep.mubr.bf16.mxu0 %v12746_v35  ;;  %3747 = vmatprep.mubr.bf16.mxu1 %v12746_v35  ;;  %v15573_v35 = vld [vmem:[%s20515_s1 + $0x6ec] ss:$16 sps:$4 sm:$0xff]  }
 0x159   : > { %4618 = vmatpush1.bf16.msra.mxu0 %v15532_v39  ;;  %4810 = vmatprep.subr.bf16.mxu1 %v15543_v44  ;;  %v2915_v39 = vsel %vm17722_vm5, %v12666_v24, %v2914_v17  ;;  %v15571_v44 = vld [vmem:[%s20515_s1 + $0x6e8] ss:$16 sps:$4 sm:$0xff]   ;;  %v2931_v17 = vrot.slane %v16719_v16, 5 }
 0x15a   : > { %4619 = vmatprep.subr.bf16.mxu0 %v15540_v45  ;;  %4811 = vmatpush1.bf16.msra.mxu1 %v15541_v48  ;;  %v12749_v45 = vcombine.low %v2908_v12, %v2911_v13  ;;  %v12752_v48 = vcombine.high %v2915_v39, %v2918_v4  ;;  %v2930_v13 = vrot.slane %v2928_v1, 4  ;;  %v16720_v27 = vld [vmem:[%s17008_s29 + $0xc8] sm:$0xff] }
 0x15b   : > { %4812 = vmatprep.subr.bf16.mxu1 %v15549_v5  ;;  %v16715_v5 = vld [vmem:[%s17008_s29 + $0x90] sm:$0xff]  ;;  %v2935_v47 = vrot.slane %v16720_v27, 5  ;;  %v16728_v27 = vld [vmem:[%s17008_s29 + $0x100] sm:$0x11] }
 0x15c   : > { %v12667_v51 = vrot.slane %v16715_v5, 9  ;;  %v2932_v24 = vsel %vm17722_vm5, %v2930_v13, %v2931_v17  ;;  %v16726_v13 = vld [vmem:[%s17008_s29 + $0xf8] sm:$0xff]  ;;  %v15610_v17 = vld [vmem:[%s20515_s1 + $0x7e0] ss:$16 sps:$4 sm:$0xff]  }
 0x15d   : > { %4620 = vmatpush1.bf16.msra.mxu0 %v15538_v54  ;;  %v16716_v54 = vld [vmem:[%s17008_s29 + $0xa0] sm:$0x11]  ;;  %v2949_v16 = vrot.slane %v16726_v13, 5  ;;  %v18036_v13 = vld [vmem:[%s17008_s29 + $0x30] sm:$0xff] }
 0x15e   : > { %4621 = vmatprep.subr.bf16.mxu0 %v15546_v60  ;;  %4813 = vmatpush1.bf16.msra.mxu1 %v15547_v61  ;;  %v2924_v57 = vrot.slane %v16716_v54, 5  ;;  %v15579_v60 = vld [vmem:[%s20515_s1 + $0x70c] ss:$16 sps:$4 sm:$0xff]   ;;  %v15576_v61 = vld [vmem:[%s20515_s1 + $0x724] ss:$16 sps:$4 sm:$0xff]   ;;  %v2922_v0 = vsel %vm17722_vm5, %v12667_v51, %v2921_v36  ;;  %v2938_v36 = vrot.slane %v16722_v40, 5 }
 0x15f   : > { %3555 = vmatmul.mubr.bf16.gmra.mrb[8].mxu0 %v12745_v62  ;;  %3748 = vmatmul.mubr.bf16.gmra.mrb[8].mxu1 %v12745_v62  ;;  %v15577_v62 = vld [vmem:[%s20515_s1 + $0x708] ss:$16 sps:$4 sm:$0xff]  }
 0x160   : > { %3564 = vmatprep.mubr.bf16.mxu0 %v12748_v63  ;;  %3757 = vmatprep.mubr.bf16.mxu1 %v12748_v63  ;;  %v15585_v63 = vld [vmem:[%s20515_s1 + $0x72c] ss:$16 sps:$4 sm:$0xff]   ;;  %v2925_v52 = vsel %vm17722_vm5, %v2923_v53, %v2924_v57  ;;  %v16723_v53 = vld [vmem:[%s17008_s29 + $0xe0] sm:$0xff] }
 0x161   : > { %4622 = vmatpush1.bf16.msra.mxu0 %v15544_v3  ;;  %4814 = vmatprep.subr.bf16.mxu1 %v15555_v15  ;;  %v15582_v3 = vld [vmem:[%s20515_s1 + $0x744] ss:$16 sps:$4 sm:$0xff]   ;;  %v15583_v15 = vld [vmem:[%s20515_s1 + $0x728] ss:$16 sps:$4 sm:$0xff]   ;;  %v2942_v54 = vrot.slane %v16723_v53, 5 }
 0x162   : > { %4623 = vmatprep.subr.bf16.mxu0 %v15552_v8  ;;  %4815 = vmatpush1.bf16.msra.mxu1 %v15553_v9  ;;  %v12751_v8 = vcombine.low %v2915_v39, %v2918_v4  ;;  %v12754_v9 = vcombine.high %v2922_v0, %v2925_v52  ;;  %v2937_v4 = vrot.slane %v2935_v47, 4  ;;  %v15598_v57 = vld [vmem:[%s20515_s1 + $0x7a0] ss:$16 sps:$4 sm:$0xff]  }
 0x163   : > { %4816 = vmatprep.subr.bf16.mxu1 %v15561_v10  ;;  %v16718_v10 = vld [vmem:[%s17008_s29 + $0xa8] sm:$0xff] }
 0x164   : > { %v12668_v12 = vrot.slane %v16718_v10, 9  ;;  %v2939_v51 = vsel %vm17722_vm5, %v2937_v4, %v2938_v36  ;;  %v2959_v36 = vrot.slane %v17633_v56, 5 }
 0x165   : > { %4624 = vmatpush1.bf16.msra.mxu0 %v15550_v26  ;;  %v15580_v26 = vld [vmem:[%s20515_s1 + $0x740] ss:$16 sps:$4 sm:$0xff]  }
 0x166   : > { %4625 = vmatprep.subr.bf16.mxu0 %v15558_v18  ;;  %4817 = vmatpush1.bf16.msra.mxu1 %v15559_v19  ;;  %v15591_v18 = vld [vmem:[%s20515_s1 + $0x74c] ss:$16 sps:$4 sm:$0xff]   ;;  %v15588_v19 = vld [vmem:[%s20515_s1 + $0x764] ss:$16 sps:$4 sm:$0xff]   ;;  %v2929_v46 = vsel %vm17722_vm5, %v12668_v12, %v2928_v1  ;;  %v2945_v1 = vrot.slane %v16725_v14, 5 }
 0x167   : > { %3565 = vmatmul.mubr.bf16.gmra.mrb[12].mxu0 %v12747_v21  ;;  %3758 = vmatmul.mubr.bf16.gmra.mrb[12].mxu1 %v12747_v21  ;;  %v15589_v21 = vld [vmem:[%s20515_s1 + $0x748] ss:$16 sps:$4 sm:$0xff]  }
 0x168   : > { %3574 = vmatprep.mubr.bf16.mxu0 %v12750_v22  ;;  %3767 = vmatprep.mubr.bf16.mxu1 %v12750_v22  ;;  %v15597_v22 = vld [vmem:[%s20515_s1 + $0x76c] ss:$16 sps:$4 sm:$0xff]  }
 0x169   : > { %4626 = vmatpush1.bf16.msra.mxu0 %v15556_v31  ;;  %4818 = vmatprep.subr.bf16.mxu1 %v15567_v32  ;;  %v15594_v31 = vld [vmem:[%s20515_s1 + $0x784] ss:$16 sps:$4 sm:$0xff]   ;;  %v15595_v32 = vld [vmem:[%s20515_s1 + $0x768] ss:$16 sps:$4 sm:$0xff]  }
 0x16a   : > { %4627 = vmatprep.subr.bf16.mxu0 %v15564_v33  ;;  %4819 = vmatpush1.bf16.msra.mxu1 %v15565_v34  ;;  %v12753_v33 = vcombine.low %v2922_v0, %v2925_v52  ;;  %v12756_v34 = vcombine.high %v2929_v46, %v2932_v24  ;;  %v2944_v52 = vrot.slane %v2942_v54, 4 }
 0x16b   : > { %4820 = vmatprep.subr.bf16.mxu1 %v15573_v35  ;;  %v16721_v35 = vld [vmem:[%s17008_s29 + $0xc0] sm:$0xff] }
 0x16c   : > { %v12669_v39 = vrot.slane %v16721_v35, 9  ;;  %v2946_v12 = vsel %vm17722_vm5, %v2944_v52, %v2945_v1  ;;  %v2980_v52 = vrot.slane %v17690_v58, 5  ;;  %v2984_v1 = vrot.slane %v17703_v25, 5 }
 0x16d   : > { %4628 = vmatpush1.bf16.msra.mxu0 %v15562_v41  ;;  %v15592_v41 = vld [vmem:[%s20515_s1 + $0x780] ss:$16 sps:$4 sm:$0xff]   ;;  %v2987_v58 = vrot.slane %v17708_v20, 5 }
 0x16e   : > { %4629 = vmatprep.subr.bf16.mxu0 %v15570_v43  ;;  %4821 = vmatpush1.bf16.msra.mxu1 %v15571_v44  ;;  %v15603_v43 = vld [vmem:[%s20515_s1 + $0x78c] ss:$16 sps:$4 sm:$0xff]   ;;  %v15600_v44 = vld [vmem:[%s20515_s1 + $0x7a4] ss:$16 sps:$4 sm:$0xff]   ;;  %v2936_v5 = vsel %vm17722_vm5, %v12669_v39, %v2935_v47  ;;  %v2952_v47 = vrot.slane %v16728_v27, 5 }
 0x16f   : > { %3575 = vmatmul.mubr.bf16.gmra.mrb[16].mxu0 %v12749_v45  ;;  %3768 = vmatmul.mubr.bf16.gmra.mrb[16].mxu1 %v12749_v45  ;;  %v15601_v45 = vld [vmem:[%s20515_s1 + $0x788] ss:$16 sps:$4 sm:$0xff]   ;;  %v18031_v20 = vld [vmem:[%s17008_s29 + $0x20] sm:$0xff]  ;;  %v18064_v27 = vld [vmem:[%s17008_s29 + $0x50] sm:$0xff] }
 0x170   : > { %3584 = vmatprep.mubr.bf16.mxu0 %v12752_v48  ;;  %3777 = vmatprep.mubr.bf16.mxu1 %v12752_v48  ;;  %v15609_v48 = vld [vmem:[%s20515_s1 + $0x7ac] ss:$16 sps:$4 sm:$0xff]  }
 0x171   : > { %4630 = vmatpush1.bf16.msra.mxu0 %v15568_v59  ;;  %4822 = vmatprep.subr.bf16.mxu1 %v15579_v60  ;;  %v15606_v59 = vld [vmem:[%s20515_s1 + $0x7c4] ss:$16 sps:$4 sm:$0xff]   ;;  %v15607_v60 = vld [vmem:[%s20515_s1 + $0x7a8] ss:$16 sps:$4 sm:$0xff]  }
 0x172   : > { %4631 = vmatprep.subr.bf16.mxu0 %v15576_v61  ;;  %4823 = vmatpush1.bf16.msra.mxu1 %v15577_v62  ;;  %v12755_v61 = vcombine.low %v2929_v46, %v2932_v24  ;;  %v12758_v62 = vcombine.high %v2936_v5, %v2939_v51  ;;  %v2951_v24 = vrot.slane %v2949_v16, 4  ;;  %v16729_v39 = vld [vmem:[%s17008_s29 + $0x108] sm:$0xff] }
 0x173   : > { %4824 = vmatprep.subr.bf16.mxu1 %v15585_v63  ;;  %v16724_v63 = vld [vmem:[%s17008_s29 + $0xd8] sm:$0xff]  ;;  %v12672_v4 = vrot.slane %v16729_v39, 9 }
 0x174   : > { %v12670_v0 = vrot.slane %v16724_v63, 9  ;;  %v15646_v39 = vld [vmem:[%s20515_s1 + $0x848] ss:$16 sps:$4 sm:$0xff]  }
 0x175   : > { %4632 = vmatpush1.bf16.msra.mxu0 %v15574_v2  ;;  %v15604_v2 = vld [vmem:[%s20515_s1 + $0x7c0] ss:$16 sps:$4 sm:$0xff]  }
 0x176   : > { %4633 = vmatprep.subr.bf16.mxu0 %v15582_v3  ;;  %4825 = vmatpush1.bf16.msra.mxu1 %v15583_v15  ;;  %v15615_v3 = vld [vmem:[%s20515_s1 + $0x7cc] ss:$16 sps:$4 sm:$0xff]   ;;  %v15612_v15 = vld [vmem:[%s20515_s1 + $0x7e4] ss:$16 sps:$4 sm:$0xff]   ;;  %v2943_v10 = vsel %vm17722_vm5, %v12670_v0, %v2942_v54  ;;  %v2970_v54 = vrot.slane %v17667_v29, 5  ;;  %v12675_v0 = vrot.slane %v17675_v42, 9 }
 0x177   : > { %3585 = vmatmul.mubr.bf16.gmra.mrb[20].mxu0 %v12751_v8  ;;  %3778 = vmatmul.mubr.bf16.gmra.mrb[20].mxu1 %v12751_v8  ;;  %v15613_v8 = vld [vmem:[%s20515_s1 + $0x7c8] ss:$16 sps:$4 sm:$0xff]   ;;  %v12676_v42 = vrot.slane %v17696_v6, 9 }
 0x178   : > { %3594 = vmatprep.mubr.bf16.mxu0 %v12754_v9  ;;  %3787 = vmatprep.mubr.bf16.mxu1 %v12754_v9  ;;  %v15618_v9 = vld [vmem:[%s20515_s1 + $0x7ec] ss:$16 sps:$4 sm:$0xff]  }
 0x179   : > { %4634 = vmatpush1.bf16.msra.mxu0 %v15580_v26  ;;  %4826 = vmatprep.subr.bf16.mxu1 %v15591_v18  ;;  %v15616_v26 = vld [vmem:[%s20515_s1 + $0x7e8] ss:$16 sps:$4 sm:$0xff]   ;;  %v15623_v18 = vld [vmem:[%s20515_s1 + $0x804] ss:$16 sps:$4 sm:$0xff]  }
 0x17a   : > { %4635 = vmatprep.subr.bf16.mxu0 %v15588_v19  ;;  %4827 = vmatpush1.bf16.msra.mxu1 %v15589_v21  ;;  %v12757_v19 = vcombine.low %v2936_v5, %v2939_v51  ;;  %v12760_v21 = vcombine.high %v2943_v10, %v2946_v12  ;;  %v2966_v51 = vrot.slane %v17654_v11, 5  ;;  %v18028_v6 = vld [vmem:[%s17008_s29 + $0x18] sm:$0xff] }
 0x17b   : > { %4828 = vmatprep.subr.bf16.mxu1 %v15597_v22  ;;  %v16727_v22 = vld [vmem:[%s17008_s29 + $0xf0] sm:$0xff] }
 0x17c   : > { %v12671_v46 = vrot.slane %v16727_v22, 9  ;;  %v15640_v22 = vld [vmem:[%s20515_s1 + $0x82c] ss:$16 sps:$4 sm:$0xff]  }
 0x17d   : > { %4636 = vmatpush1.bf16.msra.mxu0 %v15586_v30  ;;  %v15632_v30 = vld [vmem:[%s20515_s1 + $0x80c] ss:$16 sps:$4 sm:$0xff]  }
 0x17e   : > { %4637 = vmatprep.subr.bf16.mxu0 %v15594_v31  ;;  %4829 = vmatpush1.bf16.msra.mxu1 %v15595_v32  ;;  %v2950_v31 = vsel %vm17722_vm5, %v12671_v46, %v2949_v16  ;;  %v2953_v32 = vsel %vm17722_vm5, %v2951_v24, %v2952_v47  ;;  %v18039_v16 = vld [vmem:[%s17008_s29 + $0x38] sm:$0xff]  ;;  %v15626_v46 = vld [vmem:[%s20515_s1 + $0x820] ss:$16 sps:$4 sm:$0xff]   ;;  %v18061_v24 = vld [vmem:[%s17008_s29 + $0x48] sm:$0xff] }
 0x17f   : > { %3595 = vmatmul.mubr.bf16.gmra.mrb[24].mxu0 %v12753_v33  ;;  %3788 = vmatmul.mubr.bf16.gmra.mrb[24].mxu1 %v12753_v33  ;;  %v2956_v33 = vrot.slane %v17628_v49, 5  ;;  %v12762_v35 = vcombine.high %v2950_v31, %v2953_v32  ;;  %v2963_v49 = vrot.slane %v17649_v7, 5  ;;  %v15636_v47 = vld [vmem:[%s20515_s1 + $0x844] ss:$16 sps:$4 sm:$0xff]  }
 0x180   : > { %3604 = vmatprep.mubr.bf16.mxu0 %v12756_v34  ;;  %3797 = vmatprep.mubr.bf16.mxu1 %v12756_v34  ;;  %v12759_v34 = vcombine.low %v2943_v10, %v2946_v12  ;;  %v12950_v12 = vcombine.high %v18028_v6, %v18031_v20 }
 0x181   : > { %4638 = vmatpush1.bf16.msra.mxu0 %v15592_v41  ;;  %4830 = vmatprep.subr.bf16.mxu1 %v15603_v43  ;;  %v2958_v40 = vrot.slane %v2956_v33, 4  ;;  %v2957_v41 = vsel %vm17722_vm5, %v12672_v4, %v2956_v33  ;;  %v2965_v5 = vrot.slane %v2963_v49, 4  ;;  %v15634_v33 = vld [vmem:[%s20515_s1 + $0x840] ss:$16 sps:$4 sm:$0xff]   ;;  %v15656_v4 = vld [vmem:[%s20515_s1 + $0x86c] ss:$16 sps:$4 sm:$0xff]  }
 0x182   : > { %4639 = vmatprep.subr.bf16.mxu0 %v15600_v44  ;;  %4831 = vmatpush1.bf16.msra.mxu1 %v15601_v45  ;;  %v12761_v44 = vcombine.low %v2950_v31, %v2953_v32  ;;  %v12951_v31 = vcombine.low %v18036_v13, %v18039_v16  ;;  %v12954_v32 = vcombine.high %v18061_v24, %v18064_v27 }
 0x183   : > { %4832 = vmatprep.subr.bf16.mxu1 %v15609_v48  ;;  %v2960_v43 = vsel %vm17722_vm5, %v2958_v40, %v2959_v36  ;;  %v12673_v48 = vrot.slane %v17639_v50, 9  ;;  %v2967_v53 = vsel %vm17722_vm5, %v2965_v5, %v2966_v51  ;;  %v2972_v50 = vrot.slane %v2970_v54, 4  ;;  %v18092_v40 = vld [vmem:[%s17008_s29 + $0x60] sm:$0xff]  ;;  %v18095_v36 = vld [vmem:[%s17008_s29 + $0x68] sm:$0xff] }
 0x184   : > { %v12764_v45 = vcombine.high %v2957_v41, %v2960_v43  ;;  %v12763_v7 = vcombine.low %v2957_v41, %v2960_v43  ;;  %v15642_v41 = vld [vmem:[%s20515_s1 + $0x860] ss:$16 sps:$4 sm:$0xff]   ;;  %v15652_v43 = vld [vmem:[%s20515_s1 + $0x884] ss:$16 sps:$4 sm:$0xff]   ;;  %v15664_v5 = vld [vmem:[%s20515_s1 + $0x88c] ss:$16 sps:$4 sm:$0xff]  }
 0x185   : > { %4640 = vmatpush1.bf16.msra.mxu0 %v15598_v57  ;;  %v2964_v56 = vsel %vm17722_vm5, %v12673_v48, %v2963_v49  ;;  %v15654_v49 = vld [vmem:[%s20515_s1 + $0x868] ss:$16 sps:$4 sm:$0xff]   ;;  %v15650_v48 = vld [vmem:[%s20515_s1 + $0x880] ss:$16 sps:$4 sm:$0xff]   ;;  %v15660_v51 = vld [vmem:[%s20515_s1 + $0x8a4] ss:$16 sps:$4 sm:$0xff]  }
 0x186   : > { %4641 = vmatprep.subr.bf16.mxu0 %v15606_v59  ;;  %4833 = vmatpush1.bf16.msra.mxu1 %v15607_v60  ;;  %v12766_v57 = vcombine.high %v2964_v56, %v2967_v53  ;;  %v12674_v59 = vrot.slane %v17660_v23, 9  ;;  %v2973_v60 = vrot.slane %v17672_v37, 5  ;;  %v12765_v29 = vcombine.low %v2964_v56, %v2967_v53  ;;  %v15662_v56 = vld [vmem:[%s20515_s1 + $0x888] ss:$16 sps:$4 sm:$0xff]   ;;  %v15672_v53 = vld [vmem:[%s20515_s1 + $0x8ac] ss:$16 sps:$4 sm:$0xff]  }
 0x187   : > { %3605 = vmatmul.mubr.bf16.gmra.mrb[28].mxu0 %v12755_v61  ;;  %3798 = vmatmul.mubr.bf16.gmra.mrb[28].mxu1 %v12755_v61 }
 0x188   : > { %3614 = vmatprep.mubr.bf16.mxu0 %v12758_v62  ;;  %3807 = vmatprep.mubr.bf16.mxu1 %v12758_v62  ;;  %v2971_v11 = vsel %vm17722_vm5, %v12674_v59, %v2970_v54  ;;  %v2974_v61 = vsel %vm17722_vm5, %v2972_v50, %v2973_v60  ;;  %v2977_v62 = vrot.slane %v17680_v38, 5  ;;  %v18126_v54 = vld [vmem:[%s17008_s29 + $0x78] sm:$0xff]  ;;  %v15668_v59 = vld [vmem:[%s20515_s1 + $0x8c4] ss:$16 sps:$4 sm:$0xff]   ;;  %v12955_v60 = vcombine.low %v18092_v40, %v18095_v36 }
 0x189   : > { %4642 = vmatpush1.bf16.msra.mxu0 %v15604_v2  ;;  %4834 = vmatprep.subr.bf16.mxu1 %v15615_v3  ;;  %v12768_v63 = vcombine.high %v2971_v11, %v2974_v61  ;;  %v12767_v38 = vcombine.low %v2971_v11, %v2974_v61  ;;  %v2986_v3 = vrot.slane %v2984_v1, 4  ;;  %v15670_v50 = vld [vmem:[%s20515_s1 + $0x8a8] ss:$16 sps:$4 sm:$0xff]   ;;  %v15666_v61 = vld [vmem:[%s20515_s1 + $0x8c0] ss:$16 sps:$4 sm:$0xff]  }
 0x18a   : > { %4643 = vmatprep.subr.bf16.mxu0 %v15612_v15  ;;  %4835 = vmatpush1.bf16.msra.mxu1 %v15613_v8  ;;  %v2979_v23 = vrot.slane %v2977_v62, 4  ;;  %v2978_v37 = vsel %vm17722_vm5, %v12675_v0, %v2977_v62  ;;  %v2985_v15 = vsel %vm17722_vm5, %v12676_v42, %v2984_v1  ;;  %v15680_v62 = vld [vmem:[%s20515_s1 + $0x8cc] ss:$16 sps:$4 sm:$0xff]   ;;  %v15686_v1 = vld [vmem:[%s20515_s1 + $0x8e8] ss:$16 sps:$4 sm:$0xff]  }
 0x18b   : > { %4836 = vmatprep.subr.bf16.mxu1 %v15618_v9  ;;  %v2988_v25 = vsel %vm17722_vm5, %v2986_v3, %v2987_v58  ;;  %v15688_v0 = vld [vmem:[%s20515_s1 + $0x8ec] ss:$16 sps:$4 sm:$0xff]   ;;  %v15682_v42 = vld [vmem:[%s20515_s1 + $0x900] ss:$16 sps:$4 sm:$0xff]   ;;  %v15692_v58 = vld [vmem:[%s20515_s1 + $0x924] ss:$16 sps:$4 sm:$0xff]  }
 0x18c   : > { %v2981_v14 = vsel %vm17722_vm5, %v2979_v23, %v2980_v52  ;;  %v12772_v9 = vcombine.high %v2985_v15, %v2988_v25  ;;  %v12771_v10 = vcombine.low %v2985_v15, %v2988_v25  ;;  %v18160_v23 = vld [vmem:[%s17008_s29 + $0x90] sm:$0xff]  ;;  %v18163_v52 = vld [vmem:[%s17008_s29 + $0x98] sm:$0xff] }
 0x18d   : > { %4644 = vmatpush1.bf16.msra.mxu0 %v15610_v17  ;;  %v12770_v2 = vcombine.high %v2978_v37, %v2981_v14  ;;  %v12769_v8 = vcombine.low %v2978_v37, %v2981_v14  ;;  %v12949_v17 = vcombine.low %v18028_v6, %v18031_v20  ;;  %v15674_v37 = vld [vmem:[%s20515_s1 + $0x8e0] ss:$16 sps:$4 sm:$0xff]   ;;  %v15684_v14 = vld [vmem:[%s20515_s1 + $0x904] ss:$16 sps:$4 sm:$0xff]   ;;  %v15696_v3 = vld [vmem:[%s20515_s1 + $0x90c] ss:$16 sps:$4 sm:$0xff]  }
 0x18e   : > { %4837 = vmatpush1.bf16.msra.mxu1 %v15616_v26  ;;  %6024 = vmatprep.subr.bf16.mxu0 %v15623_v18  ;;  %v15621_v26 = vld [vmem:[%s20515_s1 + $0x800] ss:$16 sps:$4 sm:$0xff]   ;;  %v12952_v18 = vcombine.high %v18036_v13, %v18039_v16  ;;  %v15694_v15 = vld [vmem:[%s20515_s1 + $0x908] ss:$16 sps:$4 sm:$0xff]   ;;  %v15704_v25 = vld [vmem:[%s20515_s1 + $0x92c] ss:$16 sps:$4 sm:$0xff]  }
 0x18f   : > { %3615 = vmatmul.mubr.bf16.gmra.mrb[32].mxu0 %v12757_v19  ;;  %3808 = vmatmul.mubr.bf16.gmra.mrb[32].mxu1 %v12757_v19  ;;  %v15628_v19 = vld [vmem:[%s20515_s1 + $0x824] ss:$16 sps:$4 sm:$0xff]  }
 0x190   : > { %3624 = vmatprep.mubr.bf16.mxu0 %v12760_v21  ;;  %3817 = vmatprep.mubr.bf16.mxu1 %v12760_v21  ;;  %v15630_v21 = vld [vmem:[%s20515_s1 + $0x808] ss:$16 sps:$4 sm:$0xff]  }
 0x191   : > { %6217 = vmatprep.subr.bf16.mxu1 %v15632_v30  ;;  %v15638_v30 = vld [vmem:[%s20515_s1 + $0x828] ss:$16 sps:$4 sm:$0xff]  }
 0x197   : > { %3625 = vmatmul.mubr.bf16.gmra.mrb[36].mxu0 %v12759_v34  ;;  %3818 = vmatmul.mubr.bf16.gmra.mrb[36].mxu1 %v12759_v34  ;;  %v15648_v34 = vld [vmem:[%s20515_s1 + $0x84c] ss:$16 sps:$4 sm:$0xff]  }
 0x198   : > { %3634 = vmatprep.mubr.bf16.mxu0 %v12762_v35  ;;  %3827 = vmatprep.mubr.bf16.mxu1 %v12762_v35  ;;  %v15644_v35 = vld [vmem:[%s20515_s1 + $0x864] ss:$16 sps:$4 sm:$0xff]  }
 0x19f   : > { %3635 = vmatmul.mubr.bf16.gmra.mrb[40].mxu0 %v12761_v44  ;;  %3828 = vmatmul.mubr.bf16.gmra.mrb[40].mxu1 %v12761_v44  ;;  %v12953_v44 = vcombine.low %v18061_v24, %v18064_v27 }
 0x1a0   : > { %3644 = vmatprep.mubr.bf16.mxu0 %v12764_v45  ;;  %3837 = vmatprep.mubr.bf16.mxu1 %v12764_v45  ;;  %v12956_v45 = vcombine.high %v18092_v40, %v18095_v36 }
 0x1a7   : > { %3645 = vmatmul.mubr.bf16.gmra.mrb[44].mxu0 %v12763_v7  ;;  %3838 = vmatmul.mubr.bf16.gmra.mrb[44].mxu1 %v12763_v7  ;;  %v18129_v7 = vld [vmem:[%s17008_s29 + $0x80] sm:$0xff] }
 0x1a8   : > { %3654 = vmatprep.mubr.bf16.mxu0 %v12766_v57  ;;  %3847 = vmatprep.mubr.bf16.mxu1 %v12766_v57  ;;  %v15658_v57 = vld [vmem:[%s20515_s1 + $0x8a0] ss:$16 sps:$4 sm:$0xff]   ;;  %v12958_v11 = vcombine.high %v18126_v54, %v18129_v7 }
 0x1af   : > { %3655 = vmatmul.mubr.bf16.gmra.mrb[48].mxu0 %v12765_v29  ;;  %3848 = vmatmul.mubr.bf16.gmra.mrb[48].mxu1 %v12765_v29  ;;  %v15676_v29 = vld [vmem:[%s20515_s1 + $0x8e4] ss:$16 sps:$4 sm:$0xff]  }
 0x1b0   : > { %3664 = vmatprep.mubr.bf16.mxu0 %v12768_v63  ;;  %3857 = vmatprep.mubr.bf16.mxu1 %v12768_v63  ;;  %v15678_v63 = vld [vmem:[%s20515_s1 + $0x8c8] ss:$16 sps:$4 sm:$0xff]  }
 0x1b7   : > { %3665 = vmatmul.mubr.bf16.gmra.mrb[52].mxu0 %v12767_v38  ;;  %3858 = vmatmul.mubr.bf16.gmra.mrb[52].mxu1 %v12767_v38  ;;  %v12957_v38 = vcombine.low %v18126_v54, %v18129_v7 }
 0x1b8   : > { %3674 = vmatprep.mubr.bf16.mxu0 %v12770_v2  ;;  %3867 = vmatprep.mubr.bf16.mxu1 %v12770_v2  ;;  %v12960_v2 = vcombine.high %v18160_v23, %v18163_v52 }
 0x1bf   : > { %3675 = vmatmul.mubr.bf16.gmra.mrb[56].mxu0 %v12769_v8  ;;  %3868 = vmatmul.mubr.bf16.gmra.mrb[56].mxu1 %v12769_v8  ;;  %v18194_v8 = vld [vmem:[%s17008_s29 + $0xa8] sm:$0xff] }
 0x1c0   : > { %3684 = vmatprep.mubr.bf16.mxu0 %v12772_v9  ;;  %3877 = vmatprep.mubr.bf16.mxu1 %v12772_v9  ;;  %v18197_v9 = vld [vmem:[%s17008_s29 + $0xb0] sm:$0xff] }
 0x1c7   : > { %3685 = vmatmul.mubr.bf16.gmra.mrb[60].mxu0 %v12771_v10  ;;  %3878 = vmatmul.mubr.bf16.gmra.mrb[60].mxu1 %v12771_v10  ;;  %v15690_v10 = vld [vmem:[%s20515_s1 + $0x920] ss:$16 sps:$4 sm:$0xff]  }
 0x1c8   : > { %4645 = vmatprep.mubr.bf16.mxu0 %v12950_v12  ;;  %4838 = vmatprep.mubr.bf16.mxu1 %v12950_v12  ;;  %v15700_v12 = vld [vmem:[%s20515_s1 + $0x944] ss:$16 sps:$4 sm:$0xff]  }
 0x1cf   : > { %4646 = vmatmul.mubr.bf16.vlgmr.msra.gmra.mrb[0].mxu0 %v12949_v17  ;;  %4839 = vmatmul.mubr.bf16.vlgmr.msra.gmra.mrb[0].mxu1 %v12949_v17  ;;  %v15702_v17 = vld [vmem:[%s20515_s1 + $0x928] ss:$16 sps:$4 sm:$0xff]  }
 0x1d0   : > { %6025 = vmatpush1.bf16.msra.mxu0 %v15621_v26  ;;  %4655 = vmatprep.mubr.bf16.mxu0 %v12952_v18  ;;  %v12959_v26 = vcombine.low %v18160_v23, %v18163_v52 }
 0x1d1   : > { %4848 = vmatprep.mubr.bf16.mxu1 %v12952_v18  ;;  %6026 = vmatprep.subr.bf16.mxu0 %v15628_v19  ;;  %v12962_v18 = vcombine.high %v18194_v8, %v18197_v9  ;;  %v15698_v19 = vld [vmem:[%s20515_s1 + $0x940] ss:$16 sps:$4 sm:$0xff]  }
 0x1d2   : > { %6218 = vmatpush1.bf16.msra.mxu1 %v15630_v21  ;;  %v15712_v21 = vld [vmem:[%s20515_s1 + $0x94c] ss:$16 sps:$4 sm:$0xff]  }
 0x1d3   : > { %6219 = vmatprep.subr.bf16.mxu1 %v15640_v22  ;;  %v15708_v22 = vld [vmem:[%s20515_s1 + $0x964] ss:$16 sps:$4 sm:$0xff]  }
 0x1d4   : > { %6027 = vmatpush1.bf16.msra.mxu0 %v15626_v46  ;;  %v15710_v46 = vld [vmem:[%s20515_s1 + $0x948] ss:$16 sps:$4 sm:$0xff]  }
 0x1d5   : > { %6028 = vmatprep.subr.bf16.mxu0 %v15636_v47  ;;  %v15720_v47 = vld [vmem:[%s20515_s1 + $0x96c] ss:$16 sps:$4 sm:$0xff]  }
 0x1d6   : > { %6220 = vmatpush1.bf16.msra.mxu1 %v15638_v30  ;;  %v18228_v30 = vld [vmem:[%s17008_s29 + $0xc0] sm:$0xff] }
 0x1d7   : > { %4656 = vmatmul.mubr.bf16.gmra.mrb[4].mxu0 %v12951_v31  ;;  %4849 = vmatmul.mubr.bf16.gmra.mrb[4].mxu1 %v12951_v31  ;;  %v18231_v31 = vld [vmem:[%s17008_s29 + $0xc8] sm:$0xff] }
 0x1d8   : > { %4665 = vmatprep.mubr.bf16.mxu0 %v12954_v32  ;;  %4858 = vmatprep.mubr.bf16.mxu1 %v12954_v32  ;;  %v15706_v32 = vld [vmem:[%s20515_s1 + $0x960] ss:$16 sps:$4 sm:$0xff]  }
 0x1d9   : > { %6029 = vmatpush1.bf16.msra.mxu0 %v15634_v33  ;;  %6221 = vmatprep.subr.bf16.mxu1 %v15648_v34  ;;  %v15716_v33 = vld [vmem:[%s20515_s1 + $0x984] ss:$16 sps:$4 sm:$0xff]   ;;  %v15718_v34 = vld [vmem:[%s20515_s1 + $0x968] ss:$16 sps:$4 sm:$0xff]  }
 0x1da   : > { %6030 = vmatprep.subr.bf16.mxu0 %v15644_v35  ;;  %6222 = vmatpush1.bf16.msra.mxu1 %v15646_v39  ;;  %v12961_v35 = vcombine.low %v18194_v8, %v18197_v9  ;;  %v12964_v39 = vcombine.high %v18228_v30, %v18231_v31 }
 0x1db   : > { %6223 = vmatprep.subr.bf16.mxu1 %v15656_v4  ;;  %v15714_v4 = vld [vmem:[%s20515_s1 + $0x980] ss:$16 sps:$4 sm:$0xff]  }
 0x1dd   : > { %6031 = vmatpush1.bf16.msra.mxu0 %v15642_v41  ;;  %v15728_v41 = vld [vmem:[%s20515_s1 + $0x98c] ss:$16 sps:$4 sm:$0xff]  }
 0x1de   : > { %6032 = vmatprep.subr.bf16.mxu0 %v15652_v43  ;;  %6224 = vmatpush1.bf16.msra.mxu1 %v15654_v49  ;;  %v15724_v43 = vld [vmem:[%s20515_s1 + $0x9a4] ss:$16 sps:$4 sm:$0xff]   ;;  %v15726_v49 = vld [vmem:[%s20515_s1 + $0x988] ss:$16 sps:$4 sm:$0xff]  }
 0x1df   : > { %4666 = vmatmul.mubr.bf16.gmra.mrb[8].mxu0 %v12953_v44  ;;  %4859 = vmatmul.mubr.bf16.gmra.mrb[8].mxu1 %v12953_v44  ;;  %v15735_v44 = vld [vmem:[%s20515_s1 + $0x9ac] ss:$16 sps:$4 sm:$0xff]  }
 0x1e0   : > { %4675 = vmatprep.mubr.bf16.mxu0 %v12956_v45  ;;  %4868 = vmatprep.mubr.bf16.mxu1 %v12956_v45  ;;  %v18262_v45 = vld [vmem:[%s17008_s29 + $0xd8] sm:$0xff] }
 0x1e1   : > { %6033 = vmatpush1.bf16.msra.mxu0 %v15650_v48  ;;  %6225 = vmatprep.subr.bf16.mxu1 %v15664_v5  ;;  %v18265_v48 = vld [vmem:[%s17008_s29 + $0xe0] sm:$0xff] }
 0x1e2   : > { %6034 = vmatprep.subr.bf16.mxu0 %v15660_v51  ;;  %6226 = vmatpush1.bf16.msra.mxu1 %v15662_v56  ;;  %v15722_v5 = vld [vmem:[%s20515_s1 + $0x9a0] ss:$16 sps:$4 sm:$0xff]   ;;  %v15732_v51 = vld [vmem:[%s20515_s1 + $0x9c4] ss:$16 sps:$4 sm:$0xff]   ;;  %v15733_v56 = vld [vmem:[%s20515_s1 + $0x9a8] ss:$16 sps:$4 sm:$0xff]  }
 0x1e3   : > { %6227 = vmatprep.subr.bf16.mxu1 %v15672_v53  ;;  %v12963_v53 = vcombine.low %v18228_v30, %v18231_v31 }
 0x1e5   : > { %6035 = vmatpush1.bf16.msra.mxu0 %v15658_v57  ;;  %v12966_v57 = vcombine.high %v18262_v45, %v18265_v48 }
 0x1e6   : > { %6036 = vmatprep.subr.bf16.mxu0 %v15668_v59  ;;  %6228 = vmatpush1.bf16.msra.mxu1 %v15670_v50  ;;  %v15730_v59 = vld [vmem:[%s20515_s1 + $0x9c0] ss:$16 sps:$4 sm:$0xff]   ;;  %v15743_v50 = vld [vmem:[%s20515_s1 + $0x9cc] ss:$16 sps:$4 sm:$0xff]  }
 0x1e7   : > { %4676 = vmatmul.mubr.bf16.gmra.mrb[12].mxu0 %v12955_v60  ;;  %4869 = vmatmul.mubr.bf16.gmra.mrb[12].mxu1 %v12955_v60  ;;  %v15740_v60 = vld [vmem:[%s20515_s1 + $0x9e4] ss:$16 sps:$4 sm:$0xff]  }
 0x1e8   : > { %4685 = vmatprep.mubr.bf16.mxu0 %v12958_v11  ;;  %4878 = vmatprep.mubr.bf16.mxu1 %v12958_v11  ;;  %v15741_v11 = vld [vmem:[%s20515_s1 + $0x9c8] ss:$16 sps:$4 sm:$0xff]  }
 0x1e9   : > { %6037 = vmatpush1.bf16.msra.mxu0 %v15666_v61  ;;  %6229 = vmatprep.subr.bf16.mxu1 %v15680_v62  ;;  %v15746_v61 = vld [vmem:[%s20515_s1 + $0x9ec] ss:$16 sps:$4 sm:$0xff]   ;;  %v18296_v62 = vld [vmem:[%s17008_s29 + $0xf0] sm:$0xff] }
 0x1ea   : > { %6038 = vmatprep.subr.bf16.mxu0 %v15676_v29  ;;  %6230 = vmatpush1.bf16.msra.mxu1 %v15678_v63  ;;  %v18299_v29 = vld [vmem:[%s17008_s29 + $0xf8] sm:$0xff]  ;;  %v15738_v63 = vld [vmem:[%s20515_s1 + $0x9e0] ss:$16 sps:$4 sm:$0xff]  }
 0x1eb   : > { %6231 = vmatprep.subr.bf16.mxu1 %v15688_v0  ;;  %v15744_v0 = vld [vmem:[%s20515_s1 + $0x9e8] ss:$16 sps:$4 sm:$0xff]  }
 0x1ed   : > { %6039 = vmatpush1.bf16.msra.mxu0 %v15674_v37  ;;  %v15749_v37 = vld [vmem:[%s20515_s1 + $0xa04] ss:$16 sps:$4 sm:$0xff]  }
 0x1ee   : > { %6040 = vmatprep.subr.bf16.mxu0 %v15684_v14  ;;  %6232 = vmatpush1.bf16.msra.mxu1 %v15686_v1  ;;  %v12965_v14 = vcombine.low %v18262_v45, %v18265_v48  ;;  %v12968_v1 = vcombine.high %v18296_v62, %v18299_v29 }
 0x1ef   : > { %4686 = vmatmul.mubr.bf16.gmra.mrb[16].mxu0 %v12957_v38  ;;  %4879 = vmatmul.mubr.bf16.gmra.mrb[16].mxu1 %v12957_v38  ;;  %v15755_v38 = vld [vmem:[%s20515_s1 + $0xa0c] ss:$16 sps:$4 sm:$0xff]  }
 0x1f0   : > { %4695 = vmatprep.mubr.bf16.mxu0 %v12960_v2  ;;  %4888 = vmatprep.mubr.bf16.mxu1 %v12960_v2  ;;  %v18318_v2 = vld [vmem:[%s17008_s29 + $0x108] sm:$0xff] }
 0x1f1   : > { %6041 = vmatpush1.bf16.msra.mxu0 %v15682_v42  ;;  %6233 = vmatprep.subr.bf16.mxu1 %v15696_v3  ;;  %v18321_v42 = vld [vmem:[%s17008_s29 + $0x110] sm:$0xff]  ;;  %v12967_v3 = vcombine.low %v18296_v62, %v18299_v29 }
 0x1f2   : > { %6042 = vmatprep.subr.bf16.mxu0 %v15692_v58  ;;  %6234 = vmatpush1.bf16.msra.mxu1 %v15694_v15  ;;  %v12970_v58 = vcombine.high %v18318_v2, %v18321_v42  ;;  %v18328_v15 = vld [vmem:[%s17008_s29 + $0x120] sm:$0xff] }
 0x1f3   : > { %6235 = vmatprep.subr.bf16.mxu1 %v15704_v25  ;;  %v18331_v25 = vld [vmem:[%s17008_s29 + $0x128] sm:$0xff] }
 0x1f5   : > { %6043 = vmatpush1.bf16.msra.mxu0 %v15690_v10  ;;  %v12969_v10 = vcombine.low %v18318_v2, %v18321_v42 }
 0x1f6   : > { %6044 = vmatprep.subr.bf16.mxu0 %v15700_v12  ;;  %6236 = vmatpush1.bf16.msra.mxu1 %v15702_v17  ;;  %v12972_v12 = vcombine.high %v18328_v15, %v18331_v25  ;;  %v18338_v17 = vld [vmem:[%s17008_s29 + $0x138] sm:$0xff] }
 0x1f7   : > { %4696 = vmatmul.mubr.bf16.gmra.mrb[20].mxu0 %v12959_v26  ;;  %4889 = vmatmul.mubr.bf16.gmra.mrb[20].mxu1 %v12959_v26  ;;  %v18341_v26 = vld [vmem:[%s17008_s29 + $0x140] sm:$0xff] }
 0x1f8   : > { %4705 = vmatprep.mubr.bf16.mxu0 %v12962_v18  ;;  %4898 = vmatprep.mubr.bf16.mxu1 %v12962_v18  ;;  %v12971_v18 = vcombine.low %v18328_v15, %v18331_v25 }
 0x1f9   : > { %6045 = vmatpush1.bf16.msra.mxu0 %v15698_v19  ;;  %6237 = vmatprep.subr.bf16.mxu1 %v15712_v21  ;;  %v12974_v19 = vcombine.high %v18338_v17, %v18341_v26  ;;  %v18348_v21 = vld [vmem:[%s17008_s29 + $0x150] sm:$0xff] }
 0x1fa   : > { %6046 = vmatprep.subr.bf16.mxu0 %v15708_v22  ;;  %6238 = vmatpush1.bf16.msra.mxu1 %v15710_v46  ;;  %v18351_v22 = vld [vmem:[%s17008_s29 + $0x158] sm:$0xff]  ;;  %v12973_v46 = vcombine.low %v18338_v17, %v18341_v26 }
 0x1fb   : > { %6239 = vmatprep.subr.bf16.mxu1 %v15720_v47  ;;  %v12976_v47 = vcombine.high %v18348_v21, %v18351_v22 }
 0x1fd   : > { %6047 = vmatpush1.bf16.msra.mxu0 %v15706_v32  ;;  %v18358_v32 = vld [vmem:[%s17008_s29 + $0x168] sm:$0xff] }
 0x1fe   : > { %6048 = vmatprep.subr.bf16.mxu0 %v15716_v33  ;;  %6240 = vmatpush1.bf16.msra.mxu1 %v15718_v34  ;;  %v18361_v33 = vld [vmem:[%s17008_s29 + $0x170] sm:$0xff]  ;;  %v5128_v34 = vshrl.u32 %v18028_v6, 16 }
 0x1ff   : > { %4706 = vmatmul.mubr.bf16.gmra.mrb[24].mxu0 %v12961_v35  ;;  %4899 = vmatmul.mubr.bf16.gmra.mrb[24].mxu1 %v12961_v35  ;;  %v5131_v35 = vshll.u32 %v18028_v6, 16 }
 0x200   : > { %4715 = vmatprep.mubr.bf16.mxu0 %v12964_v39  ;;  %4908 = vmatprep.mubr.bf16.mxu1 %v12964_v39  ;;  %v5137_v39 = vshll.u32 %v18031_v20, 16 }
 0x201   : > { %6049 = vmatpush1.bf16.msra.mxu0 %v15714_v4  ;;  %6241 = vmatprep.subr.bf16.mxu1 %v15728_v41  ;;  %v5141_v4 = vshrl.u32 %v18031_v20, 16  ;;  %v12975_v41 = vcombine.low %v18348_v21, %v18351_v22 }
 0x202   : > { %6050 = vmatprep.subr.bf16.mxu0 %v15724_v43  ;;  %6242 = vmatpush1.bf16.msra.mxu1 %v15726_v49  ;;  %v12978_v43 = vcombine.high %v18358_v32, %v18361_v33  ;;  %v5130_v49 = vrot.slane %v5128_v34, 4 }
 0x203   : > { %6243 = vmatprep.subr.bf16.mxu1 %v15735_v44  ;;  %v5133_v44 = vrot.slane %v5131_v35, 5 }
 0x205   : > { %6051 = vmatpush1.bf16.msra.mxu0 %v15722_v5  ;;  %v5139_v5 = vrot.slane %v5137_v39, 5  ;;  %v5134_v6 = vor.u32 %v5133_v44, %v5130_v49  ;;  %v18404_v44 = vld [vmem:[%s17008_s29 + $0x58] sm:$0x11] }
 0x206   : > { %6052 = vmatprep.subr.bf16.mxu0 %v15732_v51  ;;  %6244 = vmatpush1.bf16.msra.mxu1 %v15733_v56  ;;  %v5143_v51 = vrot.slane %v5141_v4, 4  ;;  %v18372_v56 = vld [vmem:[%s17008_s29 + $0x28] sm:$0x11] }
 0x207   : > { %4716 = vmatmul.mubr.bf16.gmra.mrb[28].mxu0 %v12963_v53  ;;  %4909 = vmatmul.mubr.bf16.gmra.mrb[28].mxu1 %v12963_v53  ;;  %v5147_v20 = vshll.u32 %v18372_v56, 16 }
 0x208   : > { %4725 = vmatprep.mubr.bf16.mxu0 %v12966_v57  ;;  %4918 = vmatprep.mubr.bf16.mxu1 %v12966_v57  ;;  %v5144_v53 = vor.u32 %v5143_v51, %v5139_v5  ;;  %v18376_v57 = vld [vmem:[%s17008_s29 + $0x180] sm:$0xff] }
 0x209   : > { %6053 = vmatpush1.bf16.msra.mxu0 %v15730_v59  ;;  %6245 = vmatprep.subr.bf16.mxu1 %v15743_v50  ;;  %v18379_v59 = vld [vmem:[%s17008_s29 + $0x188] sm:$0xff]  ;;  %v5152_v50 = vshrl.u32 %v18036_v13, 16 }
 0x20a   : > { %6054 = vmatprep.subr.bf16.mxu0 %v15740_v60  ;;  %6246 = vmatpush1.bf16.msra.mxu1 %v15741_v11  ;;  %v5155_v60 = vshll.u32 %v18036_v13, 16  ;;  %v5161_v11 = vshll.u32 %v18039_v16, 16  ;;  %v5176_v13 = vshrl.u32 %v18061_v24, 16 }
 0x20b   : > { %6247 = vmatprep.subr.bf16.mxu1 %v15746_v61  ;;  %v5165_v61 = vshrl.u32 %v18039_v16, 16  ;;  %v5185_v16 = vshll.u32 %v18064_v27, 16 }
 0x20d   : > { %6055 = vmatpush1.bf16.msra.mxu0 %v15738_v63  ;;  %v12977_v63 = vcombine.low %v18358_v32, %v18361_v33 }
 0x20e   : > { %6248 = vmatpush1.bf16.msra.mxu1 %v15744_v0  ;;  %7179 = vmatprep.subr.bf16.mxu0 %v15749_v37  ;;  %v12980_v0 = vcombine.high %v18376_v57, %v18379_v59  ;;  %v5135_v37 = vrot.slane %v5134_v6, 4 }
 0x20f   : > { %4726 = vmatmul.mubr.bf16.gmra.mrb[32].mxu0 %v12965_v14  ;;  %4919 = vmatmul.mubr.bf16.gmra.mrb[32].mxu1 %v12965_v14  ;;  %v5145_v14 = vrot.slane %v5144_v53, 4 }
 0x210   : > { %4735 = vmatprep.mubr.bf16.mxu0 %v12968_v1  ;;  %4928 = vmatprep.mubr.bf16.mxu1 %v12968_v1  ;;  %v5149_v1 = vrot.slane %v5147_v20, 5 }
 0x211   : > { %7372 = vmatprep.subr.bf16.mxu1 %v15755_v38  ;;  %v5154_v38 = vrot.slane %v5152_v50, 4  ;;  %v5195_v50 = vshll.u32 %v18404_v44, 16 }
 0x217   : > { %4736 = vmatmul.mubr.bf16.gmra.mrb[36].mxu0 %v12967_v3  ;;  %4929 = vmatmul.mubr.bf16.gmra.mrb[36].mxu1 %v12967_v3  ;;  %v5157_v3 = vrot.slane %v5155_v60, 5  ;;  %v5200_v60 = vshrl.u32 %v18092_v40, 16 }
 0x218   : > { %4745 = vmatprep.mubr.bf16.mxu0 %v12970_v58  ;;  %4938 = vmatprep.mubr.bf16.mxu1 %v12970_v58  ;;  %v5163_v58 = vrot.slane %v5161_v11, 5  ;;  %v5203_v11 = vshll.u32 %v18092_v40, 16  ;;  %v15747_v40 = vld [vmem:[%s20515_s1 + $0xa00] ss:$16 sps:$4 sm:$0xff]  }
 0x219   : > { %v5158_v34 = vor.u32 %v5157_v3, %v5154_v38  ;;  %v5197_v3 = vrot.slane %v5195_v50, 5 }
 0x21b   : > { %v5159_v51 = vrot.slane %v5158_v34, 4 }
 0x21f   : > { %4746 = vmatmul.mubr.bf16.gmra.mrb[40].mxu0 %v12969_v10  ;;  %4939 = vmatmul.mubr.bf16.gmra.mrb[40].mxu1 %v12969_v10  ;;  %v5167_v10 = vrot.slane %v5165_v61, 4  ;;  %v5209_v61 = vshll.u32 %v18095_v36, 16 }
 0x220   : > { %4755 = vmatprep.mubr.bf16.mxu0 %v12972_v12  ;;  %4948 = vmatprep.mubr.bf16.mxu1 %v12972_v12  ;;  %v18390_v12 = vld [vmem:[%s17008_s29 + $0x40] sm:$0x11] }
 0x221   : > { %v5168_v35 = vor.u32 %v5167_v10, %v5163_v58  ;;  %v5171_v39 = vshll.u32 %v18390_v12, 16  ;;  %v5202_v10 = vrot.slane %v5200_v60, 4 }
 0x223   : > { %v5169_v6 = vrot.slane %v5168_v35, 4 }
 0x227   : > { %4756 = vmatmul.mubr.bf16.gmra.mrb[44].mxu0 %v12971_v18  ;;  %4949 = vmatmul.mubr.bf16.gmra.mrb[44].mxu1 %v12971_v18  ;;  %v5179_v18 = vshll.u32 %v18061_v24, 16  ;;  %v5178_v24 = vrot.slane %v5176_v13, 4  ;;  %v5205_v13 = vrot.slane %v5203_v11, 5 }
 0x228   : > { %4765 = vmatprep.mubr.bf16.mxu0 %v12974_v19  ;;  %4958 = vmatprep.mubr.bf16.mxu1 %v12974_v19  ;;  %v5189_v19 = vshrl.u32 %v18064_v27, 16 }
 0x229   : > { %v5181_v4 = vrot.slane %v5179_v18, 5  ;;  %v5206_v35 = vor.u32 %v5205_v13, %v5202_v10  ;;  %v15765_v10 = vld [vmem:[%s20515_s1 + $0xa48] ss:$16 sps:$4 sm:$0xff]   ;;  %v5257_v13 = vshll.u32 %v18163_v52, 16 }
 0x22a   : > { %v5191_v49 = vrot.slane %v5189_v19, 4 }
 0x22b   : > { %v5182_v53 = vor.u32 %v5181_v4, %v5178_v24  ;;  %v15750_v24 = vld [vmem:[%s20515_s1 + $0xa20] ss:$16 sps:$4 sm:$0xff]   ;;  %v5207_v50 = vrot.slane %v5206_v35, 4 }
 0x22f   : > { %4766 = vmatmul.mubr.bf16.gmra.mrb[48].mxu0 %v12973_v46  ;;  %4959 = vmatmul.mubr.bf16.gmra.mrb[48].mxu1 %v12973_v46  ;;  %v5140_v46 = vsel %vm17355_vm2, %v5135_v37, %v5139_v5  ;;  %v5173_v5 = vrot.slane %v5171_v39, 5  ;;  %v15761_v39 = vld [vmem:[%s20515_s1 + $0xa2c] ss:$16 sps:$4 sm:$0xff]  }
 0x230   : > { %4775 = vmatprep.mubr.bf16.mxu0 %v12976_v47  ;;  %4968 = vmatprep.mubr.bf16.mxu1 %v12976_v47  ;;  %v5150_v47 = vsel %vm17355_vm2, %v5145_v14, %v5149_v1  ;;  %v5183_v1 = vrot.slane %v5182_v53, 4 }
 0x231   : > { %v13110_v27 = vcombine.high %v5140_v46, %v5150_v47  ;;  %v5174_v37 = vsel %vm17355_vm2, %v5169_v6, %v5173_v5  ;;  %v13109_v14 = vcombine.low %v5140_v46, %v5150_v47  ;;  %v15753_v46 = vld [vmem:[%s20515_s1 + $0xa08] ss:$16 sps:$4 sm:$0xff]   ;;  %v5237_v6 = vshrl.u32 %v18129_v7, 16 }
 0x232   : > { %v15759_v5 = vld [vmem:[%s20515_s1 + $0xa28] ss:$16 sps:$4 sm:$0xff]  }
 0x237   : > { %4776 = vmatmul.mubr.bf16.gmra.mrb[52].mxu0 %v12975_v41  ;;  %4969 = vmatmul.mubr.bf16.gmra.mrb[52].mxu1 %v12975_v41  ;;  %v12979_v41 = vcombine.low %v18376_v57, %v18379_v59 }
 0x238   : > { %4785 = vmatprep.mubr.bf16.mxu0 %v12978_v43  ;;  %4978 = vmatprep.mubr.bf16.mxu1 %v12978_v43  ;;  %v5187_v43 = vrot.slane %v5185_v16, 5  ;;  %v5211_v16 = vrot.slane %v5209_v61, 5  ;;  %v18452_v61 = vld [vmem:[%s17008_s29 + $0x88] sm:$0x11] }
 0x239   : > { %v5243_v35 = vshll.u32 %v18452_v61, 16 }
 0x23a   : > { %v5192_v20 = vor.u32 %v5191_v49, %v5187_v43  ;;  %v5188_v47 = vsel %vm17355_vm2, %v5183_v1, %v5187_v43  ;;  %v5224_v49 = vshrl.u32 %v18126_v54, 16  ;;  %v5227_v43 = vshll.u32 %v18126_v54, 16  ;;  %v15756_v54 = vld [vmem:[%s20515_s1 + $0xa40] ss:$16 sps:$4 sm:$0xff]  }
 0x23b   : > { %v5239_v1 = vrot.slane %v5237_v6, 4 }
 0x23c   : > { %v5193_v38 = vrot.slane %v5192_v20, 4 }
 0x23e   : > { %v5198_v34 = vsel %vm17355_vm2, %v5193_v38, %v5197_v3  ;;  %v5251_v38 = vshll.u32 %v18160_v23, 16  ;;  %v15764_v3 = vld [vmem:[%s20515_s1 + $0xa64] ss:$16 sps:$4 sm:$0xff]  }
 0x23f   : > { %4786 = vmatmul.mubr.bf16.gmra.mrb[56].mxu0 %v12977_v63  ;;  %4979 = vmatmul.mubr.bf16.gmra.mrb[56].mxu1 %v12977_v63  ;;  %v5213_v63 = vshrl.u32 %v18095_v36, 16  ;;  %v15752_v36 = vld [vmem:[%s20515_s1 + $0xa24] ss:$16 sps:$4 sm:$0xff]   ;;  %v13114_v20 = vcombine.high %v5188_v47, %v5198_v34 }
 0x240   : > { %4795 = vmatprep.mubr.bf16.mxu0 %v12980_v0  ;;  %4988 = vmatprep.mubr.bf16.mxu1 %v12980_v0  ;;  %v5164_v0 = vsel %vm17355_vm2, %v5159_v51, %v5163_v58  ;;  %v18422_v58 = vld [vmem:[%s17008_s29 + $0x70] sm:$0x11]  ;;  %v5233_v51 = vshll.u32 %v18129_v7, 16  ;;  %v5229_v7 = vrot.slane %v5227_v43, 5  ;;  %v13113_v43 = vcombine.low %v5188_v47, %v5198_v34 }
 0x241   : > { %v13112_v18 = vcombine.high %v5164_v0, %v5174_v37  ;;  %v5215_v19 = vrot.slane %v5213_v63, 4  ;;  %v13111_v53 = vcombine.low %v5164_v0, %v5174_v37  ;;  %v5226_v63 = vrot.slane %v5224_v49, 4  ;;  %v15767_v0 = vld [vmem:[%s20515_s1 + $0xa4c] ss:$16 sps:$4 sm:$0xff]   ;;  %v15771_v49 = vld [vmem:[%s20515_s1 + $0xa68] ss:$16 sps:$4 sm:$0xff]  }
 0x242   : > { %v5248_v37 = vshrl.u32 %v18160_v23, 16  ;;  %v5212_v23 = vsel %vm17355_vm2, %v5207_v50, %v5211_v16  ;;  %v15779_v50 = vld [vmem:[%s20515_s1 + $0xa8c] ss:$16 sps:$4 sm:$0xff]   ;;  %v15776_v34 = vld [vmem:[%s20515_s1 + $0xaa4] ss:$16 sps:$4 sm:$0xff]  }
 0x243   : > { %v5216_v4 = vor.u32 %v5215_v19, %v5211_v16  ;;  %v15770_v16 = vld [vmem:[%s20515_s1 + $0xa84] ss:$16 sps:$4 sm:$0xff]  }
 0x245   : > { %v5217_v60 = vrot.slane %v5216_v4, 4  ;;  %v5259_v4 = vrot.slane %v5257_v13, 5 }
 0x247   : > { %4796 = vmatmul.mubr.bf16.gmra.mrb[60].mxu0 %v12979_v41  ;;  %4989 = vmatmul.mubr.bf16.gmra.mrb[60].mxu1 %v12979_v41  ;;  %v5219_v41 = vshll.u32 %v18422_v58, 16 }
 0x248   : > { %6056 = vmatprep.mubr.bf16.mxu0 %v13110_v27  ;;  %6249 = vmatprep.mubr.bf16.mxu1 %v13110_v27  ;;  %v15758_v27 = vld [vmem:[%s20515_s1 + $0xa44] ss:$16 sps:$4 sm:$0xff]  }
 0x249   : > { %v5221_v11 = vrot.slane %v5219_v41, 5 }
 0x24b   : > { %v5222_v19 = vsel %vm17355_vm2, %v5217_v60, %v5221_v11  ;;  %v15777_v11 = vld [vmem:[%s20515_s1 + $0xa88] ss:$16 sps:$4 sm:$0xff]  }
 0x24f   : > { %6057 = vmatmul.mubr.bf16.vlgmr.msra.gmra.mrb[0].mxu0 %v13109_v14  ;;  %6250 = vmatmul.mubr.bf16.vlgmr.msra.gmra.mrb[0].mxu1 %v13109_v14  ;;  %v5235_v14 = vrot.slane %v5233_v51, 5  ;;  %v13116_v51 = vcombine.high %v5212_v23, %v5222_v19 }
 0x250   : > { %7180 = vmatpush1.bf16.msra.mxu0 %v15747_v40  ;;  %6066 = vmatprep.mubr.bf16.mxu0 %v13112_v18  ;;  %v5261_v40 = vshrl.u32 %v18163_v52, 16  ;;  %v15762_v52 = vld [vmem:[%s20515_s1 + $0xa60] ss:$16 sps:$4 sm:$0xff]  }
 0x251   : > { %6259 = vmatprep.mubr.bf16.mxu1 %v13112_v18  ;;  %7181 = vmatprep.subr.bf16.mxu0 %v15752_v36  ;;  %v15773_v18 = vld [vmem:[%s20515_s1 + $0xa6c] ss:$16 sps:$4 sm:$0xff]   ;;  %v5230_v36 = vor.u32 %v5229_v7, %v5226_v63  ;;  %v5272_v63 = vshrl.u32 %v18194_v8, 16  ;;  %v5275_v7 = vshll.u32 %v18194_v8, 16  ;;  %v15774_v8 = vld [vmem:[%s20515_s1 + $0xaa0] ss:$16 sps:$4 sm:$0xff]  }
 0x252   : > { %7373 = vmatpush1.bf16.msra.mxu1 %v15753_v46  ;;  %v5240_v46 = vor.u32 %v5239_v1, %v5235_v14  ;;  %v5263_v41 = vrot.slane %v5261_v40, 4  ;;  %v5281_v1 = vshll.u32 %v18197_v9, 16 }
 0x253   : > { %7374 = vmatprep.subr.bf16.mxu1 %v15761_v39  ;;  %v5250_v39 = vrot.slane %v5248_v37, 4  ;;  %v5231_v6 = vrot.slane %v5230_v36, 4  ;;  %v15785_v37 = vld [vmem:[%s20515_s1 + $0xaac] ss:$16 sps:$4 sm:$0xff]   ;;  %v5274_v36 = vrot.slane %v5272_v63, 4 }
 0x254   : > { %7182 = vmatpush1.bf16.msra.mxu0 %v15750_v24  ;;  %v5253_v24 = vrot.slane %v5251_v38, 5  ;;  %v5264_v60 = vor.u32 %v5263_v41, %v5259_v4  ;;  %v15788_v41 = vld [vmem:[%s20515_s1 + $0xae4] ss:$16 sps:$4 sm:$0xff]  }
 0x255   : > { %7183 = vmatprep.subr.bf16.mxu0 %v15758_v27  ;;  %v18485_v27 = vld [vmem:[%s17008_s29 + $0xa0] sm:$0x11]  ;;  %v5236_v38 = vsel %vm17355_vm2, %v5231_v6, %v5235_v14  ;;  %v15783_v14 = vld [vmem:[%s20515_s1 + $0xaa8] ss:$16 sps:$4 sm:$0xff]  }
 0x256   : > { %7375 = vmatpush1.bf16.msra.mxu1 %v15759_v5  ;;  %v5241_v5 = vrot.slane %v5240_v46, 4  ;;  %v5267_v47 = vshll.u32 %v18485_v27, 16  ;;  %v5265_v13 = vrot.slane %v5264_v60, 4  ;;  %v5283_v46 = vrot.slane %v5281_v1, 5  ;;  %v15786_v60 = vld [vmem:[%s20515_s1 + $0xae0] ss:$16 sps:$4 sm:$0xff]  }
 0x257   : > { %6067 = vmatmul.mubr.bf16.gmra.mrb[4].mxu0 %v13111_v53  ;;  %6260 = vmatmul.mubr.bf16.gmra.mrb[4].mxu1 %v13111_v53  ;;  %v5245_v53 = vrot.slane %v5243_v35, 5  ;;  %v18560_v1 = vld [vmem:[%s17008_s29 + $0xd0] sm:$0x11] }
 0x258   : > { %6076 = vmatprep.mubr.bf16.mxu0 %v13114_v20  ;;  %6269 = vmatprep.mubr.bf16.mxu1 %v13114_v20  ;;  %v15768_v20 = vld [vmem:[%s20515_s1 + $0xa80] ss:$16 sps:$4 sm:$0xff]   ;;  %v5269_v40 = vrot.slane %v5267_v47, 5 }
 0x259   : > { %7184 = vmatpush1.bf16.msra.mxu0 %v15756_v54  ;;  %7376 = vmatprep.subr.bf16.mxu1 %v15767_v0  ;;  %v5254_v54 = vor.u32 %v5253_v24, %v5250_v39  ;;  %v5285_v0 = vshrl.u32 %v18197_v9, 16  ;;  %v13115_v9 = vcombine.low %v5212_v23, %v5222_v19  ;;  %v18521_v24 = vld [vmem:[%s17008_s29 + $0xb8] sm:$0x11]  ;;  %v15780_v23 = vld [vmem:[%s20515_s1 + $0xac0] ss:$16 sps:$4 sm:$0xff]  }
 0x25a   : > { %7185 = vmatprep.subr.bf16.mxu0 %v15764_v3  ;;  %7377 = vmatpush1.bf16.msra.mxu1 %v15765_v10  ;;  %v5246_v3 = vsel %vm17355_vm2, %v5241_v5, %v5245_v53  ;;  %v15791_v19 = vld [vmem:[%s20515_s1 + $0xacc] ss:$16 sps:$4 sm:$0xff]   ;;  %v5296_v53 = vshrl.u32 %v18228_v30, 16 }
 0x25b   : > { %7378 = vmatprep.subr.bf16.mxu1 %v15773_v18  ;;  %v5255_v10 = vrot.slane %v5254_v54, 4  ;;  %v15782_v18 = vld [vmem:[%s20515_s1 + $0xac4] ss:$16 sps:$4 sm:$0xff]   ;;  %v5287_v35 = vrot.slane %v5285_v0, 4  ;;  %v13118_v39 = vcombine.high %v5236_v38, %v5246_v3  ;;  %v15797_v5 = vld [vmem:[%s20515_s1 + $0xaec] ss:$16 sps:$4 sm:$0xff]   ;;  %v13117_v47 = vcombine.low %v5236_v38, %v5246_v3 }
 0x25c   : > { %v5305_v54 = vshll.u32 %v18231_v31, 16  ;;  %v5298_v0 = vrot.slane %v5296_v53, 4  ;;  %v18597_v53 = vld [vmem:[%s17008_s29 + $0xe8] sm:$0x11] }
 0x25d   : > { %7186 = vmatpush1.bf16.msra.mxu0 %v15762_v52  ;;  %v5277_v52 = vrot.slane %v5275_v7, 5  ;;  %v5288_v6 = vor.u32 %v5287_v35, %v5283_v46 }
 0x25e   : > { %7187 = vmatprep.subr.bf16.mxu0 %v15770_v16  ;;  %7379 = vmatpush1.bf16.msra.mxu1 %v15771_v49  ;;  %v18531_v16 = vsel %vm17355_vm2, %v5255_v10, %v5259_v4  ;;  %v15789_v49 = vld [vmem:[%s20515_s1 + $0xac8] ss:$16 sps:$4 sm:$0xff]   ;;  %v5291_v4 = vshll.u32 %v18521_v24, 16  ;;  %v5307_v38 = vrot.slane %v5305_v54, 5  ;;  %v5320_v10 = vshrl.u32 %v18262_v45, 16 }
 0x25f   : > { %6077 = vmatmul.mubr.bf16.gmra.mrb[8].mxu0 %v13113_v43  ;;  %6270 = vmatmul.mubr.bf16.gmra.mrb[8].mxu1 %v13113_v43  ;;  %v5270_v43 = vsel %vm17355_vm2, %v5265_v13, %v5269_v40  ;;  %v5289_v63 = vrot.slane %v5288_v6, 4  ;;  %v15803_v13 = vld [vmem:[%s20515_s1 + $0xb0c] ss:$16 sps:$4 sm:$0xff]   ;;  %v5329_v40 = vshll.u32 %v18265_v48, 16 }
 0x260   : > { %6086 = vmatprep.mubr.bf16.mxu0 %v13116_v51  ;;  %6279 = vmatprep.mubr.bf16.mxu1 %v13116_v51  ;;  %v5278_v51 = vor.u32 %v5277_v52, %v5274_v36  ;;  %v5293_v7 = vrot.slane %v5291_v4, 5  ;;  %v15809_v36 = vld [vmem:[%s20515_s1 + $0xb2c] ss:$16 sps:$4 sm:$0xff]   ;;  %v15807_v4 = vld [vmem:[%s20515_s1 + $0xb28] ss:$16 sps:$4 sm:$0xff]  }
 0x261   : > { %7188 = vmatpush1.bf16.msra.mxu0 %v15768_v20  ;;  %7380 = vmatprep.subr.bf16.mxu1 %v15779_v50  ;;  %v5299_v20 = vshll.u32 %v18228_v30, 16  ;;  %v5309_v50 = vshrl.u32 %v18231_v31, 16  ;;  %v15795_v30 = vld [vmem:[%s20515_s1 + $0xae8] ss:$16 sps:$4 sm:$0xff]  }
 0x262   : > { %7189 = vmatprep.subr.bf16.mxu0 %v15776_v34  ;;  %7381 = vmatpush1.bf16.msra.mxu1 %v15777_v11  ;;  %v15794_v34 = vld [vmem:[%s20515_s1 + $0xb04] ss:$16 sps:$4 sm:$0xff]   ;;  %v13120_v11 = vcombine.high %v18531_v16, %v5270_v43  ;;  %v5279_v31 = vrot.slane %v5278_v51, 4  ;;  %v5294_v52 = vsel %vm17355_vm2, %v5289_v63, %v5293_v7  ;;  %v5331_v51 = vrot.slane %v5329_v40, 5 }
 0x263   : > { %7382 = vmatprep.subr.bf16.mxu1 %v15785_v37  ;;  %v5301_v37 = vrot.slane %v5299_v20, 5  ;;  %v5311_v3 = vrot.slane %v5309_v50, 4  ;;  %v5344_v63 = vshrl.u32 %v18296_v62, 16  ;;  %v5347_v7 = vshll.u32 %v18296_v62, 16  ;;  %v15810_v62 = vld [vmem:[%s20515_s1 + $0xb60] ss:$16 sps:$4 sm:$0xff]  }
 0x265   : > { %7190 = vmatpush1.bf16.msra.mxu0 %v15774_v8  ;;  %v5323_v8 = vshll.u32 %v18262_v45, 16  ;;  %v15801_v45 = vld [vmem:[%s20515_s1 + $0xb08] ss:$16 sps:$4 sm:$0xff]   ;;  %v5302_v35 = vor.u32 %v5301_v37, %v5298_v0  ;;  %v5353_v0 = vshll.u32 %v18299_v29, 16  ;;  %v5357_v37 = vshrl.u32 %v18299_v29, 16 }
 0x266   : > { %7191 = vmatprep.subr.bf16.mxu0 %v15782_v18  ;;  %7383 = vmatpush1.bf16.msra.mxu1 %v15783_v14  ;;  %v5333_v18 = vshrl.u32 %v18265_v48, 16  ;;  %v15800_v14 = vld [vmem:[%s20515_s1 + $0xb24] ss:$16 sps:$4 sm:$0xff]   ;;  %v5284_v48 = vsel %vm17355_vm2, %v5279_v31, %v5283_v46  ;;  %v15813_v31 = vld [vmem:[%s20515_s1 + $0xb48] ss:$16 sps:$4 sm:$0xff]  }
 0x267   : > { %6087 = vmatmul.mubr.bf16.gmra.mrb[12].mxu0 %v13115_v9  ;;  %6280 = vmatmul.mubr.bf16.gmra.mrb[12].mxu1 %v13115_v9  ;;  %v15792_v9 = vld [vmem:[%s20515_s1 + $0xb00] ss:$16 sps:$4 sm:$0xff]   ;;  %v15806_v46 = vld [vmem:[%s20515_s1 + $0xb44] ss:$16 sps:$4 sm:$0xff]   ;;  %v13122_v20 = vcombine.high %v5284_v48, %v5294_v52  ;;  %v5303_v54 = vrot.slane %v5302_v35, 4  ;;  %v13121_v29 = vcombine.low %v5284_v48, %v5294_v52  ;;  %v5359_v35 = vrot.slane %v5357_v37, 4 }
 0x268   : > { %6096 = vmatprep.mubr.bf16.mxu0 %v13118_v39  ;;  %6289 = vmatprep.mubr.bf16.mxu1 %v13118_v39  ;;  %v5312_v39 = vor.u32 %v5311_v3, %v5307_v38  ;;  %v5335_v6 = vrot.slane %v5333_v18, 4  ;;  %v15821_v3 = vld [vmem:[%s20515_s1 + $0xb6c] ss:$16 sps:$4 sm:$0xff]   ;;  %v15818_v18 = vld [vmem:[%s20515_s1 + $0xb84] ss:$16 sps:$4 sm:$0xff]  }
 0x269   : > { %7192 = vmatpush1.bf16.msra.mxu0 %v15780_v23  ;;  %7384 = vmatprep.subr.bf16.mxu1 %v15791_v19  ;;  %v5315_v23 = vshll.u32 %v18560_v1, 16  ;;  %v5322_v19 = vrot.slane %v5320_v10, 4  ;;  %v5308_v10 = vsel %vm17355_vm2, %v5303_v54, %v5307_v38  ;;  %v15819_v38 = vld [vmem:[%s20515_s1 + $0xb68] ss:$16 sps:$4 sm:$0xff]   ;;  %v15816_v48 = vld [vmem:[%s20515_s1 + $0xb80] ss:$16 sps:$4 sm:$0xff]  }
 0x26a   : > { %7193 = vmatprep.subr.bf16.mxu0 %v15788_v41  ;;  %7385 = vmatpush1.bf16.msra.mxu1 %v15789_v49  ;;  %v5325_v41 = vrot.slane %v5323_v8, 5  ;;  %v15798_v49 = vld [vmem:[%s20515_s1 + $0xb20] ss:$16 sps:$4 sm:$0xff]   ;;  %v5313_v50 = vrot.slane %v5312_v39, 4  ;;  %v15827_v52 = vld [vmem:[%s20515_s1 + $0xb8c] ss:$16 sps:$4 sm:$0xff]  }
 0x26b   : > { %7386 = vmatprep.subr.bf16.mxu1 %v15797_v5  ;;  %v13119_v5 = vcombine.low %v18531_v16, %v5270_v43  ;;  %v5339_v16 = vshll.u32 %v18597_v53, 16  ;;  %v15812_v43 = vld [vmem:[%s20515_s1 + $0xb64] ss:$16 sps:$4 sm:$0xff]   ;;  %v5371_v54 = vshll.u32 %v18318_v2, 16  ;;  %v18672_v37 = vld [vmem:[%s17008_s29 + $0x118] sm:$0x11] }
 0x26d   : > { %7194 = vmatpush1.bf16.msra.mxu0 %v15786_v60  ;;  %v5317_v60 = vrot.slane %v5315_v23, 5  ;;  %v5341_v40 = vrot.slane %v5339_v16, 5  ;;  %v18633_v23 = vld [vmem:[%s17008_s29 + $0x100] sm:$0x11] }
 0x26e   : > { %7195 = vmatprep.subr.bf16.mxu0 %v15794_v34  ;;  %7387 = vmatpush1.bf16.msra.mxu1 %v15795_v30  ;;  %v15804_v34 = vld [vmem:[%s20515_s1 + $0xb40] ss:$16 sps:$4 sm:$0xff]   ;;  %v15815_v30 = vld [vmem:[%s20515_s1 + $0xb4c] ss:$16 sps:$4 sm:$0xff]  }
 0x26f   : > { %6097 = vmatmul.mubr.bf16.gmra.mrb[16].mxu0 %v13117_v47  ;;  %6290 = vmatmul.mubr.bf16.gmra.mrb[16].mxu1 %v13117_v47  ;;  %v5326_v47 = vor.u32 %v5325_v41, %v5322_v19  ;;  %v5318_v8 = vsel %vm17355_vm2, %v5313_v50, %v5317_v60  ;;  %v15824_v41 = vld [vmem:[%s20515_s1 + $0xba4] ss:$16 sps:$4 sm:$0xff]   ;;  %v5377_v50 = vshll.u32 %v18321_v42, 16  ;;  %v5381_v60 = vshrl.u32 %v18321_v42, 16 }
 0x270   : > { %6106 = vmatprep.mubr.bf16.mxu0 %v13120_v11  ;;  %6299 = vmatprep.mubr.bf16.mxu1 %v13120_v11  ;;  %v5336_v11 = vor.u32 %v5335_v6, %v5331_v51  ;;  %v13124_v39 = vcombine.high %v5308_v10, %v5318_v8 }
 0x271   : > { %7196 = vmatpush1.bf16.msra.mxu0 %v15792_v9  ;;  %7388 = vmatprep.subr.bf16.mxu1 %v15803_v13  ;;  %v5327_v9 = vrot.slane %v5326_v47, 4  ;;  %v15822_v47 = vld [vmem:[%s20515_s1 + $0xba0] ss:$16 sps:$4 sm:$0xff]  }
 0x272   : > { %7197 = vmatprep.subr.bf16.mxu0 %v15800_v14  ;;  %7389 = vmatpush1.bf16.msra.mxu1 %v15801_v45  ;;  %v5337_v13 = vrot.slane %v5336_v11, 4  ;;  %v5346_v14 = vrot.slane %v5344_v63, 4  ;;  %v5349_v45 = vrot.slane %v5347_v7, 5  ;;  %v5373_v63 = vrot.slane %v5371_v54, 5  ;;  %v15851_v54 = vld [vmem:[%s20515_s1 + $0xc0c] ss:$16 sps:$4 sm:$0xff]  }
 0x273   : > { %7390 = vmatprep.subr.bf16.mxu1 %v15809_v36  ;;  %v5355_v36 = vrot.slane %v5353_v0, 5  ;;  %v18643_v19 = vsel %vm17355_vm2, %v5327_v9, %v5331_v51  ;;  %v5363_v51 = vshll.u32 %v18633_v23, 16  ;;  %v5379_v7 = vrot.slane %v5377_v50, 5  ;;  %v15837_v9 = vld [vmem:[%s20515_s1 + $0xbc8] ss:$16 sps:$4 sm:$0xff]  }
 0x274   : > { %v5342_v6 = vsel %vm17355_vm2, %v5337_v13, %v5341_v40  ;;  %v5383_v0 = vrot.slane %v5381_v60, 4  ;;  %v18712_v50 = vld [vmem:[%s17008_s29 + $0x130] sm:$0x11]  ;;  %v5416_v60 = vshrl.u32 %v18338_v17, 16 }
 0x275   : > { %7198 = vmatpush1.bf16.msra.mxu0 %v15798_v49  ;;  %v15825_v49 = vld [vmem:[%s20515_s1 + $0xb88] ss:$16 sps:$4 sm:$0xff]   ;;  %v13126_v42 = vcombine.high %v18643_v19, %v5342_v6 }
 0x276   : > { %7199 = vmatprep.subr.bf16.mxu0 %v15806_v46  ;;  %7391 = vmatpush1.bf16.msra.mxu1 %v15807_v4  ;;  %v5350_v46 = vor.u32 %v5349_v45, %v5346_v14  ;;  %v5360_v4 = vor.u32 %v5359_v35, %v5355_v36  ;;  %v5392_v14 = vshrl.u32 %v18328_v15, 16  ;;  %v5395_v45 = vshll.u32 %v18328_v15, 16  ;;  %v15845_v15 = vld [vmem:[%s20515_s1 + $0xc04] ss:$16 sps:$4 sm:$0xff]  }
 0x277   : > { %6107 = vmatmul.mubr.bf16.gmra.mrb[20].mxu0 %v13119_v5  ;;  %6300 = vmatmul.mubr.bf16.gmra.mrb[20].mxu1 %v13119_v5  ;;  %v15833_v5 = vld [vmem:[%s20515_s1 + $0xbac] ss:$16 sps:$4 sm:$0xff]   ;;  %v5401_v35 = vshll.u32 %v18331_v25, 16 }
 0x278   : > { %6116 = vmatprep.mubr.bf16.mxu0 %v13122_v20  ;;  %6309 = vmatprep.mubr.bf16.mxu1 %v13122_v20  ;;  %v5368_v20 = vshrl.u32 %v18318_v2, 16  ;;  %v15831_v2 = vld [vmem:[%s20515_s1 + $0xba8] ss:$16 sps:$4 sm:$0xff]   ;;  %v5351_v11 = vrot.slane %v5350_v46, 4  ;;  %v5361_v16 = vrot.slane %v5360_v4, 4  ;;  %v5394_v4 = vrot.slane %v5392_v14, 4 }
 0x279   : > { %7200 = vmatpush1.bf16.msra.mxu0 %v15804_v34  ;;  %7392 = vmatprep.subr.bf16.mxu1 %v15815_v30  ;;  %v13123_v34 = vcombine.low %v5308_v10, %v5318_v8  ;;  %v15830_v30 = vld [vmem:[%s20515_s1 + $0xbc4] ss:$16 sps:$4 sm:$0xff]   ;;  %v15839_v10 = vld [vmem:[%s20515_s1 + $0xbcc] ss:$16 sps:$4 sm:$0xff]  }
 0x27a   : > { %7201 = vmatprep.subr.bf16.mxu0 %v15812_v43  ;;  %7393 = vmatpush1.bf16.msra.mxu1 %v15813_v31  ;;  %v5365_v43 = vrot.slane %v5363_v51, 5  ;;  %v5370_v31 = vrot.slane %v5368_v20, 4  ;;  %v15836_v8 = vld [vmem:[%s20515_s1 + $0xbe4] ss:$16 sps:$4 sm:$0xff]   ;;  %v5397_v51 = vrot.slane %v5395_v45, 5 }
 0x27b   : > { %7394 = vmatprep.subr.bf16.mxu1 %v15821_v3  ;;  %v15828_v3 = vld [vmem:[%s20515_s1 + $0xbc0] ss:$16 sps:$4 sm:$0xff]  }
 0x27c   : > { %v5366_v13 = vsel %vm17355_vm2, %v5361_v16, %v5365_v43  ;;  %v5374_v40 = vor.u32 %v5373_v63, %v5370_v31  ;;  %v18724_v63 = vld [vmem:[%s17008_s29 + $0x148] sm:$0x11] }
 0x27d   : > { %7202 = vmatpush1.bf16.msra.mxu0 %v15810_v62  ;;  %v5356_v62 = vsel %vm17355_vm2, %v5351_v11, %v5355_v36  ;;  %v5405_v36 = vshrl.u32 %v18331_v25, 16  ;;  %v5418_v11 = vrot.slane %v5416_v60, 4  ;;  %v5477_v60 = vshrl.u32 %v18361_v33, 16 }
 0x27e   : > { %7203 = vmatprep.subr.bf16.mxu0 %v15818_v18  ;;  %7395 = vmatpush1.bf16.msra.mxu1 %v15819_v38  ;;  %v5384_v18 = vor.u32 %v5383_v0, %v5379_v7  ;;  %v5387_v38 = vshll.u32 %v18672_v37, 16  ;;  %v13128_v25 = vcombine.high %v5356_v62, %v5366_v13  ;;  %v13127_v31 = vcombine.low %v5356_v62, %v5366_v13 }
 0x27f   : > { %6117 = vmatmul.mubr.bf16.gmra.mrb[24].mxu0 %v13121_v29  ;;  %6310 = vmatmul.mubr.bf16.gmra.mrb[24].mxu1 %v13121_v29  ;;  %v15842_v29 = vld [vmem:[%s20515_s1 + $0xbec] ss:$16 sps:$4 sm:$0xff]   ;;  %v5407_v20 = vrot.slane %v5405_v36, 4  ;;  %v5453_v62 = vshrl.u32 %v18351_v22, 16 }
 0x280   : > { %6126 = vmatprep.mubr.bf16.mxu0 %v13124_v39  ;;  %6319 = vmatprep.mubr.bf16.mxu1 %v13124_v39  ;;  %v15834_v39 = vld [vmem:[%s20515_s1 + $0xbe0] ss:$16 sps:$4 sm:$0xff]   ;;  %v5389_v46 = vrot.slane %v5387_v38, 5  ;;  %v5449_v38 = vshll.u32 %v18351_v22, 16 }
 0x281   : > { %7204 = vmatpush1.bf16.msra.mxu0 %v15816_v48  ;;  %7396 = vmatprep.subr.bf16.mxu1 %v15827_v52  ;;  %v15840_v48 = vld [vmem:[%s20515_s1 + $0xbe8] ss:$16 sps:$4 sm:$0xff]   ;;  %v13125_v52 = vcombine.low %v18643_v19, %v5342_v6  ;;  %v5419_v19 = vshll.u32 %v18338_v17, 16  ;;  %v5425_v6 = vshll.u32 %v18341_v26, 16  ;;  %v5411_v17 = vshll.u32 %v18712_v50, 16 }
 0x282   : > { %7205 = vmatprep.subr.bf16.mxu0 %v15824_v41  ;;  %7397 = vmatpush1.bf16.msra.mxu1 %v15825_v49  ;;  %v5375_v41 = vrot.slane %v5374_v40, 4  ;;  %v5385_v49 = vrot.slane %v5384_v18, 4  ;;  %v5440_v40 = vshrl.u32 %v18348_v21, 16  ;;  %v5443_v18 = vshll.u32 %v18348_v21, 16 }
 0x283   : > { %7398 = vmatprep.subr.bf16.mxu1 %v15833_v5  ;;  %v5403_v5 = vrot.slane %v5401_v35, 5  ;;  %v5427_v16 = vrot.slane %v5425_v6, 5  ;;  %v5451_v21 = vrot.slane %v5449_v38, 5 }
 0x285   : > { %7206 = vmatpush1.bf16.msra.mxu0 %v15822_v47  ;;  %v5429_v47 = vshrl.u32 %v18341_v26, 16  ;;  %v5421_v26 = vrot.slane %v5419_v19, 5 }
 0x286   : > { %7207 = vmatprep.subr.bf16.mxu0 %v15830_v30  ;;  %7399 = vmatpush1.bf16.msra.mxu1 %v15831_v2  ;;  %v5390_v30 = vsel %vm17355_vm2, %v5385_v49, %v5389_v46  ;;  %v5398_v2 = vor.u32 %v5397_v51, %v5394_v4 }
 0x287   : > { %6127 = vmatmul.mubr.bf16.gmra.mrb[28].mxu0 %v13123_v34  ;;  %6320 = vmatmul.mubr.bf16.gmra.mrb[28].mxu1 %v13123_v34  ;;  %v5380_v34 = vsel %vm17355_vm2, %v5375_v41, %v5379_v7  ;;  %v5431_v43 = vrot.slane %v5429_v47, 4  ;;  %v5422_v7 = vor.u32 %v5421_v26, %v5418_v11  ;;  %v18736_v41 = vld [vmem:[%s17008_s29 + $0x160] sm:$0x11]  ;;  %v5479_v11 = vrot.slane %v5477_v60, 4  ;;  %v18748_v26 = vld [vmem:[%s17008_s29 + $0x178] sm:$0x11] }
 0x288   : > { %6136 = vmatprep.mubr.bf16.mxu0 %v13126_v42  ;;  %6329 = vmatprep.mubr.bf16.mxu1 %v13126_v42  ;;  %v5408_v42 = vor.u32 %v5407_v20, %v5403_v5  ;;  %v13130_v0 = vcombine.high %v5380_v34, %v5390_v30  ;;  %v13129_v45 = vcombine.low %v5380_v34, %v5390_v30  ;;  %v5459_v51 = vshll.u32 %v18736_v41, 16 }
 0x289   : > { %7208 = vmatpush1.bf16.msra.mxu0 %v15828_v3  ;;  %7400 = vmatprep.subr.bf16.mxu1 %v15839_v10  ;;  %v5399_v3 = vrot.slane %v5398_v2, 4  ;;  %v5423_v35 = vrot.slane %v5422_v7, 4  ;;  %v5467_v20 = vshll.u32 %v18358_v32, 16 }
 0x28a   : > { %7209 = vmatprep.subr.bf16.mxu0 %v15836_v8  ;;  %7401 = vmatpush1.bf16.msra.mxu1 %v15837_v9  ;;  %v5409_v10 = vrot.slane %v5408_v42, 4  ;;  %v5413_v8 = vrot.slane %v5411_v17, 5  ;;  %v5432_v9 = vor.u32 %v5431_v43, %v5427_v16  ;;  %v5461_v30 = vrot.slane %v5459_v51, 5 }
 0x28b   : > { %7402 = vmatprep.subr.bf16.mxu1 %v15842_v29  ;;  %v5435_v29 = vshll.u32 %v18724_v63, 16  ;;  %v5404_v13 = vsel %vm17355_vm2, %v5399_v3, %v5403_v5  ;;  %v5428_v22 = vsel %vm17355_vm2, %v5423_v35, %v5427_v16  ;;  %v5464_v5 = vshrl.u32 %v18358_v32, 16 }
 0x28c   : > { %v5414_v14 = vsel %vm17355_vm2, %v5409_v10, %v5413_v8  ;;  %v5433_v36 = vrot.slane %v5432_v9, 4  ;;  %v5469_v42 = vrot.slane %v5467_v20, 5  ;;  %v5491_v3 = vshll.u32 %v18376_v57, 16  ;;  %v16731_v20 = vld [vmem:[%s17008_s29 + $0x18] sm:$0xff] }
 0x28d   : > { %7210 = vmatpush1.bf16.msra.mxu0 %v15834_v39  ;;  %v5437_v39 = vrot.slane %v5435_v29, 5  ;;  %v13131_v19 = vcombine.low %v5404_v13, %v5414_v14  ;;  %v5466_v2 = vrot.slane %v5464_v5, 4  ;;  %v5497_v10 = vshll.u32 %v18379_v59, 16 }
 0x28e   : > { %7403 = vmatpush1.bf16.msra.mxu1 %v15840_v48  ;;  %8290 = vmatprep.subr.bf16.mxu0 %v15845_v15  ;;  %v5442_v48 = vrot.slane %v5440_v40, 4  ;;  %v5445_v15 = vrot.slane %v5443_v18, 5  ;;  %v5501_v8 = vshrl.u32 %v18379_v59, 16 }
 0x28f   : > { %6137 = vmatmul.mubr.bf16.gmra.mrb[32].mxu0 %v13125_v52  ;;  %6330 = vmatmul.mubr.bf16.gmra.mrb[32].mxu1 %v13125_v52  ;;  %v5455_v52 = vrot.slane %v5453_v62, 4  ;;  %v5438_v49 = vsel %vm17355_vm2, %v5433_v36, %v5437_v39  ;;  %v5470_v16 = vor.u32 %v5469_v42, %v5466_v2  ;;  %v5493_v62 = vrot.slane %v5491_v3, 5  ;;  %v15843_v3 = vld [vmem:[%s20515_s1 + $0xc00] ss:$16 sps:$4 sm:$0xff]  }
 0x290   : > { %6146 = vmatprep.mubr.bf16.mxu0 %v13128_v25  ;;  %6339 = vmatprep.mubr.bf16.mxu1 %v13128_v25  ;;  %v13132_v25 = vcombine.high %v5404_v13, %v5414_v14  ;;  %v5446_v46 = vor.u32 %v5445_v15, %v5442_v48  ;;  %v13134_v6 = vcombine.high %v5428_v22, %v5438_v49  ;;  %v5499_v13 = vrot.slane %v5497_v10, 5 }
 0x291   : > { %8483 = vmatprep.subr.bf16.mxu1 %v15851_v54  ;;  %v5456_v4 = vor.u32 %v5455_v52, %v5451_v21  ;;  %v5473_v54 = vshll.u32 %v18361_v33, 16  ;;  %v13133_v7 = vcombine.low %v5428_v22, %v5438_v49  ;;  %v5471_v29 = vrot.slane %v5470_v16, 4 }
 0x292   : > { %v5447_v47 = vrot.slane %v5446_v46, 4  ;;  %v5503_v14 = vrot.slane %v5501_v8, 4  ;;  %v16730_v46 = vld [vmem:[%s17008_s29 + $0x20] sm:$0xff]  ;;  %v16735_v8 = vld [vmem:[%s17008_s29 + $0x48] sm:$0xff] }
 0x293   : > { %v5457_v34 = vrot.slane %v5456_v4, 4  ;;  %v5475_v17 = vrot.slane %v5473_v54, 5  ;;  %v6556_v4 = vrot.slane %v16730_v46, 5  ;;  %v13205_v54 = vrot.slane %v16731_v20, 9  ;;  %v15869_v46 = vld [vmem:[%s20515_s1 + $0xc6c] ss:$16 sps:$4 sm:$0xff]  }
 0x294   : > { %v5452_v32 = vsel %vm17355_vm2, %v5447_v47, %v5451_v21  ;;  %v5504_v36 = vor.u32 %v5503_v14, %v5499_v13  ;;  %v16736_v14 = vld [vmem:[%s17008_s29 + $0x68] sm:$0xff] }
 0x295   : > { %v5462_v33 = vsel %vm17355_vm2, %v5457_v34, %v5461_v30  ;;  %v5480_v43 = vor.u32 %v5479_v11, %v5475_v17  ;;  %v6558_v60 = vrot.slane %v6556_v4, 4  ;;  %v16732_v34 = vld [vmem:[%s17008_s29 + $0x38] sm:$0xff] }
 0x296   : > { %v13136_v9 = vcombine.high %v5452_v32, %v5462_v33  ;;  %v13135_v48 = vcombine.low %v5452_v32, %v5462_v33  ;;  %v5505_v52 = vrot.slane %v5504_v36, 4  ;;  %v6563_v30 = vrot.slane %v16732_v34, 5 }
 0x297   : > { %6147 = vmatmul.mubr.bf16.gmra.mrb[36].mxu0 %v13127_v31  ;;  %6340 = vmatmul.mubr.bf16.gmra.mrb[36].mxu1 %v13127_v31  ;;  %v5483_v31 = vshll.u32 %v18748_v26, 16  ;;  %v5481_v40 = vrot.slane %v5480_v43, 4  ;;  %v16734_v43 = vld [vmem:[%s17008_s29 + $0x50] sm:$0xff] }
 0x298   : > { %6156 = vmatprep.mubr.bf16.mxu0 %v13130_v0  ;;  %6349 = vmatprep.mubr.bf16.mxu1 %v13130_v0  ;;  %v5488_v0 = vshrl.u32 %v18376_v57, 16  ;;  %v5476_v57 = vsel %vm17355_vm2, %v5471_v29, %v5475_v17  ;;  %v16733_v17 = vld [vmem:[%s17008_s29 + $0x30] sm:$0xff]  ;;  %v6565_v32 = vrot.slane %v6563_v30, 4  ;;  %v6573_v29 = vrot.slane %v18404_v44, 5 }
 0x299   : > { %v5485_v18 = vrot.slane %v5483_v31, 5  ;;  %v13206_v11 = vrot.slane %v16733_v17, 9  ;;  %v6570_v31 = vrot.slane %v16734_v43, 5  ;;  %v15875_v17 = vld [vmem:[%s20515_s1 + $0xc8c] ss:$16 sps:$4 sm:$0xff]  }
 0x29a   : > { %v5490_v38 = vrot.slane %v5488_v0, 4 }
 0x29b   : > { %v5486_v59 = vsel %vm17355_vm2, %v5481_v40, %v5485_v18  ;;  %v6564_v33 = vsel %vm17722_vm5, %v13206_v11, %v6563_v30  ;;  %v15849_v40 = vld [vmem:[%s20515_s1 + $0xc08] ss:$16 sps:$4 sm:$0xff]   ;;  %v15857_v18 = vld [vmem:[%s20515_s1 + $0xc2c] ss:$16 sps:$4 sm:$0xff]   ;;  %v15872_v11 = vld [vmem:[%s20515_s1 + $0xca4] ss:$16 sps:$4 sm:$0xff]  }
 0x29c   : > { %v5494_v35 = vor.u32 %v5493_v62, %v5490_v38  ;;  %v13138_v15 = vcombine.high %v5476_v57, %v5486_v59  ;;  %v13137_v51 = vcombine.low %v5476_v57, %v5486_v59  ;;  %v15846_v38 = vld [vmem:[%s20515_s1 + $0xc20] ss:$16 sps:$4 sm:$0xff]   ;;  %v6577_v57 = vrot.slane %v16736_v14, 5  ;;  %v15855_v59 = vld [vmem:[%s20515_s1 + $0xc28] ss:$16 sps:$4 sm:$0xff]  }
 0x29d   : > { %v16742_v14 = vld [vmem:[%s17008_s29 + $0xb0] sm:$0xff] }
 0x29e   : > { %v5495_v21 = vrot.slane %v5494_v35, 4 }
 0x29f   : > { %6157 = vmatmul.mubr.bf16.gmra.mrb[40].mxu0 %v13129_v45  ;;  %6350 = vmatmul.mubr.bf16.gmra.mrb[40].mxu1 %v13129_v45  ;;  %v18760_v45 = vld [vmem:[%s17008_s29 + $0x190] sm:$0x11] }
 0x2a0   : > { %6166 = vmatprep.mubr.bf16.mxu0 %v13132_v25  ;;  %6359 = vmatprep.mubr.bf16.mxu1 %v13132_v25  ;;  %v5507_v39 = vshll.u32 %v18760_v45, 16  ;;  %v5500_v22 = vsel %vm17355_vm2, %v5495_v21, %v5499_v13  ;;  %v15854_v13 = vld [vmem:[%s20515_s1 + $0xc44] ss:$16 sps:$4 sm:$0xff]   ;;  %v6579_v21 = vrot.slane %v6577_v57, 4 }
 0x2a2   : > { %v5509_v25 = vrot.slane %v5507_v39, 5  ;;  %v15852_v39 = vld [vmem:[%s20515_s1 + $0xc40] ss:$16 sps:$4 sm:$0xff]  }
 0x2a4   : > { %v5510_v49 = vsel %vm17355_vm2, %v5505_v52, %v5509_v25  ;;  %v6580_v52 = vrot.slane %v18422_v58, 5  ;;  %v15863_v25 = vld [vmem:[%s20515_s1 + $0xc4c] ss:$16 sps:$4 sm:$0xff]  }
 0x2a5   : > { %v13140_v5 = vcombine.high %v5500_v22, %v5510_v49  ;;  %v13139_v2 = vcombine.low %v5500_v22, %v5510_v49  ;;  %v15860_v22 = vld [vmem:[%s20515_s1 + $0xc64] ss:$16 sps:$4 sm:$0xff]   ;;  %v15861_v49 = vld [vmem:[%s20515_s1 + $0xc48] ss:$16 sps:$4 sm:$0xff]  }
 0x2a7   : > { %6167 = vmatmul.mubr.bf16.gmra.mrb[44].mxu0 %v13131_v19  ;;  %6360 = vmatmul.mubr.bf16.gmra.mrb[44].mxu1 %v13131_v19  ;;  %v6559_v19 = vrot.slane %v18372_v56, 5  ;;  %v6566_v56 = vrot.slane %v18390_v12, 5  ;;  %v15848_v12 = vld [vmem:[%s20515_s1 + $0xc24] ss:$16 sps:$4 sm:$0xff]  }
 0x2a8   : > { %6176 = vmatprep.mubr.bf16.mxu0 %v13134_v6  ;;  %6369 = vmatprep.mubr.bf16.mxu1 %v13134_v6  ;;  %v6557_v6 = vsel %vm17722_vm5, %v13205_v54, %v6556_v4  ;;  %v6581_v4 = vsel %vm17722_vm5, %v6579_v21, %v6580_v52  ;;  %v15866_v54 = vld [vmem:[%s20515_s1 + $0xc84] ss:$16 sps:$4 sm:$0xff]  }
 0x2a9   : > { %v6560_v47 = vsel %vm17722_vm5, %v6558_v60, %v6559_v19  ;;  %v6567_v16 = vsel %vm17722_vm5, %v6565_v32, %v6566_v56  ;;  %v15867_v60 = vld [vmem:[%s20515_s1 + $0xc68] ss:$16 sps:$4 sm:$0xff]  }
 0x2aa   : > { %v13286_v42 = vcombine.high %v6557_v6, %v6560_v47  ;;  %v13285_v0 = vcombine.low %v6557_v6, %v6560_v47  ;;  %v13288_v10 = vcombine.high %v6564_v33, %v6567_v16  ;;  %v13287_v35 = vcombine.low %v6564_v33, %v6567_v16  ;;  %v16739_v47 = vld [vmem:[%s17008_s29 + $0x78] sm:$0xff] }
 0x2ab   : > { %v13209_v34 = vrot.slane %v16739_v47, 9  ;;  %v15873_v32 = vld [vmem:[%s20515_s1 + $0xc88] ss:$16 sps:$4 sm:$0xff]  }
 0x2ac   : > { %v16740_v16 = vld [vmem:[%s17008_s29 + $0x98] sm:$0xff] }
 0x2ad   : > { %v6591_v43 = vrot.slane %v16740_v16, 5  ;;  %v16746_v16 = vld [vmem:[%s17008_s29 + $0xe0] sm:$0xff] }
 0x2af   : > { %6177 = vmatmul.mubr.bf16.gmra.mrb[48].mxu0 %v13133_v7  ;;  %6370 = vmatmul.mubr.bf16.gmra.mrb[48].mxu1 %v13133_v7  ;;  %v13207_v7 = vrot.slane %v16735_v8, 9  ;;  %v16741_v8 = vld [vmem:[%s17008_s29 + $0x90] sm:$0xff] }
 0x2b0   : > { %6186 = vmatprep.mubr.bf16.mxu0 %v13136_v9  ;;  %6379 = vmatprep.mubr.bf16.mxu1 %v13136_v9  ;;  %v6572_v9 = vrot.slane %v6570_v31, 4 }
 0x2b1   : > { %v6571_v44 = vsel %vm17722_vm5, %v13207_v7, %v6570_v31  ;;  %v15870_v31 = vld [vmem:[%s20515_s1 + $0xca0] ss:$16 sps:$4 sm:$0xff]   ;;  %v13210_v7 = vrot.slane %v16741_v8, 9  ;;  %v16747_v8 = vld [vmem:[%s17008_s29 + $0xd8] sm:$0xff] }
 0x2b2   : > { %v6574_v62 = vsel %vm17722_vm5, %v6572_v9, %v6573_v29  ;;  %v6593_v9 = vrot.slane %v6591_v43, 4  ;;  %v6594_v29 = vrot.slane %v18485_v27, 5  ;;  %v15893_v27 = vld [vmem:[%s20515_s1 + $0xcec] ss:$16 sps:$4 sm:$0xff]  }
 0x2b3   : > { %v13290_v36 = vcombine.high %v6571_v44, %v6574_v62  ;;  %v13289_v19 = vcombine.low %v6571_v44, %v6574_v62  ;;  %v15885_v44 = vld [vmem:[%s20515_s1 + $0xcc8] ss:$16 sps:$4 sm:$0xff]   ;;  %v6592_v62 = vsel %vm17722_vm5, %v13210_v7, %v6591_v43  ;;  %v6612_v43 = vrot.slane %v16746_v16, 5 }
 0x2b4   : > { %v13213_v7 = vrot.slane %v16747_v8, 9  ;;  %v6636_v16 = vrot.slane %v18712_v50, 5  ;;  %v16755_v8 = vld [vmem:[%s17008_s29 + $0x138] sm:$0xff]  ;;  %v6643_v50 = vrot.slane %v18724_v63, 5  ;;  %v6650_v63 = vrot.slane %v18736_v41, 5 }
 0x2b5   : > { %v6657_v41 = vrot.slane %v18748_v26, 5  ;;  %v6664_v26 = vrot.slane %v18760_v45, 5  ;;  %v19079_v45 = vld [vmem:[%s17008_s29 + $0x38] sm:$0xff] }
 0x2b7   : > { %6187 = vmatmul.mubr.bf16.gmra.mrb[52].mxu0 %v13135_v48  ;;  %6380 = vmatmul.mubr.bf16.gmra.mrb[52].mxu1 %v13135_v48  ;;  %v16737_v48 = vld [vmem:[%s17008_s29 + $0x60] sm:$0xff] }
 0x2b8   : > { %6196 = vmatprep.mubr.bf16.mxu0 %v13138_v15  ;;  %6389 = vmatprep.mubr.bf16.mxu1 %v13138_v15  ;;  %v13208_v15 = vrot.slane %v16737_v48, 9 }
 0x2ba   : > { %v6578_v58 = vsel %vm17722_vm5, %v13208_v15, %v6577_v57  ;;  %v6598_v57 = vrot.slane %v16742_v14, 5  ;;  %v16743_v15 = vld [vmem:[%s17008_s29 + $0xa8] sm:$0xff] }
 0x2bb   : > { %v13292_v6 = vcombine.high %v6578_v58, %v6581_v4  ;;  %v13211_v21 = vrot.slane %v16743_v15, 9 }
 0x2bc   : > { %v6600_v52 = vrot.slane %v6598_v57, 4 }
 0x2bf   : > { %6197 = vmatmul.mubr.bf16.gmra.mrb[56].mxu0 %v13137_v51  ;;  %6390 = vmatmul.mubr.bf16.gmra.mrb[56].mxu1 %v13137_v51  ;;  %v15858_v51 = vld [vmem:[%s20515_s1 + $0xc60] ss:$16 sps:$4 sm:$0xff]  }
 0x2c0   : > { %6206 = vmatprep.mubr.bf16.mxu0 %v13140_v5  ;;  %6399 = vmatprep.mubr.bf16.mxu1 %v13140_v5  ;;  %v16738_v5 = vld [vmem:[%s17008_s29 + $0x80] sm:$0xff] }
 0x2c1   : > { %v6584_v20 = vrot.slane %v16738_v5, 5  ;;  %v16744_v5 = vld [vmem:[%s17008_s29 + $0xc8] sm:$0xff] }
 0x2c3   : > { %v6586_v30 = vrot.slane %v6584_v20, 4  ;;  %v6585_v56 = vsel %vm17722_vm5, %v13209_v34, %v6584_v20  ;;  %v6605_v20 = vrot.slane %v16744_v5, 5  ;;  %v16745_v34 = vld [vmem:[%s17008_s29 + $0xc0] sm:$0xff] }
 0x2c4   : > { %v15930_v5 = vld [vmem:[%s20515_s1 + $0xde0] ss:$16 sps:$4 sm:$0xff]  }
 0x2c7   : > { %6207 = vmatmul.mubr.bf16.gmra.mrb[60].mxu0 %v13139_v2  ;;  %6400 = vmatmul.mubr.bf16.gmra.mrb[60].mxu1 %v13139_v2  ;;  %v6587_v2 = vrot.slane %v18452_v61, 5  ;;  %v15881_v61 = vld [vmem:[%s20515_s1 + $0xcac] ss:$16 sps:$4 sm:$0xff]  }
 0x2c8   : > { %7211 = vmatprep.mubr.bf16.mxu0 %v13286_v42  ;;  %7404 = vmatprep.mubr.bf16.mxu1 %v13286_v42  ;;  %v15864_v42 = vld [vmem:[%s20515_s1 + $0xc80] ss:$16 sps:$4 sm:$0xff]  }
 0x2c9   : > { %v6588_v33 = vsel %vm17722_vm5, %v6586_v30, %v6587_v2  ;;  %v13212_v30 = vrot.slane %v16745_v34, 9  ;;  %v6607_v2 = vrot.slane %v6605_v20, 4 }
 0x2cf   : > { %7212 = vmatmul.mubr.bf16.vlgmr.msra.gmra.mrb[0].mxu0 %v13285_v0  ;;  %7405 = vmatmul.mubr.bf16.vlgmr.msra.gmra.mrb[0].mxu1 %v13285_v0  ;;  %v15878_v0 = vld [vmem:[%s20515_s1 + $0xcc4] ss:$16 sps:$4 sm:$0xff]  }
 0x2d0   : > { %8291 = vmatpush1.bf16.msra.mxu0 %v15843_v3  ;;  %7221 = vmatprep.mubr.bf16.mxu0 %v13288_v10  ;;  %v15879_v3 = vld [vmem:[%s20515_s1 + $0xca8] ss:$16 sps:$4 sm:$0xff]  }
 0x2d1   : > { %7414 = vmatprep.mubr.bf16.mxu1 %v13288_v10  ;;  %8292 = vmatprep.subr.bf16.mxu0 %v15848_v12  ;;  %v13291_v10 = vcombine.low %v6578_v58, %v6581_v4  ;;  %v13294_v12 = vcombine.high %v6585_v56, %v6588_v33  ;;  %v15897_v58 = vld [vmem:[%s20515_s1 + $0xd08] ss:$16 sps:$4 sm:$0xff]   ;;  %v6599_v4 = vsel %vm17722_vm5, %v13211_v21, %v6598_v57  ;;  %v15918_v57 = vld [vmem:[%s20515_s1 + $0xda0] ss:$16 sps:$4 sm:$0xff]  }
 0x2d2   : > { %8484 = vmatpush1.bf16.msra.mxu1 %v15849_v40  ;;  %v15876_v40 = vld [vmem:[%s20515_s1 + $0xcc0] ss:$16 sps:$4 sm:$0xff]  }
 0x2d3   : > { %8485 = vmatprep.subr.bf16.mxu1 %v15857_v18  ;;  %v15887_v18 = vld [vmem:[%s20515_s1 + $0xccc] ss:$16 sps:$4 sm:$0xff]  }
 0x2d4   : > { %8293 = vmatpush1.bf16.msra.mxu0 %v15846_v38  ;;  %v15884_v38 = vld [vmem:[%s20515_s1 + $0xce4] ss:$16 sps:$4 sm:$0xff]  }
 0x2d5   : > { %8294 = vmatprep.subr.bf16.mxu0 %v15854_v13  ;;  %v6595_v13 = vsel %vm17722_vm5, %v6593_v9, %v6594_v29  ;;  %v6614_v9 = vrot.slane %v6612_v43, 4  ;;  %v6615_v29 = vrot.slane %v18597_v53, 5  ;;  %v15929_v53 = vld [vmem:[%s20515_s1 + $0xdac] ss:$16 sps:$4 sm:$0xff]  }
 0x2d6   : > { %8486 = vmatpush1.bf16.msra.mxu1 %v15855_v59  ;;  %v15882_v59 = vld [vmem:[%s20515_s1 + $0xce0] ss:$16 sps:$4 sm:$0xff]   ;;  %v13296_v48 = vcombine.high %v6592_v62, %v6595_v13 }
 0x2d7   : > { %7222 = vmatmul.mubr.bf16.gmra.mrb[4].mxu0 %v13287_v35  ;;  %7415 = vmatmul.mubr.bf16.gmra.mrb[4].mxu1 %v13287_v35  ;;  %v15890_v35 = vld [vmem:[%s20515_s1 + $0xd04] ss:$16 sps:$4 sm:$0xff]  }
 0x2d8   : > { %7231 = vmatprep.mubr.bf16.mxu0 %v13290_v36  ;;  %7424 = vmatprep.mubr.bf16.mxu1 %v13290_v36  ;;  %v15891_v36 = vld [vmem:[%s20515_s1 + $0xce8] ss:$16 sps:$4 sm:$0xff]  }
 0x2d9   : > { %8295 = vmatpush1.bf16.msra.mxu0 %v15852_v39  ;;  %8487 = vmatprep.subr.bf16.mxu1 %v15863_v25  ;;  %v13293_v39 = vcombine.low %v6585_v56, %v6588_v33  ;;  %v6601_v25 = vrot.slane %v18521_v24, 5  ;;  %v15905_v24 = vld [vmem:[%s20515_s1 + $0xd2c] ss:$16 sps:$4 sm:$0xff]   ;;  %v6606_v56 = vsel %vm17722_vm5, %v13212_v30, %v6605_v20  ;;  %v15936_v20 = vld [vmem:[%s20515_s1 + $0xde8] ss:$16 sps:$4 sm:$0xff]   ;;  %v6629_v30 = vrot.slane %v18672_v37, 5 }
 0x2da   : > { %8296 = vmatprep.subr.bf16.mxu0 %v15860_v22  ;;  %8488 = vmatpush1.bf16.msra.mxu1 %v15861_v49  ;;  %v15888_v22 = vld [vmem:[%s20515_s1 + $0xd00] ss:$16 sps:$4 sm:$0xff]   ;;  %v15899_v49 = vld [vmem:[%s20515_s1 + $0xd0c] ss:$16 sps:$4 sm:$0xff]  }
 0x2db   : > { %8489 = vmatprep.subr.bf16.mxu1 %v15869_v46  ;;  %v15896_v46 = vld [vmem:[%s20515_s1 + $0xd24] ss:$16 sps:$4 sm:$0xff]   ;;  %v16752_v37 = vld [vmem:[%s17008_s29 + $0x128] sm:$0xff] }
 0x2dd   : > { %8297 = vmatpush1.bf16.msra.mxu0 %v15858_v51  ;;  %v6602_v51 = vsel %vm17722_vm5, %v6600_v52, %v6601_v25  ;;  %v6622_v52 = vrot.slane %v18633_v23, 5  ;;  %v15924_v25 = vld [vmem:[%s20515_s1 + $0xdc0] ss:$16 sps:$4 sm:$0xff]   ;;  %v15938_v23 = vld [vmem:[%s20515_s1 + $0xdec] ss:$16 sps:$4 sm:$0xff]  }
 0x2de   : > { %8298 = vmatprep.subr.bf16.mxu0 %v15866_v54  ;;  %8490 = vmatpush1.bf16.msra.mxu1 %v15867_v60  ;;  %v15894_v54 = vld [vmem:[%s20515_s1 + $0xd20] ss:$16 sps:$4 sm:$0xff]   ;;  %v15902_v60 = vld [vmem:[%s20515_s1 + $0xd44] ss:$16 sps:$4 sm:$0xff]   ;;  %v13298_v47 = vcombine.high %v6599_v4, %v6602_v51 }
 0x2df   : > { %7232 = vmatmul.mubr.bf16.gmra.mrb[8].mxu0 %v13289_v19  ;;  %7425 = vmatmul.mubr.bf16.gmra.mrb[8].mxu1 %v13289_v19  ;;  %v15903_v19 = vld [vmem:[%s20515_s1 + $0xd28] ss:$16 sps:$4 sm:$0xff]  }
 0x2e0   : > { %7241 = vmatprep.mubr.bf16.mxu0 %v13292_v6  ;;  %7434 = vmatprep.mubr.bf16.mxu1 %v13292_v6  ;;  %v13295_v6 = vcombine.low %v6592_v62, %v6595_v13  ;;  %v6616_v62 = vsel %vm17722_vm5, %v6614_v9, %v6615_v29  ;;  %v16748_v13 = vld [vmem:[%s17008_s29 + $0xf8] sm:$0xff] }
 0x2e1   : > { %8299 = vmatpush1.bf16.msra.mxu0 %v15864_v42  ;;  %8491 = vmatprep.subr.bf16.mxu1 %v15875_v17  ;;  %v6608_v42 = vrot.slane %v18560_v1, 5  ;;  %v15900_v17 = vld [vmem:[%s20515_s1 + $0xd40] ss:$16 sps:$4 sm:$0xff]   ;;  %v15917_v1 = vld [vmem:[%s20515_s1 + $0xd6c] ss:$16 sps:$4 sm:$0xff]   ;;  %v6619_v14 = vrot.slane %v16748_v13, 5 }
 0x2e2   : > { %8300 = vmatprep.subr.bf16.mxu0 %v15872_v11  ;;  %8492 = vmatpush1.bf16.msra.mxu1 %v15873_v32  ;;  %v15911_v11 = vld [vmem:[%s20515_s1 + $0xd4c] ss:$16 sps:$4 sm:$0xff]   ;;  %v15908_v32 = vld [vmem:[%s20515_s1 + $0xd64] ss:$16 sps:$4 sm:$0xff]  }
 0x2e3   : > { %8493 = vmatprep.subr.bf16.mxu1 %v15881_v61  ;;  %v15909_v61 = vld [vmem:[%s20515_s1 + $0xd48] ss:$16 sps:$4 sm:$0xff]   ;;  %v6609_v33 = vsel %vm17722_vm5, %v6607_v2, %v6608_v42  ;;  %v6621_v21 = vrot.slane %v6619_v14, 4  ;;  %v15952_v2 = vld [vmem:[%s20515_s1 + $0xe0c] ss:$16 sps:$4 sm:$0xff]  }
 0x2e5   : > { %8301 = vmatpush1.bf16.msra.mxu0 %v15870_v31  ;;  %v15906_v31 = vld [vmem:[%s20515_s1 + $0xd60] ss:$16 sps:$4 sm:$0xff]  }
 0x2e6   : > { %8302 = vmatprep.subr.bf16.mxu0 %v15878_v0  ;;  %8494 = vmatpush1.bf16.msra.mxu1 %v15879_v3  ;;  %v15914_v0 = vld [vmem:[%s20515_s1 + $0xd84] ss:$16 sps:$4 sm:$0xff]   ;;  %v15915_v3 = vld [vmem:[%s20515_s1 + $0xd68] ss:$16 sps:$4 sm:$0xff]  }
 0x2e7   : > { %7242 = vmatmul.mubr.bf16.gmra.mrb[12].mxu0 %v13291_v10  ;;  %7435 = vmatmul.mubr.bf16.gmra.mrb[12].mxu1 %v13291_v10  ;;  %v13297_v10 = vcombine.low %v6599_v4, %v6602_v51  ;;  %v16750_v4 = vld [vmem:[%s17008_s29 + $0x110] sm:$0xff] }
 0x2e8   : > { %7251 = vmatprep.mubr.bf16.mxu0 %v13294_v12  ;;  %7444 = vmatprep.mubr.bf16.mxu1 %v13294_v12  ;;  %v13300_v12 = vcombine.high %v6606_v56, %v6609_v33  ;;  %v6626_v51 = vrot.slane %v16750_v4, 5 }
 0x2e9   : > { %8303 = vmatpush1.bf16.msra.mxu0 %v15876_v40  ;;  %8495 = vmatprep.subr.bf16.mxu1 %v15887_v18  ;;  %v15912_v40 = vld [vmem:[%s20515_s1 + $0xd80] ss:$16 sps:$4 sm:$0xff]   ;;  %v15923_v18 = vld [vmem:[%s20515_s1 + $0xd8c] ss:$16 sps:$4 sm:$0xff]  }
 0x2ea   : > { %8304 = vmatprep.subr.bf16.mxu0 %v15884_v38  ;;  %8496 = vmatpush1.bf16.msra.mxu1 %v15885_v44  ;;  %v15920_v38 = vld [vmem:[%s20515_s1 + $0xda4] ss:$16 sps:$4 sm:$0xff]   ;;  %v15921_v44 = vld [vmem:[%s20515_s1 + $0xd88] ss:$16 sps:$4 sm:$0xff]   ;;  %v6628_v34 = vrot.slane %v6626_v51, 4 }
 0x2eb   : > { %8497 = vmatprep.subr.bf16.mxu1 %v15893_v27  ;;  %v6613_v27 = vsel %vm17722_vm5, %v13213_v7, %v6612_v43  ;;  %v13217_v7 = vrot.slane %v16755_v8, 9  ;;  %v19140_v8 = vld [vmem:[%s17008_s29 + $0x78] sm:$0xff] }
 0x2ed   : > { %8305 = vmatpush1.bf16.msra.mxu0 %v15882_v59  ;;  %v15926_v59 = vld [vmem:[%s20515_s1 + $0xdc4] ss:$16 sps:$4 sm:$0xff]  }
 0x2ee   : > { %8306 = vmatprep.subr.bf16.mxu0 %v15890_v35  ;;  %8498 = vmatpush1.bf16.msra.mxu1 %v15891_v36  ;;  %v15927_v35 = vld [vmem:[%s20515_s1 + $0xda8] ss:$16 sps:$4 sm:$0xff]   ;;  %v13299_v36 = vcombine.low %v6606_v56, %v6609_v33 }
 0x2ef   : > { %7252 = vmatmul.mubr.bf16.gmra.mrb[16].mxu0 %v13293_v39  ;;  %7445 = vmatmul.mubr.bf16.gmra.mrb[16].mxu1 %v13293_v39  ;;  %v13302_v39 = vcombine.high %v6613_v27, %v6616_v62 }
 0x2f0   : > { %7261 = vmatprep.mubr.bf16.mxu0 %v13296_v48  ;;  %7454 = vmatprep.mubr.bf16.mxu1 %v13296_v48  ;;  %v16749_v48 = vld [vmem:[%s17008_s29 + $0xf0] sm:$0xff] }
 0x2f1   : > { %8307 = vmatpush1.bf16.msra.mxu0 %v15888_v22  ;;  %8499 = vmatprep.subr.bf16.mxu1 %v15899_v49  ;;  %v13214_v15 = vrot.slane %v16749_v48, 9  ;;  %v15935_v22 = vld [vmem:[%s20515_s1 + $0xdcc] ss:$16 sps:$4 sm:$0xff]   ;;  %v15932_v49 = vld [vmem:[%s20515_s1 + $0xde4] ss:$16 sps:$4 sm:$0xff]  }
 0x2f2   : > { %8308 = vmatprep.subr.bf16.mxu0 %v15896_v46  ;;  %8500 = vmatpush1.bf16.msra.mxu1 %v15897_v58  ;;  %v15933_v46 = vld [vmem:[%s20515_s1 + $0xdc8] ss:$16 sps:$4 sm:$0xff]  }
 0x2f3   : > { %8501 = vmatprep.subr.bf16.mxu1 %v15905_v24  ;;  %v6620_v58 = vsel %vm17722_vm5, %v13214_v15, %v6619_v14  ;;  %v6623_v24 = vsel %vm17722_vm5, %v6621_v21, %v6622_v52  ;;  %v16759_v48 = vld [vmem:[%s17008_s29 + $0x168] sm:$0xff] }
 0x2f4   : > { %v13219_v15 = vrot.slane %v16759_v48, 9  ;;  %v16000_v48 = vld [vmem:[%s20515_s1 + $0xecc] ss:$16 sps:$4 sm:$0xff]  }
 0x2f5   : > { %8309 = vmatpush1.bf16.msra.mxu0 %v15894_v54  ;;  %v15943_v54 = vld [vmem:[%s20515_s1 + $0xe04] ss:$16 sps:$4 sm:$0xff]  }
 0x2f6   : > { %8310 = vmatprep.subr.bf16.mxu0 %v15902_v60  ;;  %8502 = vmatpush1.bf16.msra.mxu1 %v15903_v19  ;;  %v13301_v60 = vcombine.low %v6613_v27, %v6616_v62  ;;  %v13304_v19 = vcombine.high %v6620_v58, %v6623_v24  ;;  %v16757_v27 = vld [vmem:[%s17008_s29 + $0x150] sm:$0xff] }
 0x2f7   : > { %7262 = vmatmul.mubr.bf16.gmra.mrb[20].mxu0 %v13295_v6  ;;  %7455 = vmatmul.mubr.bf16.gmra.mrb[20].mxu1 %v13295_v6  ;;  %v16751_v6 = vld [vmem:[%s17008_s29 + $0x108] sm:$0xff]  ;;  %v13218_v62 = vrot.slane %v16757_v27, 9 }
 0x2f8   : > { %7271 = vmatprep.mubr.bf16.mxu0 %v13298_v47  ;;  %7464 = vmatprep.mubr.bf16.mxu1 %v13298_v47  ;;  %v13215_v47 = vrot.slane %v16751_v6, 9  ;;  %v15982_v27 = vld [vmem:[%s20515_s1 + $0xe88] ss:$16 sps:$4 sm:$0xff]  }
 0x2f9   : > { %8311 = vmatpush1.bf16.msra.mxu0 %v15900_v17  ;;  %8503 = vmatprep.subr.bf16.mxu1 %v15911_v11  ;;  %v6630_v17 = vsel %vm17722_vm5, %v6628_v34, %v6629_v30  ;;  %v6633_v11 = vrot.slane %v16752_v37, 5  ;;  %v19087_v34 = vld [vmem:[%s17008_s29 + $0x50] sm:$0xff]  ;;  %v15950_v37 = vld [vmem:[%s20515_s1 + $0xe08] ss:$16 sps:$4 sm:$0xff]  }
 0x2fa   : > { %8312 = vmatprep.subr.bf16.mxu0 %v15908_v32  ;;  %8504 = vmatpush1.bf16.msra.mxu1 %v15909_v61  ;;  %v6627_v42 = vsel %vm17722_vm5, %v13215_v47, %v6626_v51  ;;  %v13303_v32 = vcombine.low %v6620_v58, %v6623_v24  ;;  %v16761_v58 = vld [vmem:[%s17008_s29 + $0x180] sm:$0xff]  ;;  %v19084_v47 = vld [vmem:[%s17008_s29 + $0x48] sm:$0xff] }
 0x2fb   : > { %8505 = vmatprep.subr.bf16.mxu1 %v15917_v1  ;;  %v13306_v61 = vcombine.high %v6627_v42, %v6630_v17  ;;  %v16753_v1 = vld [vmem:[%s17008_s29 + $0x120] sm:$0xff]  ;;  %v6635_v33 = vrot.slane %v6633_v11, 4  ;;  %v13220_v24 = vrot.slane %v16761_v58, 9 }
 0x2fc   : > { %v13216_v56 = vrot.slane %v16753_v1, 9  ;;  %v19112_v1 = vld [vmem:[%s17008_s29 + $0x68] sm:$0xff] }
 0x2fd   : > { %8313 = vmatpush1.bf16.msra.mxu0 %v15906_v31  ;;  %v6637_v31 = vsel %vm17722_vm5, %v6635_v33, %v6636_v16  ;;  %v15958_v33 = vld [vmem:[%s20515_s1 + $0xe28] ss:$16 sps:$4 sm:$0xff]   ;;  %v13495_v16 = vcombine.low %v19084_v47, %v19087_v34 }
 0x2fe   : > { %8314 = vmatprep.subr.bf16.mxu0 %v15914_v0  ;;  %8506 = vmatpush1.bf16.msra.mxu1 %v15915_v3  ;;  %v6634_v43 = vsel %vm17722_vm5, %v13216_v56, %v6633_v11  ;;  %v16754_v0 = vld [vmem:[%s17008_s29 + $0x140] sm:$0xff]  ;;  %v15960_v11 = vld [vmem:[%s20515_s1 + $0xe2c] ss:$16 sps:$4 sm:$0xff]  }
 0x2ff   : > { %7272 = vmatmul.mubr.bf16.gmra.mrb[24].mxu0 %v13297_v10  ;;  %7465 = vmatmul.mubr.bf16.gmra.mrb[24].mxu1 %v13297_v10  ;;  %v6640_v3 = vrot.slane %v16754_v0, 5  ;;  %v13305_v10 = vcombine.low %v6627_v42, %v6630_v17  ;;  %v13496_v42 = vcombine.high %v19084_v47, %v19087_v34  ;;  %v15948_v17 = vld [vmem:[%s20515_s1 + $0xe24] ss:$16 sps:$4 sm:$0xff]   ;;  %v15968_v0 = vld [vmem:[%s20515_s1 + $0xe4c] ss:$16 sps:$4 sm:$0xff]  }
 0x300   : > { %7281 = vmatprep.mubr.bf16.mxu0 %v13300_v12  ;;  %7474 = vmatprep.mubr.bf16.mxu1 %v13300_v12  ;;  %v13308_v12 = vcombine.high %v6634_v43, %v6637_v31  ;;  %v15956_v56 = vld [vmem:[%s20515_s1 + $0xe44] ss:$16 sps:$4 sm:$0xff]  }
 0x301   : > { %8315 = vmatpush1.bf16.msra.mxu0 %v15912_v40  ;;  %8507 = vmatprep.subr.bf16.mxu1 %v15923_v18  ;;  %v6642_v9 = vrot.slane %v6640_v3, 4  ;;  %v6641_v29 = vsel %vm17722_vm5, %v13217_v7, %v6640_v3  ;;  %v16756_v18 = vld [vmem:[%s17008_s29 + $0x158] sm:$0xff]  ;;  %v15964_v3 = vld [vmem:[%s20515_s1 + $0xe64] ss:$16 sps:$4 sm:$0xff]  }
 0x302   : > { %8316 = vmatprep.subr.bf16.mxu0 %v15920_v38  ;;  %8508 = vmatpush1.bf16.msra.mxu1 %v15921_v44  ;;  %v6647_v38 = vrot.slane %v16756_v18, 5  ;;  %v13307_v44 = vcombine.low %v6634_v43, %v6637_v31  ;;  %v15954_v31 = vld [vmem:[%s20515_s1 + $0xe40] ss:$16 sps:$4 sm:$0xff]  }
 0x303   : > { %8509 = vmatprep.subr.bf16.mxu1 %v15929_v53  ;;  %v6644_v40 = vsel %vm17722_vm5, %v6642_v9, %v6643_v50  ;;  %v19143_v7 = vld [vmem:[%s17008_s29 + $0x80] sm:$0xff] }
 0x304   : > { %v13310_v53 = vcombine.high %v6641_v29, %v6644_v40  ;;  %v6649_v13 = vrot.slane %v6647_v38, 4  ;;  %v6648_v14 = vsel %vm17722_vm5, %v13218_v62, %v6647_v38  ;;  %v15962_v9 = vld [vmem:[%s20515_s1 + $0xe60] ss:$16 sps:$4 sm:$0xff]   ;;  %v15972_v50 = vld [vmem:[%s20515_s1 + $0xe84] ss:$16 sps:$4 sm:$0xff]   ;;  %v13500_v18 = vcombine.high %v19140_v8, %v19143_v7 }
 0x305   : > { %8317 = vmatpush1.bf16.msra.mxu0 %v15918_v57  ;;  %v15970_v38 = vld [vmem:[%s20515_s1 + $0xe80] ss:$16 sps:$4 sm:$0xff]   ;;  %v15992_v62 = vld [vmem:[%s20515_s1 + $0xeac] ss:$16 sps:$4 sm:$0xff]  }
 0x306   : > { %8318 = vmatprep.subr.bf16.mxu0 %v15926_v59  ;;  %8510 = vmatpush1.bf16.msra.mxu1 %v15927_v35  ;;  %v6651_v57 = vsel %vm17722_vm5, %v6649_v13, %v6650_v63  ;;  %v16758_v59 = vld [vmem:[%s17008_s29 + $0x170] sm:$0xff]  ;;  %v19177_v63 = vld [vmem:[%s17008_s29 + $0x98] sm:$0xff] }
 0x307   : > { %7282 = vmatmul.mubr.bf16.gmra.mrb[28].mxu0 %v13299_v36  ;;  %7475 = vmatmul.mubr.bf16.gmra.mrb[28].mxu1 %v13299_v36  ;;  %v6654_v35 = vrot.slane %v16758_v59, 5  ;;  %v13309_v36 = vcombine.low %v6641_v29, %v6644_v40  ;;  %v15974_v29 = vld [vmem:[%s20515_s1 + $0xe68] ss:$16 sps:$4 sm:$0xff]   ;;  %v19174_v13 = vld [vmem:[%s17008_s29 + $0x90] sm:$0xff] }
 0x308   : > { %7291 = vmatprep.mubr.bf16.mxu0 %v13302_v39  ;;  %7484 = vmatprep.mubr.bf16.mxu1 %v13302_v39  ;;  %v13312_v39 = vcombine.high %v6648_v14, %v6651_v57  ;;  %v15990_v59 = vld [vmem:[%s20515_s1 + $0xea8] ss:$16 sps:$4 sm:$0xff]  }
 0x309   : > { %8319 = vmatpush1.bf16.msra.mxu0 %v15924_v25  ;;  %8511 = vmatprep.subr.bf16.mxu1 %v15935_v22  ;;  %v6656_v21 = vrot.slane %v6654_v35, 4  ;;  %v6655_v52 = vsel %vm17722_vm5, %v13219_v15, %v6654_v35  ;;  %v16760_v22 = vld [vmem:[%s17008_s29 + $0x188] sm:$0xff]  ;;  %v13499_v35 = vcombine.low %v19140_v8, %v19143_v7  ;;  %v15996_v15 = vld [vmem:[%s20515_s1 + $0xee4] ss:$16 sps:$4 sm:$0xff]  }
 0x30a   : > { %8320 = vmatprep.subr.bf16.mxu0 %v15932_v49  ;;  %8512 = vmatpush1.bf16.msra.mxu1 %v15933_v46  ;;  %v6661_v49 = vrot.slane %v16760_v22, 5  ;;  %v13311_v46 = vcombine.low %v6648_v14, %v6651_v57  ;;  %v15978_v14 = vld [vmem:[%s20515_s1 + $0xea0] ss:$16 sps:$4 sm:$0xff]   ;;  %v15988_v57 = vld [vmem:[%s20515_s1 + $0xec4] ss:$16 sps:$4 sm:$0xff]  }
 0x30b   : > { %8513 = vmatprep.subr.bf16.mxu1 %v15938_v23  ;;  %v6658_v25 = vsel %vm17722_vm5, %v6656_v21, %v6657_v41  ;;  %v15998_v21 = vld [vmem:[%s20515_s1 + $0xec8] ss:$16 sps:$4 sm:$0xff]   ;;  %v16008_v41 = vld [vmem:[%s20515_s1 + $0xeec] ss:$16 sps:$4 sm:$0xff]   ;;  %v15994_v22 = vld [vmem:[%s20515_s1 + $0xee0] ss:$16 sps:$4 sm:$0xff]  }
 0x30c   : > { %v13314_v23 = vcombine.high %v6655_v52, %v6658_v25  ;;  %v6663_v4 = vrot.slane %v6661_v49, 4  ;;  %v6662_v51 = vsel %vm17722_vm5, %v13220_v24, %v6661_v49  ;;  %v16004_v49 = vld [vmem:[%s20515_s1 + $0xf04] ss:$16 sps:$4 sm:$0xff]   ;;  %v16002_v24 = vld [vmem:[%s20515_s1 + $0xf00] ss:$16 sps:$4 sm:$0xff]  }
 0x30d   : > { %8321 = vmatpush1.bf16.msra.mxu0 %v15930_v5 }
 0x30e   : > { %8514 = vmatpush1.bf16.msra.mxu1 %v15936_v20  ;;  %9701 = vmatprep.subr.bf16.mxu0 %v15943_v54  ;;  %v6665_v5 = vsel %vm17722_vm5, %v6663_v4, %v6664_v26  ;;  %v13313_v20 = vcombine.low %v6655_v52, %v6658_v25  ;;  %v19208_v52 = vld [vmem:[%s17008_s29 + $0xa8] sm:$0xff]  ;;  %v19211_v25 = vld [vmem:[%s17008_s29 + $0xb0] sm:$0xff] }
 0x30f   : > { %7292 = vmatmul.mubr.bf16.gmra.mrb[32].mxu0 %v13301_v60  ;;  %7485 = vmatmul.mubr.bf16.gmra.mrb[32].mxu1 %v13301_v60  ;;  %v13316_v54 = vcombine.high %v6662_v51, %v6665_v5  ;;  %v19076_v60 = vld [vmem:[%s17008_s29 + $0x30] sm:$0xff]  ;;  %v13504_v58 = vcombine.high %v19208_v52, %v19211_v25  ;;  %v16016_v4 = vld [vmem:[%s20515_s1 + $0xf0c] ss:$16 sps:$4 sm:$0xff]  }
 0x310   : > { %7301 = vmatprep.mubr.bf16.mxu0 %v13304_v19  ;;  %7494 = vmatprep.mubr.bf16.mxu1 %v13304_v19  ;;  %v13315_v19 = vcombine.low %v6662_v51, %v6665_v5  ;;  %v13494_v6 = vcombine.high %v19076_v60, %v19079_v45  ;;  %v13493_v30 = vcombine.low %v19076_v60, %v19079_v45  ;;  %v16012_v26 = vld [vmem:[%s20515_s1 + $0xf24] ss:$16 sps:$4 sm:$0xff]   ;;  %v16014_v51 = vld [vmem:[%s20515_s1 + $0xf08] ss:$16 sps:$4 sm:$0xff]   ;;  %v16024_v5 = vld [vmem:[%s20515_s1 + $0xf2c] ss:$16 sps:$4 sm:$0xff]  }
 0x311   : > { %9894 = vmatprep.subr.bf16.mxu1 %v15952_v2  ;;  %v15941_v2 = vld [vmem:[%s20515_s1 + $0xe00] ss:$16 sps:$4 sm:$0xff]  }
 0x317   : > { %7302 = vmatmul.mubr.bf16.gmra.mrb[36].mxu0 %v13303_v32  ;;  %7495 = vmatmul.mubr.bf16.gmra.mrb[36].mxu1 %v13303_v32  ;;  %v15946_v32 = vld [vmem:[%s20515_s1 + $0xe20] ss:$16 sps:$4 sm:$0xff]  }
 0x318   : > { %7311 = vmatprep.mubr.bf16.mxu0 %v13306_v61  ;;  %7504 = vmatprep.mubr.bf16.mxu1 %v13306_v61  ;;  %v19109_v61 = vld [vmem:[%s17008_s29 + $0x60] sm:$0xff] }
 0x319   : > { %v13498_v43 = vcombine.high %v19109_v61, %v19112_v1  ;;  %v13497_v40 = vcombine.low %v19109_v61, %v19112_v1 }
 0x31f   : > { %7312 = vmatmul.mubr.bf16.gmra.mrb[40].mxu0 %v13305_v10  ;;  %7505 = vmatmul.mubr.bf16.gmra.mrb[40].mxu1 %v13305_v10  ;;  %v15966_v10 = vld [vmem:[%s20515_s1 + $0xe48] ss:$16 sps:$4 sm:$0xff]  }
 0x320   : > { %7321 = vmatprep.mubr.bf16.mxu0 %v13308_v12  ;;  %7514 = vmatprep.mubr.bf16.mxu1 %v13308_v12  ;;  %v15976_v12 = vld [vmem:[%s20515_s1 + $0xe6c] ss:$16 sps:$4 sm:$0xff]  }
 0x327   : > { %7322 = vmatmul.mubr.bf16.gmra.mrb[44].mxu0 %v13307_v44  ;;  %7515 = vmatmul.mubr.bf16.gmra.mrb[44].mxu1 %v13307_v44  ;;  %v15984_v44 = vld [vmem:[%s20515_s1 + $0xe8c] ss:$16 sps:$4 sm:$0xff]  }
 0x328   : > { %7331 = vmatprep.mubr.bf16.mxu0 %v13310_v53  ;;  %7524 = vmatprep.mubr.bf16.mxu1 %v13310_v53  ;;  %v15980_v53 = vld [vmem:[%s20515_s1 + $0xea4] ss:$16 sps:$4 sm:$0xff]  }
 0x32f   : > { %7332 = vmatmul.mubr.bf16.gmra.mrb[48].mxu0 %v13309_v36  ;;  %7525 = vmatmul.mubr.bf16.gmra.mrb[48].mxu1 %v13309_v36  ;;  %v13502_v36 = vcombine.high %v19174_v13, %v19177_v63 }
 0x330   : > { %7341 = vmatprep.mubr.bf16.mxu0 %v13312_v39  ;;  %7534 = vmatprep.mubr.bf16.mxu1 %v13312_v39  ;;  %v15986_v39 = vld [vmem:[%s20515_s1 + $0xec0] ss:$16 sps:$4 sm:$0xff]  }
 0x337   : > { %7342 = vmatmul.mubr.bf16.gmra.mrb[52].mxu0 %v13311_v46  ;;  %7535 = vmatmul.mubr.bf16.gmra.mrb[52].mxu1 %v13311_v46  ;;  %v16006_v46 = vld [vmem:[%s20515_s1 + $0xee8] ss:$16 sps:$4 sm:$0xff]  }
 0x338   : > { %7351 = vmatprep.mubr.bf16.mxu0 %v13314_v23  ;;  %7544 = vmatprep.mubr.bf16.mxu1 %v13314_v23  ;;  %v13501_v23 = vcombine.low %v19174_v13, %v19177_v63 }
 0x33f   : > { %7352 = vmatmul.mubr.bf16.gmra.mrb[56].mxu0 %v13313_v20  ;;  %7545 = vmatmul.mubr.bf16.gmra.mrb[56].mxu1 %v13313_v20  ;;  %v19242_v20 = vld [vmem:[%s17008_s29 + $0xc0] sm:$0xff] }
 0x340   : > { %7361 = vmatprep.mubr.bf16.mxu0 %v13316_v54  ;;  %7554 = vmatprep.mubr.bf16.mxu1 %v13316_v54  ;;  %v19245_v54 = vld [vmem:[%s17008_s29 + $0xc8] sm:$0xff] }
 0x347   : > { %7362 = vmatmul.mubr.bf16.gmra.mrb[60].mxu0 %v13315_v19  ;;  %7555 = vmatmul.mubr.bf16.gmra.mrb[60].mxu1 %v13315_v19  ;;  %v16010_v19 = vld [vmem:[%s20515_s1 + $0xf20] ss:$16 sps:$4 sm:$0xff]  }
 0x348   : > { %8322 = vmatprep.mubr.bf16.mxu0 %v13494_v6  ;;  %8515 = vmatprep.mubr.bf16.mxu1 %v13494_v6  ;;  %v16020_v6 = vld [vmem:[%s20515_s1 + $0xf44] ss:$16 sps:$4 sm:$0xff]  }
 0x34f   : > { %8323 = vmatmul.mubr.bf16.vlgmr.msra.gmra.mrb[0].mxu0 %v13493_v30  ;;  %8516 = vmatmul.mubr.bf16.vlgmr.msra.gmra.mrb[0].mxu1 %v13493_v30  ;;  %v16022_v30 = vld [vmem:[%s20515_s1 + $0xf28] ss:$16 sps:$4 sm:$0xff]  }
 0x350   : > { %9702 = vmatpush1.bf16.msra.mxu0 %v15941_v2  ;;  %8332 = vmatprep.mubr.bf16.mxu0 %v13496_v42  ;;  %v13503_v2 = vcombine.low %v19208_v52, %v19211_v25 }
 0x351   : > { %8525 = vmatprep.mubr.bf16.mxu1 %v13496_v42  ;;  %9703 = vmatprep.subr.bf16.mxu0 %v15948_v17  ;;  %v13506_v42 = vcombine.high %v19242_v20, %v19245_v54  ;;  %v16018_v17 = vld [vmem:[%s20515_s1 + $0xf40] ss:$16 sps:$4 sm:$0xff]  }
 0x352   : > { %9895 = vmatpush1.bf16.msra.mxu1 %v15950_v37  ;;  %v16032_v37 = vld [vmem:[%s20515_s1 + $0xf4c] ss:$16 sps:$4 sm:$0xff]  }
 0x353   : > { %9896 = vmatprep.subr.bf16.mxu1 %v15960_v11  ;;  %v16028_v11 = vld [vmem:[%s20515_s1 + $0xf64] ss:$16 sps:$4 sm:$0xff]  }
 0x354   : > { %9704 = vmatpush1.bf16.msra.mxu0 %v15946_v32  ;;  %v16030_v32 = vld [vmem:[%s20515_s1 + $0xf48] ss:$16 sps:$4 sm:$0xff]  }
 0x355   : > { %9705 = vmatprep.subr.bf16.mxu0 %v15956_v56  ;;  %v16040_v56 = vld [vmem:[%s20515_s1 + $0xf6c] ss:$16 sps:$4 sm:$0xff]  }
 0x356   : > { %9897 = vmatpush1.bf16.msra.mxu1 %v15958_v33  ;;  %v19276_v33 = vld [vmem:[%s17008_s29 + $0xd8] sm:$0xff] }
 0x357   : > { %8333 = vmatmul.mubr.bf16.gmra.mrb[4].mxu0 %v13495_v16  ;;  %8526 = vmatmul.mubr.bf16.gmra.mrb[4].mxu1 %v13495_v16  ;;  %v19279_v16 = vld [vmem:[%s17008_s29 + $0xe0] sm:$0xff] }
 0x358   : > { %8342 = vmatprep.mubr.bf16.mxu0 %v13498_v43  ;;  %8535 = vmatprep.mubr.bf16.mxu1 %v13498_v43  ;;  %v16026_v43 = vld [vmem:[%s20515_s1 + $0xf60] ss:$16 sps:$4 sm:$0xff]  }
 0x359   : > { %9706 = vmatpush1.bf16.msra.mxu0 %v15954_v31  ;;  %9898 = vmatprep.subr.bf16.mxu1 %v15968_v0  ;;  %v16036_v31 = vld [vmem:[%s20515_s1 + $0xf84] ss:$16 sps:$4 sm:$0xff]   ;;  %v16038_v0 = vld [vmem:[%s20515_s1 + $0xf68] ss:$16 sps:$4 sm:$0xff]  }
 0x35a   : > { %9707 = vmatprep.subr.bf16.mxu0 %v15964_v3  ;;  %9899 = vmatpush1.bf16.msra.mxu1 %v15966_v10  ;;  %v13505_v3 = vcombine.low %v19242_v20, %v19245_v54  ;;  %v13508_v10 = vcombine.high %v19276_v33, %v19279_v16 }
 0x35b   : > { %9900 = vmatprep.subr.bf16.mxu1 %v15976_v12  ;;  %v16034_v12 = vld [vmem:[%s20515_s1 + $0xf80] ss:$16 sps:$4 sm:$0xff]  }
 0x35d   : > { %9708 = vmatpush1.bf16.msra.mxu0 %v15962_v9  ;;  %v16048_v9 = vld [vmem:[%s20515_s1 + $0xf8c] ss:$16 sps:$4 sm:$0xff]  }
 0x35e   : > { %9709 = vmatprep.subr.bf16.mxu0 %v15972_v50  ;;  %9901 = vmatpush1.bf16.msra.mxu1 %v15974_v29  ;;  %v16044_v50 = vld [vmem:[%s20515_s1 + $0xfa4] ss:$16 sps:$4 sm:$0xff]   ;;  %v16046_v29 = vld [vmem:[%s20515_s1 + $0xf88] ss:$16 sps:$4 sm:$0xff]  }
 0x35f   : > { %8343 = vmatmul.mubr.bf16.gmra.mrb[8].mxu0 %v13497_v40  ;;  %8536 = vmatmul.mubr.bf16.gmra.mrb[8].mxu1 %v13497_v40  ;;  %v16055_v40 = vld [vmem:[%s20515_s1 + $0xfac] ss:$16 sps:$4 sm:$0xff]  }
 0x360   : > { %8352 = vmatprep.mubr.bf16.mxu0 %v13500_v18  ;;  %8545 = vmatprep.mubr.bf16.mxu1 %v13500_v18  ;;  %v19310_v18 = vld [vmem:[%s17008_s29 + $0xf0] sm:$0xff] }
 0x361   : > { %9710 = vmatpush1.bf16.msra.mxu0 %v15970_v38  ;;  %9902 = vmatprep.subr.bf16.mxu1 %v15984_v44  ;;  %v19313_v38 = vld [vmem:[%s17008_s29 + $0xf8] sm:$0xff]  ;;  %v16042_v44 = vld [vmem:[%s20515_s1 + $0xfa0] ss:$16 sps:$4 sm:$0xff]  }
 0x362   : > { %9711 = vmatprep.subr.bf16.mxu0 %v15980_v53  ;;  %9903 = vmatpush1.bf16.msra.mxu1 %v15982_v27  ;;  %v16052_v53 = vld [vmem:[%s20515_s1 + $0xfc4] ss:$16 sps:$4 sm:$0xff]   ;;  %v16053_v27 = vld [vmem:[%s20515_s1 + $0xfa8] ss:$16 sps:$4 sm:$0xff]  }
 0x363   : > { %9904 = vmatprep.subr.bf16.mxu1 %v15992_v62  ;;  %v13507_v62 = vcombine.low %v19276_v33, %v19279_v16 }
 0x365   : > { %9712 = vmatpush1.bf16.msra.mxu0 %v15978_v14  ;;  %v13510_v14 = vcombine.high %v19310_v18, %v19313_v38 }
 0x366   : > { %9713 = vmatprep.subr.bf16.mxu0 %v15988_v57  ;;  %9905 = vmatpush1.bf16.msra.mxu1 %v15990_v59  ;;  %v16050_v57 = vld [vmem:[%s20515_s1 + $0xfc0] ss:$16 sps:$4 sm:$0xff]   ;;  %v16063_v59 = vld [vmem:[%s20515_s1 + $0xfcc] ss:$16 sps:$4 sm:$0xff]  }
 0x367   : > { %8353 = vmatmul.mubr.bf16.gmra.mrb[12].mxu0 %v13499_v35  ;;  %8546 = vmatmul.mubr.bf16.gmra.mrb[12].mxu1 %v13499_v35  ;;  %v16060_v35 = vld [vmem:[%s20515_s1 + $0xfe4] ss:$16 sps:$4 sm:$0xff]  }
 0x368   : > { %8362 = vmatprep.mubr.bf16.mxu0 %v13502_v36  ;;  %8555 = vmatprep.mubr.bf16.mxu1 %v13502_v36  ;;  %v16061_v36 = vld [vmem:[%s20515_s1 + $0xfc8] ss:$16 sps:$4 sm:$0xff]  }
 0x369   : > { %9714 = vmatpush1.bf16.msra.mxu0 %v15986_v39  ;;  %9906 = vmatprep.subr.bf16.mxu1 %v16000_v48  ;;  %v16066_v39 = vld [vmem:[%s20515_s1 + $0xfec] ss:$16 sps:$4 sm:$0xff]  }
 0x36a   : > { %9715 = vmatprep.subr.bf16.mxu0 %v15996_v15  ;;  %9907 = vmatpush1.bf16.msra.mxu1 %v15998_v21  ;;  %v19344_v48 = vld [vmem:[%s17008_s29 + $0x108] sm:$0xff]  ;;  %v19347_v15 = vld [vmem:[%s17008_s29 + $0x110] sm:$0xff] }
 0x36b   : > { %9908 = vmatprep.subr.bf16.mxu1 %v16008_v41  ;;  %v16058_v21 = vld [vmem:[%s20515_s1 + $0xfe0] ss:$16 sps:$4 sm:$0xff]   ;;  %v16064_v41 = vld [vmem:[%s20515_s1 + $0xfe8] ss:$16 sps:$4 sm:$0xff]  }
 0x36d   : > { %9716 = vmatpush1.bf16.msra.mxu0 %v15994_v22  ;;  %v16069_v22 = vld [vmem:[%s20515_s1 + $0x1004] ss:$16 sps:$4 sm:$0xff]  }
 0x36e   : > { %9717 = vmatprep.subr.bf16.mxu0 %v16004_v49  ;;  %9909 = vmatpush1.bf16.msra.mxu1 %v16006_v46  ;;  %v13509_v49 = vcombine.low %v19310_v18, %v19313_v38  ;;  %v13512_v46 = vcombine.high %v19344_v48, %v19347_v15 }
 0x36f   : > { %8363 = vmatmul.mubr.bf16.gmra.mrb[16].mxu0 %v13501_v23  ;;  %8556 = vmatmul.mubr.bf16.gmra.mrb[16].mxu1 %v13501_v23  ;;  %v16075_v23 = vld [vmem:[%s20515_s1 + $0x100c] ss:$16 sps:$4 sm:$0xff]  }
 0x370   : > { %8372 = vmatprep.mubr.bf16.mxu0 %v13504_v58  ;;  %8565 = vmatprep.mubr.bf16.mxu1 %v13504_v58  ;;  %v19366_v58 = vld [vmem:[%s17008_s29 + $0x120] sm:$0xff] }
 0x371   : > { %9718 = vmatpush1.bf16.msra.mxu0 %v16002_v24  ;;  %9910 = vmatprep.subr.bf16.mxu1 %v16016_v4  ;;  %v19369_v24 = vld [vmem:[%s17008_s29 + $0x128] sm:$0xff]  ;;  %v13511_v4 = vcombine.low %v19344_v48, %v19347_v15 }
 0x372   : > { %9719 = vmatprep.subr.bf16.mxu0 %v16012_v26  ;;  %9911 = vmatpush1.bf16.msra.mxu1 %v16014_v51  ;;  %v13514_v26 = vcombine.high %v19366_v58, %v19369_v24  ;;  %v19376_v51 = vld [vmem:[%s17008_s29 + $0x138] sm:$0xff] }
 0x373   : > { %9912 = vmatprep.subr.bf16.mxu1 %v16024_v5  ;;  %v19379_v5 = vld [vmem:[%s17008_s29 + $0x140] sm:$0xff] }
 0x375   : > { %9720 = vmatpush1.bf16.msra.mxu0 %v16010_v19  ;;  %v13513_v19 = vcombine.low %v19366_v58, %v19369_v24 }
 0x376   : > { %9721 = vmatprep.subr.bf16.mxu0 %v16020_v6  ;;  %9913 = vmatpush1.bf16.msra.mxu1 %v16022_v30  ;;  %v13516_v6 = vcombine.high %v19376_v51, %v19379_v5  ;;  %v19386_v30 = vld [vmem:[%s17008_s29 + $0x150] sm:$0xff] }
 0x377   : > { %8373 = vmatmul.mubr.bf16.gmra.mrb[20].mxu0 %v13503_v2  ;;  %8566 = vmatmul.mubr.bf16.gmra.mrb[20].mxu1 %v13503_v2  ;;  %v19389_v2 = vld [vmem:[%s17008_s29 + $0x158] sm:$0xff] }
 0x378   : > { %8382 = vmatprep.mubr.bf16.mxu0 %v13506_v42  ;;  %8575 = vmatprep.mubr.bf16.mxu1 %v13506_v42  ;;  %v13515_v42 = vcombine.low %v19376_v51, %v19379_v5 }
 0x379   : > { %9722 = vmatpush1.bf16.msra.mxu0 %v16018_v17  ;;  %9914 = vmatprep.subr.bf16.mxu1 %v16032_v37  ;;  %v13518_v17 = vcombine.high %v19386_v30, %v19389_v2  ;;  %v19396_v37 = vld [vmem:[%s17008_s29 + $0x168] sm:$0xff] }
 0x37a   : > { %9723 = vmatprep.subr.bf16.mxu0 %v16028_v11  ;;  %9915 = vmatpush1.bf16.msra.mxu1 %v16030_v32  ;;  %v19399_v11 = vld [vmem:[%s17008_s29 + $0x170] sm:$0xff]  ;;  %v13517_v32 = vcombine.low %v19386_v30, %v19389_v2 }
 0x37b   : > { %9916 = vmatprep.subr.bf16.mxu1 %v16040_v56  ;;  %v13520_v56 = vcombine.high %v19396_v37, %v19399_v11 }
 0x37d   : > { %9724 = vmatpush1.bf16.msra.mxu0 %v16026_v43  ;;  %v19406_v43 = vld [vmem:[%s17008_s29 + $0x180] sm:$0xff] }
 0x37e   : > { %9725 = vmatprep.subr.bf16.mxu0 %v16036_v31  ;;  %9917 = vmatpush1.bf16.msra.mxu1 %v16038_v0  ;;  %v19409_v31 = vld [vmem:[%s17008_s29 + $0x188] sm:$0xff]  ;;  %v8805_v0 = vshrl.u32 %v19076_v60, 16 }
 0x37f   : > { %8383 = vmatmul.mubr.bf16.gmra.mrb[24].mxu0 %v13505_v3  ;;  %8576 = vmatmul.mubr.bf16.gmra.mrb[24].mxu1 %v13505_v3  ;;  %v8808_v3 = vshll.u32 %v19076_v60, 16 }
 0x380   : > { %8392 = vmatprep.mubr.bf16.mxu0 %v13508_v10  ;;  %8585 = vmatprep.mubr.bf16.mxu1 %v13508_v10  ;;  %v8814_v10 = vshll.u32 %v19079_v45, 16 }
 0x381   : > { %9726 = vmatpush1.bf16.msra.mxu0 %v16034_v12  ;;  %9918 = vmatprep.subr.bf16.mxu1 %v16048_v9  ;;  %v8818_v12 = vshrl.u32 %v19079_v45, 16  ;;  %v13519_v9 = vcombine.low %v19396_v37, %v19399_v11 }
 0x382   : > { %9727 = vmatprep.subr.bf16.mxu0 %v16044_v50  ;;  %9919 = vmatpush1.bf16.msra.mxu1 %v16046_v29  ;;  %v13522_v50 = vcombine.high %v19406_v43, %v19409_v31  ;;  %v8807_v29 = vrot.slane %v8805_v0, 4 }
 0x383   : > { %9920 = vmatprep.subr.bf16.mxu1 %v16055_v40  ;;  %v8810_v40 = vrot.slane %v8808_v3, 5 }
 0x385   : > { %9728 = vmatpush1.bf16.msra.mxu0 %v16042_v44  ;;  %v8816_v44 = vrot.slane %v8814_v10, 5  ;;  %v8811_v60 = vor.u32 %v8810_v40, %v8807_v29  ;;  %v19452_v40 = vld [vmem:[%s17008_s29 + $0x70] sm:$0x11] }
 0x386   : > { %9729 = vmatprep.subr.bf16.mxu0 %v16052_v53  ;;  %9921 = vmatpush1.bf16.msra.mxu1 %v16053_v27  ;;  %v8820_v53 = vrot.slane %v8818_v12, 4  ;;  %v19420_v27 = vld [vmem:[%s17008_s29 + $0x40] sm:$0x11] }
 0x387   : > { %8393 = vmatmul.mubr.bf16.gmra.mrb[28].mxu0 %v13507_v62  ;;  %8586 = vmatmul.mubr.bf16.gmra.mrb[28].mxu1 %v13507_v62  ;;  %v8824_v45 = vshll.u32 %v19420_v27, 16 }
 0x388   : > { %8402 = vmatprep.mubr.bf16.mxu0 %v13510_v14  ;;  %8595 = vmatprep.mubr.bf16.mxu1 %v13510_v14  ;;  %v8821_v62 = vor.u32 %v8820_v53, %v8816_v44  ;;  %v19424_v14 = vld [vmem:[%s17008_s29 + $0x198] sm:$0xff] }
 0x389   : > { %9730 = vmatpush1.bf16.msra.mxu0 %v16050_v57  ;;  %9922 = vmatprep.subr.bf16.mxu1 %v16063_v59  ;;  %v19427_v57 = vld [vmem:[%s17008_s29 + $0x1a0] sm:$0xff]  ;;  %v8829_v59 = vshrl.u32 %v19084_v47, 16 }
 0x38a   : > { %9731 = vmatprep.subr.bf16.mxu0 %v16060_v35  ;;  %9923 = vmatpush1.bf16.msra.mxu1 %v16061_v36  ;;  %v8832_v35 = vshll.u32 %v19084_v47, 16  ;;  %v8838_v36 = vshll.u32 %v19087_v34, 16  ;;  %v8853_v47 = vshrl.u32 %v19109_v61, 16 }
 0x38b   : > { %9924 = vmatprep.subr.bf16.mxu1 %v16066_v39  ;;  %v8842_v39 = vshrl.u32 %v19087_v34, 16  ;;  %v8862_v34 = vshll.u32 %v19112_v1, 16 }
 0x38d   : > { %9732 = vmatpush1.bf16.msra.mxu0 %v16058_v21  ;;  %v13521_v21 = vcombine.low %v19406_v43, %v19409_v31 }
 0x38e   : > { %9925 = vmatpush1.bf16.msra.mxu1 %v16064_v41  ;;  %10856 = vmatprep.subr.bf16.mxu0 %v16069_v22  ;;  %v13524_v41 = vcombine.high %v19424_v14, %v19427_v57  ;;  %v8812_v22 = vrot.slane %v8811_v60, 4 }
 0x38f   : > { %8403 = vmatmul.mubr.bf16.gmra.mrb[32].mxu0 %v13509_v49  ;;  %8596 = vmatmul.mubr.bf16.gmra.mrb[32].mxu1 %v13509_v49  ;;  %v8822_v49 = vrot.slane %v8821_v62, 4 }
 0x390   : > { %8412 = vmatprep.mubr.bf16.mxu0 %v13512_v46  ;;  %8605 = vmatprep.mubr.bf16.mxu1 %v13512_v46  ;;  %v8826_v46 = vrot.slane %v8824_v45, 5 }
 0x391   : > { %11049 = vmatprep.subr.bf16.mxu1 %v16075_v23  ;;  %v8831_v23 = vrot.slane %v8829_v59, 4  ;;  %v8872_v59 = vshll.u32 %v19452_v40, 16 }
 0x397   : > { %8413 = vmatmul.mubr.bf16.gmra.mrb[36].mxu0 %v13511_v4  ;;  %8606 = vmatmul.mubr.bf16.gmra.mrb[36].mxu1 %v13511_v4  ;;  %v8834_v4 = vrot.slane %v8832_v35, 5  ;;  %v8877_v35 = vshrl.u32 %v19140_v8, 16 }
 0x398   : > { %8422 = vmatprep.mubr.bf16.mxu0 %v13514_v26  ;;  %8615 = vmatprep.mubr.bf16.mxu1 %v13514_v26  ;;  %v8840_v26 = vrot.slane %v8838_v36, 5  ;;  %v8880_v36 = vshll.u32 %v19140_v8, 16  ;;  %v16067_v8 = vld [vmem:[%s20515_s1 + $0x1000] ss:$16 sps:$4 sm:$0xff]  }
 0x399   : > { %v8835_v0 = vor.u32 %v8834_v4, %v8831_v23  ;;  %v8874_v4 = vrot.slane %v8872_v59, 5 }
 0x39b   : > { %v8836_v53 = vrot.slane %v8835_v0, 4 }
 0x39f   : > { %8423 = vmatmul.mubr.bf16.gmra.mrb[40].mxu0 %v13513_v19  ;;  %8616 = vmatmul.mubr.bf16.gmra.mrb[40].mxu1 %v13513_v19  ;;  %v8844_v19 = vrot.slane %v8842_v39, 4  ;;  %v8886_v39 = vshll.u32 %v19143_v7, 16 }
 0x3a0   : > { %8432 = vmatprep.mubr.bf16.mxu0 %v13516_v6  ;;  %8625 = vmatprep.mubr.bf16.mxu1 %v13516_v6  ;;  %v19438_v6 = vld [vmem:[%s17008_s29 + $0x58] sm:$0x11] }
 0x3a1   : > { %v8845_v3 = vor.u32 %v8844_v19, %v8840_v26  ;;  %v8848_v10 = vshll.u32 %v19438_v6, 16  ;;  %v8879_v19 = vrot.slane %v8877_v35, 4 }
 0x3a3   : > { %v8846_v60 = vrot.slane %v8845_v3, 4 }
 0x3a7   : > { %8433 = vmatmul.mubr.bf16.gmra.mrb[44].mxu0 %v13515_v42  ;;  %8626 = vmatmul.mubr.bf16.gmra.mrb[44].mxu1 %v13515_v42  ;;  %v8856_v42 = vshll.u32 %v19109_v61, 16  ;;  %v8855_v61 = vrot.slane %v8853_v47, 4  ;;  %v8882_v47 = vrot.slane %v8880_v36, 5 }
 0x3a8   : > { %8442 = vmatprep.mubr.bf16.mxu0 %v13518_v17  ;;  %8635 = vmatprep.mubr.bf16.mxu1 %v13518_v17  ;;  %v8866_v17 = vshrl.u32 %v19112_v1, 16 }
 0x3a9   : > { %v8858_v12 = vrot.slane %v8856_v42, 5  ;;  %v8883_v3 = vor.u32 %v8882_v47, %v8879_v19  ;;  %v16085_v19 = vld [vmem:[%s20515_s1 + $0x1048] ss:$16 sps:$4 sm:$0xff]   ;;  %v8934_v47 = vshll.u32 %v19211_v25, 16 }
 0x3aa   : > { %v8868_v29 = vrot.slane %v8866_v17, 4 }
 0x3ab   : > { %v8859_v62 = vor.u32 %v8858_v12, %v8855_v61  ;;  %v16070_v61 = vld [vmem:[%s20515_s1 + $0x1020] ss:$16 sps:$4 sm:$0xff]   ;;  %v8884_v59 = vrot.slane %v8883_v3, 4 }
 0x3af   : > { %8443 = vmatmul.mubr.bf16.gmra.mrb[48].mxu0 %v13517_v32  ;;  %8636 = vmatmul.mubr.bf16.gmra.mrb[48].mxu1 %v13517_v32  ;;  %v8817_v32 = vsel %vm17355_vm2, %v8812_v22, %v8816_v44  ;;  %v8850_v44 = vrot.slane %v8848_v10, 5  ;;  %v16081_v10 = vld [vmem:[%s20515_s1 + $0x102c] ss:$16 sps:$4 sm:$0xff]  }
 0x3b0   : > { %8452 = vmatprep.mubr.bf16.mxu0 %v13520_v56  ;;  %8645 = vmatprep.mubr.bf16.mxu1 %v13520_v56  ;;  %v8827_v56 = vsel %vm17355_vm2, %v8822_v49, %v8826_v46  ;;  %v8860_v46 = vrot.slane %v8859_v62, 4 }
 0x3b1   : > { %v13654_v1 = vcombine.high %v8817_v32, %v8827_v56  ;;  %v8851_v22 = vsel %vm17355_vm2, %v8846_v60, %v8850_v44  ;;  %v13653_v49 = vcombine.low %v8817_v32, %v8827_v56  ;;  %v16073_v32 = vld [vmem:[%s20515_s1 + $0x1008] ss:$16 sps:$4 sm:$0xff]   ;;  %v8914_v60 = vshrl.u32 %v19177_v63, 16 }
 0x3b2   : > { %v16079_v44 = vld [vmem:[%s20515_s1 + $0x1028] ss:$16 sps:$4 sm:$0xff]  }
 0x3b7   : > { %8453 = vmatmul.mubr.bf16.gmra.mrb[52].mxu0 %v13519_v9  ;;  %8646 = vmatmul.mubr.bf16.gmra.mrb[52].mxu1 %v13519_v9  ;;  %v13523_v9 = vcombine.low %v19424_v14, %v19427_v57 }
 0x3b8   : > { %8462 = vmatprep.mubr.bf16.mxu0 %v13522_v50  ;;  %8655 = vmatprep.mubr.bf16.mxu1 %v13522_v50  ;;  %v8864_v50 = vrot.slane %v8862_v34, 5  ;;  %v8888_v34 = vrot.slane %v8886_v39, 5  ;;  %v19500_v39 = vld [vmem:[%s17008_s29 + $0xa0] sm:$0x11] }
 0x3b9   : > { %v8920_v3 = vshll.u32 %v19500_v39, 16 }
 0x3ba   : > { %v8869_v45 = vor.u32 %v8868_v29, %v8864_v50  ;;  %v8865_v56 = vsel %vm17355_vm2, %v8860_v46, %v8864_v50  ;;  %v8901_v29 = vshrl.u32 %v19174_v13, 16  ;;  %v8904_v50 = vshll.u32 %v19174_v13, 16  ;;  %v16076_v13 = vld [vmem:[%s20515_s1 + $0x1040] ss:$16 sps:$4 sm:$0xff]  }
 0x3bb   : > { %v8916_v46 = vrot.slane %v8914_v60, 4 }
 0x3bc   : > { %v8870_v23 = vrot.slane %v8869_v45, 4 }
 0x3be   : > { %v8875_v0 = vsel %vm17355_vm2, %v8870_v23, %v8874_v4  ;;  %v8928_v23 = vshll.u32 %v19208_v52, 16  ;;  %v16084_v4 = vld [vmem:[%s20515_s1 + $0x1064] ss:$16 sps:$4 sm:$0xff]  }
 0x3bf   : > { %8463 = vmatmul.mubr.bf16.gmra.mrb[56].mxu0 %v13521_v21  ;;  %8656 = vmatmul.mubr.bf16.gmra.mrb[56].mxu1 %v13521_v21  ;;  %v8890_v21 = vshrl.u32 %v19143_v7, 16  ;;  %v16072_v7 = vld [vmem:[%s20515_s1 + $0x1024] ss:$16 sps:$4 sm:$0xff]   ;;  %v13658_v45 = vcombine.high %v8865_v56, %v8875_v0 }
 0x3c0   : > { %8472 = vmatprep.mubr.bf16.mxu0 %v13524_v41  ;;  %8665 = vmatprep.mubr.bf16.mxu1 %v13524_v41  ;;  %v8841_v41 = vsel %vm17355_vm2, %v8836_v53, %v8840_v26  ;;  %v19470_v26 = vld [vmem:[%s17008_s29 + $0x88] sm:$0x11]  ;;  %v8910_v53 = vshll.u32 %v19177_v63, 16  ;;  %v8906_v63 = vrot.slane %v8904_v50, 5  ;;  %v13657_v50 = vcombine.low %v8865_v56, %v8875_v0  ;;  %v16096_v0 = vld [vmem:[%s20515_s1 + $0x10a4] ss:$16 sps:$4 sm:$0xff]  }
 0x3c1   : > { %v13656_v42 = vcombine.high %v8841_v41, %v8851_v22  ;;  %v8892_v17 = vrot.slane %v8890_v21, 4  ;;  %v13655_v62 = vcombine.low %v8841_v41, %v8851_v22  ;;  %v8903_v21 = vrot.slane %v8901_v29, 4  ;;  %v16087_v41 = vld [vmem:[%s20515_s1 + $0x104c] ss:$16 sps:$4 sm:$0xff]   ;;  %v16091_v29 = vld [vmem:[%s20515_s1 + $0x1068] ss:$16 sps:$4 sm:$0xff]  }
 0x3c2   : > { %v8925_v22 = vshrl.u32 %v19208_v52, 16  ;;  %v8889_v52 = vsel %vm17355_vm2, %v8884_v59, %v8888_v34  ;;  %v16099_v59 = vld [vmem:[%s20515_s1 + $0x108c] ss:$16 sps:$4 sm:$0xff]  }
 0x3c3   : > { %v8893_v12 = vor.u32 %v8892_v17, %v8888_v34  ;;  %v16090_v34 = vld [vmem:[%s20515_s1 + $0x1084] ss:$16 sps:$4 sm:$0xff]  }
 0x3c5   : > { %v8894_v35 = vrot.slane %v8893_v12, 4  ;;  %v8936_v12 = vrot.slane %v8934_v47, 5 }
 0x3c7   : > { %8473 = vmatmul.mubr.bf16.gmra.mrb[60].mxu0 %v13523_v9  ;;  %8666 = vmatmul.mubr.bf16.gmra.mrb[60].mxu1 %v13523_v9  ;;  %v8896_v9 = vshll.u32 %v19470_v26, 16 }
 0x3c8   : > { %9733 = vmatprep.mubr.bf16.mxu0 %v13654_v1  ;;  %9926 = vmatprep.mubr.bf16.mxu1 %v13654_v1  ;;  %v16078_v1 = vld [vmem:[%s20515_s1 + $0x1044] ss:$16 sps:$4 sm:$0xff]  }
 0x3c9   : > { %v8898_v36 = vrot.slane %v8896_v9, 5 }
 0x3cb   : > { %v8899_v17 = vsel %vm17355_vm2, %v8894_v35, %v8898_v36  ;;  %v16097_v36 = vld [vmem:[%s20515_s1 + $0x1088] ss:$16 sps:$4 sm:$0xff]  }
 0x3cf   : > { %9734 = vmatmul.mubr.bf16.vlgmr.msra.gmra.mrb[0].mxu0 %v13653_v49  ;;  %9927 = vmatmul.mubr.bf16.vlgmr.msra.gmra.mrb[0].mxu1 %v13653_v49  ;;  %v8912_v49 = vrot.slane %v8910_v53, 5  ;;  %v13660_v53 = vcombine.high %v8889_v52, %v8899_v17 }
 0x3d0   : > { %10857 = vmatpush1.bf16.msra.mxu0 %v16067_v8  ;;  %9743 = vmatprep.mubr.bf16.mxu0 %v13656_v42  ;;  %v8938_v8 = vshrl.u32 %v19211_v25, 16  ;;  %v16082_v25 = vld [vmem:[%s20515_s1 + $0x1060] ss:$16 sps:$4 sm:$0xff]  }
 0x3d1   : > { %9936 = vmatprep.mubr.bf16.mxu1 %v13656_v42  ;;  %10858 = vmatprep.subr.bf16.mxu0 %v16072_v7  ;;  %v16093_v42 = vld [vmem:[%s20515_s1 + $0x106c] ss:$16 sps:$4 sm:$0xff]   ;;  %v8907_v7 = vor.u32 %v8906_v63, %v8903_v21  ;;  %v8949_v21 = vshrl.u32 %v19242_v20, 16  ;;  %v8952_v63 = vshll.u32 %v19242_v20, 16  ;;  %v16094_v20 = vld [vmem:[%s20515_s1 + $0x10a0] ss:$16 sps:$4 sm:$0xff]  }
 0x3d2   : > { %11050 = vmatpush1.bf16.msra.mxu1 %v16073_v32  ;;  %v8917_v32 = vor.u32 %v8916_v46, %v8912_v49  ;;  %v8940_v9 = vrot.slane %v8938_v8, 4  ;;  %v8958_v46 = vshll.u32 %v19245_v54, 16 }
 0x3d3   : > { %11051 = vmatprep.subr.bf16.mxu1 %v16081_v10  ;;  %v8927_v10 = vrot.slane %v8925_v22, 4  ;;  %v8908_v60 = vrot.slane %v8907_v7, 4  ;;  %v16105_v22 = vld [vmem:[%s20515_s1 + $0x10ac] ss:$16 sps:$4 sm:$0xff]   ;;  %v8951_v7 = vrot.slane %v8949_v21, 4 }
 0x3d4   : > { %10859 = vmatpush1.bf16.msra.mxu0 %v16070_v61  ;;  %v8930_v61 = vrot.slane %v8928_v23, 5  ;;  %v8941_v35 = vor.u32 %v8940_v9, %v8936_v12  ;;  %v16108_v9 = vld [vmem:[%s20515_s1 + $0x10e4] ss:$16 sps:$4 sm:$0xff]  }
 0x3d5   : > { %10860 = vmatprep.subr.bf16.mxu0 %v16078_v1  ;;  %v19533_v1 = vld [vmem:[%s17008_s29 + $0xb8] sm:$0x11]  ;;  %v8913_v23 = vsel %vm17355_vm2, %v8908_v60, %v8912_v49 }
 0x3d6   : > { %11052 = vmatpush1.bf16.msra.mxu1 %v16079_v44  ;;  %v8918_v44 = vrot.slane %v8917_v32, 4  ;;  %v8944_v56 = vshll.u32 %v19533_v1, 16  ;;  %v8942_v47 = vrot.slane %v8941_v35, 4  ;;  %v16103_v49 = vld [vmem:[%s20515_s1 + $0x10a8] ss:$16 sps:$4 sm:$0xff]   ;;  %v8960_v32 = vrot.slane %v8958_v46, 5 }
 0x3d7   : > { %9744 = vmatmul.mubr.bf16.gmra.mrb[4].mxu0 %v13655_v62  ;;  %9937 = vmatmul.mubr.bf16.gmra.mrb[4].mxu1 %v13655_v62  ;;  %v8922_v62 = vrot.slane %v8920_v3, 5  ;;  %v16106_v35 = vld [vmem:[%s20515_s1 + $0x10e0] ss:$16 sps:$4 sm:$0xff]   ;;  %v19608_v46 = vld [vmem:[%s17008_s29 + $0xe8] sm:$0x11] }
 0x3d8   : > { %9753 = vmatprep.mubr.bf16.mxu0 %v13658_v45  ;;  %9946 = vmatprep.mubr.bf16.mxu1 %v13658_v45  ;;  %v16088_v45 = vld [vmem:[%s20515_s1 + $0x1080] ss:$16 sps:$4 sm:$0xff]   ;;  %v8946_v8 = vrot.slane %v8944_v56, 5 }
 0x3d9   : > { %10861 = vmatpush1.bf16.msra.mxu0 %v16076_v13  ;;  %11053 = vmatprep.subr.bf16.mxu1 %v16087_v41  ;;  %v8931_v13 = vor.u32 %v8930_v61, %v8927_v10  ;;  %v8962_v41 = vshrl.u32 %v19245_v54, 16  ;;  %v13659_v54 = vcombine.low %v8889_v52, %v8899_v17  ;;  %v19569_v61 = vld [vmem:[%s17008_s29 + $0xd0] sm:$0x11]  ;;  %v16111_v17 = vld [vmem:[%s20515_s1 + $0x10cc] ss:$16 sps:$4 sm:$0xff]  }
 0x3da   : > { %10862 = vmatprep.subr.bf16.mxu0 %v16084_v4  ;;  %11054 = vmatpush1.bf16.msra.mxu1 %v16085_v19  ;;  %v8923_v4 = vsel %vm17355_vm2, %v8918_v44, %v8922_v62  ;;  %v16100_v52 = vld [vmem:[%s20515_s1 + $0x10c0] ss:$16 sps:$4 sm:$0xff]   ;;  %v16117_v44 = vld [vmem:[%s20515_s1 + $0x10ec] ss:$16 sps:$4 sm:$0xff]   ;;  %v8973_v62 = vshrl.u32 %v19276_v33, 16 }
 0x3db   : > { %11055 = vmatprep.subr.bf16.mxu1 %v16093_v42  ;;  %v8932_v19 = vrot.slane %v8931_v13, 4  ;;  %v16102_v42 = vld [vmem:[%s20515_s1 + $0x10c4] ss:$16 sps:$4 sm:$0xff]   ;;  %v8964_v3 = vrot.slane %v8962_v41, 4  ;;  %v13662_v10 = vcombine.high %v8913_v23, %v8923_v4  ;;  %v8982_v13 = vshll.u32 %v19279_v16, 16 }
 0x3dc   : > { %v13661_v56 = vcombine.low %v8913_v23, %v8923_v4  ;;  %v8975_v41 = vrot.slane %v8973_v62, 4  ;;  %v19645_v62 = vld [vmem:[%s17008_s29 + $0x100] sm:$0x11] }
 0x3dd   : > { %10863 = vmatpush1.bf16.msra.mxu0 %v16082_v25  ;;  %v8954_v25 = vrot.slane %v8952_v63, 5  ;;  %v8965_v60 = vor.u32 %v8964_v3, %v8960_v32  ;;  %v8984_v23 = vrot.slane %v8982_v13, 5 }
 0x3de   : > { %10864 = vmatprep.subr.bf16.mxu0 %v16090_v34  ;;  %11056 = vmatpush1.bf16.msra.mxu1 %v16091_v29  ;;  %v19579_v34 = vsel %vm17355_vm2, %v8932_v19, %v8936_v12  ;;  %v16109_v29 = vld [vmem:[%s20515_s1 + $0x10c8] ss:$16 sps:$4 sm:$0xff]   ;;  %v8968_v12 = vshll.u32 %v19569_v61, 16  ;;  %v8997_v19 = vshrl.u32 %v19310_v18, 16 }
 0x3df   : > { %9754 = vmatmul.mubr.bf16.gmra.mrb[8].mxu0 %v13657_v50  ;;  %9947 = vmatmul.mubr.bf16.gmra.mrb[8].mxu1 %v13657_v50  ;;  %v8947_v50 = vsel %vm17355_vm2, %v8942_v47, %v8946_v8  ;;  %v8966_v21 = vrot.slane %v8965_v60, 4  ;;  %v16123_v47 = vld [vmem:[%s20515_s1 + $0x110c] ss:$16 sps:$4 sm:$0xff]   ;;  %v9006_v8 = vshll.u32 %v19313_v38, 16 }
 0x3e0   : > { %9763 = vmatprep.mubr.bf16.mxu0 %v13660_v53  ;;  %9956 = vmatprep.mubr.bf16.mxu1 %v13660_v53  ;;  %v8955_v53 = vor.u32 %v8954_v25, %v8951_v7  ;;  %v8970_v63 = vrot.slane %v8968_v12, 5  ;;  %v16129_v7 = vld [vmem:[%s20515_s1 + $0x112c] ss:$16 sps:$4 sm:$0xff]   ;;  %v16127_v12 = vld [vmem:[%s20515_s1 + $0x1128] ss:$16 sps:$4 sm:$0xff]  }
 0x3e1   : > { %10865 = vmatpush1.bf16.msra.mxu0 %v16088_v45  ;;  %11057 = vmatprep.subr.bf16.mxu1 %v16099_v59  ;;  %v8976_v45 = vshll.u32 %v19276_v33, 16  ;;  %v8986_v59 = vshrl.u32 %v19279_v16, 16  ;;  %v16115_v33 = vld [vmem:[%s20515_s1 + $0x10e8] ss:$16 sps:$4 sm:$0xff]  }
 0x3e2   : > { %10866 = vmatprep.subr.bf16.mxu0 %v16096_v0  ;;  %11058 = vmatpush1.bf16.msra.mxu1 %v16097_v36  ;;  %v16114_v0 = vld [vmem:[%s20515_s1 + $0x1104] ss:$16 sps:$4 sm:$0xff]   ;;  %v13664_v36 = vcombine.high %v19579_v34, %v8947_v50  ;;  %v8956_v16 = vrot.slane %v8955_v53, 4  ;;  %v8971_v25 = vsel %vm17355_vm2, %v8966_v21, %v8970_v63  ;;  %v9008_v53 = vrot.slane %v9006_v8, 5 }
 0x3e3   : > { %11059 = vmatprep.subr.bf16.mxu1 %v16105_v22  ;;  %v8978_v22 = vrot.slane %v8976_v45, 5  ;;  %v8988_v4 = vrot.slane %v8986_v59, 4  ;;  %v9021_v21 = vshrl.u32 %v19344_v48, 16  ;;  %v9024_v63 = vshll.u32 %v19344_v48, 16  ;;  %v16130_v48 = vld [vmem:[%s20515_s1 + $0x1160] ss:$16 sps:$4 sm:$0xff]  }
 0x3e5   : > { %10867 = vmatpush1.bf16.msra.mxu0 %v16094_v20  ;;  %v9000_v20 = vshll.u32 %v19310_v18, 16  ;;  %v16121_v18 = vld [vmem:[%s20515_s1 + $0x1108] ss:$16 sps:$4 sm:$0xff]   ;;  %v8979_v3 = vor.u32 %v8978_v22, %v8975_v41  ;;  %v9030_v41 = vshll.u32 %v19347_v15, 16  ;;  %v9034_v22 = vshrl.u32 %v19347_v15, 16 }
 0x3e6   : > { %10868 = vmatprep.subr.bf16.mxu0 %v16102_v42  ;;  %11060 = vmatpush1.bf16.msra.mxu1 %v16103_v49  ;;  %v9010_v42 = vshrl.u32 %v19313_v38, 16  ;;  %v16120_v49 = vld [vmem:[%s20515_s1 + $0x1124] ss:$16 sps:$4 sm:$0xff]   ;;  %v8961_v38 = vsel %vm17355_vm2, %v8956_v16, %v8960_v32  ;;  %v16133_v16 = vld [vmem:[%s20515_s1 + $0x1148] ss:$16 sps:$4 sm:$0xff]  }
 0x3e7   : > { %9764 = vmatmul.mubr.bf16.gmra.mrb[12].mxu0 %v13659_v54  ;;  %9957 = vmatmul.mubr.bf16.gmra.mrb[12].mxu1 %v13659_v54  ;;  %v16112_v54 = vld [vmem:[%s20515_s1 + $0x1100] ss:$16 sps:$4 sm:$0xff]   ;;  %v16126_v32 = vld [vmem:[%s20515_s1 + $0x1144] ss:$16 sps:$4 sm:$0xff]   ;;  %v13666_v45 = vcombine.high %v8961_v38, %v8971_v25  ;;  %v8980_v13 = vrot.slane %v8979_v3, 4  ;;  %v13665_v15 = vcombine.low %v8961_v38, %v8971_v25  ;;  %v9036_v3 = vrot.slane %v9034_v22, 4 }
 0x3e8   : > { %9773 = vmatprep.mubr.bf16.mxu0 %v13662_v10  ;;  %9966 = vmatprep.mubr.bf16.mxu1 %v13662_v10  ;;  %v8989_v10 = vor.u32 %v8988_v4, %v8984_v23  ;;  %v9012_v60 = vrot.slane %v9010_v42, 4  ;;  %v16141_v4 = vld [vmem:[%s20515_s1 + $0x116c] ss:$16 sps:$4 sm:$0xff]   ;;  %v16138_v42 = vld [vmem:[%s20515_s1 + $0x1184] ss:$16 sps:$4 sm:$0xff]  }
 0x3e9   : > { %10869 = vmatpush1.bf16.msra.mxu0 %v16100_v52  ;;  %11061 = vmatprep.subr.bf16.mxu1 %v16111_v17  ;;  %v8992_v52 = vshll.u32 %v19608_v46, 16  ;;  %v8999_v17 = vrot.slane %v8997_v19, 4  ;;  %v8985_v19 = vsel %vm17355_vm2, %v8980_v13, %v8984_v23  ;;  %v16139_v23 = vld [vmem:[%s20515_s1 + $0x1168] ss:$16 sps:$4 sm:$0xff]   ;;  %v16136_v38 = vld [vmem:[%s20515_s1 + $0x1180] ss:$16 sps:$4 sm:$0xff]  }
 0x3ea   : > { %10870 = vmatprep.subr.bf16.mxu0 %v16108_v9  ;;  %11062 = vmatpush1.bf16.msra.mxu1 %v16109_v29  ;;  %v9002_v9 = vrot.slane %v9000_v20, 5  ;;  %v16118_v29 = vld [vmem:[%s20515_s1 + $0x1120] ss:$16 sps:$4 sm:$0xff]   ;;  %v8990_v59 = vrot.slane %v8989_v10, 4  ;;  %v16147_v25 = vld [vmem:[%s20515_s1 + $0x118c] ss:$16 sps:$4 sm:$0xff]  }
 0x3eb   : > { %11063 = vmatprep.subr.bf16.mxu1 %v16117_v44  ;;  %v13663_v44 = vcombine.low %v19579_v34, %v8947_v50  ;;  %v9016_v34 = vshll.u32 %v19645_v62, 16  ;;  %v16132_v50 = vld [vmem:[%s20515_s1 + $0x1164] ss:$16 sps:$4 sm:$0xff]   ;;  %v9048_v13 = vshll.u32 %v19366_v58, 16 }
 0x3ec   : > { %v19720_v22 = vld [vmem:[%s17008_s29 + $0x130] sm:$0x11] }
 0x3ed   : > { %10871 = vmatpush1.bf16.msra.mxu0 %v16106_v35  ;;  %v8994_v35 = vrot.slane %v8992_v52, 5  ;;  %v9018_v8 = vrot.slane %v9016_v34, 5  ;;  %v19681_v52 = vld [vmem:[%s17008_s29 + $0x118] sm:$0x11] }
 0x3ee   : > { %10872 = vmatprep.subr.bf16.mxu0 %v16114_v0  ;;  %11064 = vmatpush1.bf16.msra.mxu1 %v16115_v33  ;;  %v16124_v0 = vld [vmem:[%s20515_s1 + $0x1140] ss:$16 sps:$4 sm:$0xff]   ;;  %v16135_v33 = vld [vmem:[%s20515_s1 + $0x114c] ss:$16 sps:$4 sm:$0xff]  }
 0x3ef   : > { %9774 = vmatmul.mubr.bf16.gmra.mrb[16].mxu0 %v13661_v56  ;;  %9967 = vmatmul.mubr.bf16.gmra.mrb[16].mxu1 %v13661_v56  ;;  %v9003_v56 = vor.u32 %v9002_v9, %v8999_v17  ;;  %v8995_v20 = vsel %vm17355_vm2, %v8990_v59, %v8994_v35  ;;  %v16144_v9 = vld [vmem:[%s20515_s1 + $0x11a4] ss:$16 sps:$4 sm:$0xff]   ;;  %v9054_v59 = vshll.u32 %v19369_v24, 16  ;;  %v9058_v35 = vshrl.u32 %v19369_v24, 16 }
 0x3f0   : > { %9783 = vmatprep.mubr.bf16.mxu0 %v13664_v36  ;;  %9976 = vmatprep.mubr.bf16.mxu1 %v13664_v36  ;;  %v9013_v36 = vor.u32 %v9012_v60, %v9008_v53  ;;  %v13668_v10 = vcombine.high %v8985_v19, %v8995_v20 }
 0x3f1   : > { %10873 = vmatpush1.bf16.msra.mxu0 %v16112_v54  ;;  %11065 = vmatprep.subr.bf16.mxu1 %v16123_v47  ;;  %v9004_v54 = vrot.slane %v9003_v56, 4  ;;  %v16142_v56 = vld [vmem:[%s20515_s1 + $0x11a0] ss:$16 sps:$4 sm:$0xff]  }
 0x3f2   : > { %10874 = vmatprep.subr.bf16.mxu0 %v16120_v49  ;;  %11066 = vmatpush1.bf16.msra.mxu1 %v16121_v18  ;;  %v9014_v47 = vrot.slane %v9013_v36, 4  ;;  %v9023_v49 = vrot.slane %v9021_v21, 4  ;;  %v9026_v18 = vrot.slane %v9024_v63, 5  ;;  %v9050_v21 = vrot.slane %v9048_v13, 5 }
 0x3f3   : > { %11067 = vmatprep.subr.bf16.mxu1 %v16129_v7  ;;  %v9032_v7 = vrot.slane %v9030_v41, 5  ;;  %v19691_v17 = vsel %vm17355_vm2, %v9004_v54, %v9008_v53  ;;  %v9040_v53 = vshll.u32 %v19681_v52, 16  ;;  %v9056_v63 = vrot.slane %v9054_v59, 5  ;;  %v16157_v54 = vld [vmem:[%s20515_s1 + $0x11c8] ss:$16 sps:$4 sm:$0xff]  }
 0x3f4   : > { %v9019_v60 = vsel %vm17355_vm2, %v9014_v47, %v9018_v8  ;;  %v9060_v41 = vrot.slane %v9058_v35, 4  ;;  %v9093_v13 = vshrl.u32 %v19386_v30, 16  ;;  %v9096_v59 = vshll.u32 %v19386_v30, 16 }
 0x3f5   : > { %10875 = vmatpush1.bf16.msra.mxu0 %v16118_v29  ;;  %v16145_v29 = vld [vmem:[%s20515_s1 + $0x1188] ss:$16 sps:$4 sm:$0xff]   ;;  %v13670_v24 = vcombine.high %v19691_v17, %v9019_v60  ;;  %v9102_v35 = vshll.u32 %v19389_v2, 16 }
 0x3f6   : > { %10876 = vmatprep.subr.bf16.mxu0 %v16126_v32  ;;  %11068 = vmatpush1.bf16.msra.mxu1 %v16127_v12  ;;  %v9027_v32 = vor.u32 %v9026_v18, %v9023_v49  ;;  %v9037_v12 = vor.u32 %v9036_v3, %v9032_v7  ;;  %v9069_v49 = vshrl.u32 %v19376_v51, 16  ;;  %v9072_v18 = vshll.u32 %v19376_v51, 16 }
 0x3f7   : > { %9784 = vmatmul.mubr.bf16.gmra.mrb[20].mxu0 %v13663_v44  ;;  %9977 = vmatmul.mubr.bf16.gmra.mrb[20].mxu1 %v13663_v44  ;;  %v16153_v44 = vld [vmem:[%s20515_s1 + $0x11ac] ss:$16 sps:$4 sm:$0xff]   ;;  %v9078_v3 = vshll.u32 %v19379_v5, 16 }
 0x3f8   : > { %9793 = vmatprep.mubr.bf16.mxu0 %v13666_v45  ;;  %9986 = vmatprep.mubr.bf16.mxu1 %v13666_v45  ;;  %v9045_v45 = vshrl.u32 %v19366_v58, 16  ;;  %v16151_v58 = vld [vmem:[%s20515_s1 + $0x11a8] ss:$16 sps:$4 sm:$0xff]   ;;  %v9028_v36 = vrot.slane %v9027_v32, 4  ;;  %v9038_v34 = vrot.slane %v9037_v12, 4  ;;  %v9071_v32 = vrot.slane %v9069_v49, 4 }
 0x3f9   : > { %10877 = vmatpush1.bf16.msra.mxu0 %v16124_v0  ;;  %11069 = vmatprep.subr.bf16.mxu1 %v16135_v33  ;;  %v13667_v0 = vcombine.low %v8985_v19, %v8995_v20  ;;  %v16150_v33 = vld [vmem:[%s20515_s1 + $0x11c4] ss:$16 sps:$4 sm:$0xff]   ;;  %v16159_v19 = vld [vmem:[%s20515_s1 + $0x11cc] ss:$16 sps:$4 sm:$0xff]   ;;  %v9074_v12 = vrot.slane %v9072_v18, 5 }
 0x3fa   : > { %10878 = vmatprep.subr.bf16.mxu0 %v16132_v50  ;;  %11070 = vmatpush1.bf16.msra.mxu1 %v16133_v16  ;;  %v9042_v50 = vrot.slane %v9040_v53, 5  ;;  %v9047_v16 = vrot.slane %v9045_v45, 4  ;;  %v16156_v20 = vld [vmem:[%s20515_s1 + $0x11e4] ss:$16 sps:$4 sm:$0xff]   ;;  %v9080_v53 = vrot.slane %v9078_v3, 5 }
 0x3fb   : > { %11071 = vmatprep.subr.bf16.mxu1 %v16141_v4  ;;  %v16148_v4 = vld [vmem:[%s20515_s1 + $0x11c0] ss:$16 sps:$4 sm:$0xff]   ;;  %v19754_v45 = vld [vmem:[%s17008_s29 + $0x148] sm:$0x11] }
 0x3fc   : > { %v9043_v47 = vsel %vm17355_vm2, %v9038_v34, %v9042_v50  ;;  %v9051_v8 = vor.u32 %v9050_v21, %v9047_v16  ;;  %v9088_v30 = vshll.u32 %v19754_v45, 16  ;;  %v19766_v50 = vld [vmem:[%s17008_s29 + $0x160] sm:$0x11] }
 0x3fd   : > { %10879 = vmatpush1.bf16.msra.mxu0 %v16130_v48  ;;  %v9033_v48 = vsel %vm17355_vm2, %v9028_v36, %v9032_v7  ;;  %v9082_v7 = vshrl.u32 %v19379_v5, 16  ;;  %v9104_v36 = vrot.slane %v9102_v35, 5 }
 0x3fe   : > { %10880 = vmatprep.subr.bf16.mxu0 %v16138_v42  ;;  %11072 = vmatpush1.bf16.msra.mxu1 %v16139_v23  ;;  %v9061_v42 = vor.u32 %v9060_v41, %v9056_v63  ;;  %v9064_v23 = vshll.u32 %v19720_v22, 16  ;;  %v13672_v51 = vcombine.high %v9033_v48, %v9043_v47  ;;  %v13671_v34 = vcombine.low %v9033_v48, %v9043_v47 }
 0x3ff   : > { %9794 = vmatmul.mubr.bf16.gmra.mrb[24].mxu0 %v13665_v15  ;;  %9987 = vmatmul.mubr.bf16.gmra.mrb[24].mxu1 %v13665_v15  ;;  %v16162_v15 = vld [vmem:[%s20515_s1 + $0x11ec] ss:$16 sps:$4 sm:$0xff]   ;;  %v9130_v48 = vshrl.u32 %v19399_v11, 16 }
 0x400   : > { %9803 = vmatprep.mubr.bf16.mxu0 %v13668_v10  ;;  %9996 = vmatprep.mubr.bf16.mxu1 %v13668_v10  ;;  %v16154_v10 = vld [vmem:[%s20515_s1 + $0x11e0] ss:$16 sps:$4 sm:$0xff]   ;;  %v9066_v5 = vrot.slane %v9064_v23, 5 }
 0x401   : > { %10881 = vmatpush1.bf16.msra.mxu0 %v16136_v38  ;;  %11073 = vmatprep.subr.bf16.mxu1 %v16147_v25  ;;  %v16160_v38 = vld [vmem:[%s20515_s1 + $0x11e8] ss:$16 sps:$4 sm:$0xff]   ;;  %v13669_v25 = vcombine.low %v19691_v17, %v9019_v60  ;;  %v9106_v17 = vshrl.u32 %v19389_v2, 16 }
 0x402   : > { %10882 = vmatprep.subr.bf16.mxu0 %v16144_v9  ;;  %11074 = vmatpush1.bf16.msra.mxu1 %v16145_v29  ;;  %v9052_v9 = vrot.slane %v9051_v8, 4  ;;  %v9062_v29 = vrot.slane %v9061_v42, 4  ;;  %v9126_v8 = vshll.u32 %v19399_v11, 16 }
 0x403   : > { %11075 = vmatprep.subr.bf16.mxu1 %v16153_v44  ;;  %v9084_v44 = vrot.slane %v9082_v7, 4  ;;  %v9108_v2 = vrot.slane %v9106_v17, 4 }
 0x404   : > { %v9057_v60 = vsel %vm17355_vm2, %v9052_v9, %v9056_v63 }
 0x405   : > { %10883 = vmatpush1.bf16.msra.mxu0 %v16142_v56  ;;  %v9067_v56 = vsel %vm17355_vm2, %v9062_v29, %v9066_v5  ;;  %v9109_v63 = vor.u32 %v9108_v2, %v9104_v36 }
 0x406   : > { %10884 = vmatprep.subr.bf16.mxu0 %v16150_v33  ;;  %11076 = vmatpush1.bf16.msra.mxu1 %v16151_v58  ;;  %v9085_v33 = vor.u32 %v9084_v44, %v9080_v53  ;;  %v9095_v58 = vrot.slane %v9093_v13, 4  ;;  %v13674_v16 = vcombine.high %v9057_v60, %v9067_v56  ;;  %v13673_v23 = vcombine.low %v9057_v60, %v9067_v56 }
 0x407   : > { %9804 = vmatmul.mubr.bf16.gmra.mrb[28].mxu0 %v13667_v0  ;;  %9997 = vmatmul.mubr.bf16.gmra.mrb[28].mxu1 %v13667_v0  ;;  %v9075_v0 = vor.u32 %v9074_v12, %v9071_v32  ;;  %v9110_v18 = vrot.slane %v9109_v63, 4  ;;  %v9141_v12 = vshrl.u32 %v19406_v43, 16  ;;  %v9150_v44 = vshll.u32 %v19409_v31, 16 }
 0x408   : > { %9813 = vmatprep.mubr.bf16.mxu0 %v13670_v24  ;;  %10006 = vmatprep.mubr.bf16.mxu1 %v13670_v24  ;;  %v9098_v24 = vrot.slane %v9096_v59, 5  ;;  %v9086_v41 = vrot.slane %v9085_v33, 4  ;;  %v9154_v13 = vshrl.u32 %v19409_v31, 16 }
 0x409   : > { %10885 = vmatpush1.bf16.msra.mxu0 %v16148_v4  ;;  %11077 = vmatprep.subr.bf16.mxu1 %v16159_v19  ;;  %v9076_v21 = vrot.slane %v9075_v0, 4  ;;  %v9090_v4 = vrot.slane %v9088_v30, 5  ;;  %v9143_v0 = vrot.slane %v9141_v12, 4  ;;  %v9152_v30 = vrot.slane %v9150_v44, 5 }
 0x40a   : > { %10886 = vmatprep.subr.bf16.mxu0 %v16156_v20  ;;  %11078 = vmatpush1.bf16.msra.mxu1 %v16157_v54  ;;  %v9099_v19 = vor.u32 %v9098_v24, %v9095_v58  ;;  %v9112_v20 = vshll.u32 %v19766_v50, 16  ;;  %v9117_v54 = vshrl.u32 %v19396_v37, 16  ;;  %v9156_v58 = vrot.slane %v9154_v13, 4  ;;  %v19790_v24 = vld [vmem:[%s17008_s29 + $0x190] sm:$0x11] }
 0x40b   : > { %11079 = vmatprep.subr.bf16.mxu1 %v16162_v15  ;;  %v9120_v15 = vshll.u32 %v19396_v37, 16  ;;  %v9081_v47 = vsel %vm17355_vm2, %v9076_v21, %v9080_v53  ;;  %v9091_v42 = vsel %vm17355_vm2, %v9086_v41, %v9090_v4  ;;  %v9128_v37 = vrot.slane %v9126_v8, 5 }
 0x40c   : > { %v9100_v49 = vrot.slane %v9099_v19, 4  ;;  %v9114_v3 = vrot.slane %v9112_v20, 5  ;;  %v9119_v7 = vrot.slane %v9117_v54, 4  ;;  %v9144_v53 = vshll.u32 %v19406_v43, 16 }
 0x40d   : > { %10887 = vmatpush1.bf16.msra.mxu0 %v16154_v10  ;;  %v9122_v10 = vrot.slane %v9120_v15, 5  ;;  %v13675_v59 = vcombine.low %v9081_v47, %v9091_v42  ;;  %v9157_v2 = vor.u32 %v9156_v58, %v9152_v30  ;;  %v9168_v21 = vshll.u32 %v19424_v14, 16 }
 0x40e   : > { %11080 = vmatpush1.bf16.msra.mxu1 %v16160_v38  ;;  %v9132_v38 = vrot.slane %v9130_v48, 4  ;;  %v9105_v11 = vsel %vm17355_vm2, %v9100_v49, %v9104_v36  ;;  %v9115_v9 = vsel %vm17355_vm2, %v9110_v18, %v9114_v3  ;;  %v9146_v33 = vrot.slane %v9144_v53, 5  ;;  %v16763_v53 = vld [vmem:[%s17008_s29 + $0x30] sm:$0xff] }
 0x40f   : > { %9814 = vmatmul.mubr.bf16.gmra.mrb[32].mxu0 %v13669_v25  ;;  %10007 = vmatmul.mubr.bf16.gmra.mrb[32].mxu1 %v13669_v25  ;;  %v13676_v25 = vcombine.high %v9081_v47, %v9091_v42  ;;  %v9123_v29 = vor.u32 %v9122_v10, %v9119_v7  ;;  %v13678_v35 = vcombine.high %v9105_v11, %v9115_v9  ;;  %v9174_v41 = vshll.u32 %v19427_v57, 16 }
 0x410   : > { %9823 = vmatprep.mubr.bf16.mxu0 %v13672_v51  ;;  %10016 = vmatprep.mubr.bf16.mxu1 %v13672_v51  ;;  %v19778_v51 = vld [vmem:[%s17008_s29 + $0x178] sm:$0x11]  ;;  %v9133_v5 = vor.u32 %v9132_v38, %v9128_v37  ;;  %v9147_v36 = vor.u32 %v9146_v33, %v9143_v0  ;;  %v9178_v4 = vshrl.u32 %v19427_v57, 16  ;;  %v13677_v19 = vcombine.low %v9105_v11, %v9115_v9  ;;  %v16765_v33 = vld [vmem:[%s17008_s29 + $0x48] sm:$0xff] }
 0x411   : > { %v9136_v32 = vshll.u32 %v19778_v51, 16  ;;  %v9124_v17 = vrot.slane %v9123_v29, 4  ;;  %v9158_v54 = vrot.slane %v9157_v2, 4  ;;  %v9170_v48 = vrot.slane %v9168_v21, 5  ;;  %v16762_v29 = vld [vmem:[%s17008_s29 + $0x38] sm:$0xff]  ;;  %v16767_v21 = vld [vmem:[%s17008_s29 + $0x60] sm:$0xff] }
 0x412   : > { %v9134_v60 = vrot.slane %v9133_v5, 4  ;;  %v9148_v20 = vrot.slane %v9147_v36, 4  ;;  %v9176_v47 = vrot.slane %v9174_v41, 5  ;;  %v9180_v42 = vrot.slane %v9178_v4, 4  ;;  %v16766_v36 = vld [vmem:[%s17008_s29 + $0x68] sm:$0xff] }
 0x413   : > { %v9138_v56 = vrot.slane %v9136_v32, 5  ;;  %v9129_v43 = vsel %vm17355_vm2, %v9124_v17, %v9128_v37  ;;  %v10233_v5 = vrot.slane %v16762_v29, 5  ;;  %v13749_v44 = vrot.slane %v16763_v53, 9  ;;  %v16764_v17 = vld [vmem:[%s17008_s29 + $0x50] sm:$0xff] }
 0x414   : > { %v9181_v18 = vor.u32 %v9180_v42, %v9176_v47  ;;  %v10247_v2 = vrot.slane %v16766_v36, 5  ;;  %v13751_v41 = vrot.slane %v16767_v21, 9 }
 0x415   : > { %v9139_v31 = vsel %vm17355_vm2, %v9134_v60, %v9138_v56  ;;  %v10235_v13 = vrot.slane %v10233_v5, 4  ;;  %v10240_v60 = vrot.slane %v16764_v17, 5 }
 0x416   : > { %v13680_v63 = vcombine.high %v9129_v43, %v9139_v31  ;;  %v13679_v7 = vcombine.low %v9129_v43, %v9139_v31  ;;  %v9182_v38 = vrot.slane %v9181_v18, 4  ;;  %v10249_v4 = vrot.slane %v10247_v2, 4 }
 0x417   : > { %9824 = vmatmul.mubr.bf16.gmra.mrb[36].mxu0 %v13671_v34  ;;  %10017 = vmatmul.mubr.bf16.gmra.mrb[36].mxu1 %v13671_v34  ;;  %v9160_v34 = vshll.u32 %v19790_v24, 16  ;;  %v10242_v58 = vrot.slane %v10240_v60, 4 }
 0x418   : > { %9833 = vmatprep.mubr.bf16.mxu0 %v13674_v16  ;;  %10026 = vmatprep.mubr.bf16.mxu1 %v13674_v16  ;;  %v9165_v16 = vshrl.u32 %v19424_v14, 16  ;;  %v9153_v14 = vsel %vm17355_vm2, %v9148_v20, %v9152_v30  ;;  %v13750_v30 = vrot.slane %v16765_v33, 9  ;;  %v16768_v20 = vld [vmem:[%s17008_s29 + $0x80] sm:$0xff] }
 0x419   : > { %v9162_v15 = vrot.slane %v9160_v34, 5 }
 0x41a   : > { %v9167_v8 = vrot.slane %v9165_v16, 4  ;;  %v10241_v43 = vsel %vm17722_vm5, %v13750_v30, %v10240_v60 }
 0x41b   : > { %v9163_v57 = vsel %vm17355_vm2, %v9158_v54, %v9162_v15  ;;  %v10254_v54 = vrot.slane %v16768_v20, 5  ;;  %v16779_v20 = vld [vmem:[%s17008_s29 + $0xf0] sm:$0xff] }
 0x41c   : > { %v9171_v49 = vor.u32 %v9170_v48, %v9167_v8  ;;  %v13682_v10 = vcombine.high %v9153_v14, %v9163_v57  ;;  %v13681_v32 = vcombine.low %v9153_v14, %v9163_v57  ;;  %v16769_v48 = vld [vmem:[%s17008_s29 + $0x78] sm:$0xff] }
 0x41d   : > { %v10256_v42 = vrot.slane %v10254_v54, 4 }
 0x41e   : > { %v9172_v37 = vrot.slane %v9171_v49, 4  ;;  %v16770_v49 = vld [vmem:[%s17008_s29 + $0x98] sm:$0xff] }
 0x41f   : > { %9834 = vmatmul.mubr.bf16.gmra.mrb[40].mxu0 %v13673_v23  ;;  %10027 = vmatmul.mubr.bf16.gmra.mrb[40].mxu1 %v13673_v23  ;;  %v19802_v23 = vld [vmem:[%s17008_s29 + $0x1a8] sm:$0x11]  ;;  %v10261_v18 = vrot.slane %v16770_v49, 5 }
 0x420   : > { %9843 = vmatprep.mubr.bf16.mxu0 %v13676_v25  ;;  %10036 = vmatprep.mubr.bf16.mxu1 %v13676_v25  ;;  %v9184_v3 = vshll.u32 %v19802_v23, 16  ;;  %v9177_v11 = vsel %vm17355_vm2, %v9172_v37, %v9176_v47  ;;  %v13752_v47 = vrot.slane %v16769_v48, 9 }
 0x422   : > { %v9186_v25 = vrot.slane %v9184_v3, 5  ;;  %v10255_v14 = vsel %vm17722_vm5, %v13752_v47, %v10254_v54  ;;  %v13757_v54 = vrot.slane %v16779_v20, 9  ;;  %v16780_v47 = vld [vmem:[%s17008_s29 + $0x110] sm:$0xff]  ;;  %v16791_v20 = vld [vmem:[%s17008_s29 + $0x180] sm:$0xff] }
 0x424   : > { %v9187_v9 = vsel %vm17355_vm2, %v9182_v38, %v9186_v25  ;;  %v10263_v38 = vrot.slane %v10261_v18, 4 }
 0x425   : > { %v13684_v12 = vcombine.high %v9177_v11, %v9187_v9  ;;  %v13683_v56 = vcombine.low %v9177_v11, %v9187_v9  ;;  %v16772_v9 = vld [vmem:[%s17008_s29 + $0xb0] sm:$0xff] }
 0x426   : > { %v10268_v29 = vrot.slane %v16772_v9, 5 }
 0x427   : > { %9844 = vmatmul.mubr.bf16.gmra.mrb[44].mxu0 %v13675_v59  ;;  %10037 = vmatmul.mubr.bf16.gmra.mrb[44].mxu1 %v13675_v59  ;;  %v10236_v59 = vrot.slane %v19420_v27, 5  ;;  %v10243_v27 = vrot.slane %v19438_v6, 5  ;;  %v10250_v6 = vrot.slane %v19452_v40, 5  ;;  %v10257_v40 = vrot.slane %v19470_v26, 5 }
 0x428   : > { %9853 = vmatprep.mubr.bf16.mxu0 %v13678_v35  ;;  %10046 = vmatprep.mubr.bf16.mxu1 %v13678_v35  ;;  %v10234_v35 = vsel %vm17722_vm5, %v13749_v44, %v10233_v5  ;;  %v10264_v26 = vrot.slane %v19500_v39, 5  ;;  %v10270_v44 = vrot.slane %v10268_v29, 4  ;;  %v10271_v39 = vrot.slane %v19533_v1, 5 }
 0x429   : > { %v10237_v28 = vsel %vm17722_vm5, %v10235_v13, %v10236_v59  ;;  %v10244_v31 = vsel %vm17722_vm5, %v10242_v58, %v10243_v27  ;;  %v10258_v57 = vsel %vm17722_vm5, %v10256_v42, %v10257_v40  ;;  %v10278_v1 = vrot.slane %v19569_v61, 5  ;;  %v16776_v27 = vld [vmem:[%s17008_s29 + $0xe0] sm:$0xff] }
 0x42a   : > { %v13830_v0 = vcombine.high %v10234_v35, %v10237_v28  ;;  %v13829_v34 = vcombine.low %v10234_v35, %v10237_v28  ;;  %v13832_v16 = vcombine.high %v10241_v43, %v10244_v31  ;;  %v13831_v15 = vcombine.low %v10241_v43, %v10244_v31  ;;  %v16774_v35 = vld [vmem:[%s17008_s29 + $0xc8] sm:$0xff] }
 0x42b   : > { %v10265_v11 = vsel %vm17722_vm5, %v10263_v38, %v10264_v26  ;;  %v13835_v5 = vcombine.low %v10255_v14, %v10258_v57  ;;  %v10272_v59 = vsel %vm17722_vm5, %v10270_v44, %v10271_v39  ;;  %v10275_v28 = vrot.slane %v16774_v35, 5  ;;  %v16785_v39 = vld [vmem:[%s17008_s29 + $0x138] sm:$0xff] }
 0x42c   : > { %v10282_v43 = vrot.slane %v16776_v27, 5  ;;  %v10285_v61 = vrot.slane %v19608_v46, 5  ;;  %v10292_v46 = vrot.slane %v19645_v62, 5  ;;  %v10296_v42 = vrot.slane %v16780_v47, 5 }
 0x42d   : > { %v10277_v33 = vrot.slane %v10275_v28, 4  ;;  %v10299_v62 = vrot.slane %v19681_v52, 5  ;;  %v10306_v52 = vrot.slane %v19720_v22, 5  ;;  %v10313_v22 = vrot.slane %v19754_v45, 5 }
 0x42e   : > { %v10320_v45 = vrot.slane %v19766_v50, 5  ;;  %v10327_v50 = vrot.slane %v19778_v51, 5  ;;  %v10334_v51 = vrot.slane %v19790_v24, 5 }
 0x42f   : > { %9854 = vmatmul.mubr.bf16.gmra.mrb[48].mxu0 %v13677_v19  ;;  %10047 = vmatmul.mubr.bf16.gmra.mrb[48].mxu1 %v13677_v19  ;;  %v10248_v19 = vsel %vm17722_vm5, %v13751_v41, %v10247_v2  ;;  %v10279_v58 = vsel %vm17722_vm5, %v10277_v33, %v10278_v1  ;;  %v16777_v2 = vld [vmem:[%s17008_s29 + $0xd8] sm:$0xff]  ;;  %v16787_v33 = vld [vmem:[%s17008_s29 + $0x150] sm:$0xff] }
 0x430   : > { %9863 = vmatprep.mubr.bf16.mxu0 %v13680_v63  ;;  %10056 = vmatprep.mubr.bf16.mxu1 %v13680_v63  ;;  %v10251_v63 = vsel %vm17722_vm5, %v10249_v4, %v10250_v6  ;;  %v16778_v4 = vld [vmem:[%s17008_s29 + $0xf8] sm:$0xff]  ;;  %v13761_v1 = vrot.slane %v16787_v33, 9 }
 0x431   : > { %v13834_v8 = vcombine.high %v10248_v19, %v10251_v63  ;;  %v13833_v3 = vcombine.low %v10248_v19, %v10251_v63  ;;  %v10289_v6 = vrot.slane %v16778_v4, 5  ;;  %v16790_v4 = vld [vmem:[%s17008_s29 + $0x188] sm:$0xff] }
 0x437   : > { %9864 = vmatmul.mubr.bf16.gmra.mrb[52].mxu0 %v13679_v7  ;;  %10057 = vmatmul.mubr.bf16.gmra.mrb[52].mxu1 %v13679_v7  ;;  %v13836_v7 = vcombine.high %v10255_v14, %v10258_v57  ;;  %v16781_v57 = vld [vmem:[%s17008_s29 + $0x108] sm:$0xff] }
 0x438   : > { %9873 = vmatprep.mubr.bf16.mxu0 %v13682_v10  ;;  %10066 = vmatprep.mubr.bf16.mxu1 %v13682_v10  ;;  %v16771_v10 = vld [vmem:[%s17008_s29 + $0x90] sm:$0xff]  ;;  %v13758_v49 = vrot.slane %v16781_v57, 9 }
 0x439   : > { %v13753_v37 = vrot.slane %v16771_v10, 9  ;;  %v16782_v10 = vld [vmem:[%s17008_s29 + $0x128] sm:$0xff] }
 0x43b   : > { %v10262_v25 = vsel %vm17722_vm5, %v13753_v37, %v10261_v18  ;;  %v10298_v18 = vrot.slane %v10296_v42, 4  ;;  %v10303_v37 = vrot.slane %v16782_v10, 5 }
 0x43c   : > { %v13837_v17 = vcombine.low %v10262_v25, %v10265_v11 }
 0x43d   : > { %v10305_v9 = vrot.slane %v10303_v37, 4 }
 0x43f   : > { %9874 = vmatmul.mubr.bf16.gmra.mrb[56].mxu0 %v13681_v32  ;;  %10067 = vmatmul.mubr.bf16.gmra.mrb[56].mxu1 %v13681_v32  ;;  %v13838_v32 = vcombine.high %v10262_v25, %v10265_v11  ;;  %v16783_v25 = vld [vmem:[%s17008_s29 + $0x120] sm:$0xff] }
 0x440   : > { %9883 = vmatprep.mubr.bf16.mxu0 %v13684_v12  ;;  %10076 = vmatprep.mubr.bf16.mxu1 %v13684_v12  ;;  %v16773_v12 = vld [vmem:[%s17008_s29 + $0xa8] sm:$0xff]  ;;  %v13759_v11 = vrot.slane %v16783_v25, 9  ;;  %v309_v25 = vld [vmem:[%s20516_s2] sm:$0xf] }
 0x441   : > { %v13754_v53 = vrot.slane %v16773_v12, 9 }
 0x443   : > { %v10269_v13 = vsel %vm17722_vm5, %v13754_v53, %v10268_v29  ;;  %v10304_v29 = vsel %vm17722_vm5, %v13759_v11, %v10303_v37 }
 0x444   : > { %v13840_v60 = vcombine.high %v10269_v13, %v10272_v59  ;;  %v13839_v31 = vcombine.low %v10269_v13, %v10272_v59  ;;  %v13760_v13 = vrot.slane %v16785_v39, 9 }
 0x447   : > { %9884 = vmatmul.mubr.bf16.gmra.mrb[60].mxu0 %v13683_v56  ;;  %10077 = vmatmul.mubr.bf16.gmra.mrb[60].mxu1 %v13683_v56  ;;  %v16775_v56 = vld [vmem:[%s17008_s29 + $0xc0] sm:$0xff] }
 0x448   : > { %10888 = vmatprep.mubr.bf16.mxu0 %v13830_v0  ;;  %11081 = vmatprep.mubr.bf16.mxu1 %v13830_v0  ;;  %v13755_v0 = vrot.slane %v16775_v56, 9 }
 0x44a   : > { %v10276_v30 = vsel %vm17722_vm5, %v13755_v0, %v10275_v28 }
 0x44b   : > { %v13842_v36 = vcombine.high %v10276_v30, %v10279_v58  ;;  %v13841_v19 = vcombine.low %v10276_v30, %v10279_v58 }
 0x44f   : > { %10889 = vmatmul.mubr.bf16.vlgmr.msra.gmra.mrb[0].mxu0 %v13829_v34  ;;  %11082 = vmatmul.mubr.bf16.vlgmr.msra.gmra.mrb[0].mxu1 %v13829_v34  ;;  %v13756_v34 = vrot.slane %v16777_v2, 9 }
 0x450   : > { %10898 = vmatprep.mubr.bf16.mxu0 %v13832_v16  ;;  %11091 = vmatprep.mubr.bf16.mxu1 %v13832_v16  ;;  %v10284_v16 = vrot.slane %v10282_v43, 4 }
 0x451   : > { %v10283_v21 = vsel %vm17722_vm5, %v13756_v34, %v10282_v43  ;;  %v16788_v43 = vld [vmem:[%s17008_s29 + $0x170] sm:$0xff]  ;;  %v16789_v34 = vld [vmem:[%s17008_s29 + $0x168] sm:$0xff] }
 0x452   : > { %v10286_v41 = vsel %vm17722_vm5, %v10284_v16, %v10285_v61  ;;  %v13762_v16 = vrot.slane %v16789_v34, 9 }
 0x453   : > { %v13844_v63 = vcombine.high %v10283_v21, %v10286_v41  ;;  %v13843_v40 = vcombine.low %v10283_v21, %v10286_v41 }
 0x457   : > { %10899 = vmatmul.mubr.bf16.gmra.mrb[4].mxu0 %v13831_v15  ;;  %11092 = vmatmul.mubr.bf16.gmra.mrb[4].mxu1 %v13831_v15  ;;  %v10291_v15 = vrot.slane %v10289_v6, 4 }
 0x458   : > { %10908 = vmatprep.mubr.bf16.mxu0 %v13834_v8  ;;  %11101 = vmatprep.mubr.bf16.mxu1 %v13834_v8  ;;  %v10290_v8 = vsel %vm17722_vm5, %v13757_v54, %v10289_v6  ;;  %v10331_v6 = vrot.slane %v16790_v4, 5  ;;  %v13763_v54 = vrot.slane %v16791_v20, 9 }
 0x459   : > { %v10293_v48 = vsel %vm17722_vm5, %v10291_v15, %v10292_v46 }
 0x45a   : > { %v13846_v14 = vcombine.high %v10290_v8, %v10293_v48  ;;  %v13845_v38 = vcombine.low %v10290_v8, %v10293_v48  ;;  %v10333_v15 = vrot.slane %v10331_v6, 4  ;;  %v10332_v46 = vsel %vm17722_vm5, %v13763_v54, %v10331_v6  ;;  %v16792_v48 = vld [vmem:[%s17008_s29 + $0x1a0] sm:$0xff] }
 0x45b   : > { %v10338_v47 = vrot.slane %v16792_v48, 5 }
 0x45c   : > { %v10335_v8 = vsel %vm17722_vm5, %v10333_v15, %v10334_v51 }
 0x45f   : > { %10909 = vmatmul.mubr.bf16.gmra.mrb[8].mxu0 %v13833_v3  ;;  %11102 = vmatmul.mubr.bf16.gmra.mrb[8].mxu1 %v13833_v3  ;;  %v10297_v3 = vsel %vm17722_vm5, %v13758_v49, %v10296_v42  ;;  %v10340_v49 = vrot.slane %v10338_v47, 4 }
 0x460   : > { %10918 = vmatprep.mubr.bf16.mxu0 %v13836_v7  ;;  %11111 = vmatprep.mubr.bf16.mxu1 %v13836_v7  ;;  %v10300_v7 = vsel %vm17722_vm5, %v10298_v18, %v10299_v62  ;;  %v10341_v18 = vrot.slane %v19802_v23, 5  ;;  %v311_v23 = vlaneseq }
 0x461   : > { %v13848_v26 = vcombine.high %v10297_v3, %v10300_v7  ;;  %v13847_v53 = vcombine.low %v10297_v3, %v10300_v7  ;;  %v13857_v3 = vcombine.low %v10332_v46, %v10335_v8 }
 0x462   : > { %v10342_v62 = vsel %vm17722_vm5, %v10340_v49, %v10341_v18  ;;  %v312_v37 = vshrl.u32 %v311_v23, 7 }
 0x464   : > { %v317_v11 = vsub.s32 1, %v312_v37 }
 0x467   : > { %10919 = vmatmul.mubr.bf16.gmra.mrb[12].mxu0 %v13835_v5  ;;  %11112 = vmatmul.mubr.bf16.gmra.mrb[12].mxu1 %v13835_v5  ;;  %v10307_v5 = vsel %vm17722_vm5, %v10305_v9, %v10306_v52  ;;  %v19932_v52 = vrot.slane %v309_v25, %v317_v11 }
 0x468   : > { %10928 = vmatprep.mubr.bf16.mxu0 %v13838_v32  ;;  %11121 = vmatprep.mubr.bf16.mxu1 %v13838_v32  ;;  %v16784_v32 = vld [vmem:[%s17008_s29 + $0x140] sm:$0xff]  ;;  %v13850_v44 = vcombine.high %v10304_v29, %v10307_v5  ;;  %v13849_v56 = vcombine.low %v10304_v29, %v10307_v5  ;;  %v325_v29 = vsub.s32 3, %v312_v37 }
 0x469   : > { %v10310_v12 = vrot.slane %v16784_v32, 5 }
 0x46b   : > { %v10312_v59 = vrot.slane %v10310_v12, 4  ;;  %v10311_v35 = vsel %vm17722_vm5, %v13760_v13, %v10310_v12 }
 0x46d   : > { %v10314_v28 = vsel %vm17722_vm5, %v10312_v59, %v10313_v22 }
 0x46e   : > { %v13852_v0 = vcombine.high %v10311_v35, %v10314_v28 }
 0x46f   : > { %10929 = vmatmul.mubr.bf16.gmra.mrb[16].mxu0 %v13837_v17  ;;  %11122 = vmatmul.mubr.bf16.gmra.mrb[16].mxu1 %v13837_v17  ;;  %v16786_v17 = vld [vmem:[%s17008_s29 + $0x158] sm:$0xff] }
 0x470   : > { %10938 = vmatprep.mubr.bf16.mxu0 %v13840_v60  ;;  %11131 = vmatprep.mubr.bf16.mxu1 %v13840_v60  ;;  %v10317_v60 = vrot.slane %v16786_v17, 5  ;;  %v19937_v17 = vrot.slane %v309_v25, %v325_v29 }
 0x472   : > { %v10319_v30 = vrot.slane %v10317_v60, 4  ;;  %v10318_v58 = vsel %vm17722_vm5, %v13761_v1, %v10317_v60 }
 0x474   : > { %v10321_v27 = vsel %vm17722_vm5, %v10319_v30, %v10320_v45 }
 0x475   : > { %v13854_v2 = vcombine.high %v10318_v58, %v10321_v27 }
 0x477   : > { %10939 = vmatmul.mubr.bf16.gmra.mrb[20].mxu0 %v13839_v31  ;;  %11132 = vmatmul.mubr.bf16.gmra.mrb[20].mxu1 %v13839_v31  ;;  %v10324_v31 = vrot.slane %v16788_v43, 5 }
 0x478   : > { %10948 = vmatprep.mubr.bf16.mxu0 %v13842_v36  ;;  %11141 = vmatprep.mubr.bf16.mxu1 %v13842_v36  ;;  %v13851_v36 = vcombine.low %v10311_v35, %v10314_v28 }
 0x479   : > { %v10326_v61 = vrot.slane %v10324_v31, 4  ;;  %v10325_v21 = vsel %vm17722_vm5, %v13762_v16, %v10324_v31 }
 0x47b   : > { %v10328_v41 = vsel %vm17722_vm5, %v10326_v61, %v10327_v50 }
 0x47c   : > { %v13855_v42 = vcombine.low %v10325_v21, %v10328_v41 }
 0x47f   : > { %10949 = vmatmul.mubr.bf16.gmra.mrb[24].mxu0 %v13841_v19  ;;  %11142 = vmatmul.mubr.bf16.gmra.mrb[24].mxu1 %v13841_v19  ;;  %v13853_v19 = vcombine.low %v10318_v58, %v10321_v27 }
 0x480   : > { %10958 = vmatprep.mubr.bf16.mxu0 %v13844_v63  ;;  %11151 = vmatprep.mubr.bf16.mxu1 %v13844_v63  ;;  %v13856_v63 = vcombine.high %v10325_v21, %v10328_v41 }
 0x487   : > { %10959 = vmatmul.mubr.bf16.gmra.mrb[28].mxu0 %v13843_v40  ;;  %11152 = vmatmul.mubr.bf16.gmra.mrb[28].mxu1 %v13843_v40  ;;  %v13858_v40 = vcombine.high %v10332_v46, %v10335_v8 }
 0x488   : > { %10968 = vmatprep.mubr.bf16.mxu0 %v13846_v14  ;;  %11161 = vmatprep.mubr.bf16.mxu1 %v13846_v14  ;;  %v16793_v14 = vld [vmem:[%s17008_s29 + $0x198] sm:$0xff] }
 0x489   : > { %v13764_v57 = vrot.slane %v16793_v14, 9 }
 0x48b   : > { %v10339_v24 = vsel %vm17722_vm5, %v13764_v57, %v10338_v47 }
 0x48c   : > { %v13860_v7 = vcombine.high %v10339_v24, %v10342_v62  ;;  %v13859_v10 = vcombine.low %v10339_v24, %v10342_v62 }
 0x48f   : > { %10969 = vmatmul.mubr.bf16.gmra.mrb[32].mxu0 %v13845_v38  ;;  %11162 = vmatmul.mubr.bf16.gmra.mrb[32].mxu1 %v13845_v38  ;;  %v313_v38 = vsub.s32 0, %v312_v37 }
 0x490   : > { %10978 = vmatprep.mubr.bf16.mxu0 %v13848_v26  ;;  %11171 = vmatprep.mubr.bf16.mxu1 %v13848_v26  ;;  %v321_v26 = vsub.s32 2, %v312_v37 }
 0x491   : > { %v19928_v55 = vrot.slane %v309_v25, %v313_v38 }
 0x492   : > { %v19930_v9 = vrot.slane %v309_v25, %v321_v26 }
 0x497   : > { %10979 = vmatmul.mubr.bf16.gmra.mrb[36].mxu0 %v13847_v53  ;;  %11172 = vmatmul.mubr.bf16.gmra.mrb[36].mxu1 %v13847_v53 }
 0x498   : > { %10988 = vmatprep.mubr.bf16.mxu0 %v13850_v44  ;;  %11181 = vmatprep.mubr.bf16.mxu1 %v13850_v44 }
 0x49f   : > { %10989 = vmatmul.mubr.bf16.gmra.mrb[40].mxu0 %v13849_v56  ;;  %11182 = vmatmul.mubr.bf16.gmra.mrb[40].mxu1 %v13849_v56 }
 0x4a0   : > { %10998 = vmatprep.mubr.bf16.mxu0 %v13852_v0  ;;  %11191 = vmatprep.mubr.bf16.mxu1 %v13852_v0 }
 0x4a7   : > { %10999 = vmatmul.mubr.bf16.gmra.mrb[44].mxu0 %v13851_v36  ;;  %11192 = vmatmul.mubr.bf16.gmra.mrb[44].mxu1 %v13851_v36 }
 0x4a8   : > { %11008 = vmatprep.mubr.bf16.mxu0 %v13854_v2  ;;  %11201 = vmatprep.mubr.bf16.mxu1 %v13854_v2 }
 0x4af   : > { %11009 = vmatmul.mubr.bf16.gmra.mrb[48].mxu0 %v13853_v19  ;;  %11202 = vmatmul.mubr.bf16.gmra.mrb[48].mxu1 %v13853_v19 }
 0x4b0   : > { %11018 = vmatprep.mubr.bf16.mxu0 %v13856_v63  ;;  %11211 = vmatprep.mubr.bf16.mxu1 %v13856_v63 }
 0x4b7   : > { %11019 = vmatmul.mubr.bf16.gmra.mrb[52].mxu0 %v13855_v42  ;;  %11212 = vmatmul.mubr.bf16.gmra.mrb[52].mxu1 %v13855_v42 }
 0x4b8   : > { %11028 = vmatprep.mubr.bf16.mxu0 %v13858_v40  ;;  %11221 = vmatprep.mubr.bf16.mxu1 %v13858_v40 }
 0x4bf   : > { %11029 = vmatmul.mubr.bf16.gmra.mrb[56].mxu0 %v13857_v3  ;;  %11222 = vmatmul.mubr.bf16.gmra.mrb[56].mxu1 %v13857_v3 }
 0x4c0   : > { %11038 = vmatprep.mubr.bf16.mxu0 %v13860_v7  ;;  %11231 = vmatprep.mubr.bf16.mxu1 %v13860_v7 }
 0x4c7   : > { %11039 = vmatmul.mubr.bf16.gmra.mrb[60].mxu0 %v13859_v10  ;;  %11232 = vmatmul.mubr.bf16.gmra.mrb[60].mxu1 %v13859_v10 }
 0x522   : > { %v10890_v5 = vpop.f32.mrb[0].mxu0  ;;  %v11083_v32 = vpop.f32.mrb[0].mxu1 }
 0x523   : > { %v14026_v12 = vadd.f32 %v10890_v5, %v19928_v55  ;;  %v14090_v53 = vadd.f32 %v11083_v32, %v19930_v9  ;;  %v10892_v44 = vpop.f32.mrb[1].mxu0  ;;  %v11085_v39 = vpop.f32.mrb[1].mxu1 }
 0x524   : > { %v14027_v13 = vadd.f32 %v10892_v44, %v19932_v52  ;;  %v10894_v59 = vpop.f32.mrb[2].mxu0  ;;  %v11087_v22 = vpop.f32.mrb[2].mxu1  ;;  %v14091_v27 = vadd.f32 %v11085_v39, %v19937_v17 }
 0x525   : > { %v13925_v35 = vmul.f32 -1.442695, %v14026_v12  ;;  %v13989_v28 = vmul.f32 -1.442695, %v14090_v53  ;;  %v14028_v60 = vadd.f32 %v10894_v59, %v19928_v55  ;;  %v10896_v56 = vpop.f32.mrb[3].mxu0  ;;  %v11089_v0 = vpop.f32.mrb[3].mxu1  ;;  %v14092_v1 = vadd.f32 %v11087_v22, %v19930_v9 }
 0x526   : > { %v13957_v33 = vmul.f32 -1.442695, %v14027_v13  ;;  %v14029_v30 = vadd.f32 %v10896_v56, %v19932_v52  ;;  %v14093_v15 = vadd.f32 %v11089_v0, %v19937_v17 }
 0x527   : > { %16163 = vpow2.f32 %v13925_v35  ;;  %v13926_v45 = vmul.f32 -1.442695, %v14028_v60  ;;  %v13990_v43 = vmul.f32 -1.442695, %v14092_v1 }
 0x528   : > { %16165 = vpow2.f32 %v13989_v28  ;;  %v13958_v58 = vmul.f32 -1.442695, %v14029_v30 }
 0x529   : > { %16167 = vpow2.f32 %v13957_v33 }
 0x52a   : > { %16169 = vpow2.f32 %v13926_v45  ;;  %v10900_v31 = vpop.f32.mrb[4].mxu0  ;;  %v11093_v36 = vpop.f32.mrb[4].mxu1 }
 0x52b   : > { %v14030_v2 = vadd.f32 %v10900_v31, %v19928_v55  ;;  %v14094_v34 = vadd.f32 %v11093_v36, %v19930_v9  ;;  %v10902_v16 = vpop.f32.mrb[5].mxu0  ;;  %v11095_v61 = vpop.f32.mrb[5].mxu1  ;;  %16171 = vpow2.f32 %v13958_v58 }
 0x52c   : > { %v14031_v50 = vadd.f32 %v10902_v16, %v19932_v52  ;;  %v10904_v21 = vpop.f32.mrb[6].mxu0  ;;  %v11097_v41 = vpop.f32.mrb[6].mxu1  ;;  %16173 = vtanh.f32 %v14091_v27  ;;  %v14095_v48 = vadd.f32 %v11095_v61, %v19937_v17  ;;  %v11978_v16 = vld [vmem:[%s19968_s18] sm:$0xff] }
 0x52d   : > { %v13927_v4 = vmul.f32 -1.442695, %v14030_v2  ;;  %v13991_v6 = vmul.f32 -1.442695, %v14094_v34  ;;  %v14032_v19 = vadd.f32 %v10904_v21, %v19928_v55  ;;  %v10906_v63 = vpop.f32.mrb[7].mxu0  ;;  %v11099_v20 = vpop.f32.mrb[7].mxu1  ;;  %16175 = vpow2.f32 %v13990_v43 }
 0x52e   : > { %v13959_v54 = vmul.f32 -1.442695, %v14031_v50  ;;  %v14096_v46 = vadd.f32 %v11097_v41, %v19930_v9  ;;  %v14033_v40 = vadd.f32 %v10906_v63, %v19932_v52  ;;  %v14097_v44 = vadd.f32 %v11099_v20, %v19937_v17 }
 0x52f   : > { %16177 = vpow2.f32 %v13927_v4  ;;  %v13928_v51 = vmul.f32 -1.442695, %v14032_v19 }
 0x530   : > { %16179 = vpow2.f32 %v13991_v6  ;;  %v13992_v7 = vmul.f32 -1.442695, %v14096_v46  ;;  %v13960_v25 = vmul.f32 -1.442695, %v14033_v40 }
 0x531   : > { %v16164_v8 = vpop.eup %16163  ;;  %16181 = vpow2.f32 %v13959_v54 }
 0x532   : > { %v16166_v47 = vpop.eup %16165  ;;  %v11466_v42 = vadd.f32 1.0, %v16164_v8  ;;  %16183 = vpow2.f32 %v13928_v51  ;;  %v10910_v14 = vpop.f32.mrb[8].mxu0 }
 0x533   : > { %v11103_v57 = vpop.f32.mrb[8].mxu1  ;;  %v16168_v49 = vpop.eup %16167  ;;  %16185 = vtanh.f32 %v14093_v15  ;;  %v11850_v5 = vadd.f32 1.0, %v16166_v47  ;;  %v14034_v39 = vadd.f32 %v10910_v14, %v19928_v55  ;;  %v11979_v15 = vld [vmem:[%s19968_s18 + $0x8] sm:$0xff] }
 0x534   : > { %v10912_v18 = vpop.f32.mrb[9].mxu0  ;;  %v19951_v24 = vpop.f32.mrb[9].mxu1  ;;  %16187 = vrcp.f32 %v11466_v42  ;;  %v11658_v3 = vadd.f32 1.0, %v16168_v49  ;;  %v14098_v45 = vadd.f32 %v11103_v57, %v19930_v9 }
 0x535   : > { %v16170_v62 = vpop.eup %16169  ;;  %v10914_v10 = vpop.f32.mrb[10].mxu0  ;;  %16189 = vtanh.f32 %v14095_v48  ;;  %v14035_v60 = vadd.f32 %v10912_v18, %v19932_v52  ;;  %v13929_v36 = vmul.f32 -1.442695, %v14034_v39 }
 0x536   : > { %v19953_v23 = vpop.f32.mrb[10].mxu1  ;;  %v11467_v37 = vadd.f32 1.0, %v16170_v62  ;;  %v10916_v38 = vpop.f32.mrb[11].mxu0  ;;  %16191 = vrcp.f32 %v11658_v3  ;;  %v14036_v50 = vadd.f32 %v10914_v10, %v19928_v55  ;;  %v13993_v63 = vmul.f32 -1.442695, %v14098_v45 }
 0x537   : > { %v16172_v26 = vpop.eup %16171  ;;  %v19955_v11 = vpop.f32.mrb[11].mxu1  ;;  %v13961_v6 = vmul.f32 -1.442695, %v14035_v60  ;;  %v14037_v48 = vadd.f32 %v10916_v38, %v19932_v52  ;;  %v14100_v57 = vadd.f32 %v19953_v23, %v19930_v9  ;;  %v14099_v23 = vadd.f32 %v19951_v24, %v19937_v17 }
 0x538   : > { %v16174_v29 = vpop.eup %16173  ;;  %16193 = vrcp.f32 %v11467_v37  ;;  %v11659_v32 = vadd.f32 1.0, %v16172_v26  ;;  %v13930_v8 = vmul.f32 -1.442695, %v14036_v50 }
 0x539   : > { %v16176_v12 = vpop.eup %16175  ;;  %16195 = vpow2.f32 %v13992_v7 }
 0x53a   : > { %v16178_v53 = vpop.eup %16177  ;;  %16197 = vrcp.f32 %v11659_v32  ;;  %v10920_v22 = vpop.f32.mrb[12].mxu0  ;;  %v11851_v1 = vadd.f32 1.0, %v16176_v12  ;;  %v11980_v32 = vld [vmem:[%s19968_s18 + $0x10] sm:$0xff]  ;;  %v13962_v12 = vmul.f32 -1.442695, %v14037_v48 }
 0x53b   : > { %v16180_v13 = vpop.eup %16179  ;;  %v11468_v59 = vadd.f32 1.0, %v16178_v53  ;;  %16199 = vpow2.f32 %v13960_v25  ;;  %v19962_v35 = vpop.f32.mrb[12].mxu1  ;;  %v14038_v7 = vadd.f32 %v10920_v22, %v19928_v55 }
 0x53c   : > { %v16182_v28 = vpop.eup %16181  ;;  %16201 = vrcp.f32 %v11850_v5  ;;  %v19971_v56 = vpop.f32.mrb[13].mxu0  ;;  %v11852_v61 = vadd.f32 1.0, %v16180_v13  ;;  %v13994_v13 = vmul.f32 -1.442695, %v14100_v57  ;;  %v14102_v24 = vadd.f32 %v19962_v35, %v19930_v9 }
 0x53d   : > { %v19973_v0 = vpop.f32.mrb[13].mxu1  ;;  %v16184_v33 = vpop.eup %16183  ;;  %16203 = vrcp.f32 %v11468_v59  ;;  %v11660_v30 = vadd.f32 1.0, %v16182_v28  ;;  %v13931_v22 = vmul.f32 -1.442695, %v14038_v7 }
 0x53e   : > { %v19976_v58 = vpop.f32.mrb[14].mxu0  ;;  %v19978_v27 = vpop.f32.mrb[14].mxu1  ;;  %v11469_v31 = vadd.f32 1.0, %v16184_v33  ;;  %16205 = vtanh.f32 %v14097_v44 }
 0x53f   : > { %v16186_v43 = vpop.eup %16185  ;;  %v19980_v2 = vpop.f32.mrb[15].mxu0  ;;  %16207 = vrcp.f32 %v11660_v30  ;;  %v14039_v30 = vadd.f32 %v19971_v56, %v19932_v52 }
 0x540   : > { %v16188_v34 = vpop.eup %16187  ;;  %v19984_v21 = vpop.f32.mrb[15].mxu1  ;;  %16209 = vrcp.f32 %v11469_v31 }
 0x541   : > { %v16190_v41 = vpop.eup %16189  ;;  %v12042_v4 = vmul.f32 %v16188_v34, %v16174_v29  ;;  %16211 = vrcp.f32 %v11851_v1  ;;  %v14101_v34 = vadd.f32 %v19955_v11, %v19937_v17  ;;  %v14040_v11 = vadd.f32 %v19976_v58, %v19928_v55 }
 0x542   : > { %v16192_v19 = vpop.eup %16191  ;;  %16213 = vpow2.f32 %v13929_v36  ;;  %v19996_v47 = vpop.f32.mrb[16].mxu0 }
 0x543   : > { %v16194_v20 = vpop.eup %16193  ;;  %v12010_v54 = vmul.f32 %v16192_v19, %v11978_v16  ;;  %16215 = vrcp.f32 %v11852_v61  ;;  %v19998_v42 = vpop.f32.mrb[16].mxu1 }
 0x544   : > { %v19987_v51 = vpop.eup %16195  ;;  %v12043_v46 = vmul.f32 %v16194_v20, %v16186_v43  ;;  %16217 = vpow2.f32 %v13961_v6  ;;  %v20002_v49 = vpop.f32.mrb[17].mxu0  ;;  %v13995_v6 = vmul.f32 -1.442695, %v14102_v24 }
 0x545   : > { %v16198_v40 = vpop.eup %16197  ;;  %v12074_v14 = vadd.f32 %v12042_v4, %v12010_v54  ;;  %v20004_v18 = vpop.f32.mrb[17].mxu1  ;;  %16219 = vpow2.f32 %v13993_v63  ;;  %v13963_v54 = vmul.f32 -1.442695, %v14039_v30  ;;  %v11853_v58 = vadd.f32 1.0, %v19987_v51 }
 0x546   : > { %v16200_v62 = vpop.eup %16199  ;;  %v12011_v3 = vmul.f32 %v16198_v40, %v11979_v15  ;;  %v20007_v10 = vpop.f32.mrb[18].mxu0  ;;  %v14103_v51 = vadd.f32 %v19973_v0, %v19937_v17 }
 0x547   : > { %v20009_v37 = vpop.f32.mrb[18].mxu1  ;;  %v16202_v38 = vpop.eup %16201  ;;  %12106 = vst [vmem:[%s19993_s15] sm:$0xff] %v12074_v14  ;;  %16221 = vtanh.f32 %v12074_v14  ;;  %v11661_v26 = vadd.f32 1.0, %v16200_v62  ;;  %v13932_v62 = vmul.f32 -1.442695, %v14040_v11 }
 0x548   : > { %v20014_v25 = vpop.f32.mrb[19].mxu0  ;;  %v16204_v29 = vpop.eup %16203  ;;  %v12075_v5 = vadd.f32 %v12043_v46, %v12011_v3  ;;  %16223 = vpow2.f32 %v13930_v8  ;;  %v11981_v8 = vld [vmem:[%s19968_s18 + $0x18] sm:$0xff] }
 0x549   : > { %v20017_v53 = vpop.f32.mrb[19].mxu1  ;;  %v16206_v44 = vpop.eup %16205  ;;  %v12044_v39 = vmul.f32 %v16204_v29, %v16190_v41  ;;  %16225 = vrcp.f32 %v11661_v26 }
 0x54a   : > { %v16208_v59 = vpop.eup %16207  ;;  %12107 = vst [vmem:[%s19993_s15 + $0x8] sm:$0xff] %v12075_v5  ;;  %16227 = vtanh.f32 %v12075_v5  ;;  %v20024_v45 = vpop.f32.mrb[20].mxu0 }
 0x54b   : > { %v16210_v28 = vpop.eup %16209  ;;  %v12012_v60 = vmul.f32 %v16208_v59, %v11980_v32  ;;  %16229 = vtanh.f32 %v14099_v23  ;;  %v20026_v43 = vpop.f32.mrb[20].mxu1 }
 0x54c   : > { %v16212_v33 = vpop.eup %16211  ;;  %v12045_v1 = vmul.f32 %v16210_v28, %v16206_v44  ;;  %16231 = vpow2.f32 %v13962_v12  ;;  %v20030_v16 = vpop.f32.mrb[21].mxu0 }
 0x54d   : > { %v16214_v31 = vpop.eup %16213  ;;  %v12076_v36 = vadd.f32 %v12044_v39, %v12012_v60  ;;  %16233 = vpow2.f32 %v13994_v13  ;;  %v20032_v35 = vpop.f32.mrb[21].mxu1  ;;  %v14104_v13 = vadd.f32 %v19978_v27, %v19930_v9 }
 0x54e   : > { %v20034_v61 = vpop.eup %16215  ;;  %v11470_v50 = vadd.f32 1.0, %v16214_v31  ;;  %16235 = vpow2.f32 %v13931_v22  ;;  %v20036_v56 = vpop.f32.mrb[22].mxu0 }
 0x54f   : > { %v20038_v41 = vpop.f32.mrb[22].mxu1  ;;  %v16218_v4 = vpop.eup %16217  ;;  %12108 = vst [vmem:[%s19993_s15 + $0x10] sm:$0xff] %v12076_v36  ;;  %16237 = vtanh.f32 %v12076_v36 }
 0x550   : > { %v20043_v19 = vpop.f32.mrb[23].mxu0  ;;  %v16220_v63 = vpop.eup %16219  ;;  %16239 = vrcp.f32 %v11470_v50  ;;  %v11662_v20 = vadd.f32 1.0, %v16218_v4  ;;  %v11982_v50 = vld [vmem:[%s19968_s18 + $0x20] sm:$0xff]  ;;  %v13996_v4 = vmul.f32 -1.442695, %v14104_v13 }
 0x551   : > { %v20045_v15 = vpop.f32.mrb[23].mxu1  ;;  %v16222_v46 = vpop.eup %16221  ;;  %16241 = vtanh.f32 %v14101_v34 }
 0x552   : > { %v16224_v48 = vpop.eup %16223  ;;  %v12170_v40 = vmul.f32 %v16222_v46, %v16202_v38  ;;  %16243 = vrcp.f32 %v11662_v20  ;;  %v20056_v26 = vpop.f32.mrb[24].mxu0  ;;  %v14041_v38 = vadd.f32 %v19980_v2, %v19932_v52  ;;  %v14042_v2 = vadd.f32 %v19996_v47, %v19928_v55 }
 0x553   : > { %v16226_v14 = vpop.eup %16225  ;;  %v11471_v57 = vadd.f32 1.0, %v16224_v48  ;;  %16245 = vpow2.f32 %v13995_v6  ;;  %v20058_v23 = vpop.f32.mrb[24].mxu1 }
 0x554   : > { %v16228_v3 = vpop.eup %16227  ;;  %12202 = vst [vmem:[%s20051_s22] sm:$0xff] %v12170_v40  ;;  %v12013_v7 = vmul.f32 %v16226_v14, %v11981_v8  ;;  %16247 = vpow2.f32 %v13963_v54  ;;  %v20064_v32 = vpop.f32.mrb[25].mxu0  ;;  %v13964_v31 = vmul.f32 -1.442695, %v14041_v38  ;;  %v13933_v11 = vmul.f32 -1.442695, %v14042_v2  ;;  %v11983_v2 = vld [vmem:[%s19968_s18 + $0x28] sm:$0xff] }
 0x555   : > { %v16230_v29 = vpop.eup %16229  ;;  %v12171_v5 = vmul.f32 %v16228_v3, %v16212_v33  ;;  %16249 = vrcp.f32 %v11471_v57  ;;  %v20066_v12 = vpop.f32.mrb[25].mxu1  ;;  %v11854_v33 = vadd.f32 1.0, %v16220_v63  ;;  %v14105_v57 = vadd.f32 %v19984_v21, %v19937_v17 }
 0x556   : > { %v16232_v44 = vpop.eup %16231  ;;  %16251 = vrcp.f32 %v11853_v58  ;;  %v12077_v39 = vadd.f32 %v12045_v1, %v12013_v7  ;;  %v20070_v59 = vpop.f32.mrb[26].mxu0  ;;  %v14106_v21 = vadd.f32 %v19998_v42, %v19930_v9 }
 0x557   : > { %v20072_v22 = vpop.f32.mrb[26].mxu1  ;;  %v16234_v28 = vpop.eup %16233  ;;  %12203 = vst [vmem:[%s20051_s22 + $0x8] sm:$0xff] %v12171_v5  ;;  %v11663_v0 = vadd.f32 1.0, %v16232_v44  ;;  %16253 = vpow2.f32 %v13932_v62 }
 0x558   : > { %v20077_v60 = vpop.f32.mrb[27].mxu0  ;;  %v16236_v24 = vpop.eup %16235  ;;  %12109 = vst [vmem:[%s19993_s15 + $0x18] sm:$0xff] %v12077_v39  ;;  %16255 = vtanh.f32 %v12077_v39  ;;  %v11855_v63 = vadd.f32 1.0, %v16234_v28 }
 0x559   : > { %v20080_v27 = vpop.f32.mrb[27].mxu1  ;;  %v16238_v1 = vpop.eup %16237  ;;  %v11472_v30 = vadd.f32 1.0, %v16236_v24  ;;  %16257 = vtanh.f32 %v14103_v51 }
 0x55a   : > { %v16240_v36 = vpop.eup %16239  ;;  %v12172_v34 = vmul.f32 %v16238_v1, %v20034_v61  ;;  %16259 = vrcp.f32 %v11663_v0  ;;  %v20085_v54 = vpop.f32.mrb[28].mxu0  ;;  %v14043_v61 = vadd.f32 %v20002_v49, %v19932_v52  ;;  %v14044_v49 = vadd.f32 %v20007_v10, %v19928_v55 }
 0x55b   : > { %v16242_v47 = vpop.eup %16241  ;;  %v12046_v6 = vmul.f32 %v16240_v36, %v16230_v29  ;;  %16261 = vrcp.f32 %v11472_v30  ;;  %v20087_v46 = vpop.f32.mrb[28].mxu1  ;;  %v13997_v36 = vmul.f32 -1.442695, %v14106_v21 }
 0x55c   : > { %v16244_v20 = vpop.eup %16243  ;;  %12204 = vst [vmem:[%s20051_s22 + $0x10] sm:$0xff] %v12172_v34  ;;  %16263 = vrcp.f32 %v11854_v33  ;;  %v20091_v40 = vpop.f32.mrb[29].mxu0  ;;  %v13965_v28 = vmul.f32 -1.442695, %v14043_v61  ;;  %v13934_v30 = vmul.f32 -1.442695, %v14044_v49 }
 0x55d   : > { %v16246_v8 = vpop.eup %16245  ;;  %v12014_v48 = vmul.f32 %v16244_v20, %v11982_v50  ;;  %16265 = vpow2.f32 %v13964_v31  ;;  %v20093_v58 = vpop.f32.mrb[29].mxu1 }
 0x55e   : > { %v16248_v14 = vpop.eup %16247  ;;  %16267 = vpow2.f32 %v13996_v4  ;;  %v20097_v62 = vpop.f32.mrb[30].mxu0  ;;  %v11856_v24 = vadd.f32 1.0, %v16246_v8  ;;  %v14107_v8 = vadd.f32 %v20004_v18, %v19937_v17 }
 0x55f   : > { %v20099_v3 = vpop.f32.mrb[30].mxu1  ;;  %v16250_v7 = vpop.eup %16249  ;;  %v12078_v29 = vadd.f32 %v12046_v6, %v12014_v48  ;;  %v11664_v5 = vadd.f32 1.0, %v16248_v14  ;;  %16269 = vpow2.f32 %v13933_v11  ;;  %v14108_v48 = vadd.f32 %v20009_v37, %v19930_v9 }
 0x560   : > { %v20103_v51 = vpop.f32.mrb[31].mxu0  ;;  %v20105_v38 = vpop.f32.mrb[31].mxu1  ;;  %16271 = vrcp.f32 %v11855_v63  ;;  %v12047_v39 = vmul.f32 %v16250_v7, %v16242_v47  ;;  %v14045_v47 = vadd.f32 %v20014_v25, %v19932_v52  ;;  %v14046_v7 = vadd.f32 %v20024_v45, %v19928_v55 }
 0x561   : > { %v16252_v44 = vpop.eup %16251  ;;  %12110 = vst [vmem:[%s19993_s15 + $0x20] sm:$0xff] %v12078_v29  ;;  %16273 = vtanh.f32 %v12078_v29 }
 0x562   : > { %v16254_v13 = vpop.eup %16253  ;;  %16275 = vrcp.f32 %v11664_v5  ;;  %v20111_v34 = vpop.f32.mrb[32].mxu0  ;;  %v13966_v37 = vmul.f32 -1.442695, %v14045_v47  ;;  %v13935_v45 = vmul.f32 -1.442695, %v14046_v7 }
 0x563   : > { %v16256_v0 = vpop.eup %16255  ;;  %v11473_v10 = vadd.f32 1.0, %v16254_v13  ;;  %16277 = vtanh.f32 %v14105_v57  ;;  %v20113_v42 = vpop.f32.mrb[32].mxu1  ;;  %v11984_v13 = vld [vmem:[%s19968_s18 + $0x30] sm:$0xff] }
 0x564   : > { %v16258_v33 = vpop.eup %16257  ;;  %v12173_v1 = vmul.f32 %v16256_v0, %v16252_v44  ;;  %v20118_v6 = vpop.f32.mrb[33].mxu0 }
 0x565   : > { %v16260_v31 = vpop.eup %16259  ;;  %16279 = vrcp.f32 %v11473_v10  ;;  %v20120_v11 = vpop.f32.mrb[33].mxu1 }
 0x566   : > { %v16262_v50 = vpop.eup %16261  ;;  %12205 = vst [vmem:[%s20051_s22 + $0x18] sm:$0xff] %v12173_v1  ;;  %v12015_v4 = vmul.f32 %v16260_v31, %v11983_v2  ;;  %16281 = vpow2.f32 %v13965_v28  ;;  %v20126_v61 = vpop.f32.mrb[34].mxu0 }
 0x567   : > { %v16264_v20 = vpop.eup %16263  ;;  %16283 = vrcp.f32 %v11856_v24  ;;  %v12048_v63 = vmul.f32 %v16262_v50, %v16258_v33  ;;  %v20128_v14 = vpop.f32.mrb[34].mxu1 }
 0x568   : > { %v16266_v25 = vpop.eup %16265  ;;  %v12079_v57 = vadd.f32 %v12047_v39, %v12015_v4  ;;  %16285 = vpow2.f32 %v13934_v30  ;;  %v20132_v29 = vpop.f32.mrb[35].mxu0  ;;  %v13998_v39 = vmul.f32 -1.442695, %v14108_v48 }
 0x569   : > { %v20134_v5 = vpop.f32.mrb[35].mxu1  ;;  %v16268_v49 = vpop.eup %16267  ;;  %v11665_v18 = vadd.f32 1.0, %v16266_v25  ;;  %16287 = vpow2.f32 %v13997_v36  ;;  %v14110_v36 = vadd.f32 %v20026_v43, %v19930_v9  ;;  %v14109_v43 = vadd.f32 %v20017_v53, %v19937_v17 }
 0x56a   : > { %v16270_v44 = vpop.eup %16269  ;;  %12111 = vst [vmem:[%s19993_s15 + $0x28] sm:$0xff] %v12079_v57  ;;  %16289 = vtanh.f32 %v12079_v57  ;;  %v11857_v10 = vadd.f32 1.0, %v16268_v49  ;;  %v20138_v33 = vpop.f32.mrb[36].mxu0 }
 0x56b   : > { %v16272_v21 = vpop.eup %16271  ;;  %v11474_v28 = vadd.f32 1.0, %v16270_v44  ;;  %16291 = vtanh.f32 %v14107_v8  ;;  %v20140_v1 = vpop.f32.mrb[36].mxu1 }
 0x56c   : > { %v16274_v0 = vpop.eup %16273  ;;  %16293 = vrcp.f32 %v11665_v18  ;;  %v20144_v50 = vpop.f32.mrb[37].mxu0 }
 0x56d   : > { %v16276_v2 = vpop.eup %16275  ;;  %v12174_v24 = vmul.f32 %v16274_v0, %v16264_v20  ;;  %16295 = vrcp.f32 %v11474_v28  ;;  %v20146_v4 = vpop.f32.mrb[37].mxu1  ;;  %v14047_v20 = vadd.f32 %v20030_v16, %v19932_v52  ;;  %v14048_v16 = vadd.f32 %v20036_v56, %v19928_v55 }
 0x56e   : > { %v16278_v30 = vpop.eup %16277  ;;  %v12016_v31 = vmul.f32 %v16276_v2, %v11984_v13  ;;  %16297 = vpow2.f32 %v13966_v37  ;;  %v20151_v8 = vpop.f32.mrb[38].mxu0  ;;  %v14112_v28 = vadd.f32 %v20038_v41, %v19930_v9  ;;  %v11985_v2 = vld [vmem:[%s19968_s18 + $0x38] sm:$0xff] }
 0x56f   : > { %v16280_v47 = vpop.eup %16279  ;;  %12206 = vst [vmem:[%s20051_s22 + $0x20] sm:$0xff] %v12174_v24  ;;  %16299 = vpow2.f32 %v13998_v39  ;;  %v20153_v48 = vpop.f32.mrb[38].mxu1  ;;  %v13967_v0 = vmul.f32 -1.442695, %v14047_v20  ;;  %v14111_v24 = vadd.f32 %v20032_v35, %v19937_v17  ;;  %v14049_v20 = vadd.f32 %v20043_v19, %v19932_v52 }
 0x570   : > { %v16282_v25 = vpop.eup %16281  ;;  %v12080_v57 = vadd.f32 %v12048_v63, %v12016_v31  ;;  %v12049_v7 = vmul.f32 %v16280_v47, %v16278_v30  ;;  %16301 = vpow2.f32 %v13935_v45  ;;  %v20157_v49 = vpop.f32.mrb[39].mxu0  ;;  %v13999_v63 = vmul.f32 -1.442695, %v14110_v36 }
 0x571   : > { %v20159_v18 = vpop.f32.mrb[39].mxu1  ;;  %v16284_v44 = vpop.eup %16283  ;;  %16303 = vrcp.f32 %v11857_v10  ;;  %v11666_v37 = vadd.f32 1.0, %v16282_v25  ;;  %v13936_v30 = vmul.f32 -1.442695, %v14048_v16  ;;  %v14000_v47 = vmul.f32 -1.442695, %v14112_v28 }
 0x572   : > { %v16286_v13 = vpop.eup %16285  ;;  %12112 = vst [vmem:[%s19993_s15 + $0x30] sm:$0xff] %v12080_v57  ;;  %16305 = vtanh.f32 %v12080_v57  ;;  %v20169_v31 = vpop.f32.mrb[40].mxu0  ;;  %v14050_v19 = vadd.f32 %v20056_v26, %v19928_v55 }
 0x573   : > { %v16288_v53 = vpop.eup %16287  ;;  %16307 = vrcp.f32 %v11666_v37  ;;  %v11475_v39 = vadd.f32 1.0, %v16286_v13  ;;  %v20171_v36 = vpop.f32.mrb[40].mxu1 }
 0x574   : > { %v16290_v45 = vpop.eup %16289  ;;  %16309 = vtanh.f32 %v14109_v43  ;;  %20524 = vst [vmem:[#allocation2_spill] sm:$0xff] %v20171_v36  ;;  %v20175_v25 = vpop.f32.mrb[41].mxu0  ;;  %v13937_v26 = vmul.f32 -1.442695, %v14050_v19 }
 0x575   : > { %v16292_v10 = vpop.eup %16291  ;;  %v12175_v56 = vmul.f32 %v16290_v45, %v16272_v21  ;;  %16311 = vrcp.f32 %v11475_v39  ;;  %v20177_v57 = vpop.f32.mrb[41].mxu1 }
 0x576   : > { %v16294_v41 = vpop.eup %16293  ;;  %16313 = vpow2.f32 %v13999_v63  ;;  %20525 = vst [vmem:[#allocation3_spill] sm:$0xff] %v20177_v57  ;;  %v20180_v21 = vpop.f32.mrb[42].mxu0 }
 0x577   : > { %v16296_v43 = vpop.eup %16295  ;;  %12207 = vst [vmem:[%s20051_s22 + $0x28] sm:$0xff] %v12175_v56  ;;  %v12017_v35 = vmul.f32 %v16294_v41, %v11985_v2  ;;  %16315 = vpow2.f32 %v13967_v0  ;;  %v20182_v37 = vpop.f32.mrb[42].mxu1  ;;  %v13968_v56 = vmul.f32 -1.442695, %v14049_v20 }
 0x578   : > { %20526 = vst [vmem:[#allocation4_spill] sm:$0xff] %v20182_v37  ;;  %v16298_v16 = vpop.eup %16297  ;;  %v12050_v13 = vmul.f32 %v16296_v43, %v16292_v10  ;;  %16317 = vtanh.f32 %v14111_v24  ;;  %v20186_v63 = vpop.f32.mrb[43].mxu0  ;;  %v11858_v10 = vadd.f32 1.0, %v16288_v53  ;;  %v11986_v43 = vld [vmem:[%s19968_s18 + $0x40] sm:$0xff] }
 0x579   : > { %v20188_v28 = vpop.f32.mrb[43].mxu1  ;;  %v16300_v39 = vpop.eup %16299  ;;  %v12081_v45 = vadd.f32 %v12049_v7, %v12017_v35  ;;  %v11667_v2 = vadd.f32 1.0, %v16298_v16  ;;  %16319 = vpow2.f32 %v13936_v30  ;;  %v14051_v7 = vadd.f32 %v20064_v32, %v19932_v52 }
 0x57a   : > { %20527 = vst [vmem:[#allocation5_spill] sm:$0xff] %v20188_v28  ;;  %v16302_v0 = vpop.eup %16301  ;;  %16321 = vpow2.f32 %v14000_v47  ;;  %v11859_v28 = vadd.f32 1.0, %v16300_v39  ;;  %v20194_v30 = vpop.f32.mrb[44].mxu0  ;;  %v14114_v32 = vadd.f32 %v20058_v23, %v19930_v9 }
 0x57b   : > { %v16304_v41 = vpop.eup %16303  ;;  %12113 = vst [vmem:[%s19993_s15 + $0x38] sm:$0xff] %v12081_v45  ;;  %16323 = vtanh.f32 %v12081_v45  ;;  %v11476_v24 = vadd.f32 1.0, %v16302_v0  ;;  %v20196_v47 = vpop.f32.mrb[44].mxu1 }
 0x57c   : > { %v16306_v37 = vpop.eup %16305  ;;  %16325 = vrcp.f32 %v11667_v2  ;;  %v20198_v53 = vpop.f32.mrb[45].mxu0 }
 0x57d   : > { %v16308_v57 = vpop.eup %16307  ;;  %v12176_v36 = vmul.f32 %v16306_v37, %v16284_v44  ;;  %16327 = vrcp.f32 %v11476_v24  ;;  %v20200_v16 = vpop.f32.mrb[45].mxu1  ;;  %v14113_v44 = vadd.f32 %v20045_v15, %v19937_v17  ;;  %v14052_v15 = vadd.f32 %v20070_v59, %v19928_v55 }
 0x57e   : > { %v16310_v20 = vpop.eup %16309  ;;  %v12018_v35 = vmul.f32 %v16308_v57, %v11986_v43  ;;  %16329 = vpow2.f32 %v13968_v56  ;;  %20528 = vst [vmem:[#allocation6_spill] sm:$0xff] %v20200_v16  ;;  %v20207_v37 = vpop.f32.mrb[46].mxu0 }
 0x57f   : > { %v16312_v45 = vpop.eup %16311  ;;  %12208 = vst [vmem:[%s20051_s22 + $0x30] sm:$0xff] %v12176_v36  ;;  %16331 = vrcp.f32 %v11858_v10  ;;  %v20209_v19 = vpop.f32.mrb[46].mxu1  ;;  %v13969_v10 = vmul.f32 -1.442695, %v14051_v7 }
 0x580   : > { %20529 = vst [vmem:[#allocation7_spill] sm:$0xff] %v20209_v19  ;;  %v16314_v57 = vpop.eup %16313  ;;  %v12082_v39 = vadd.f32 %v12050_v13, %v12018_v35  ;;  %v12051_v2 = vmul.f32 %v16312_v45, %v16310_v20  ;;  %16333 = vpow2.f32 %v13937_v26  ;;  %v20211_v0 = vpop.f32.mrb[47].mxu0  ;;  %v14001_v13 = vmul.f32 -1.442695, %v14114_v32  ;;  %v11987_v35 = vld [vmem:[%s19968_s18 + $0x48] sm:$0xff] }
 0x581   : > { %v20213_v36 = vpop.f32.mrb[47].mxu1  ;;  %v16316_v56 = vpop.eup %16315  ;;  %16335 = vrcp.f32 %v11859_v28  ;;  %v11860_v26 = vadd.f32 1.0, %v16314_v57  ;;  %v14053_v32 = vadd.f32 %v20077_v60, %v19932_v52 }
 0x582   : > { %20530 = vst [vmem:[#allocation8_spill] sm:$0xff] %v20213_v36  ;;  %v16318_v23 = vpop.eup %16317  ;;  %12114 = vst [vmem:[%s19993_s15 + $0x40] sm:$0xff] %v12082_v39  ;;  %16337 = vtanh.f32 %v12082_v39  ;;  %v11668_v43 = vadd.f32 1.0, %v16316_v56  ;;  %v13938_v36 = vmul.f32 -1.442695, %v14052_v15  ;;  %v20219_v28 = vpop.f32.mrb[48].mxu0 }
 0x583   : > { %v16320_v24 = vpop.eup %16319  ;;  %16339 = vtanh.f32 %v14113_v44  ;;  %v20221_v7 = vpop.f32.mrb[48].mxu1  ;;  %v14115_v44 = vadd.f32 %v20066_v12, %v19937_v17  ;;  %v14116_v12 = vadd.f32 %v20072_v22, %v19930_v9 }
 0x584   : > { %v16322_v20 = vpop.eup %16321  ;;  %16341 = vrcp.f32 %v11668_v43  ;;  %v11477_v45 = vadd.f32 1.0, %v16320_v24  ;;  %v20227_v57 = vpop.f32.mrb[49].mxu0 }
 0x585   : > { %v16324_v19 = vpop.eup %16323  ;;  %16343 = vpow2.f32 %v13969_v10  ;;  %v20229_v39 = vpop.f32.mrb[49].mxu1 }
 0x586   : > { %v16326_v59 = vpop.eup %16325  ;;  %v12177_v16 = vmul.f32 %v16324_v19, %v16304_v41  ;;  %16345 = vrcp.f32 %v11477_v45  ;;  %20531 = vst [vmem:[#allocation9_spill] sm:$0xff] %v20229_v39  ;;  %v20231_v15 = vpop.f32.mrb[50].mxu0  ;;  %v11988_v39 = vld [vmem:[%s19968_s18 + $0x50] sm:$0xff] }
 0x587   : > { %v16328_v56 = vpop.eup %16327  ;;  %v12019_v10 = vmul.f32 %v16326_v59, %v11987_v35  ;;  %16347 = vpow2.f32 %v14001_v13  ;;  %v20233_v43 = vpop.f32.mrb[50].mxu1  ;;  %v14054_v59 = vadd.f32 %v20085_v54, %v19928_v55 }
 0x588   : > { %20532 = vst [vmem:[#allocation10_spill] sm:$0xff] %v20233_v43  ;;  %v16330_v24 = vpop.eup %16329  ;;  %12209 = vst [vmem:[%s20051_s22 + $0x38] sm:$0xff] %v12177_v16  ;;  %16349 = vrcp.f32 %v11860_v26  ;;  %v12052_v41 = vmul.f32 %v16328_v56, %v16318_v23  ;;  %v20238_v60 = vpop.f32.mrb[51].mxu0  ;;  %v13970_v16 = vmul.f32 -1.442695, %v14053_v32  ;;  %v11861_v23 = vadd.f32 1.0, %v16322_v20 }
 0x589   : > { %v20240_v19 = vpop.f32.mrb[51].mxu1  ;;  %v16332_v45 = vpop.eup %16331  ;;  %v12083_v35 = vadd.f32 %v12051_v2, %v12019_v10  ;;  %v11669_v13 = vadd.f32 1.0, %v16330_v24  ;;  %16351 = vpow2.f32 %v13938_v36  ;;  %v14055_v2 = vadd.f32 %v20091_v40, %v19932_v52 }
 0x58a   : > { %20533 = vst [vmem:[#allocation11_spill] sm:$0xff] %v20240_v19  ;;  %v16334_v43 = vpop.eup %16333  ;;  %16353 = vtanh.f32 %v14115_v44  ;;  %v14002_v19 = vmul.f32 -1.442695, %v14116_v12  ;;  %v13939_v54 = vmul.f32 -1.442695, %v14054_v59  ;;  %v20248_v24 = vpop.f32.mrb[52].mxu0  ;;  %v14118_v40 = vadd.f32 %v20087_v46, %v19930_v9 }
 0x58b   : > { %v16336_v26 = vpop.eup %16335  ;;  %12115 = vst [vmem:[%s19993_s15 + $0x48] sm:$0xff] %v12083_v35  ;;  %16355 = vtanh.f32 %v12083_v35  ;;  %v11478_v22 = vadd.f32 1.0, %v16334_v43  ;;  %v20250_v44 = vpop.f32.mrb[52].mxu1  ;;  %v14056_v46 = vadd.f32 %v20097_v62, %v19928_v55 }
 0x58c   : > { %v16338_v56 = vpop.eup %16337  ;;  %16357 = vrcp.f32 %v11669_v13  ;;  %20534 = vst [vmem:[#allocation12_spill] sm:$0xff] %v20250_v44  ;;  %v20252_v20 = vpop.f32.mrb[53].mxu0  ;;  %v11989_v44 = vld [vmem:[%s19968_s18 + $0x58] sm:$0xff] }
 0x58d   : > { %v16340_v36 = vpop.eup %16339  ;;  %v12178_v10 = vmul.f32 %v16338_v56, %v16332_v45  ;;  %16359 = vrcp.f32 %v11478_v22  ;;  %v20254_v43 = vpop.f32.mrb[53].mxu1  ;;  %v13971_v56 = vmul.f32 -1.442695, %v14055_v2 }
 0x58e   : > { %v16342_v32 = vpop.eup %16341  ;;  %16361 = vpow2.f32 %v13970_v16  ;;  %20535 = vst [vmem:[#allocation13_spill] sm:$0xff] %v20254_v43  ;;  %v20259_v45 = vpop.f32.mrb[54].mxu0  ;;  %v14117_v16 = vadd.f32 %v20080_v27, %v19937_v17 }
 0x58f   : > { %v16344_v35 = vpop.eup %16343  ;;  %12210 = vst [vmem:[%s20051_s22 + $0x40] sm:$0xff] %v12178_v10  ;;  %v12020_v12 = vmul.f32 %v16342_v32, %v11988_v39  ;;  %16363 = vrcp.f32 %v11861_v23  ;;  %20536 = vst [vmem:[#allocation14_spill] sm:$0xff] %v20259_v45  ;;  %v20261_v13 = vpop.f32.mrb[54].mxu1 }
 0x590   : > { %20537 = vst [vmem:[#allocation15_spill] sm:$0xff] %v20261_v13  ;;  %v16346_v59 = vpop.eup %16345  ;;  %v11670_v22 = vadd.f32 1.0, %v16344_v35  ;;  %16365 = vpow2.f32 %v14002_v19  ;;  %v20265_v43 = vpop.f32.mrb[55].mxu0  ;;  %v14003_v19 = vmul.f32 -1.442695, %v14118_v40  ;;  %v14119_v40 = vadd.f32 %v20093_v58, %v19937_v17 }
 0x591   : > { %20538 = vst [vmem:[#allocation16_spill] sm:$0xff] %v20265_v43  ;;  %v16348_v39 = vpop.eup %16347  ;;  %v12084_v23 = vadd.f32 %v12052_v41, %v12020_v12  ;;  %v12053_v10 = vmul.f32 %v16346_v59, %v16340_v36  ;;  %16367 = vpow2.f32 %v13939_v54  ;;  %v20269_v32 = vpop.f32.mrb[55].mxu1  ;;  %v13940_v41 = vmul.f32 -1.442695, %v14056_v46 }
 0x592   : > { %v16350_v13 = vpop.eup %16349  ;;  %16369 = vrcp.f32 %v11670_v22  ;;  %v11862_v2 = vadd.f32 1.0, %v16348_v39  ;;  %v14057_v36 = vadd.f32 %v20103_v51, %v19932_v52  ;;  %v20275_v62 = vpop.f32.mrb[56].mxu0  ;;  %v14120_v51 = vadd.f32 %v20099_v3, %v19930_v9 }
 0x593   : > { %v16352_v35 = vpop.eup %16351  ;;  %12116 = vst [vmem:[%s19993_s15 + $0x50] sm:$0xff] %v12084_v23  ;;  %16371 = vtanh.f32 %v12084_v23  ;;  %v20277_v54 = vpop.f32.mrb[56].mxu1 }
 0x594   : > { %v16354_v27 = vpop.eup %16353  ;;  %v11479_v45 = vadd.f32 1.0, %v16352_v35  ;;  %16373 = vtanh.f32 %v14117_v16  ;;  %20539 = vst [vmem:[#allocation17_spill] sm:$0xff] %v20277_v54  ;;  %v20281_v22 = vpop.f32.mrb[57].mxu0  ;;  %v11990_v54 = vld [vmem:[%s19968_s18 + $0x60] sm:$0xff] }
 0x595   : > { %v16356_v43 = vpop.eup %16355  ;;  %16375 = vpow2.f32 %v13971_v56  ;;  %v20283_v16 = vpop.f32.mrb[57].mxu1 }
 0x596   : > { %v16358_v12 = vpop.eup %16357  ;;  %v12179_v59 = vmul.f32 %v16356_v43, %v16336_v26  ;;  %16377 = vrcp.f32 %v11479_v45  ;;  %20540 = vst [vmem:[#allocation18_spill] sm:$0xff] %v20283_v16  ;;  %v20287_v23 = vpop.f32.mrb[58].mxu0  ;;  %v14058_v43 = vadd.f32 %v20111_v34, %v19928_v55 }
 0x597   : > { %v16360_v56 = vpop.eup %16359  ;;  %v12021_v39 = vmul.f32 %v16358_v12, %v11989_v44  ;;  %16379 = vpow2.f32 %v14003_v19  ;;  %v20289_v46 = vpop.f32.mrb[58].mxu1  ;;  %v13972_v12 = vmul.f32 -1.442695, %v14057_v36 }
 0x598   : > { %20541 = vst [vmem:[#allocation19_spill] sm:$0xff] %v20289_v46  ;;  %v16362_v26 = vpop.eup %16361  ;;  %12211 = vst [vmem:[%s20051_s22 + $0x48] sm:$0xff] %v12179_v59  ;;  %16381 = vrcp.f32 %v11862_v2  ;;  %v12054_v58 = vmul.f32 %v16360_v56, %v16354_v27  ;;  %v20294_v45 = vpop.f32.mrb[59].mxu0  ;;  %v14004_v2 = vmul.f32 -1.442695, %v14120_v51 }
 0x599   : > { %20542 = vst [vmem:[#allocation20_spill] sm:$0xff] %v20294_v45  ;;  %v20296_v44 = vpop.f32.mrb[59].mxu1  ;;  %v16364_v35 = vpop.eup %16363  ;;  %v12085_v19 = vadd.f32 %v12053_v10, %v12021_v39  ;;  %v11671_v3 = vadd.f32 1.0, %v16362_v26  ;;  %16383 = vpow2.f32 %v13940_v41  ;;  %v13941_v34 = vmul.f32 -1.442695, %v14058_v43 }
 0x59a   : > { %v16366_v16 = vpop.eup %16365  ;;  %16385 = vtanh.f32 %v14119_v40  ;;  %v14059_v10 = vadd.f32 %v20118_v6, %v19932_v52  ;;  %v20302_v41 = vpop.f32.mrb[60].mxu0 }
 0x59b   : > { %v16368_v46 = vpop.eup %16367  ;;  %12117 = vst [vmem:[%s19993_s15 + $0x58] sm:$0xff] %v12085_v19  ;;  %16387 = vtanh.f32 %v12085_v19  ;;  %v20304_v36 = vpop.f32.mrb[60].mxu1 }
 0x59c   : > { %v16370_v27 = vpop.eup %16369  ;;  %16389 = vrcp.f32 %v11671_v3  ;;  %v11480_v59 = vadd.f32 1.0, %v16368_v46  ;;  %20543 = vst [vmem:[#allocation21_spill] sm:$0xff] %v20304_v36  ;;  %v20306_v51 = vpop.f32.mrb[61].mxu0 }
 0x59d   : > { %v16372_v56 = vpop.eup %16371  ;;  %v12022_v45 = vmul.f32 %v16370_v27, %v11990_v54  ;;  %16391 = vpow2.f32 %v13972_v12  ;;  %v20308_v26 = vpop.f32.mrb[61].mxu1 }
 0x59e   : > { %v16374_v40 = vpop.eup %16373  ;;  %v12180_v39 = vmul.f32 %v16372_v56, %v16350_v13  ;;  %16393 = vrcp.f32 %v11480_v59  ;;  %20544 = vst [vmem:[#allocation22_spill] sm:$0xff] %v20308_v26  ;;  %v20310_v54 = vpop.f32.mrb[62].mxu0  ;;  %v14121_v13 = vadd.f32 %v20105_v38, %v19937_v17  ;;  %v11991_v26 = vld [vmem:[%s19968_s18 + $0x68] sm:$0xff] }
 0x59f   : > { %v16376_v46 = vpop.eup %16375  ;;  %v12086_v43 = vadd.f32 %v12054_v58, %v12022_v45  ;;  %16395 = vpow2.f32 %v14004_v2  ;;  %v20312_v19 = vpop.f32.mrb[62].mxu1  ;;  %v13973_v58 = vmul.f32 -1.442695, %v14059_v10  ;;  %v14060_v45 = vadd.f32 %v20126_v61, %v19928_v55 }
 0x5a0   : > { %20545 = vst [vmem:[#allocation23_spill] sm:$0xff] %v20312_v19  ;;  %v16378_v6 = vpop.eup %16377  ;;  %12212 = vst [vmem:[%s20051_s22 + $0x50] sm:$0xff] %v12180_v39  ;;  %v11672_v3 = vadd.f32 1.0, %v16376_v46  ;;  %16397 = vpow2.f32 %v13941_v34  ;;  %v20317_v12 = vpop.f32.mrb[63].mxu0  ;;  %v11863_v46 = vadd.f32 1.0, %v16366_v16  ;;  %v14061_v61 = vadd.f32 %v20132_v29, %v19932_v52 }
 0x5a1   : > { %v16380_v27 = vpop.eup %16379  ;;  %12118 = vst [vmem:[%s19993_s15 + $0x60] sm:$0xff] %v12086_v43  ;;  %16399 = vtanh.f32 %v12086_v43  ;;  %v12055_v59 = vmul.f32 %v16378_v6, %v16374_v40  ;;  %v20322_v2 = vpop.f32.mrb[63].mxu1  ;;  %v13942_v43 = vmul.f32 -1.442695, %v14060_v45  ;;  %v14122_v16 = vadd.f32 %v20113_v42, %v19930_v9 }
 0x5a2   : > { %20546 = vst [vmem:[#allocation24_spill] sm:$0xff] %v20322_v2  ;;  %v16382_v56 = vpop.eup %16381  ;;  %16401 = vrcp.f32 %v11672_v3  ;;  %v11864_v38 = vadd.f32 1.0, %v16380_v27  ;;  %v14123_v27 = vadd.f32 %v20120_v11, %v19937_v17  ;;  %v13974_v45 = vmul.f32 -1.442695, %v14061_v61 }
 0x5a3   : > { %v16384_v39 = vpop.eup %16383  ;;  %16403 = vtanh.f32 %v14121_v13 }
 0x5a4   : > { %v16386_v19 = vpop.eup %16385  ;;  %v11481_v34 = vadd.f32 1.0, %v16384_v39  ;;  %16405 = vpow2.f32 %v13973_v58  ;;  %v11992_v39 = vld [vmem:[%s19968_s18 + $0x70] sm:$0xff] }
 0x5a5   : > { %v16388_v36 = vpop.eup %16387 }
 0x5a6   : > { %v16390_v40 = vpop.eup %16389  ;;  %v12181_v10 = vmul.f32 %v16388_v36, %v16364_v35  ;;  %16407 = vrcp.f32 %v11481_v34  ;;  %v14062_v35 = vadd.f32 %v20138_v33, %v19928_v55  ;;  %v14063_v33 = vadd.f32 %v20144_v50, %v19932_v52 }
 0x5a7   : > { %v16392_v6 = vpop.eup %16391  ;;  %16409 = vrcp.f32 %v11863_v46  ;;  %v12023_v2 = vmul.f32 %v16390_v40, %v11991_v26  ;;  %v14064_v50 = vadd.f32 %v20151_v8, %v19928_v55 }
 0x5a8   : > { %v16394_v3 = vpop.eup %16393  ;;  %12213 = vst [vmem:[%s20051_s22 + $0x58] sm:$0xff] %v12181_v10  ;;  %16411 = vrcp.f32 %v11864_v38  ;;  %v11673_v13 = vadd.f32 1.0, %v16392_v6  ;;  %v14005_v38 = vmul.f32 -1.442695, %v14122_v16  ;;  %v13943_v11 = vmul.f32 -1.442695, %v14062_v35 }
 0x5a9   : > { %v16396_v36 = vpop.eup %16395  ;;  %v12087_v29 = vadd.f32 %v12055_v59, %v12023_v2  ;;  %v12056_v58 = vmul.f32 %v16394_v3, %v16386_v19  ;;  %16413 = vpow2.f32 %v13942_v43  ;;  %v14124_v43 = vadd.f32 %v20128_v14, %v19930_v9 }
 0x5aa   : > { %v16398_v26 = vpop.eup %16397  ;;  %16415 = vrcp.f32 %v11673_v13  ;;  %v11865_v10 = vadd.f32 1.0, %v16396_v36  ;;  %v11993_v36 = vld [vmem:[%s19968_s18 + $0x78] sm:$0xff] }
 0x5ab   : > { %v16400_v42 = vpop.eup %16399  ;;  %12119 = vst [vmem:[%s19993_s15 + $0x68] sm:$0xff] %v12087_v29  ;;  %16417 = vtanh.f32 %v12087_v29  ;;  %v11482_v46 = vadd.f32 1.0, %v16398_v26  ;;  %v14006_v14 = vmul.f32 -1.442695, %v14124_v43 }
 0x5ac   : > { %v12182_v34 = vmul.f32 %v16400_v42, %v16382_v56  ;;  %16419 = vtanh.f32 %v14123_v27  ;;  %v16402_v40 = vpop.eup %16401  ;;  %v14125_v56 = vadd.f32 %v20134_v5, %v19937_v17  ;;  %v13975_v27 = vmul.f32 -1.442695, %v14063_v33 }
 0x5ad   : > { %16421 = vrcp.f32 %v11482_v46  ;;  %v16404_v19 = vpop.eup %16403  ;;  %v12024_v59 = vmul.f32 %v16402_v40, %v11992_v39  ;;  %v14065_v46 = vadd.f32 %v20157_v49, %v19932_v52  ;;  %v14127_v33 = vadd.f32 %v20146_v4, %v19937_v17 }
 0x5ae   : > { %12214 = vst [vmem:[%s20051_s22 + $0x60] sm:$0xff] %v12182_v34  ;;  %16423 = vpow2.f32 %v13974_v45  ;;  %v16406_v2 = vpop.eup %16405 }
 0x5af   : > { %16425 = vpow2.f32 %v14005_v38  ;;  %v12088_v6 = vadd.f32 %v12056_v58, %v12024_v59  ;;  %v11674_v16 = vadd.f32 1.0, %v16406_v2  ;;  %v13944_v58 = vmul.f32 -1.442695, %v14064_v50 }
 0x5b0   : > { %v16408_v61 = vpop.eup %16407  ;;  %16427 = vpow2.f32 %v13943_v11  ;;  %v14126_v11 = vadd.f32 %v20140_v1, %v19930_v9  ;;  %v13976_v43 = vmul.f32 -1.442695, %v14065_v46 }
 0x5b1   : > { %v16410_v3 = vpop.eup %16409  ;;  %16429 = vrcp.f32 %v11865_v10  ;;  %v12057_v13 = vmul.f32 %v16408_v61, %v16404_v19  ;;  %12120 = vst [vmem:[%s19993_s15 + $0x70] sm:$0xff] %v12088_v6  ;;  %v14066_v19 = vadd.f32 %v20169_v31, %v19928_v55  ;;  %v11994_v61 = vld [vmem:[%s19968_s18 + $0x80] sm:$0xff] }
 0x5b2   : > { %v16412_v35 = vpop.eup %16411  ;;  %16431 = vtanh.f32 %v12088_v6  ;;  %v14007_v6 = vmul.f32 -1.442695, %v14126_v11 }
 0x5b3   : > { %v16414_v29 = vpop.eup %16413  ;;  %16433 = vrcp.f32 %v11674_v16  ;;  %v13945_v50 = vmul.f32 -1.442695, %v14066_v19  ;;  %v14069_v19 = vadd.f32 %v20186_v63, %v19932_v52 }
 0x5b4   : > { %v16416_v26 = vpop.eup %16415  ;;  %v11483_v5 = vadd.f32 1.0, %v16414_v29  ;;  %16435 = vtanh.f32 %v14125_v56 }
 0x5b5   : > { %v16418_v45 = vpop.eup %16417  ;;  %v12025_v42 = vmul.f32 %v16416_v26, %v11993_v36  ;;  %16437 = vpow2.f32 %v13975_v27  ;;  %v14067_v36 = vadd.f32 %v20175_v25, %v19932_v52  ;;  %v14129_v26 = vadd.f32 %v20159_v18, %v19937_v17 }
 0x5b6   : > { %v16420_v8 = vpop.eup %16419  ;;  %v12183_v39 = vmul.f32 %v16418_v45, %v16410_v3  ;;  %16439 = vrcp.f32 %v11483_v5  ;;  %v14068_v45 = vadd.f32 %v20180_v21, %v19928_v55 }
 0x5b7   : > { %v16422_v38 = vpop.eup %16421  ;;  %v12089_v34 = vadd.f32 %v12057_v13, %v12025_v42  ;;  %16441 = vpow2.f32 %v14006_v14  ;;  %v14128_v14 = vadd.f32 %v20153_v48, %v19930_v9  ;;  %v11995_v48 = vld [vmem:[%s19968_s18 + $0x88] sm:$0xff] }
 0x5b8   : > { %v16424_v40 = vpop.eup %16423  ;;  %12215 = vst [vmem:[%s20051_s22 + $0x68] sm:$0xff] %v12183_v39  ;;  %v12058_v10 = vmul.f32 %v16422_v38, %v16420_v8  ;;  %16443 = vpow2.f32 %v13944_v58  ;;  %v13977_v39 = vmul.f32 -1.442695, %v14067_v36  ;;  %v13946_v11 = vmul.f32 -1.442695, %v14068_v45 }
 0x5b9   : > { %v16426_v59 = vpop.eup %16425  ;;  %12121 = vst [vmem:[%s19993_s15 + $0x78] sm:$0xff] %v12089_v34  ;;  %16445 = vtanh.f32 %v12089_v34  ;;  %v11675_v49 = vadd.f32 1.0, %v16424_v40  ;;  %v14008_v18 = vmul.f32 -1.442695, %v14128_v14  ;;  %v14071_v45 = vadd.f32 %v20198_v53, %v19932_v52 }
 0x5ba   : > { %v16428_v2 = vpop.eup %16427  ;;  %v11866_v13 = vadd.f32 1.0, %v16426_v59 }
 0x5bb   : > { %v16430_v56 = vpop.eup %16429  ;;  %16447 = vrcp.f32 %v11675_v49  ;;  %v11484_v1 = vadd.f32 1.0, %v16428_v2  ;;  %v20547_v49 = vld [vmem:[#allocation2_spill] sm:$0xff] }
 0x5bc   : > { %v16432_v16 = vpop.eup %16431  ;;  %16449 = vtanh.f32 %v14127_v33  ;;  %v14130_v2 = vadd.f32 %v20547_v49, %v19930_v9 }
 0x5bd   : > { %v16434_v4 = vpop.eup %16433  ;;  %v12184_v3 = vmul.f32 %v16432_v16, %v16412_v35  ;;  %16451 = vrcp.f32 %v11484_v1  ;;  %v14070_v16 = vadd.f32 %v20194_v30, %v19928_v55 }
 0x5be   : > { %v16436_v31 = vpop.eup %16435  ;;  %v12026_v27 = vmul.f32 %v16434_v4, %v11994_v61  ;;  %16453 = vpow2.f32 %v13976_v43  ;;  %v20548_v43 = vld [vmem:[#allocation3_spill] sm:$0xff]  ;;  %v14009_v36 = vmul.f32 -1.442695, %v14130_v2 }
 0x5bf   : > { %v16438_v29 = vpop.eup %16437  ;;  %12216 = vst [vmem:[%s20051_s22 + $0x70] sm:$0xff] %v12184_v3  ;;  %16455 = vpow2.f32 %v14007_v6  ;;  %v13978_v3 = vmul.f32 -1.442695, %v14069_v19  ;;  %v13947_v14 = vmul.f32 -1.442695, %v14070_v16 }
 0x5c0   : > { %v16440_v35 = vpop.eup %16439  ;;  %v12090_v5 = vadd.f32 %v12058_v10, %v12026_v27  ;;  %v11676_v58 = vadd.f32 1.0, %v16438_v29  ;;  %16457 = vpow2.f32 %v13945_v50 }
 0x5c1   : > { %v16442_v42 = vpop.eup %16441  ;;  %16459 = vrcp.f32 %v11866_v13  ;;  %v12059_v25 = vmul.f32 %v16440_v35, %v16436_v31  ;;  %v11996_v31 = vld [vmem:[%s19968_s18 + $0x90] sm:$0xff] }
 0x5c2   : > { %v16444_v8 = vpop.eup %16443  ;;  %12122 = vst [vmem:[%s19993_s15 + $0x80] sm:$0xff] %v12090_v5  ;;  %16461 = vtanh.f32 %v12090_v5  ;;  %v11867_v10 = vadd.f32 1.0, %v16442_v42 }
 0x5c3   : > { %v16446_v46 = vpop.eup %16445  ;;  %16463 = vrcp.f32 %v11676_v58  ;;  %v11485_v38 = vadd.f32 1.0, %v16444_v8 }
 0x5c4   : > { %v12185_v34 = vmul.f32 %v16446_v46, %v16430_v56  ;;  %16465 = vtanh.f32 %v14129_v26  ;;  %v14131_v56 = vadd.f32 %v20548_v43, %v19937_v17 }
 0x5c5   : > { %v16448_v40 = vpop.eup %16447  ;;  %16467 = vrcp.f32 %v11485_v38 }
 0x5c6   : > { %v16450_v21 = vpop.eup %16449  ;;  %12217 = vst [vmem:[%s20051_s22 + $0x78] sm:$0xff] %v12185_v34  ;;  %v12027_v33 = vmul.f32 %v16448_v40, %v11995_v48  ;;  %16469 = vpow2.f32 %v13977_v39  ;;  %v20550_v39 = vld [vmem:[#allocation5_spill] sm:$0xff]  ;;  %v14072_v34 = vadd.f32 %v20207_v37, %v19928_v55 }
 0x5c7   : > { %v16452_v59 = vpop.eup %16451  ;;  %16471 = vpow2.f32 %v14008_v18  ;;  %v14133_v46 = vadd.f32 %v20550_v39, %v19937_v17  ;;  %v14075_v39 = vadd.f32 %v20227_v57, %v19932_v52 }
 0x5c8   : > { %v16454_v61 = vpop.eup %16453  ;;  %v12091_v1 = vadd.f32 %v12059_v25, %v12027_v33  ;;  %v12060_v6 = vmul.f32 %v16452_v59, %v16450_v21  ;;  %16473 = vpow2.f32 %v13946_v11  ;;  %v20549_v25 = vld [vmem:[#allocation4_spill] sm:$0xff]  ;;  %v11997_v33 = vld [vmem:[%s19968_s18 + $0x98] sm:$0xff]  ;;  %v13948_v2 = vmul.f32 -1.442695, %v14072_v34 }
 0x5c9   : > { %v16456_v50 = vpop.eup %16455  ;;  %16475 = vrcp.f32 %v11867_v10  ;;  %v11677_v4 = vadd.f32 1.0, %v16454_v61  ;;  %v14132_v8 = vadd.f32 %v20549_v25, %v19930_v9  ;;  %v13979_v10 = vmul.f32 -1.442695, %v14071_v45 }
 0x5ca   : > { %v16458_v63 = vpop.eup %16457  ;;  %12123 = vst [vmem:[%s19993_s15 + $0x88] sm:$0xff] %v12091_v1  ;;  %16477 = vtanh.f32 %v12091_v1  ;;  %v11868_v5 = vadd.f32 1.0, %v16456_v50  ;;  %v14134_v50 = vadd.f32 %v20196_v47, %v19930_v9 }
 0x5cb   : > { %v16460_v13 = vpop.eup %16459  ;;  %16479 = vrcp.f32 %v11677_v4  ;;  %v11486_v27 = vadd.f32 1.0, %v16458_v63  ;;  %v14010_v59 = vmul.f32 -1.442695, %v14132_v8  ;;  %v20551_v4 = vld [vmem:[#allocation6_spill] sm:$0xff] }
 0x5cc   : > { %v16462_v29 = vpop.eup %16461  ;;  %16481 = vtanh.f32 %v14131_v56  ;;  %v14135_v63 = vadd.f32 %v20551_v4, %v19937_v17 }
 0x5cd   : > { %v16464_v26 = vpop.eup %16463  ;;  %v12186_v35 = vmul.f32 %v16462_v29, %v16460_v13  ;;  %16483 = vrcp.f32 %v11486_v27  ;;  %v14074_v27 = vadd.f32 %v20219_v28, %v19928_v55 }
 0x5ce   : > { %v16466_v30 = vpop.eup %16465  ;;  %v12028_v58 = vmul.f32 %v16464_v26, %v11996_v31  ;;  %16485 = vpow2.f32 %v13978_v3 }
 0x5cf   : > { %v16468_v42 = vpop.eup %16467  ;;  %12218 = vst [vmem:[%s20051_s22 + $0x80] sm:$0xff] %v12186_v35  ;;  %16487 = vpow2.f32 %v14009_v36  ;;  %v11998_v35 = vld [vmem:[%s19968_s18 + $0xa0] sm:$0xff] }
 0x5d0   : > { %v16470_v48 = vpop.eup %16469  ;;  %v12092_v38 = vadd.f32 %v12060_v6, %v12028_v58  ;;  %v12061_v18 = vmul.f32 %v16468_v42, %v16466_v30  ;;  %16489 = vpow2.f32 %v13947_v14  ;;  %v14073_v6 = vadd.f32 %v20211_v0, %v19932_v52 }
 0x5d1   : > { %v16472_v11 = vpop.eup %16471  ;;  %16491 = vrcp.f32 %v11868_v5  ;;  %v11678_v53 = vadd.f32 1.0, %v16470_v48  ;;  %v14011_v5 = vmul.f32 -1.442695, %v14134_v50  ;;  %v13949_v58 = vmul.f32 -1.442695, %v14074_v27  ;;  %v20552_v48 = vld [vmem:[#allocation7_spill] sm:$0xff] }
 0x5d2   : > { %v16474_v40 = vpop.eup %16473  ;;  %12124 = vst [vmem:[%s19993_s15 + $0x90] sm:$0xff] %v12092_v38  ;;  %16493 = vtanh.f32 %v12092_v38  ;;  %v11869_v61 = vadd.f32 1.0, %v16472_v11  ;;  %v13980_v14 = vmul.f32 -1.442695, %v14073_v6  ;;  %v14136_v38 = vadd.f32 %v20552_v48, %v19930_v9 }
 0x5d3   : > { %v16476_v21 = vpop.eup %16475  ;;  %16495 = vrcp.f32 %v11678_v53  ;;  %v11487_v19 = vadd.f32 1.0, %v16474_v40  ;;  %v14077_v50 = vadd.f32 %v20238_v60, %v19932_v52 }
 0x5d4   : > { %v16478_v49 = vpop.eup %16477  ;;  %16497 = vtanh.f32 %v14133_v46 }
 0x5d5   : > { %v16480_v43 = vpop.eup %16479  ;;  %v12187_v56 = vmul.f32 %v16478_v49, %v16476_v21  ;;  %16499 = vrcp.f32 %v11487_v19  ;;  %v13981_v19 = vmul.f32 -1.442695, %v14075_v39  ;;  %v11999_v49 = vld [vmem:[%s19968_s18 + $0xa8] sm:$0xff] }
 0x5d6   : > { %v16482_v37 = vpop.eup %16481  ;;  %v12029_v1 = vmul.f32 %v16480_v43, %v11997_v33  ;;  %16501 = vpow2.f32 %v13979_v10  ;;  %v14076_v10 = vadd.f32 %v20231_v15, %v19928_v55  ;;  %v14012_v43 = vmul.f32 -1.442695, %v14136_v38  ;;  %v20556_v38 = vld [vmem:[#allocation11_spill] sm:$0xff] }
 0x5d7   : > { %v16484_v16 = vpop.eup %16483  ;;  %12219 = vst [vmem:[%s20051_s22 + $0x88] sm:$0xff] %v12187_v56  ;;  %16503 = vpow2.f32 %v14010_v59 }
 0x5d8   : > { %v16486_v3 = vpop.eup %16485  ;;  %v12093_v13 = vadd.f32 %v12061_v18, %v12029_v1  ;;  %v12062_v31 = vmul.f32 %v16484_v16, %v16482_v37  ;;  %16505 = vpow2.f32 %v13948_v2  ;;  %v20553_v18 = vld [vmem:[#allocation8_spill] sm:$0xff] }
 0x5d9   : > { %v16488_v36 = vpop.eup %16487  ;;  %16507 = vrcp.f32 %v11869_v61  ;;  %v11679_v0 = vadd.f32 1.0, %v16486_v3  ;;  %v14137_v34 = vadd.f32 %v20553_v18, %v19937_v17  ;;  %v13950_v61 = vmul.f32 -1.442695, %v14076_v10  ;;  %v20554_v3 = vld [vmem:[#allocation9_spill] sm:$0xff] }
 0x5da   : > { %v16490_v29 = vpop.eup %16489  ;;  %12125 = vst [vmem:[%s19993_s15 + $0x98] sm:$0xff] %v12093_v13  ;;  %16509 = vtanh.f32 %v12093_v13  ;;  %v11870_v25 = vadd.f32 1.0, %v16488_v36  ;;  %v14139_v13 = vadd.f32 %v20554_v3, %v19937_v17  ;;  %v14141_v18 = vadd.f32 %v20556_v38, %v19937_v17 }
 0x5db   : > { %v16492_v26 = vpop.eup %16491  ;;  %16511 = vrcp.f32 %v11679_v0  ;;  %v11488_v47 = vadd.f32 1.0, %v16490_v29  ;;  %v14078_v0 = vadd.f32 %v20248_v24, %v19928_v55  ;;  %v14145_v38 = vadd.f32 %v20269_v32, %v19937_v17 }
 0x5dc   : > { %v16494_v30 = vpop.eup %16493  ;;  %16513 = vtanh.f32 %v14135_v63  ;;  %v14138_v63 = vadd.f32 %v20221_v7, %v19930_v9 }
 0x5dd   : > { %v16496_v45 = vpop.eup %16495  ;;  %v12188_v42 = vmul.f32 %v16494_v30, %v16492_v26  ;;  %16515 = vrcp.f32 %v11488_v47  ;;  %v13982_v26 = vmul.f32 -1.442695, %v14077_v50  ;;  %v12000_v47 = vld [vmem:[%s19968_s18 + $0xb0] sm:$0xff] }
 0x5de   : > { %v16498_v28 = vpop.eup %16497  ;;  %v12030_v8 = vmul.f32 %v16496_v45, %v11998_v35  ;;  %16517 = vpow2.f32 %v13980_v14 }
 0x5df   : > { %v16500_v46 = vpop.eup %16499  ;;  %12220 = vst [vmem:[%s20051_s22 + $0x90] sm:$0xff] %v12188_v42  ;;  %16519 = vpow2.f32 %v14011_v5  ;;  %v14013_v5 = vmul.f32 -1.442695, %v14138_v63  ;;  %v20559_v63 = vld [vmem:[#allocation12_spill] sm:$0xff] }
 0x5e0   : > { %v16502_v11 = vpop.eup %16501  ;;  %v12094_v53 = vadd.f32 %v12062_v31, %v12030_v8  ;;  %v12063_v40 = vmul.f32 %v16500_v46, %v16498_v28  ;;  %16521 = vpow2.f32 %v13949_v58  ;;  %v13951_v58 = vmul.f32 -1.442695, %v14078_v0  ;;  %v20555_v46 = vld [vmem:[#allocation10_spill] sm:$0xff] }
 0x5e1   : > { %v16504_v21 = vpop.eup %16503  ;;  %16523 = vrcp.f32 %v11870_v25  ;;  %v11680_v57 = vadd.f32 1.0, %v16502_v11  ;;  %v14079_v8 = vadd.f32 %v20252_v20, %v19932_v52  ;;  %v14140_v48 = vadd.f32 %v20555_v46, %v19930_v9  ;;  %v20561_v46 = vld [vmem:[#allocation15_spill] sm:$0xff] }
 0x5e2   : > { %v16506_v33 = vpop.eup %16505  ;;  %12126 = vst [vmem:[%s19993_s15 + $0xa0] sm:$0xff] %v12094_v53  ;;  %16525 = vtanh.f32 %v12094_v53  ;;  %v11871_v6 = vadd.f32 1.0, %v16504_v21  ;;  %v14142_v3 = vadd.f32 %v20559_v63, %v19930_v9 }
 0x5e3   : > { %v16508_v59 = vpop.eup %16507  ;;  %16527 = vrcp.f32 %v11680_v57  ;;  %v11489_v2 = vadd.f32 1.0, %v16506_v33  ;;  %v13983_v33 = vmul.f32 -1.442695, %v14079_v8  ;;  %v14083_v8 = vadd.f32 %v20281_v22, %v19932_v52 }
 0x5e4   : > { %v16510_v56 = vpop.eup %16509  ;;  %16529 = vtanh.f32 %v14137_v34 }
 0x5e5   : > { %v16512_v37 = vpop.eup %16511  ;;  %v12189_v1 = vmul.f32 %v16510_v56, %v16508_v59  ;;  %16531 = vrcp.f32 %v11489_v2  ;;  %v12001_v59 = vld [vmem:[%s19968_s18 + $0xb8] sm:$0xff]  ;;  %v14014_v2 = vmul.f32 -1.442695, %v14140_v48  ;;  %v14144_v48 = vadd.f32 %v20561_v46, %v19930_v9 }
 0x5e6   : > { %v16514_v15 = vpop.eup %16513  ;;  %v12031_v16 = vmul.f32 %v16512_v37, %v11999_v49  ;;  %16533 = vpow2.f32 %v13981_v19  ;;  %v14088_v46 = vadd.f32 %v20310_v54, %v19928_v55 }
 0x5e7   : > { %v16516_v4 = vpop.eup %16515  ;;  %12221 = vst [vmem:[%s20051_s22 + $0x98] sm:$0xff] %v12189_v1  ;;  %16535 = vpow2.f32 %v14012_v43  ;;  %v14016_v32 = vmul.f32 -1.442695, %v14144_v48 }
 0x5e8   : > { %v16518_v31 = vpop.eup %16517  ;;  %v12095_v27 = vadd.f32 %v12063_v40, %v12031_v16  ;;  %v12064_v36 = vmul.f32 %v16516_v4, %v16514_v15  ;;  %16537 = vpow2.f32 %v13950_v61  ;;  %v20557_v40 = vld [vmem:[#allocation14_spill] sm:$0xff]  ;;  %v20558_v16 = vld [vmem:[#allocation16_spill] sm:$0xff] }
 0x5e9   : > { %v16520_v29 = vpop.eup %16519  ;;  %16539 = vrcp.f32 %v11871_v6  ;;  %v11681_v60 = vadd.f32 1.0, %v16518_v31  ;;  %v14080_v10 = vadd.f32 %v20557_v40, %v19928_v55  ;;  %v14081_v50 = vadd.f32 %v20558_v16, %v19932_v52  ;;  %v20564_v16 = vld [vmem:[#allocation18_spill] sm:$0xff] }
 0x5ea   : > { %v16522_v14 = vpop.eup %16521  ;;  %12127 = vst [vmem:[%s19993_s15 + $0xa8] sm:$0xff] %v12095_v27  ;;  %16541 = vtanh.f32 %v12095_v27  ;;  %v11872_v25 = vadd.f32 1.0, %v16520_v29  ;;  %v14082_v29 = vadd.f32 %v20275_v62, %v19928_v55 }
 0x5eb   : > { %v16524_v35 = vpop.eup %16523  ;;  %16543 = vrcp.f32 %v11681_v60  ;;  %v11490_v7 = vadd.f32 1.0, %v16522_v14  ;;  %v13952_v56 = vmul.f32 -1.442695, %v14080_v10 }
 0x5ec   : > { %v16526_v30 = vpop.eup %16525  ;;  %16545 = vtanh.f32 %v14139_v13  ;;  %v20560_v13 = vld [vmem:[#allocation13_spill] sm:$0xff] }
 0x5ed   : > { %v16528_v45 = vpop.eup %16527  ;;  %v12190_v42 = vmul.f32 %v16526_v30, %v16524_v35  ;;  %16547 = vrcp.f32 %v11490_v7  ;;  %v14143_v31 = vadd.f32 %v20560_v13, %v19937_v17  ;;  %v13984_v35 = vmul.f32 -1.442695, %v14081_v50  ;;  %v12002_v7 = vld [vmem:[%s19968_s18 + $0xc0] sm:$0xff] }
 0x5ee   : > { %v16530_v24 = vpop.eup %16529  ;;  %v12032_v28 = vmul.f32 %v16528_v45, %v12000_v47  ;;  %16549 = vpow2.f32 %v13982_v26  ;;  %v14015_v30 = vmul.f32 -1.442695, %v14142_v3  ;;  %v13953_v45 = vmul.f32 -1.442695, %v14082_v29 }
 0x5ef   : > { %v16532_v39 = vpop.eup %16531  ;;  %12222 = vst [vmem:[%s20051_s22 + $0xa0] sm:$0xff] %v12190_v42  ;;  %16551 = vpow2.f32 %v14013_v5  ;;  %v14147_v50 = vadd.f32 %v20564_v16, %v19937_v17  ;;  %v14086_v13 = vadd.f32 %v20302_v41, %v19928_v55 }
 0x5f0   : > { %v16534_v34 = vpop.eup %16533  ;;  %v12096_v11 = vadd.f32 %v12064_v36, %v12032_v28  ;;  %v12065_v53 = vmul.f32 %v16532_v39, %v16530_v24  ;;  %16553 = vpow2.f32 %v13951_v58 }
 0x5f1   : > { %v16536_v21 = vpop.eup %16535  ;;  %16555 = vrcp.f32 %v11872_v25  ;;  %v11682_v20 = vadd.f32 1.0, %v16534_v34 }
 0x5f2   : > { %v16538_v57 = vpop.eup %16537  ;;  %12128 = vst [vmem:[%s19993_s15 + $0xb0] sm:$0xff] %v12096_v11  ;;  %16557 = vtanh.f32 %v12096_v11  ;;  %v11873_v1 = vadd.f32 1.0, %v16536_v21  ;;  %v13985_v21 = vmul.f32 -1.442695, %v14083_v8 }
 0x5f3   : > { %v16540_v19 = vpop.eup %16539  ;;  %16559 = vrcp.f32 %v11682_v20  ;;  %v11491_v49 = vadd.f32 1.0, %v16538_v57  ;;  %v12003_v57 = vld [vmem:[%s19968_s18 + $0xc8] sm:$0xff] }
 0x5f4   : > { %v16542_v43 = vpop.eup %16541  ;;  %16561 = vtanh.f32 %v14141_v18 }
 0x5f5   : > { %v16544_v61 = vpop.eup %16543  ;;  %v12191_v37 = vmul.f32 %v16542_v43, %v16540_v19  ;;  %16563 = vrcp.f32 %v11491_v49 }
 0x5f6   : > { %v16546_v6 = vpop.eup %16545  ;;  %v12033_v15 = vmul.f32 %v16544_v61, %v12001_v59  ;;  %16565 = vpow2.f32 %v13983_v33  ;;  %v20562_v61 = vld [vmem:[#allocation20_spill] sm:$0xff] }
 0x5f7   : > { %v16548_v4 = vpop.eup %16547  ;;  %12223 = vst [vmem:[%s20051_s22 + $0xa8] sm:$0xff] %v12191_v37  ;;  %16567 = vpow2.f32 %v14014_v2  ;;  %v14085_v37 = vadd.f32 %v20562_v61, %v19932_v52 }
 0x5f8   : > { %v16550_v27 = vpop.eup %16549  ;;  %v12097_v36 = vadd.f32 %v12065_v53, %v12033_v15  ;;  %v12066_v0 = vmul.f32 %v16548_v4, %v16546_v6  ;;  %16569 = vpow2.f32 %v13952_v56  ;;  %v14084_v53 = vadd.f32 %v20287_v23, %v19928_v55  ;;  %v20563_v6 = vld [vmem:[#allocation17_spill] sm:$0xff] }
 0x5f9   : > { %v16552_v60 = vpop.eup %16551  ;;  %16571 = vrcp.f32 %v11873_v1  ;;  %v11683_v14 = vadd.f32 1.0, %v16550_v27  ;;  %v14146_v15 = vadd.f32 %v20563_v6, %v19930_v9 }
 0x5fa   : > { %v16554_v26 = vpop.eup %16553  ;;  %12129 = vst [vmem:[%s19993_s15 + $0xb8] sm:$0xff] %v12097_v36  ;;  %16573 = vtanh.f32 %v12097_v36  ;;  %v11874_v24 = vadd.f32 1.0, %v16552_v60  ;;  %v13954_v59 = vmul.f32 -1.442695, %v14084_v53  ;;  %v12004_v60 = vld [vmem:[%s19968_s18 + $0xd0] sm:$0xff] }
 0x5fb   : > { %v16556_v47 = vpop.eup %16555  ;;  %16575 = vrcp.f32 %v11683_v14  ;;  %v11492_v5 = vadd.f32 1.0, %v16554_v26  ;;  %v14017_v26 = vmul.f32 -1.442695, %v14146_v15 }
 0x5fc   : > { %v16558_v58 = vpop.eup %16557  ;;  %16577 = vtanh.f32 %v14143_v31 }
 0x5fd   : > { %v16560_v42 = vpop.eup %16559  ;;  %v12192_v25 = vmul.f32 %v16558_v58, %v16556_v47  ;;  %16579 = vrcp.f32 %v11492_v5  ;;  %v13955_v47 = vmul.f32 -1.442695, %v14086_v13 }
 0x5fe   : > { %v16562_v62 = vpop.eup %16561  ;;  %v12034_v28 = vmul.f32 %v16560_v42, %v12002_v7  ;;  %16581 = vpow2.f32 %v13984_v35 }
 0x5ff   : > { %v16564_v39 = vpop.eup %16563  ;;  %12224 = vst [vmem:[%s20051_s22 + $0xb0] sm:$0xff] %v12192_v25  ;;  %16583 = vpow2.f32 %v14015_v30  ;;  %v20565_v25 = vld [vmem:[#allocation19_spill] sm:$0xff] }
 0x600   : > { %v16566_v18 = vpop.eup %16565  ;;  %v12098_v34 = vadd.f32 %v12066_v0, %v12034_v28  ;;  %v12067_v11 = vmul.f32 %v16564_v39, %v16562_v62  ;;  %16585 = vpow2.f32 %v13953_v45  ;;  %v13986_v0 = vmul.f32 -1.442695, %v14085_v37 }
 0x601   : > { %v16568_v40 = vpop.eup %16567  ;;  %16587 = vrcp.f32 %v11874_v24  ;;  %v11684_v22 = vadd.f32 1.0, %v16566_v18  ;;  %v14087_v45 = vadd.f32 %v20306_v51, %v19932_v52  ;;  %v14148_v24 = vadd.f32 %v20565_v25, %v19930_v9 }
 0x602   : > { %v16570_v10 = vpop.eup %16569  ;;  %12130 = vst [vmem:[%s19993_s15 + $0xc0] sm:$0xff] %v12098_v34  ;;  %16589 = vtanh.f32 %v12098_v34  ;;  %v11875_v43 = vadd.f32 1.0, %v16568_v40  ;;  %v14149_v62 = vadd.f32 %v20296_v44, %v19937_v17 }
 0x603   : > { %v16572_v20 = vpop.eup %16571  ;;  %16591 = vrcp.f32 %v11684_v22  ;;  %v11493_v33 = vadd.f32 1.0, %v16570_v10  ;;  %v13987_v18 = vmul.f32 -1.442695, %v14087_v45  ;;  %v14018_v44 = vmul.f32 -1.442695, %v14148_v24 }
 0x604   : > { %v16574_v19 = vpop.eup %16573  ;;  %16593 = vtanh.f32 %v14145_v38  ;;  %v13956_v22 = vmul.f32 -1.442695, %v14088_v46 }
 0x605   : > { %v16576_v49 = vpop.eup %16575  ;;  %v12193_v2 = vmul.f32 %v16574_v19, %v16572_v20  ;;  %16595 = vrcp.f32 %v11493_v33 }
 0x606   : > { %v16578_v23 = vpop.eup %16577  ;;  %v12035_v56 = vmul.f32 %v16576_v49, %v12003_v57  ;;  %16597 = vpow2.f32 %v13985_v21  ;;  %v14089_v57 = vadd.f32 %v20317_v12, %v19932_v52 }
 0x607   : > { %v16580_v1 = vpop.eup %16579  ;;  %12225 = vst [vmem:[%s20051_s22 + $0xb8] sm:$0xff] %v12193_v2  ;;  %16599 = vpow2.f32 %v14016_v32  ;;  %v20566_v32 = vld [vmem:[#allocation21_spill] sm:$0xff] }
 0x608   : > { %v16582_v4 = vpop.eup %16581  ;;  %v12099_v63 = vadd.f32 %v12067_v11, %v12035_v56  ;;  %v12068_v3 = vmul.f32 %v16580_v1, %v16578_v23  ;;  %16601 = vpow2.f32 %v13954_v59  ;;  %v12005_v11 = vld [vmem:[%s19968_s18 + $0xd8] sm:$0xff]  ;;  %v14150_v19 = vadd.f32 %v20566_v32, %v19930_v9  ;;  %v12006_v1 = vld [vmem:[%s19968_s18 + $0xe0] sm:$0xff] }
 0x609   : > { %v16584_v31 = vpop.eup %16583  ;;  %16603 = vrcp.f32 %v11875_v43  ;;  %v11685_v27 = vadd.f32 1.0, %v16582_v4  ;;  %v20567_v43 = vld [vmem:[#allocation22_spill] sm:$0xff]  ;;  %v13988_v52 = vmul.f32 -1.442695, %v14089_v57 }
 0x60a   : > { %v16586_v36 = vpop.eup %16585  ;;  %12131 = vst [vmem:[%s19993_s15 + $0xc8] sm:$0xff] %v12099_v63  ;;  %16605 = vtanh.f32 %v12099_v63  ;;  %v11876_v30 = vadd.f32 1.0, %v16584_v31  ;;  %v14151_v23 = vadd.f32 %v20567_v43, %v19937_v17  ;;  %v14019_v16 = vmul.f32 -1.442695, %v14150_v19 }
 0x60b   : > { %v16588_v29 = vpop.eup %16587  ;;  %16607 = vrcp.f32 %v11685_v27  ;;  %v11494_v14 = vadd.f32 1.0, %v16586_v36  ;;  %v20568_v27 = vld [vmem:[#allocation23_spill] sm:$0xff] }
 0x60c   : > { %v16590_v35 = vpop.eup %16589  ;;  %16609 = vtanh.f32 %v14147_v50  ;;  %v14152_v36 = vadd.f32 %v20568_v27, %v19930_v9 }
 0x60d   : > { %v16592_v7 = vpop.eup %16591  ;;  %v12194_v5 = vmul.f32 %v16590_v35, %v16588_v29  ;;  %16611 = vrcp.f32 %v11494_v14  ;;  %v20569_v14 = vld [vmem:[#allocation24_spill] sm:$0xff] }
 0x60e   : > { %v16594_v41 = vpop.eup %16593  ;;  %v12036_v58 = vmul.f32 %v16592_v7, %v12004_v60  ;;  %16613 = vpow2.f32 %v13986_v0  ;;  %v14020_v9 = vmul.f32 -1.442695, %v14152_v36 }
 0x60f   : > { %v16596_v42 = vpop.eup %16595  ;;  %12226 = vst [vmem:[%s20051_s22 + $0xc0] sm:$0xff] %v12194_v5  ;;  %16615 = vpow2.f32 %v14017_v26  ;;  %v14153_v26 = vadd.f32 %v20569_v14, %v19937_v17 }
 0x610   : > { %v16598_v28 = vpop.eup %16597  ;;  %v12100_v8 = vadd.f32 %v12068_v3, %v12036_v58  ;;  %v12069_v39 = vmul.f32 %v16596_v42, %v16594_v41  ;;  %16617 = vpow2.f32 %v13955_v47 }
 0x611   : > { %v16600_v48 = vpop.eup %16599  ;;  %16619 = vrcp.f32 %v11876_v30  ;;  %v11686_v51 = vadd.f32 1.0, %v16598_v28  ;;  %v12007_v30 = vld [vmem:[%s19968_s18 + $0xe8] sm:$0xff] }
 0x612   : > { %v16602_v38 = vpop.eup %16601  ;;  %12132 = vst [vmem:[%s19993_s15 + $0xd0] sm:$0xff] %v12100_v8  ;;  %16621 = vtanh.f32 %v12100_v8  ;;  %v11877_v20 = vadd.f32 1.0, %v16600_v48 }
 0x613   : > { %v16604_v34 = vpop.eup %16603  ;;  %16623 = vrcp.f32 %v11686_v51  ;;  %v11495_v53 = vadd.f32 1.0, %v16602_v38  ;;  %v12008_v38 = vld [vmem:[%s19968_s18 + $0xf0] sm:$0xff] }
 0x614   : > { %v16606_v40 = vpop.eup %16605  ;;  %16625 = vtanh.f32 %v14149_v62 }
 0x615   : > { %v16608_v10 = vpop.eup %16607  ;;  %v12195_v21 = vmul.f32 %v16606_v40, %v16604_v34  ;;  %16627 = vrcp.f32 %v11495_v53 }
 0x616   : > { %v16610_v55 = vpop.eup %16609  ;;  %v12037_v54 = vmul.f32 %v16608_v10, %v12005_v11  ;;  %16629 = vpow2.f32 %v13987_v18 }
 0x617   : > { %v16612_v33 = vpop.eup %16611  ;;  %12227 = vst [vmem:[%s20051_s22 + $0xc8] sm:$0xff] %v12195_v21  ;;  %16631 = vpow2.f32 %v14018_v44 }
 0x618   : > { %v16614_v59 = vpop.eup %16613  ;;  %v12101_v49 = vadd.f32 %v12069_v39, %v12037_v54  ;;  %v12070_v2 = vmul.f32 %v16612_v33, %v16610_v55  ;;  %16633 = vpow2.f32 %v13956_v22  ;;  %v12009_v54 = vld [vmem:[%s19968_s18 + $0xf8] sm:$0xff] }
 0x619   : > { %v16616_v56 = vpop.eup %16615  ;;  %16635 = vrcp.f32 %v11877_v20  ;;  %v11687_v61 = vadd.f32 1.0, %v16614_v59 }
 0x61a   : > { %v16618_v37 = vpop.eup %16617  ;;  %12133 = vst [vmem:[%s19993_s15 + $0xd8] sm:$0xff] %v12101_v49  ;;  %16637 = vtanh.f32 %v12101_v49  ;;  %v11878_v63 = vadd.f32 1.0, %v16616_v56 }
 0x61b   : > { %v16620_v12 = vpop.eup %16619  ;;  %16639 = vrcp.f32 %v11687_v61  ;;  %v11496_v6 = vadd.f32 1.0, %v16618_v37 }
 0x61c   : > { %v16622_v15 = vpop.eup %16621  ;;  %16641 = vtanh.f32 %v14151_v23 }
 0x61d   : > { %v16624_v50 = vpop.eup %16623  ;;  %v12196_v4 = vmul.f32 %v16622_v15, %v16620_v12  ;;  %16643 = vrcp.f32 %v11496_v6 }
 0x61e   : > { %v16626_v3 = vpop.eup %16625  ;;  %v12038_v13 = vmul.f32 %v16624_v50, %v12006_v1  ;;  %16645 = vpow2.f32 %v13988_v52 }
 0x61f   : > { %v16628_v31 = vpop.eup %16627  ;;  %12228 = vst [vmem:[%s20051_s22 + $0xd0] sm:$0xff] %v12196_v4  ;;  %16647 = vpow2.f32 %v14019_v16 }
 0x620   : > { %v16630_v0 = vpop.eup %16629  ;;  %v12102_v29 = vadd.f32 %v12070_v2, %v12038_v13  ;;  %v12071_v60 = vmul.f32 %v16628_v31, %v16626_v3  ;;  %16649 = vrcp.f32 %v11878_v63 }
 0x621   : > { %v16632_v35 = vpop.eup %16631  ;;  %v11688_v47 = vadd.f32 1.0, %v16630_v0 }
 0x622   : > { %v16634_v7 = vpop.eup %16633  ;;  %12134 = vst [vmem:[%s19993_s15 + $0xe0] sm:$0xff] %v12102_v29  ;;  %16651 = vtanh.f32 %v12102_v29  ;;  %v11879_v25 = vadd.f32 1.0, %v16632_v35 }
 0x623   : > { %v16636_v5 = vpop.eup %16635  ;;  %16653 = vrcp.f32 %v11688_v47  ;;  %v11497_v41 = vadd.f32 1.0, %v16634_v7 }
 0x624   : > { %v16638_v58 = vpop.eup %16637  ;;  %16655 = vtanh.f32 %v14153_v26 }
 0x625   : > { %v16640_v45 = vpop.eup %16639  ;;  %v12197_v42 = vmul.f32 %v16638_v58, %v16636_v5  ;;  %16657 = vrcp.f32 %v11497_v41 }
 0x626   : > { %v16642_v17 = vpop.eup %16641  ;;  %v12039_v24 = vmul.f32 %v16640_v45, %v12007_v30  ;;  %16659 = vpow2.f32 %v14020_v9 }
 0x627   : > { %v16644_v62 = vpop.eup %16643  ;;  %12229 = vst [vmem:[%s20051_s22 + $0xd8] sm:$0xff] %v12197_v42  ;;  %16661 = vrcp.f32 %v11879_v25 }
 0x628   : > { %v16646_v28 = vpop.eup %16645  ;;  %v12103_v8 = vadd.f32 %v12071_v60, %v12039_v24  ;;  %v12072_v39 = vmul.f32 %v16644_v62, %v16642_v17 }
 0x629   : > { %v11689_v46 = vadd.f32 1.0, %v16646_v28  ;;  %v16648_v48 = vpop.eup %16647 }
 0x62a   : > { %12135 = vst [vmem:[%s19993_s15 + $0xe8] sm:$0xff] %v12103_v8  ;;  %16663 = vtanh.f32 %v12103_v8  ;;  %v16650_v51 = vpop.eup %16649  ;;  %v11880_v53 = vadd.f32 1.0, %v16648_v48 }
 0x62b   : > { %16665 = vrcp.f32 %v11689_v46 }
 0x62c   : > { %v16652_v18 = vpop.eup %16651  ;;  %16667 = vrcp.f32 %v11880_v53 }
 0x62d   : > { %v16654_v34 = vpop.eup %16653  ;;  %v12198_v11 = vmul.f32 %v16652_v18, %v16650_v51 }
 0x62e   : > { %v16656_v44 = vpop.eup %16655  ;;  %v12040_v40 = vmul.f32 %v16654_v34, %v12008_v38 }
 0x62f   : > { %v16658_v22 = vpop.eup %16657  ;;  %12230 = vst [vmem:[%s20051_s22 + $0xe0] sm:$0xff] %v12198_v11 }
 0x630   : > { %v12104_v10 = vadd.f32 %v12072_v39, %v12040_v40  ;;  %v12073_v21 = vmul.f32 %v16658_v22, %v16656_v44  ;;  %v16660_v20 = vpop.eup %16659 }
 0x631   : > { %v16662_v55 = vpop.eup %16661  ;;  %v11881_v19 = vadd.f32 1.0, %v16660_v20 }
 0x632   : > { %12136 = vst [vmem:[%s19993_s15 + $0xf0] sm:$0xff] %v12104_v10  ;;  %16669 = vtanh.f32 %v12104_v10 }
 0x633   : > { %16671 = vrcp.f32 %v11881_v19 }
 0x634   : > { %v16664_v57 = vpop.eup %16663 }
 0x635   : > { %v16666_v33 = vpop.eup %16665  ;;  %v12199_v32 = vmul.f32 %v16664_v57, %v16662_v55 }
 0x636   : > { %v12041_v59 = vmul.f32 %v16666_v33, %v12009_v54  ;;  %v16668_v2 = vpop.eup %16667 }
 0x637   : > { %12231 = vst [vmem:[%s20051_s22 + $0xe8] sm:$0xff] %v12199_v32 }
 0x638   : > { %v12105_v49 = vadd.f32 %v12073_v21, %v12041_v59 }
 0x63a   : > { %12137 = vst [vmem:[%s19993_s15 + $0xf8] sm:$0xff] %v12105_v49  ;;  %16673 = vtanh.f32 %v12105_v49 }
 0x63c   : > { %v16670_v43 = vpop.eup %16669 }
 0x63d   : > { %v12200_v23 = vmul.f32 %v16670_v43, %v16668_v2  ;;  %v16672_v56 = vpop.eup %16671 }
 0x63f   : > { %12232 = vst [vmem:[%s20051_s22 + $0xf0] sm:$0xff] %v12200_v23 }
 0x644   : > { %v16674_v61 = vpop.eup %16673 }
 0x645   : > { %v12201_v37 = vmul.f32 %v16674_v61, %v16672_v56 }
 0x647   : > { %12233 = vst [vmem:[%s20051_s22 + $0xf8] sm:$0xff] %v12201_v37 }
 0x648 PF: > { %s16_s20 = sadd.s32 1, %s16816_s20   ;;  %s20570_s18 = smov %s16812_s19 }
 0x649   : > { %p13_p5 = scmp.ge.s32.totalorder %s16_s20, 4   ;;  %s20571_s19 = smov %s20573_s21 }
 0x64b   :  { %15 = sbr.rel (!%p13_p5) target bundleno = 2 (0x2), region = 92 }

</bundles_post_ra>
